<compile_context>
chip_gen: v7x
topology: tpu7x:2x2x1
jax: 0.10.0
libtpu: 0.0.40
codegen_flags: <defaults>
</compile_context>

<pallas_src>
import functools

import jax
import jax.numpy as jnp
from jax.experimental import pallas as pl
from jax.experimental.pallas import tpu as pltpu


LANES = 128          # lane-padded output width
NEG_INF = -1e30


# ---------------------------------------------------------------------------
# Fused kernel
# ---------------------------------------------------------------------------
def _fused_forward_kernel(*refs, n, d_edge, heads, iterations,
                          bn_eps, lrelu_slope, sat_rows):
    """Whole NeuroMUSX_E forward, resident in VMEM.

    Input ref order:
      x[N,Din], amask[N,N,1], m01[N,N,1], eflat[N*N,E], sel[N,128], expand[H,H*C]
      then per GATv2 layer (init, hidden_0..hidden_{it-1}, out_mus, out_sat):
        wl, bl, wr, br, we, attmat, bias
      then per BatchNorm layer (init, hidden_0..): gamma, beta
    Outputs: out_mus[N,128], out_sat[sat_rows,128]   (lane-dense slabs)
    """
    num_gat = 3 + iterations
    num_bn = 1 + iterations

    x_ref, amask_ref, m01_ref, eflat_ref, sel_ref, expand_ref = refs[:6]
    pos = 6
    gat_refs = [refs[pos + 7 * i: pos + 7 * (i + 1)] for i in range(num_gat)]
    pos += 7 * num_gat
    bn_refs = [refs[pos + 2 * i: pos + 2 * (i + 1)] for i in range(num_bn)]
    pos += 2 * num_bn
    out_mus_ref, out_sat_ref = refs[pos], refs[pos + 1]

    # --- hoisted once, reused by every layer/head --------------------------
    amask = amask_ref[...]                                  # [N, N, 1] additive
    m01 = m01_ref[...]                                      # [N, N, 1] {0,1}
    e_cols = [eflat_ref[:, k:k + 1] for k in range(d_edge)]  # each [N*N, 1]
    expand = expand_ref[...]                                # [H, H*C_hid]

    def project(h, w_ref, b_ref):
        """h @ W + b.  Degenerate-K matmuls become rank-1 VPU FMAs."""
        din = h.shape[1]
        if din <= 4:
            acc = h[:, 0:1] * w_ref[0:1, :]
            for k in range(1, din):
                acc = acc + h[:, k:k + 1] * w_ref[k:k + 1, :]
            return acc + b_ref[...]
        return jnp.dot(h, w_ref[...],
                       preferred_element_type=jnp.float32) + b_ref[...]

    def gatv2(h, layer, concat):
        wl_ref, bl_ref, wr_ref, br_ref, we_ref, attmat_ref, bias_ref = layer
        hc = wl_ref.shape[1]                                # heads * C
        c = hc // heads
        xl = project(h, wl_ref, bl_ref)                     # [N, H*C] source proj
        xr = project(h, wr_ref, br_ref)                     # [N, H*C] target proj
        # lin_edge (no bias): tiny K -> rank-1 FMAs, keeps the MXU free.
        e2 = e_cols[0] * we_ref[0:1, :]
        for k in range(1, d_edge):
            e2 = e2 + e_cols[k] * we_ref[k:k + 1, :]        # [N*N, H*C]
        e3 = e2.reshape(n, n, hc)
        # GATv2 score for ALL heads at once: s[i,j,:] = xr[i] + xl[j] + e[i,j]
        s = xr[:, None, :] + xl[None, :, :] + e3            # [N, N, H*C]
        s = jnp.where(s > 0.0, s, 0.2 * s)                  # LeakyReLU(0.2)
        # per-head logits via one small MXU dot with a block-diag att matrix
        logits = jnp.dot(s.reshape(n * n, hc), attmat_ref[...],
                         preferred_element_type=jnp.float32)
        logits = logits.reshape(n, n, heads) + amask        # [N, N, H]
        # masked softmax over sources j (axis=1) per (target i, head h)
        mx = jnp.max(logits, axis=1, keepdims=True)         # [N, 1, H]
        p = jnp.exp(logits - mx) * m01
        denom = jnp.sum(p, axis=1, keepdims=True)           # [N, 1, H]
        alpha = p * pl.reciprocal(jnp.maximum(denom, 1e-20), approx=True)
        # expand per-head alpha to per-channel lanes, aggregate over sources j
        if c > 1:
            a_exp = jnp.dot(alpha.reshape(n * n, heads), expand,
                            preferred_element_type=jnp.float32).reshape(n, n, hc)
        else:
            a_exp = alpha                                   # H*C == H
        out = jnp.sum(a_exp * xl[None, :, :], axis=1)       # [N, H*C]
        if concat:
            return out + bias_ref[...]                      # [N, H*C]
        # concat=False, out_channels == 1: mean over heads -> [N, 1]
        return jnp.mean(out, axis=1, keepdims=True) + bias_ref[...]

    def bn_lrelu(h, layer):
        gamma_ref, beta_ref = layer
        mean = jnp.mean(h, axis=0, keepdims=True)
        var = jnp.mean(jnp.square(h - mean), axis=0, keepdims=True)
        y = (h - mean) * jax.lax.rsqrt(var + bn_eps) * gamma_ref[...] + beta_ref[...]
        return jnp.where(y > 0.0, y, lrelu_slope * y)

    # ------------------------------ forward --------------------------------
    h = x_ref[...]                                          # [N, D_IN]
    h = bn_lrelu(gatv2(h, gat_refs[0], concat=True), bn_refs[0])
    for i in range(iterations):
        h = bn_lrelu(gatv2(h, gat_refs[1 + i], concat=True), bn_refs[1 + i])

    mus = gatv2(h, gat_refs[1 + iterations], concat=False)  # [N, 1]
    sat = gatv2(h, gat_refs[2 + iterations], concat=False)  # [N, 1]

    # lane-dense outputs
    out_mus_ref[...] = jnp.broadcast_to(mus, (n, LANES))

    sel = sel_ref[...]                                      # [N, 128]
    wsum = jnp.sum(sel * sat, axis=0, keepdims=True)        # [1, 128]
    cnt = jnp.sum(sel, axis=0, keepdims=True)               # [1, 128]
    pooled = wsum * pl.reciprocal(jnp.maximum(cnt, 1.0), approx=True)
    out_sat_ref[...] = jnp.broadcast_to(pooled, (sat_rows, LANES))


# ---------------------------------------------------------------------------
# Wrapper: graph prep (plain XLA, done once) + single fused pallas_call
# ---------------------------------------------------------------------------
def neuromusx_e_forward(x, adj, edge_attr, mask, batch, params, *,
                        num_graphs, heads, c_hid, iterations,
                        bn_eps=1e-5, lrelu_slope=0.01):
    n = x.shape[0]
    d_edge = edge_attr.shape[-1]
    f32 = jnp.float32

    # remove existing self-loops, add self-loops with PER-TARGET mean edge attr
    # (PyG GATv2Conv add_self_loops=True, fill_value='mean')
    eye = jnp.eye(n, dtype=f32)
    adj_ns = adj * (1.0 - eye)
    ea_ns = edge_attr * adj_ns[..., None]
    deg_in = jnp.sum(adj_ns, axis=1)                                   # [N]
    mean_attr = jnp.sum(ea_ns, axis=1) / jnp.maximum(deg_in, 1.0)[:, None]
    adj_sl = adj_ns + eye
    ea_sl = ea_ns + eye[..., None] * mean_attr[:, None, :]
    eflat = ea_sl.reshape(n * n, d_edge)

    amask = jnp.where(adj_sl > 0, 0.0, NEG_INF).astype(f32)[:, :, None]
    m01 = (adj_sl > 0).astype(f32)[:, :, None]

    # pool selection (graphs on lanes, zero-padded to 128)
    sel = (jax.nn.one_hot(batch, LANES, dtype=f32)
           * (mask == 0).astype(f32)[:, None])                         # [N, 128]

    # expand[h, h*C+c] = 1   and per-layer block-diag att:  attmat[h*C+c, h]
    expand = jnp.repeat(jnp.eye(heads, dtype=f32), c_hid, axis=1)      # [H, H*C]

    def attmat_of(att):                                    # att: [H, C]
        h_, c_ = att.shape
        exp = jnp.repeat(jnp.eye(h_, dtype=f32), c_, axis=1)           # [H, H*C]
        return exp.T * att.reshape(-1)[:, None]                        # [H*C, H]

    gat_layers = ([params["gat_init"]] + list(params["gat_hidden"])
                  + [params["gat_out_mus"], params["gat_out_sat"]])
    bn_layers = [params["bn_init"]] + list(params["bn_hidden"])

    inputs = [x.astype(f32), amask, m01, eflat, sel, expand]
    for g in gat_layers:
        inputs += [g["wl"], g["bl"], g["wr"], g["br"], g["we"],
                   attmat_of(g["att"]), g["bias"]]
    for b in bn_layers:
        inputs += [b["gamma"], b["beta"]]

    sat_rows = 8
    kern = functools.partial(
        _fused_forward_kernel, n=n, d_edge=d_edge, heads=heads,
        iterations=iterations, bn_eps=bn_eps, lrelu_slope=lrelu_slope,
        sat_rows=sat_rows)

    vmem = pl.BlockSpec(memory_space=pltpu.MemorySpace.VMEM)
    out_mus, out_sat = pl.pallas_call(
        kern,
        out_shape=(jax.ShapeDtypeStruct((n, LANES), f32),
                   jax.ShapeDtypeStruct((sat_rows, LANES), f32)),
        in_specs=[vmem] * len(inputs),
        out_specs=(vmem, vmem),
        compiler_params=pltpu.CompilerParams(
            vmem_limit_bytes=32 * 1024 * 1024),
    )(*inputs)

    x_out_mus = out_mus[:, 0]                # [N]
    x_out_sat = out_sat[0, :num_graphs]      # [G]
    return x_out_mus, x_out_sat
    # TODO(synk): for multi-graph batches, add a leading "parallel" grid axis
    # over independent graphs to use both TensorCores on v7x, and row-tile the
    # [N,N,H*C] score tensor once N grows beyond VMEM (~700 nodes on v7x).


# ---------------------------------------------------------------------------
# Deterministic parameter init (shapes from the PyTorch module __init__)
# ---------------------------------------------------------------------------
def _glorot(key, shape):
    fan_in, fan_out = shape
    lim = (6.0 / (fan_in + fan_out)) ** 0.5
    return jax.random.uniform(key, shape, jnp.float32, -lim, lim)


def init_gatv2_params(key, d_in, out_ch, heads, d_edge, concat):
    ks = jax.random.split(key, 4)
    hc = heads * out_ch
    return {
        "wl": _glorot(ks[0], (d_in, hc)),                 # lin_l (source)
        "bl": jnp.zeros((1, hc), jnp.float32),
        "wr": _glorot(ks[1], (d_in, hc)),                 # lin_r (target)
        "br": jnp.zeros((1, hc), jnp.float32),
        "we": _glorot(ks[2], (d_edge, hc)),               # lin_edge (no bias)
        "att": _glorot(ks[3], (heads, out_ch)),           # att vector per head
        "bias": jnp.zeros((1, hc if concat else out_ch), jnp.float32),
    }


def init_bn_params(d):
    return {"gamma": jnp.ones((1, d), jnp.float32),
            "beta": jnp.zeros((1, d), jnp.float32)}


# ---------------------------------------------------------------------------
if __name__ == "__main__":
    # module-consistent small sizes (defaults: d_in=2, d_hidden=64, heads=16)
    N, G = 16, 2
    D_IN, D_HIDDEN, HEADS, D_EDGE, ITERS = 2, 64, 16, 2, 1
    C_HID = D_HIDDEN // HEADS            # d_hidden_true

    key = jax.random.PRNGKey(0)
    kx, ka, ke, kp = jax.random.split(key, 4)

    x = jax.random.normal(kx, (N, D_IN), jnp.float32)
    adj = (jax.random.uniform(ka, (N, N)) < 0.3).astype(jnp.float32)   # edge j->i
    edge_attr = jax.random.normal(ke, (N, N, D_EDGE), jnp.float32)
    mask = jnp.array([0, 1] * (N // 2), jnp.int32)                     # data.mask
    batch = jnp.concatenate([jnp.zeros(N // 2, jnp.int32),
                             jnp.ones(N // 2, jnp.int32)])             # data.batch

    pk = jax.random.split(kp, 3 + ITERS)
    params = {
        "gat_init": init_gatv2_params(pk[0], D_IN, C_HID, HEADS, D_EDGE, True),
        "bn_init": init_bn_params(D_HIDDEN),
        "gat_hidden": [init_gatv2_params(pk[1 + i], D_HIDDEN, C_HID, HEADS,
                                         D_EDGE, True) for i in range(ITERS)],
        "bn_hidden": [init_bn_params(D_HIDDEN) for _ in range(ITERS)],
        "gat_out_mus": init_gatv2_params(pk[1 + ITERS], D_HIDDEN, 1, HEADS,
                                         D_EDGE, False),
        "gat_out_sat": init_gatv2_params(pk[2 + ITERS], D_HIDDEN, 1, HEADS,
                                         D_EDGE, False),
    }

    fwd = jax.jit(functools.partial(neuromusx_e_forward,
                                    num_graphs=G, heads=HEADS,
                                    c_hid=C_HID, iterations=ITERS))
    x_out_mus, x_out_sat = fwd(x, adj, edge_attr, mask, batch, params)
    jax.block_until_ready((x_out_mus, x_out_sat))

    assert x_out_mus.shape == (N,) and x_out_sat.shape == (G,)
    assert bool(jnp.all(jnp.isfinite(x_out_mus)))
    assert bool(jnp.all(jnp.isfinite(x_out_sat)))
    # TODO(synk): BatchNorm running-stat updates (training side effect) are not modelled.
    print("KERNEL_OK")
</pallas_src>

<mosaic_0001>
module attributes {stable_mosaic.version = 11 : i64} {
  func.func @_fused_forward_kernel(%arg0: memref<16x2xf32, #tpu.memory_space<vmem>>, %arg1: memref<16x16x1xf32, #tpu.memory_space<vmem>>, %arg2: memref<16x16x1xf32, #tpu.memory_space<vmem>>, %arg3: memref<256x2xf32, #tpu.memory_space<vmem>>, %arg4: memref<16x128xf32, #tpu.memory_space<vmem>>, %arg5: memref<16x64xf32, #tpu.memory_space<vmem>>, %arg6: memref<2x64xf32, #tpu.memory_space<vmem>>, %arg7: memref<1x64xf32, #tpu.memory_space<vmem>>, %arg8: memref<2x64xf32, #tpu.memory_space<vmem>>, %arg9: memref<1x64xf32, #tpu.memory_space<vmem>>, %arg10: memref<2x64xf32, #tpu.memory_space<vmem>>, %arg11: memref<64x16xf32, #tpu.memory_space<vmem>>, %arg12: memref<1x64xf32, #tpu.memory_space<vmem>>, %arg13: memref<64x64xf32, #tpu.memory_space<vmem>>, %arg14: memref<1x64xf32, #tpu.memory_space<vmem>>, %arg15: memref<64x64xf32, #tpu.memory_space<vmem>>, %arg16: memref<1x64xf32, #tpu.memory_space<vmem>>, %arg17: memref<2x64xf32, #tpu.memory_space<vmem>>, %arg18: memref<64x16xf32, #tpu.memory_space<vmem>>, %arg19: memref<1x64xf32, #tpu.memory_space<vmem>>, %arg20: memref<64x16xf32, #tpu.memory_space<vmem>>, %arg21: memref<1x16xf32, #tpu.memory_space<vmem>>, %arg22: memref<64x16xf32, #tpu.memory_space<vmem>>, %arg23: memref<1x16xf32, #tpu.memory_space<vmem>>, %arg24: memref<2x16xf32, #tpu.memory_space<vmem>>, %arg25: memref<16x16xf32, #tpu.memory_space<vmem>>, %arg26: memref<1x1xf32, #tpu.memory_space<vmem>>, %arg27: memref<64x16xf32, #tpu.memory_space<vmem>>, %arg28: memref<1x16xf32, #tpu.memory_space<vmem>>, %arg29: memref<64x16xf32, #tpu.memory_space<vmem>>, %arg30: memref<1x16xf32, #tpu.memory_space<vmem>>, %arg31: memref<2x16xf32, #tpu.memory_space<vmem>>, %arg32: memref<16x16xf32, #tpu.memory_space<vmem>>, %arg33: memref<1x1xf32, #tpu.memory_space<vmem>>, %arg34: memref<1x64xf32, #tpu.memory_space<vmem>>, %arg35: memref<1x64xf32, #tpu.memory_space<vmem>>, %arg36: memref<1x64xf32, #tpu.memory_space<vmem>>, %arg37: memref<1x64xf32, #tpu.memory_space<vmem>>, %arg38: memref<16x128xf32, #tpu.memory_space<vmem>>, %arg39: memref<8x128xf32, #tpu.memory_space<vmem>>) attributes {dimension_semantics = [], scalar_prefetch = 0 : i64, scratch_operands = 0 : i64, tpu.core_type = #tpu.core_type<tc>} {
    %c0 = arith.constant 0 : index
    %c0_0 = arith.constant 0 : index
    %c0_1 = arith.constant 0 : index
    %0 = vector.load %arg1[%c0, %c0_0, %c0_1] : memref<16x16x1xf32, #tpu.memory_space<vmem>>, vector<16x16x1xf32>
    %c0_2 = arith.constant 0 : index
    %c0_3 = arith.constant 0 : index
    %c0_4 = arith.constant 0 : index
    %1 = vector.load %arg2[%c0_2, %c0_3, %c0_4] : memref<16x16x1xf32, #tpu.memory_space<vmem>>, vector<16x16x1xf32>
    %c0_5 = arith.constant 0 : index
    %c0_6 = arith.constant 0 : index
    %2 = vector.load %arg3[%c0_5, %c0_6] : memref<256x2xf32, #tpu.memory_space<vmem>>, vector<256x1xf32>
    %c0_7 = arith.constant 0 : index
    %c1 = arith.constant 1 : index
    %3 = vector.load %arg3[%c0_7, %c1] : memref<256x2xf32, #tpu.memory_space<vmem>>, vector<256x1xf32>
    %c0_8 = arith.constant 0 : index
    %c0_9 = arith.constant 0 : index
    %4 = vector.load %arg5[%c0_8, %c0_9] : memref<16x64xf32, #tpu.memory_space<vmem>>, vector<16x64xf32>
    %c0_10 = arith.constant 0 : index
    %c0_11 = arith.constant 0 : index
    %5 = vector.load %arg0[%c0_10, %c0_11] : memref<16x2xf32, #tpu.memory_space<vmem>>, vector<16x2xf32>
    %6 = vector.extract_strided_slice %5 {offsets = [0, 0], sizes = [16, 1], strides = [1, 1]} : vector<16x2xf32> to vector<16x1xf32>
    %c0_12 = arith.constant 0 : index
    %c0_13 = arith.constant 0 : index
    %7 = vector.load %arg6[%c0_12, %c0_13] : memref<2x64xf32, #tpu.memory_space<vmem>>, vector<1x64xf32>
    %8 = vector.broadcast %6 : vector<16x1xf32> to vector<16x64xf32>
    %9 = vector.broadcast %7 : vector<1x64xf32> to vector<16x64xf32>
    %10 = arith.mulf %8, %9 : vector<16x64xf32>
    %11 = vector.extract_strided_slice %5 {offsets = [0, 1], sizes = [16, 1], strides = [1, 1]} : vector<16x2xf32> to vector<16x1xf32>
    %c1_14 = arith.constant 1 : index
    %c0_15 = arith.constant 0 : index
    %12 = vector.load %arg6[%c1_14, %c0_15] : memref<2x64xf32, #tpu.memory_space<vmem>>, vector<1x64xf32>
    %13 = vector.broadcast %11 : vector<16x1xf32> to vector<16x64xf32>
    %14 = vector.broadcast %12 : vector<1x64xf32> to vector<16x64xf32>
    %15 = arith.mulf %13, %14 : vector<16x64xf32>
    %16 = arith.addf %10, %15 : vector<16x64xf32>
    %c0_16 = arith.constant 0 : index
    %c0_17 = arith.constant 0 : index
    %17 = vector.load %arg7[%c0_16, %c0_17] : memref<1x64xf32, #tpu.memory_space<vmem>>, vector<1x64xf32>
    %18 = vector.broadcast %17 : vector<1x64xf32> to vector<16x64xf32>
    %19 = arith.addf %16, %18 : vector<16x64xf32>
    %20 = vector.extract_strided_slice %5 {offsets = [0, 0], sizes = [16, 1], strides = [1, 1]} : vector<16x2xf32> to vector<16x1xf32>
    %c0_18 = arith.constant 0 : index
    %c0_19 = arith.constant 0 : index
    %21 = vector.load %arg8[%c0_18, %c0_19] : memref<2x64xf32, #tpu.memory_space<vmem>>, vector<1x64xf32>
    %22 = vector.broadcast %20 : vector<16x1xf32> to vector<16x64xf32>
    %23 = vector.broadcast %21 : vector<1x64xf32> to vector<16x64xf32>
    %24 = arith.mulf %22, %23 : vector<16x64xf32>
    %25 = vector.extract_strided_slice %5 {offsets = [0, 1], sizes = [16, 1], strides = [1, 1]} : vector<16x2xf32> to vector<16x1xf32>
    %c1_20 = arith.constant 1 : index
    %c0_21 = arith.constant 0 : index
    %26 = vector.load %arg8[%c1_20, %c0_21] : memref<2x64xf32, #tpu.memory_space<vmem>>, vector<1x64xf32>
    %27 = vector.broadcast %25 : vector<16x1xf32> to vector<16x64xf32>
    %28 = vector.broadcast %26 : vector<1x64xf32> to vector<16x64xf32>
    %29 = arith.mulf %27, %28 : vector<16x64xf32>
    %30 = arith.addf %24, %29 : vector<16x64xf32>
    %c0_22 = arith.constant 0 : index
    %c0_23 = arith.constant 0 : index
    %31 = vector.load %arg9[%c0_22, %c0_23] : memref<1x64xf32, #tpu.memory_space<vmem>>, vector<1x64xf32>
    %32 = vector.broadcast %31 : vector<1x64xf32> to vector<16x64xf32>
    %33 = arith.addf %30, %32 : vector<16x64xf32>
    %c0_24 = arith.constant 0 : index
    %c0_25 = arith.constant 0 : index
    %34 = vector.load %arg10[%c0_24, %c0_25] : memref<2x64xf32, #tpu.memory_space<vmem>>, vector<1x64xf32>
    %35 = vector.broadcast %2 : vector<256x1xf32> to vector<256x64xf32>
    %36 = vector.broadcast %34 : vector<1x64xf32> to vector<256x64xf32>
    %37 = arith.mulf %35, %36 : vector<256x64xf32>
    %c1_26 = arith.constant 1 : index
    %c0_27 = arith.constant 0 : index
    %38 = vector.load %arg10[%c1_26, %c0_27] : memref<2x64xf32, #tpu.memory_space<vmem>>, vector<1x64xf32>
    %39 = vector.broadcast %3 : vector<256x1xf32> to vector<256x64xf32>
    %40 = vector.broadcast %38 : vector<1x64xf32> to vector<256x64xf32>
    %41 = arith.mulf %39, %40 : vector<256x64xf32>
    %42 = arith.addf %37, %41 : vector<256x64xf32>
    %43 = vector.shape_cast %42 : vector<256x64xf32> to vector<16x16x64xf32>
    %44 = vector.shape_cast %33 : vector<16x64xf32> to vector<16x1x64xf32>
    %45 = vector.shape_cast %19 : vector<16x64xf32> to vector<1x16x64xf32>
    %46 = vector.broadcast %44 : vector<16x1x64xf32> to vector<16x16x64xf32>
    %47 = vector.broadcast %45 : vector<1x16x64xf32> to vector<16x16x64xf32>
    %48 = arith.addf %46, %47 : vector<16x16x64xf32>
    %49 = arith.addf %48, %43 : vector<16x16x64xf32>
    %cst = arith.constant 0.000000e+00 : f32
    %50 = vector.broadcast %cst : f32 to vector<16x16x64xf32>
    %51 = arith.cmpf ogt, %49, %50 : vector<16x16x64xf32>
    %cst_28 = arith.constant 2.000000e-01 : f32
    %52 = vector.broadcast %cst_28 : f32 to vector<16x16x64xf32>
    %53 = arith.mulf %52, %49 : vector<16x16x64xf32>
    %54 = arith.select %51, %49, %53 : vector<16x16x64xi1>, vector<16x16x64xf32>
    %55 = vector.shape_cast %54 : vector<16x16x64xf32> to vector<256x64xf32>
    %c0_29 = arith.constant 0 : index
    %c0_30 = arith.constant 0 : index
    %56 = vector.load %arg11[%c0_29, %c0_30] : memref<64x16xf32, #tpu.memory_space<vmem>>, vector<64x16xf32>
    %cst_31 = arith.constant dense<0.000000e+00> : vector<256x16xf32>
    %57 = tpu.matmul %55, %56, %cst_31 {dimension_numbers = #tpu.dot_dimension_numbers<[1], [0], [0], [1], [0, 0, 1, 1], [], []>} : vector<256x64xf32>, vector<64x16xf32>, vector<256x16xf32> -> vector<256x16xf32>
    %58 = vector.shape_cast %57 : vector<256x16xf32> to vector<16x16x16xf32>
    %59 = vector.broadcast %0 : vector<16x16x1xf32> to vector<16x16x16xf32>
    %60 = arith.addf %58, %59 : vector<16x16x16xf32>
    %cst_32 = arith.constant dense<0xFF800000> : vector<16x16xf32>
    %61 = vector.multi_reduction <maximumf>, %60, %cst_32 [1] : vector<16x16x16xf32> to vector<16x16xf32>
    %62 = vector.shape_cast %61 : vector<16x16xf32> to vector<16x1x16xf32>
    %63 = vector.broadcast %62 : vector<16x1x16xf32> to vector<16x16x16xf32>
    %64 = arith.subf %60, %63 : vector<16x16x16xf32>
    %65 = math.exp %64 : vector<16x16x16xf32>
    %66 = vector.broadcast %1 : vector<16x16x1xf32> to vector<16x16x16xf32>
    %67 = arith.mulf %65, %66 : vector<16x16x16xf32>
    %cst_33 = arith.constant dense<0.000000e+00> : vector<16x16xf32>
    %68 = vector.multi_reduction <add>, %67, %cst_33 [1] : vector<16x16x16xf32> to vector<16x16xf32>
    %69 = vector.shape_cast %68 : vector<16x16xf32> to vector<16x1x16xf32>
    %cst_34 = arith.constant 9.99999968E-21 : f32
    %70 = vector.broadcast %cst_34 : f32 to vector<16x1x16xf32>
    %71 = arith.maximumf %69, %70 : vector<16x1x16xf32>
    %72 = tpu.reciprocal %71 {approx = true} : vector<16x1x16xf32> -> vector<16x1x16xf32>
    %73 = vector.broadcast %72 : vector<16x1x16xf32> to vector<16x16x16xf32>
    %74 = arith.mulf %67, %73 : vector<16x16x16xf32>
    %75 = vector.shape_cast %74 : vector<16x16x16xf32> to vector<256x16xf32>
    %cst_35 = arith.constant dense<0.000000e+00> : vector<256x64xf32>
    %76 = tpu.matmul %75, %4, %cst_35 {dimension_numbers = #tpu.dot_dimension_numbers<[1], [0], [0], [1], [0, 0, 1, 1], [], []>} : vector<256x16xf32>, vector<16x64xf32>, vector<256x64xf32> -> vector<256x64xf32>
    %77 = vector.shape_cast %76 : vector<256x64xf32> to vector<16x16x64xf32>
    %78 = vector.shape_cast %19 : vector<16x64xf32> to vector<1x16x64xf32>
    %79 = vector.broadcast %78 : vector<1x16x64xf32> to vector<16x16x64xf32>
    %80 = arith.mulf %77, %79 : vector<16x16x64xf32>
    %cst_36 = arith.constant dense<0.000000e+00> : vector<16x64xf32>
    %81 = vector.multi_reduction <add>, %80, %cst_36 [1] : vector<16x16x64xf32> to vector<16x64xf32>
    %c0_37 = arith.constant 0 : index
    %c0_38 = arith.constant 0 : index
    %82 = vector.load %arg12[%c0_37, %c0_38] : memref<1x64xf32, #tpu.memory_space<vmem>>, vector<1x64xf32>
    %83 = vector.broadcast %82 : vector<1x64xf32> to vector<16x64xf32>
    %84 = arith.addf %81, %83 : vector<16x64xf32>
    %cst_39 = arith.constant dense<0.000000e+00> : vector<64xf32>
    %85 = vector.multi_reduction <add>, %84, %cst_39 [0] : vector<16x64xf32> to vector<64xf32>
    %86 = vector.shape_cast %85 : vector<64xf32> to vector<1x64xf32>
    %cst_40 = arith.constant 1.600000e+01 : f32
    %87 = vector.broadcast %cst_40 : f32 to vector<1x64xf32>
    %88 = arith.divf %86, %87 : vector<1x64xf32>
    %89 = vector.broadcast %88 : vector<1x64xf32> to vector<16x64xf32>
    %90 = arith.subf %84, %89 : vector<16x64xf32>
    %91 = arith.mulf %90, %90 : vector<16x64xf32>
    %cst_41 = arith.constant dense<0.000000e+00> : vector<64xf32>
    %92 = vector.multi_reduction <add>, %91, %cst_41 [0] : vector<16x64xf32> to vector<64xf32>
    %93 = vector.shape_cast %92 : vector<64xf32> to vector<1x64xf32>
    %cst_42 = arith.constant 1.600000e+01 : f32
    %94 = vector.broadcast %cst_42 : f32 to vector<1x64xf32>
    %95 = arith.divf %93, %94 : vector<1x64xf32>
    %96 = vector.broadcast %88 : vector<1x64xf32> to vector<16x64xf32>
    %97 = arith.subf %84, %96 : vector<16x64xf32>
    %cst_43 = arith.constant 9.99999974E-6 : f32
    %98 = vector.broadcast %cst_43 : f32 to vector<1x64xf32>
    %99 = arith.addf %95, %98 : vector<1x64xf32>
    %100 = math.rsqrt %99 : vector<1x64xf32>
    %101 = vector.broadcast %100 : vector<1x64xf32> to vector<16x64xf32>
    %102 = arith.mulf %97, %101 : vector<16x64xf32>
    %c0_44 = arith.constant 0 : index
    %c0_45 = arith.constant 0 : index
    %103 = vector.load %arg34[%c0_44, %c0_45] : memref<1x64xf32, #tpu.memory_space<vmem>>, vector<1x64xf32>
    %104 = vector.broadcast %103 : vector<1x64xf32> to vector<16x64xf32>
    %105 = arith.mulf %102, %104 : vector<16x64xf32>
    %c0_46 = arith.constant 0 : index
    %c0_47 = arith.constant 0 : index
    %106 = vector.load %arg35[%c0_46, %c0_47] : memref<1x64xf32, #tpu.memory_space<vmem>>, vector<1x64xf32>
    %107 = vector.broadcast %106 : vector<1x64xf32> to vector<16x64xf32>
    %108 = arith.addf %105, %107 : vector<16x64xf32>
    %cst_48 = arith.constant 0.000000e+00 : f32
    %109 = vector.broadcast %cst_48 : f32 to vector<16x64xf32>
    %110 = arith.cmpf ogt, %108, %109 : vector<16x64xf32>
    %cst_49 = arith.constant 0.00999999977 : f32
    %111 = vector.broadcast %cst_49 : f32 to vector<16x64xf32>
    %112 = arith.mulf %111, %108 : vector<16x64xf32>
    %113 = arith.select %110, %108, %112 : vector<16x64xi1>, vector<16x64xf32>
    %c0_50 = arith.constant 0 : index
    %c0_51 = arith.constant 0 : index
    %114 = vector.load %arg13[%c0_50, %c0_51] : memref<64x64xf32, #tpu.memory_space<vmem>>, vector<64x64xf32>
    %cst_52 = arith.constant dense<0.000000e+00> : vector<16x64xf32>
    %115 = tpu.matmul %113, %114, %cst_52 {dimension_numbers = #tpu.dot_dimension_numbers<[1], [0], [0], [1], [0, 0, 1, 1], [], []>} : vector<16x64xf32>, vector<64x64xf32>, vector<16x64xf32> -> vector<16x64xf32>
    %c0_53 = arith.constant 0 : index
    %c0_54 = arith.constant 0 : index
    %116 = vector.load %arg14[%c0_53, %c0_54] : memref<1x64xf32, #tpu.memory_space<vmem>>, vector<1x64xf32>
    %117 = vector.broadcast %116 : vector<1x64xf32> to vector<16x64xf32>
    %118 = arith.addf %115, %117 : vector<16x64xf32>
    %c0_55 = arith.constant 0 : index
    %c0_56 = arith.constant 0 : index
    %119 = vector.load %arg15[%c0_55, %c0_56] : memref<64x64xf32, #tpu.memory_space<vmem>>, vector<64x64xf32>
    %cst_57 = arith.constant dense<0.000000e+00> : vector<16x64xf32>
    %120 = tpu.matmul %113, %119, %cst_57 {dimension_numbers = #tpu.dot_dimension_numbers<[1], [0], [0], [1], [0, 0, 1, 1], [], []>} : vector<16x64xf32>, vector<64x64xf32>, vector<16x64xf32> -> vector<16x64xf32>
    %c0_58 = arith.constant 0 : index
    %c0_59 = arith.constant 0 : index
    %121 = vector.load %arg16[%c0_58, %c0_59] : memref<1x64xf32, #tpu.memory_space<vmem>>, vector<1x64xf32>
    %122 = vector.broadcast %121 : vector<1x64xf32> to vector<16x64xf32>
    %123 = arith.addf %120, %122 : vector<16x64xf32>
    %c0_60 = arith.constant 0 : index
    %c0_61 = arith.constant 0 : index
    %124 = vector.load %arg17[%c0_60, %c0_61] : memref<2x64xf32, #tpu.memory_space<vmem>>, vector<1x64xf32>
    %125 = vector.broadcast %2 : vector<256x1xf32> to vector<256x64xf32>
    %126 = vector.broadcast %124 : vector<1x64xf32> to vector<256x64xf32>
    %127 = arith.mulf %125, %126 : vector<256x64xf32>
    %c1_62 = arith.constant 1 : index
    %c0_63 = arith.constant 0 : index
    %128 = vector.load %arg17[%c1_62, %c0_63] : memref<2x64xf32, #tpu.memory_space<vmem>>, vector<1x64xf32>
    %129 = vector.broadcast %3 : vector<256x1xf32> to vector<256x64xf32>
    %130 = vector.broadcast %128 : vector<1x64xf32> to vector<256x64xf32>
    %131 = arith.mulf %129, %130 : vector<256x64xf32>
    %132 = arith.addf %127, %131 : vector<256x64xf32>
    %133 = vector.shape_cast %132 : vector<256x64xf32> to vector<16x16x64xf32>
    %134 = vector.shape_cast %123 : vector<16x64xf32> to vector<16x1x64xf32>
    %135 = vector.shape_cast %118 : vector<16x64xf32> to vector<1x16x64xf32>
    %136 = vector.broadcast %134 : vector<16x1x64xf32> to vector<16x16x64xf32>
    %137 = vector.broadcast %135 : vector<1x16x64xf32> to vector<16x16x64xf32>
    %138 = arith.addf %136, %137 : vector<16x16x64xf32>
    %139 = arith.addf %138, %133 : vector<16x16x64xf32>
    %cst_64 = arith.constant 0.000000e+00 : f32
    %140 = vector.broadcast %cst_64 : f32 to vector<16x16x64xf32>
    %141 = arith.cmpf ogt, %139, %140 : vector<16x16x64xf32>
    %cst_65 = arith.constant 2.000000e-01 : f32
    %142 = vector.broadcast %cst_65 : f32 to vector<16x16x64xf32>
    %143 = arith.mulf %142, %139 : vector<16x16x64xf32>
    %144 = arith.select %141, %139, %143 : vector<16x16x64xi1>, vector<16x16x64xf32>
    %145 = vector.shape_cast %144 : vector<16x16x64xf32> to vector<256x64xf32>
    %c0_66 = arith.constant 0 : index
    %c0_67 = arith.constant 0 : index
    %146 = vector.load %arg18[%c0_66, %c0_67] : memref<64x16xf32, #tpu.memory_space<vmem>>, vector<64x16xf32>
    %cst_68 = arith.constant dense<0.000000e+00> : vector<256x16xf32>
    %147 = tpu.matmul %145, %146, %cst_68 {dimension_numbers = #tpu.dot_dimension_numbers<[1], [0], [0], [1], [0, 0, 1, 1], [], []>} : vector<256x64xf32>, vector<64x16xf32>, vector<256x16xf32> -> vector<256x16xf32>
    %148 = vector.shape_cast %147 : vector<256x16xf32> to vector<16x16x16xf32>
    %149 = vector.broadcast %0 : vector<16x16x1xf32> to vector<16x16x16xf32>
    %150 = arith.addf %148, %149 : vector<16x16x16xf32>
    %cst_69 = arith.constant dense<0xFF800000> : vector<16x16xf32>
    %151 = vector.multi_reduction <maximumf>, %150, %cst_69 [1] : vector<16x16x16xf32> to vector<16x16xf32>
    %152 = vector.shape_cast %151 : vector<16x16xf32> to vector<16x1x16xf32>
    %153 = vector.broadcast %152 : vector<16x1x16xf32> to vector<16x16x16xf32>
    %154 = arith.subf %150, %153 : vector<16x16x16xf32>
    %155 = math.exp %154 : vector<16x16x16xf32>
    %156 = vector.broadcast %1 : vector<16x16x1xf32> to vector<16x16x16xf32>
    %157 = arith.mulf %155, %156 : vector<16x16x16xf32>
    %cst_70 = arith.constant dense<0.000000e+00> : vector<16x16xf32>
    %158 = vector.multi_reduction <add>, %157, %cst_70 [1] : vector<16x16x16xf32> to vector<16x16xf32>
    %159 = vector.shape_cast %158 : vector<16x16xf32> to vector<16x1x16xf32>
    %cst_71 = arith.constant 9.99999968E-21 : f32
    %160 = vector.broadcast %cst_71 : f32 to vector<16x1x16xf32>
    %161 = arith.maximumf %159, %160 : vector<16x1x16xf32>
    %162 = tpu.reciprocal %161 {approx = true} : vector<16x1x16xf32> -> vector<16x1x16xf32>
    %163 = vector.broadcast %162 : vector<16x1x16xf32> to vector<16x16x16xf32>
    %164 = arith.mulf %157, %163 : vector<16x16x16xf32>
    %165 = vector.shape_cast %164 : vector<16x16x16xf32> to vector<256x16xf32>
    %cst_72 = arith.constant dense<0.000000e+00> : vector<256x64xf32>
    %166 = tpu.matmul %165, %4, %cst_72 {dimension_numbers = #tpu.dot_dimension_numbers<[1], [0], [0], [1], [0, 0, 1, 1], [], []>} : vector<256x16xf32>, vector<16x64xf32>, vector<256x64xf32> -> vector<256x64xf32>
    %167 = vector.shape_cast %166 : vector<256x64xf32> to vector<16x16x64xf32>
    %168 = vector.shape_cast %118 : vector<16x64xf32> to vector<1x16x64xf32>
    %169 = vector.broadcast %168 : vector<1x16x64xf32> to vector<16x16x64xf32>
    %170 = arith.mulf %167, %169 : vector<16x16x64xf32>
    %cst_73 = arith.constant dense<0.000000e+00> : vector<16x64xf32>
    %171 = vector.multi_reduction <add>, %170, %cst_73 [1] : vector<16x16x64xf32> to vector<16x64xf32>
    %c0_74 = arith.constant 0 : index
    %c0_75 = arith.constant 0 : index
    %172 = vector.load %arg19[%c0_74, %c0_75] : memref<1x64xf32, #tpu.memory_space<vmem>>, vector<1x64xf32>
    %173 = vector.broadcast %172 : vector<1x64xf32> to vector<16x64xf32>
    %174 = arith.addf %171, %173 : vector<16x64xf32>
    %cst_76 = arith.constant dense<0.000000e+00> : vector<64xf32>
    %175 = vector.multi_reduction <add>, %174, %cst_76 [0] : vector<16x64xf32> to vector<64xf32>
    %176 = vector.shape_cast %175 : vector<64xf32> to vector<1x64xf32>
    %cst_77 = arith.constant 1.600000e+01 : f32
    %177 = vector.broadcast %cst_77 : f32 to vector<1x64xf32>
    %178 = arith.divf %176, %177 : vector<1x64xf32>
    %179 = vector.broadcast %178 : vector<1x64xf32> to vector<16x64xf32>
    %180 = arith.subf %174, %179 : vector<16x64xf32>
    %181 = arith.mulf %180, %180 : vector<16x64xf32>
    %cst_78 = arith.constant dense<0.000000e+00> : vector<64xf32>
    %182 = vector.multi_reduction <add>, %181, %cst_78 [0] : vector<16x64xf32> to vector<64xf32>
    %183 = vector.shape_cast %182 : vector<64xf32> to vector<1x64xf32>
    %cst_79 = arith.constant 1.600000e+01 : f32
    %184 = vector.broadcast %cst_79 : f32 to vector<1x64xf32>
    %185 = arith.divf %183, %184 : vector<1x64xf32>
    %186 = vector.broadcast %178 : vector<1x64xf32> to vector<16x64xf32>
    %187 = arith.subf %174, %186 : vector<16x64xf32>
    %cst_80 = arith.constant 9.99999974E-6 : f32
    %188 = vector.broadcast %cst_80 : f32 to vector<1x64xf32>
    %189 = arith.addf %185, %188 : vector<1x64xf32>
    %190 = math.rsqrt %189 : vector<1x64xf32>
    %191 = vector.broadcast %190 : vector<1x64xf32> to vector<16x64xf32>
    %192 = arith.mulf %187, %191 : vector<16x64xf32>
    %c0_81 = arith.constant 0 : index
    %c0_82 = arith.constant 0 : index
    %193 = vector.load %arg36[%c0_81, %c0_82] : memref<1x64xf32, #tpu.memory_space<vmem>>, vector<1x64xf32>
    %194 = vector.broadcast %193 : vector<1x64xf32> to vector<16x64xf32>
    %195 = arith.mulf %192, %194 : vector<16x64xf32>
    %c0_83 = arith.constant 0 : index
    %c0_84 = arith.constant 0 : index
    %196 = vector.load %arg37[%c0_83, %c0_84] : memref<1x64xf32, #tpu.memory_space<vmem>>, vector<1x64xf32>
    %197 = vector.broadcast %196 : vector<1x64xf32> to vector<16x64xf32>
    %198 = arith.addf %195, %197 : vector<16x64xf32>
    %cst_85 = arith.constant 0.000000e+00 : f32
    %199 = vector.broadcast %cst_85 : f32 to vector<16x64xf32>
    %200 = arith.cmpf ogt, %198, %199 : vector<16x64xf32>
    %cst_86 = arith.constant 0.00999999977 : f32
    %201 = vector.broadcast %cst_86 : f32 to vector<16x64xf32>
    %202 = arith.mulf %201, %198 : vector<16x64xf32>
    %203 = arith.select %200, %198, %202 : vector<16x64xi1>, vector<16x64xf32>
    %c0_87 = arith.constant 0 : index
    %c0_88 = arith.constant 0 : index
    %204 = vector.load %arg20[%c0_87, %c0_88] : memref<64x16xf32, #tpu.memory_space<vmem>>, vector<64x16xf32>
    %cst_89 = arith.constant dense<0.000000e+00> : vector<16x16xf32>
    %205 = tpu.matmul %203, %204, %cst_89 {dimension_numbers = #tpu.dot_dimension_numbers<[1], [0], [0], [1], [0, 0, 1, 1], [], []>} : vector<16x64xf32>, vector<64x16xf32>, vector<16x16xf32> -> vector<16x16xf32>
    %c0_90 = arith.constant 0 : index
    %c0_91 = arith.constant 0 : index
    %206 = vector.load %arg21[%c0_90, %c0_91] : memref<1x16xf32, #tpu.memory_space<vmem>>, vector<1x16xf32>
    %207 = vector.broadcast %206 : vector<1x16xf32> to vector<16x16xf32>
    %208 = arith.addf %205, %207 : vector<16x16xf32>
    %c0_92 = arith.constant 0 : index
    %c0_93 = arith.constant 0 : index
    %209 = vector.load %arg22[%c0_92, %c0_93] : memref<64x16xf32, #tpu.memory_space<vmem>>, vector<64x16xf32>
    %cst_94 = arith.constant dense<0.000000e+00> : vector<16x16xf32>
    %210 = tpu.matmul %203, %209, %cst_94 {dimension_numbers = #tpu.dot_dimension_numbers<[1], [0], [0], [1], [0, 0, 1, 1], [], []>} : vector<16x64xf32>, vector<64x16xf32>, vector<16x16xf32> -> vector<16x16xf32>
    %c0_95 = arith.constant 0 : index
    %c0_96 = arith.constant 0 : index
    %211 = vector.load %arg23[%c0_95, %c0_96] : memref<1x16xf32, #tpu.memory_space<vmem>>, vector<1x16xf32>
    %212 = vector.broadcast %211 : vector<1x16xf32> to vector<16x16xf32>
    %213 = arith.addf %210, %212 : vector<16x16xf32>
    %c0_97 = arith.constant 0 : index
    %c0_98 = arith.constant 0 : index
    %214 = vector.load %arg24[%c0_97, %c0_98] : memref<2x16xf32, #tpu.memory_space<vmem>>, vector<1x16xf32>
    %215 = vector.broadcast %2 : vector<256x1xf32> to vector<256x16xf32>
    %216 = vector.broadcast %214 : vector<1x16xf32> to vector<256x16xf32>
    %217 = arith.mulf %215, %216 : vector<256x16xf32>
    %c1_99 = arith.constant 1 : index
    %c0_100 = arith.constant 0 : index
    %218 = vector.load %arg24[%c1_99, %c0_100] : memref<2x16xf32, #tpu.memory_space<vmem>>, vector<1x16xf32>
    %219 = vector.broadcast %3 : vector<256x1xf32> to vector<256x16xf32>
    %220 = vector.broadcast %218 : vector<1x16xf32> to vector<256x16xf32>
    %221 = arith.mulf %219, %220 : vector<256x16xf32>
    %222 = arith.addf %217, %221 : vector<256x16xf32>
    %223 = vector.shape_cast %222 : vector<256x16xf32> to vector<16x16x16xf32>
    %224 = vector.shape_cast %213 : vector<16x16xf32> to vector<16x1x16xf32>
    %225 = vector.shape_cast %208 : vector<16x16xf32> to vector<1x16x16xf32>
    %226 = vector.broadcast %224 : vector<16x1x16xf32> to vector<16x16x16xf32>
    %227 = vector.broadcast %225 : vector<1x16x16xf32> to vector<16x16x16xf32>
    %228 = arith.addf %226, %227 : vector<16x16x16xf32>
    %229 = arith.addf %228, %223 : vector<16x16x16xf32>
    %cst_101 = arith.constant 0.000000e+00 : f32
    %230 = vector.broadcast %cst_101 : f32 to vector<16x16x16xf32>
    %231 = arith.cmpf ogt, %229, %230 : vector<16x16x16xf32>
    %cst_102 = arith.constant 2.000000e-01 : f32
    %232 = vector.broadcast %cst_102 : f32 to vector<16x16x16xf32>
    %233 = arith.mulf %232, %229 : vector<16x16x16xf32>
    %234 = arith.select %231, %229, %233 : vector<16x16x16xi1>, vector<16x16x16xf32>
    %235 = vector.shape_cast %234 : vector<16x16x16xf32> to vector<256x16xf32>
    %c0_103 = arith.constant 0 : index
    %c0_104 = arith.constant 0 : index
    %236 = vector.load %arg25[%c0_103, %c0_104] : memref<16x16xf32, #tpu.memory_space<vmem>>, vector<16x16xf32>
    %cst_105 = arith.constant dense<0.000000e+00> : vector<256x16xf32>
    %237 = tpu.matmul %235, %236, %cst_105 {dimension_numbers = #tpu.dot_dimension_numbers<[1], [0], [0], [1], [0, 0, 1, 1], [], []>} : vector<256x16xf32>, vector<16x16xf32>, vector<256x16xf32> -> vector<256x16xf32>
    %238 = vector.shape_cast %237 : vector<256x16xf32> to vector<16x16x16xf32>
    %239 = vector.broadcast %0 : vector<16x16x1xf32> to vector<16x16x16xf32>
    %240 = arith.addf %238, %239 : vector<16x16x16xf32>
    %cst_106 = arith.constant dense<0xFF800000> : vector<16x16xf32>
    %241 = vector.multi_reduction <maximumf>, %240, %cst_106 [1] : vector<16x16x16xf32> to vector<16x16xf32>
    %242 = vector.shape_cast %241 : vector<16x16xf32> to vector<16x1x16xf32>
    %243 = vector.broadcast %242 : vector<16x1x16xf32> to vector<16x16x16xf32>
    %244 = arith.subf %240, %243 : vector<16x16x16xf32>
    %245 = math.exp %244 : vector<16x16x16xf32>
    %246 = vector.broadcast %1 : vector<16x16x1xf32> to vector<16x16x16xf32>
    %247 = arith.mulf %245, %246 : vector<16x16x16xf32>
    %cst_107 = arith.constant dense<0.000000e+00> : vector<16x16xf32>
    %248 = vector.multi_reduction <add>, %247, %cst_107 [1] : vector<16x16x16xf32> to vector<16x16xf32>
    %249 = vector.shape_cast %248 : vector<16x16xf32> to vector<16x1x16xf32>
    %cst_108 = arith.constant 9.99999968E-21 : f32
    %250 = vector.broadcast %cst_108 : f32 to vector<16x1x16xf32>
    %251 = arith.maximumf %249, %250 : vector<16x1x16xf32>
    %252 = tpu.reciprocal %251 {approx = true} : vector<16x1x16xf32> -> vector<16x1x16xf32>
    %253 = vector.broadcast %252 : vector<16x1x16xf32> to vector<16x16x16xf32>
    %254 = arith.mulf %247, %253 : vector<16x16x16xf32>
    %255 = vector.shape_cast %208 : vector<16x16xf32> to vector<1x16x16xf32>
    %256 = vector.broadcast %255 : vector<1x16x16xf32> to vector<16x16x16xf32>
    %257 = arith.mulf %254, %256 : vector<16x16x16xf32>
    %cst_109 = arith.constant dense<0.000000e+00> : vector<16x16xf32>
    %258 = vector.multi_reduction <add>, %257, %cst_109 [1] : vector<16x16x16xf32> to vector<16x16xf32>
    %cst_110 = arith.constant dense<0.000000e+00> : vector<16xf32>
    %259 = vector.multi_reduction <add>, %258, %cst_110 [1] : vector<16x16xf32> to vector<16xf32>
    %260 = vector.shape_cast %259 : vector<16xf32> to vector<16x1xf32>
    %cst_111 = arith.constant 1.600000e+01 : f32
    %261 = vector.broadcast %cst_111 : f32 to vector<16x1xf32>
    %262 = arith.divf %260, %261 : vector<16x1xf32>
    %c0_112 = arith.constant 0 : index
    %c0_113 = arith.constant 0 : index
    %263 = vector.load %arg26[%c0_112, %c0_113] : memref<1x1xf32, #tpu.memory_space<vmem>>, vector<1x1xf32>
    %264 = vector.broadcast %263 : vector<1x1xf32> to vector<16x1xf32>
    %265 = arith.addf %262, %264 : vector<16x1xf32>
    %c0_114 = arith.constant 0 : index
    %c0_115 = arith.constant 0 : index
    %266 = vector.load %arg27[%c0_114, %c0_115] : memref<64x16xf32, #tpu.memory_space<vmem>>, vector<64x16xf32>
    %cst_116 = arith.constant dense<0.000000e+00> : vector<16x16xf32>
    %267 = tpu.matmul %203, %266, %cst_116 {dimension_numbers = #tpu.dot_dimension_numbers<[1], [0], [0], [1], [0, 0, 1, 1], [], []>} : vector<16x64xf32>, vector<64x16xf32>, vector<16x16xf32> -> vector<16x16xf32>
    %c0_117 = arith.constant 0 : index
    %c0_118 = arith.constant 0 : index
    %268 = vector.load %arg28[%c0_117, %c0_118] : memref<1x16xf32, #tpu.memory_space<vmem>>, vector<1x16xf32>
    %269 = vector.broadcast %268 : vector<1x16xf32> to vector<16x16xf32>
    %270 = arith.addf %267, %269 : vector<16x16xf32>
    %c0_119 = arith.constant 0 : index
    %c0_120 = arith.constant 0 : index
    %271 = vector.load %arg29[%c0_119, %c0_120] : memref<64x16xf32, #tpu.memory_space<vmem>>, vector<64x16xf32>
    %cst_121 = arith.constant dense<0.000000e+00> : vector<16x16xf32>
    %272 = tpu.matmul %203, %271, %cst_121 {dimension_numbers = #tpu.dot_dimension_numbers<[1], [0], [0], [1], [0, 0, 1, 1], [], []>} : vector<16x64xf32>, vector<64x16xf32>, vector<16x16xf32> -> vector<16x16xf32>
    %c0_122 = arith.constant 0 : index
    %c0_123 = arith.constant 0 : index
    %273 = vector.load %arg30[%c0_122, %c0_123] : memref<1x16xf32, #tpu.memory_space<vmem>>, vector<1x16xf32>
    %274 = vector.broadcast %273 : vector<1x16xf32> to vector<16x16xf32>
    %275 = arith.addf %272, %274 : vector<16x16xf32>
    %c0_124 = arith.constant 0 : index
    %c0_125 = arith.constant 0 : index
    %276 = vector.load %arg31[%c0_124, %c0_125] : memref<2x16xf32, #tpu.memory_space<vmem>>, vector<1x16xf32>
    %277 = vector.broadcast %2 : vector<256x1xf32> to vector<256x16xf32>
    %278 = vector.broadcast %276 : vector<1x16xf32> to vector<256x16xf32>
    %279 = arith.mulf %277, %278 : vector<256x16xf32>
    %c1_126 = arith.constant 1 : index
    %c0_127 = arith.constant 0 : index
    %280 = vector.load %arg31[%c1_126, %c0_127] : memref<2x16xf32, #tpu.memory_space<vmem>>, vector<1x16xf32>
    %281 = vector.broadcast %3 : vector<256x1xf32> to vector<256x16xf32>
    %282 = vector.broadcast %280 : vector<1x16xf32> to vector<256x16xf32>
    %283 = arith.mulf %281, %282 : vector<256x16xf32>
    %284 = arith.addf %279, %283 : vector<256x16xf32>
    %285 = vector.shape_cast %284 : vector<256x16xf32> to vector<16x16x16xf32>
    %286 = vector.shape_cast %275 : vector<16x16xf32> to vector<16x1x16xf32>
    %287 = vector.shape_cast %270 : vector<16x16xf32> to vector<1x16x16xf32>
    %288 = vector.broadcast %286 : vector<16x1x16xf32> to vector<16x16x16xf32>
    %289 = vector.broadcast %287 : vector<1x16x16xf32> to vector<16x16x16xf32>
    %290 = arith.addf %288, %289 : vector<16x16x16xf32>
    %291 = arith.addf %290, %285 : vector<16x16x16xf32>
    %cst_128 = arith.constant 0.000000e+00 : f32
    %292 = vector.broadcast %cst_128 : f32 to vector<16x16x16xf32>
    %293 = arith.cmpf ogt, %291, %292 : vector<16x16x16xf32>
    %cst_129 = arith.constant 2.000000e-01 : f32
    %294 = vector.broadcast %cst_129 : f32 to vector<16x16x16xf32>
    %295 = arith.mulf %294, %291 : vector<16x16x16xf32>
    %296 = arith.select %293, %291, %295 : vector<16x16x16xi1>, vector<16x16x16xf32>
    %297 = vector.shape_cast %296 : vector<16x16x16xf32> to vector<256x16xf32>
    %c0_130 = arith.constant 0 : index
    %c0_131 = arith.constant 0 : index
    %298 = vector.load %arg32[%c0_130, %c0_131] : memref<16x16xf32, #tpu.memory_space<vmem>>, vector<16x16xf32>
    %cst_132 = arith.constant dense<0.000000e+00> : vector<256x16xf32>
    %299 = tpu.matmul %297, %298, %cst_132 {dimension_numbers = #tpu.dot_dimension_numbers<[1], [0], [0], [1], [0, 0, 1, 1], [], []>} : vector<256x16xf32>, vector<16x16xf32>, vector<256x16xf32> -> vector<256x16xf32>
    %300 = vector.shape_cast %299 : vector<256x16xf32> to vector<16x16x16xf32>
    %301 = vector.broadcast %0 : vector<16x16x1xf32> to vector<16x16x16xf32>
    %302 = arith.addf %300, %301 : vector<16x16x16xf32>
    %cst_133 = arith.constant dense<0xFF800000> : vector<16x16xf32>
    %303 = vector.multi_reduction <maximumf>, %302, %cst_133 [1] : vector<16x16x16xf32> to vector<16x16xf32>
    %304 = vector.shape_cast %303 : vector<16x16xf32> to vector<16x1x16xf32>
    %305 = vector.broadcast %304 : vector<16x1x16xf32> to vector<16x16x16xf32>
    %306 = arith.subf %302, %305 : vector<16x16x16xf32>
    %307 = math.exp %306 : vector<16x16x16xf32>
    %308 = vector.broadcast %1 : vector<16x16x1xf32> to vector<16x16x16xf32>
    %309 = arith.mulf %307, %308 : vector<16x16x16xf32>
    %cst_134 = arith.constant dense<0.000000e+00> : vector<16x16xf32>
    %310 = vector.multi_reduction <add>, %309, %cst_134 [1] : vector<16x16x16xf32> to vector<16x16xf32>
    %311 = vector.shape_cast %310 : vector<16x16xf32> to vector<16x1x16xf32>
    %cst_135 = arith.constant 9.99999968E-21 : f32
    %312 = vector.broadcast %cst_135 : f32 to vector<16x1x16xf32>
    %313 = arith.maximumf %311, %312 : vector<16x1x16xf32>
    %314 = tpu.reciprocal %313 {approx = true} : vector<16x1x16xf32> -> vector<16x1x16xf32>
    %315 = vector.broadcast %314 : vector<16x1x16xf32> to vector<16x16x16xf32>
    %316 = arith.mulf %309, %315 : vector<16x16x16xf32>
    %317 = vector.shape_cast %270 : vector<16x16xf32> to vector<1x16x16xf32>
    %318 = vector.broadcast %317 : vector<1x16x16xf32> to vector<16x16x16xf32>
    %319 = arith.mulf %316, %318 : vector<16x16x16xf32>
    %cst_136 = arith.constant dense<0.000000e+00> : vector<16x16xf32>
    %320 = vector.multi_reduction <add>, %319, %cst_136 [1] : vector<16x16x16xf32> to vector<16x16xf32>
    %cst_137 = arith.constant dense<0.000000e+00> : vector<16xf32>
    %321 = vector.multi_reduction <add>, %320, %cst_137 [1] : vector<16x16xf32> to vector<16xf32>
    %322 = vector.shape_cast %321 : vector<16xf32> to vector<16x1xf32>
    %cst_138 = arith.constant 1.600000e+01 : f32
    %323 = vector.broadcast %cst_138 : f32 to vector<16x1xf32>
    %324 = arith.divf %322, %323 : vector<16x1xf32>
    %c0_139 = arith.constant 0 : index
    %c0_140 = arith.constant 0 : index
    %325 = vector.load %arg33[%c0_139, %c0_140] : memref<1x1xf32, #tpu.memory_space<vmem>>, vector<1x1xf32>
    %326 = vector.broadcast %325 : vector<1x1xf32> to vector<16x1xf32>
    %327 = arith.addf %324, %326 : vector<16x1xf32>
    %328 = vector.shape_cast %265 : vector<16x1xf32> to vector<16x1xf32>
    %329 = vector.broadcast %328 : vector<16x1xf32> to vector<16x128xf32>
    %c0_141 = arith.constant 0 : index
    %c0_142 = arith.constant 0 : index
    %330 = vector.load %arg38[%c0_141, %c0_142] : memref<16x128xf32, #tpu.memory_space<vmem>>, vector<16x128xf32>
    tpu.vector_store %arg38[%c0_141, %c0_142], %329 {strides = array<i32>} : memref<16x128xf32, #tpu.memory_space<vmem>>, vector<16x128xf32>,
    %c0_143 = arith.constant 0 : index
    %c0_144 = arith.constant 0 : index
    %331 = vector.load %arg4[%c0_143, %c0_144] : memref<16x128xf32, #tpu.memory_space<vmem>>, vector<16x128xf32>
    %332 = vector.broadcast %327 : vector<16x1xf32> to vector<16x128xf32>
    %333 = arith.mulf %331, %332 : vector<16x128xf32>
    %cst_145 = arith.constant dense<0.000000e+00> : vector<128xf32>
    %334 = vector.multi_reduction <add>, %333, %cst_145 [0] : vector<16x128xf32> to vector<128xf32>
    %335 = vector.shape_cast %334 : vector<128xf32> to vector<1x128xf32>
    %cst_146 = arith.constant dense<0.000000e+00> : vector<128xf32>
    %336 = vector.multi_reduction <add>, %331, %cst_146 [0] : vector<16x128xf32> to vector<128xf32>
    %337 = vector.shape_cast %336 : vector<128xf32> to vector<1x128xf32>
    %cst_147 = arith.constant 1.000000e+00 : f32
    %338 = vector.broadcast %cst_147 : f32 to vector<1x128xf32>
    %339 = arith.maximumf %337, %338 : vector<1x128xf32>
    %340 = tpu.reciprocal %339 {approx = true} : vector<1x128xf32> -> vector<1x128xf32>
    %341 = arith.mulf %335, %340 : vector<1x128xf32>
    %342 = vector.shape_cast %341 : vector<1x128xf32> to vector<1x128xf32>
    %343 = vector.broadcast %342 : vector<1x128xf32> to vector<8x128xf32>
    %c0_148 = arith.constant 0 : index
    %c0_149 = arith.constant 0 : index
    %344 = vector.load %arg39[%c0_148, %c0_149] : memref<8x128xf32, #tpu.memory_space<vmem>>, vector<8x128xf32>
    tpu.vector_store %arg39[%c0_148, %c0_149], %343 {strides = array<i32>} : memref<8x128xf32, #tpu.memory_space<vmem>>, vector<8x128xf32>,
    return
  }
}

</mosaic_0001>

<bundles_post_ra>
// kernel: mul.53
= control target key start
LH: loop header
LB: loop body
LE: loop exit
PB: predicated region body
PF: predicated region fallthrough
CT: control target
= control target key end

     0   :  { %s131_s10 = smov 60   ;;  %s132_s11 = smov 52   ;;  %vm3_vm0 = vcmask 31744   ;;  %vm9_vm1 = vcmask 523744   ;;  %vm15_vm2 = vcmask 490944   ;;  %vm21_vm3 = vcmask 458144   ;;  %s207_s0 = inlined_call_operand.vmem [shape: f32[16,4], index: 0, kind: input, shape index: {}]   ;;  %s208_s1 = inlined_call_operand.vmem [shape: f32[64], index: 1, kind: output, shape index: {}]  }
   0x1   :  { %v101_v0 = vld [vmem:[%s207_s0 + $0xf] sm:$0x1]   ;;  %v103_v1 = vld [vmem:[%s207_s0 + $0xd] sm:$0x1]   ;;  %v102_v2 = vld [vmem:[%s207_s0 + $0xe] sm:$0x1]  }
   0x2   :  { %7 = vrot.lane.b32.xlu0 %v101_v0, %s131_s10  ;;  %19 = vrot.lane.b32.xlu1 %v103_v1, %s132_s11  ;;  %v104_v3 = vld [vmem:[%s207_s0 + $0xc] sm:$0x1]   ;;  %s133_s16 = smov 56   ;;  %s134_s17 = smov 48   ;;  %v105_v4 = vld [vmem:[%s207_s0 + $0xb] sm:$0x1]  }
   0x3   :  { %v106_v5 = vld [vmem:[%s207_s0 + $0xa] sm:$0x1]   ;;  %v2_v6 = vld [vmem:[%s207_s0] sm:$0x1]   ;;  %s135_s24 = smov 44   ;;  %s136_s25 = smov 40  }
   0x4   :  { %4 = vst.msk [vmem:[#allocation0] sm:$0x1] %vm3_vm0, %v2_v6   ;;  %v107_v7 = vld [vmem:[%s207_s0 + $0x9] sm:$0x1]   ;;  %v108_v8 = vld [vmem:[%s207_s0 + $0x8] sm:$0x1]  }
   0x5   :  { %s137_s30 = smov 36   ;;  %s138_s2 = smov 32   ;;  %v109_v9 = vld [vmem:[%s207_s0 + $0x7] sm:$0x1]   ;;  %v110_v10 = vld [vmem:[%s207_s0 + $0x6] sm:$0x1]  }
   0x6   :  { %13 = vrot.lane.b32.xlu0 %v102_v2, %s133_s16  ;;  %25 = vrot.lane.b32.xlu1 %v104_v3, %s134_s17  ;;  %s139_s7 = smov 28   ;;  %s140_s8 = smov 24   ;;  %v111_v11 = vld [vmem:[%s207_s0 + $0x5] sm:$0x1]   ;;  %v112_v12 = vld [vmem:[%s207_s0 + $0x4] sm:$0x1]  }
   0x7   :  { %s141_s13 = smov 20   ;;  %s142_s14 = smov 16   ;;  %v113_v13 = vld [vmem:[%s207_s0 + $0x3] sm:$0x1]   ;;  %v114_v14 = vld [vmem:[%s207_s0 + $0x2] sm:$0x1]  }
   0x8   :  { %s143_s19 = smov 12   ;;  %s144_s20 = smov 8   ;;  %v115_v15 = vld [vmem:[%s207_s0 + $0x1] sm:$0x1]   ;;  %vm27_vm4 = vcmask 425344   ;;  %vm33_vm5 = vcmask 392544  }
   0x9   :  { %s145_s0 = smov 4   ;;  %vm39_vm6 = vcmask 359744   ;;  %vm45_vm7 = vcmask 326944   ;;  %vm51_vm8 = vcmask 294144   ;;  %vm57_vm9 = vcmask 261344  }
   0xa   :  { %31 = vrot.lane.b32.xlu0 %v105_v4, %s135_s24  ;;  %37 = vrot.lane.b32.xlu1 %v106_v5, %s136_s25  ;;  %vm63_vm10 = vcmask 228544   ;;  %vm69_vm11 = vcmask 195744   ;;  %vm75_vm12 = vcmask 162944   ;;  %vm81_vm13 = vcmask 130144  }
   0xb   :  { %vm87_vm14 = vcmask 97344   ;;  %vm93_vm15 = vcmask 64544  }
   0xe   :  { %43 = vrot.lane.b32.xlu0 %v107_v7, %s137_s30  ;;  %49 = vrot.lane.b32.xlu1 %v108_v8, %s138_s2 }
  0x12   :  { %55 = vrot.lane.b32.xlu0 %v109_v9, %s139_s7  ;;  %61 = vrot.lane.b32.xlu1 %v110_v10, %s140_s8 }
  0x16   :  { %67 = vrot.lane.b32.xlu0 %v111_v11, %s141_s13  ;;  %73 = vrot.lane.b32.xlu1 %v112_v12, %s142_s14 }
  0x1a   :  { %79 = vrot.lane.b32.xlu0 %v113_v13, %s143_s19  ;;  %85 = vrot.lane.b32.xlu1 %v114_v14, %s144_s20 }
  0x1e   :  { %91 = vrot.lane.b32.xlu0 %v115_v15, %s145_s0 }
  0x74   :  { %v8_v16 = vpop.permute.xlu0 %7   ;;  %v20_v17 = vpop.permute.xlu1 %19  }
  0x75   :  { %10 = vst.msk [vmem:[#allocation0] sm:$0x1] %vm9_vm1, %v8_v16  }
  0x78   :  { %v14_v18 = vpop.permute.xlu0 %13   ;;  %v26_v19 = vpop.permute.xlu1 %25  }
  0x79   :  { %16 = vst.msk [vmem:[#allocation0] sm:$0x1] %vm15_vm2, %v14_v18  }
  0x7a   :  { %22 = vst.msk [vmem:[#allocation0] sm:$0x1] %vm21_vm3, %v20_v17  }
  0x7b   :  { %28 = vst.msk [vmem:[#allocation0] sm:$0x1] %vm27_vm4, %v26_v19  }
  0x7c   :  { %v32_v20 = vpop.permute.xlu0 %31   ;;  %v38_v21 = vpop.permute.xlu1 %37  }
  0x7d   :  { %34 = vst.msk [vmem:[#allocation0] sm:$0x1] %vm33_vm5, %v32_v20  }
  0x7e   :  { %40 = vst.msk [vmem:[#allocation0] sm:$0x1] %vm39_vm6, %v38_v21  }
  0x80   :  { %v44_v22 = vpop.permute.xlu0 %43   ;;  %v50_v23 = vpop.permute.xlu1 %49  }
  0x81   :  { %46 = vst.msk [vmem:[#allocation0] sm:$0x1] %vm45_vm7, %v44_v22  }
  0x82   :  { %52 = vst.msk [vmem:[#allocation0] sm:$0x1] %vm51_vm8, %v50_v23  }
  0x84   :  { %v56_v24 = vpop.permute.xlu0 %55   ;;  %v62_v25 = vpop.permute.xlu1 %61  }
  0x85   :  { %58 = vst.msk [vmem:[#allocation0] sm:$0x1] %vm57_vm9, %v56_v24  }
  0x86   :  { %64 = vst.msk [vmem:[#allocation0] sm:$0x1] %vm63_vm10, %v62_v25  }
  0x88   :  { %v68_v26 = vpop.permute.xlu0 %67   ;;  %v74_v27 = vpop.permute.xlu1 %73  }
  0x89   :  { %70 = vst.msk [vmem:[#allocation0] sm:$0x1] %vm69_vm11, %v68_v26  }
  0x8a   :  { %76 = vst.msk [vmem:[#allocation0] sm:$0x1] %vm75_vm12, %v74_v27  }
  0x8c   :  { %v80_v28 = vpop.permute.xlu0 %79   ;;  %v86_v29 = vpop.permute.xlu1 %85  }
  0x8d   :  { %82 = vst.msk [vmem:[#allocation0] sm:$0x1] %vm81_vm13, %v80_v28  }
  0x8e   :  { %88 = vst.msk [vmem:[#allocation0] sm:$0x1] %vm87_vm14, %v86_v29  }
  0x90   :  { %v92_v30 = vpop.permute.xlu0 %91  }
  0x91   :  { %94 = vst.msk [vmem:[#allocation0] sm:$0x1] %vm93_vm15, %v92_v30  }
  0x98   :  { %v98_v31 = vld [vmem:[#allocation0] sm:$0x1] }
  0x99   :  { %100 = vst [vmem:[%s208_s1] sm:$0x1] %v98_v31 }

// kernel: neuromusx_e_forward.1
= control target key start
LH: loop header
LB: loop body
LE: loop exit
PB: predicated region body
PF: predicated region fallthrough
CT: control target
= control target key end

     0   :  { %v10382_v0 = vmov 0   ;;  %s10383_s6 = smov 3   ;;  %v10384_v3 = vmov 1   ;;  %s10385_s10 = smov 11   ;;  %v10389_v49 = vmov 1966171168   ;;  %v733_v51 = vlaneseq  ;;  %s15256_s0 = inlined_call_operand.smem [shape: u32[40], index: -1, kind: input, shape index: {}] }
   0x1   :  { %9980 = vset.pattern.permute.xlu1 %v10382_v0  ;;  %9978 = vset.pattern.permute.xlu0 %v10382_v0  ;;  %s1_s5 = sld [smem:[%s15256_s0]]   ;;  %s10386_s14 = smov 8   ;;  %v731_v50 = vunpack.c.l.s4 %v10389_v49  ;;  %vm1075_vm0 = vcmask 523264  }
   0x2   :  { %s10437_s9 = sld [smem:[%s15256_s0 + %s10383_s6]]   ;;  %s10387_s18 = smov 9   ;;  %v734_v56 = vshrl.u32 %v733_v51, 7 }
   0x3   :  { %s8803_s13 = sld [smem:[%s15256_s0 + %s10385_s10]]   ;;  %s10388_s22 = smov 1   ;;  %v732_v55 = vunpack.c.0.s8 %v731_v50 }
   0x4   :  { %s8800_s17 = sld [smem:[%s15256_s0 + %s10386_s14]]   ;;  %s10390_s26 = smov 6  }
   0x5   :  { %s8801_s21 = sld [smem:[%s15256_s0 + %s10387_s18]]   ;;  %s10391_s30 = smov 10  }
   0x6   :  { %s10485_s25 = sld [smem:[%s15256_s0 + %s10388_s22]]   ;;  %s10392_s4 = smov 7  }
   0x7   :  { %v264_v1 = vld [vmem:[%s1_s5 + $0x8] sm:$0xff]  ;;  %v263_v2 = vld [vmem:[%s1_s5] sm:$0xff]  ;;  %s8798_s29 = sld [smem:[%s15256_s0 + %s10390_s26]]   ;;  %s10393_s8 = smov 2  }
   0x8   :  { %273 = vperm.xlu1 %9980, %v264_v1   ;;  %268 = vperm.xlu0 %9978, %v263_v2   ;;  %v229_v4 = vld [vmem:[%s10437_s9] sm:$0xff]  ;;  %v230_v5 = vld [vmem:[%s10437_s9 + $0x8] sm:$0xff]  ;;  %v231_v7 = vld [vmem:[%s10437_s9 + $0x10] sm:$0xff]  ;;  %s10519_s3 = sld [smem:[%s15256_s0 + %s10391_s30]]   ;;  %s10394_s12 = smov 17  }
   0x9   :  { %v1067_v6 = vld [vmem:[%s8803_s13] sm:$0xff]  ;;  %v1068_v8 = vld [vmem:[%s8803_s13 + $0x8] sm:$0xff]  ;;  %v1069_v10 = vld [vmem:[%s8803_s13 + $0x10] sm:$0xff]  ;;  %s8799_s7 = sld [smem:[%s15256_s0 + %s10392_s4]]   ;;  %s10395_s16 = smov 24  }
   0xa   :  { %v9790_v9 = vpack.c.bf16 %v1068_v8, %v1067_v6  ;;  %v1070_v11 = vld [vmem:[%s8803_s13 + $0x18] sm:$0xff]  ;;  %v1071_v13 = vld [vmem:[%s8803_s13 + $0x20] sm:$0xff]  ;;  %v1072_v14 = vld [vmem:[%s8803_s13 + $0x28] sm:$0xff]  ;;  %s10658_s11 = sld [smem:[%s15256_s0 + %s10393_s8]]   ;;  %s10396_s20 = smov 31  }
   0xb   :  { %v9794_v12 = vpack.c.bf16 %v1070_v11, %v1069_v10  ;;  %v232_v15 = vld [vmem:[%s10437_s9 + $0x18] sm:$0xff]  ;;  %v9798_v16 = vpack.c.bf16 %v1072_v14, %v1071_v13  ;;  %v1073_v17 = vld [vmem:[%s8803_s13 + $0x30] sm:$0xff]  ;;  %v233_v19 = vld [vmem:[%s10437_s9 + $0x20] sm:$0xff]  ;;  %s10807_s15 = sld [smem:[%s15256_s0 + %s10394_s12]]   ;;  %s10397_s24 = smov 5  }
   0xc   :  { %9981 = vset.pattern.permute.xlu1 %v10384_v3  ;;  %9979 = vset.pattern.permute.xlu0 %v10384_v3  ;;  %v1074_v18 = vld [vmem:[%s8803_s13 + $0x38] sm:$0xff]  ;;  %v234_v21 = vld [vmem:[%s10437_s9 + $0x28] sm:$0xff]  ;;  %v235_v22 = vld [vmem:[%s10437_s9 + $0x30] sm:$0xff]  ;;  %s10814_s19 = sld [smem:[%s15256_s0 + %s10395_s16]]   ;;  %s10398_s28 = smov 12  }
   0xd   :  { %288 = vperm.xlu1 %9981, %v264_v1   ;;  %284 = vperm.xlu0 %9979, %v263_v2   ;;  %v9802_v20 = vpack.c.bf16 %v1074_v18, %v1073_v17  ;;  %v236_v23 = vld [vmem:[%s10437_s9 + $0x38] sm:$0xff]  ;;  %v237_v24 = vld [vmem:[%s10437_s9 + $0x40] sm:$0xff]  ;;  %v238_v25 = vld [vmem:[%s10437_s9 + $0x48] sm:$0xff]  ;;  %v10502_v1 = vsub.s32 %v732_v55, %v734_v56  ;;  %s10819_s23 = sld [smem:[%s15256_s0 + %s10396_s20]]   ;;  %s10399_s2 = smov 13  }
   0xe   :  { %9791 = vmatprep.subr.bf16.mxu0 %v9790_v9  ;;  %v239_v26 = vld [vmem:[%s10437_s9 + $0x50] sm:$0xff]  ;;  %v240_v27 = vld [vmem:[%s10437_s9 + $0x58] sm:$0xff]  ;;  %v241_v28 = vld [vmem:[%s10437_s9 + $0x60] sm:$0xff]  ;;  %s8797_s27 = sld [smem:[%s15256_s0 + %s10397_s24]]   ;;  %s10400_s6 = smov 15  }
   0xf   :  { %9793 = vmatpush3.bf16.msra.mxu0 %v9790_v9  ;;  %v242_v29 = vld [vmem:[%s10437_s9 + $0x68] sm:$0xff]  ;;  %v243_v30 = vld [vmem:[%s10437_s9 + $0x70] sm:$0xff]  ;;  %v244_v31 = vld [vmem:[%s10437_s9 + $0x78] sm:$0xff]  ;;  %15493 = vst [vmem:[#allocation4_spill] sm:$0xff] %v10502_v1  ;;  %s8804_s1 = sld [smem:[%s15256_s0 + %s10398_s28]]   ;;  %s10401_s10 = smov 34  }
  0x10   :  { %9795 = vmatprep.subr.bf16.mxu0 %v9794_v12  ;;  %v245_v32 = vld [vmem:[%s10437_s9 + $0x80] sm:$0xff]  ;;  %v246_v33 = vld [vmem:[%s10437_s9 + $0x88] sm:$0xff]  ;;  %v247_v34 = vld [vmem:[%s10437_s9 + $0x90] sm:$0xff]  ;;  %s11738_s5 = sld [smem:[%s15256_s0 + %s10399_s2]]   ;;  %s10402_s14 = smov 35  }
  0x11   :  { %9982 = vset.pattern.permute.xlu1 %v10382_v0  ;;  %532 = vperm.xlu0 %9979, %v229_v4   ;;  %v248_v35 = vld [vmem:[%s10437_s9 + $0x98] sm:$0xff]  ;;  %v249_v36 = vld [vmem:[%s10437_s9 + $0xa0] sm:$0xff]  ;;  %v250_v37 = vld [vmem:[%s10437_s9 + $0xa8] sm:$0xff]  ;;  %s8826_s13 = sld [smem:[%s15256_s0 + %s10401_s10]]   ;;  %s10403_s20 = smov 18  }
  0x12   :  { %336 = vperm.xlu1 %9982, %v229_v4   ;;  %v251_v38 = vld [vmem:[%s10437_s9 + $0xb0] sm:$0xff]  ;;  %v252_v39 = vld [vmem:[%s10437_s9 + $0xb8] sm:$0xff]  ;;  %v253_v40 = vld [vmem:[%s10437_s9 + $0xc0] sm:$0xff]  ;;  %s8827_s18 = sld [smem:[%s15256_s0 + %s10402_s14]]   ;;  %s10406_s2 = smov 19  }
  0x13   :  { %9797 = vmatpush3.bf16.msra.mxu0 %v9794_v12  ;;  %v254_v41 = vld [vmem:[%s10437_s9 + $0xc8] sm:$0xff]  ;;  %v255_v42 = vld [vmem:[%s10437_s9 + $0xd0] sm:$0xff]  ;;  %v256_v43 = vld [vmem:[%s10437_s9 + $0xd8] sm:$0xff]  ;;  %s8810_s24 = sld [smem:[%s15256_s0 + %s10403_s20]]   ;;  %s10408_s10 = smov 20  }
  0x14   :  { %9799 = vmatprep.subr.bf16.mxu0 %v9798_v16  ;;  %v257_v44 = vld [vmem:[%s10437_s9 + $0xe0] sm:$0xff]  ;;  %v258_v45 = vld [vmem:[%s10437_s9 + $0xe8] sm:$0xff]  ;;  %v259_v46 = vld [vmem:[%s10437_s9 + $0xf0] sm:$0xff]  ;;  %s10409_s14 = smov 27   ;;  %s10410_s20 = smov 36  }
  0x15   :  { %536 = vperm.xlu0 %9979, %v230_v5   ;;  %v10487_v52 = vld [vmem:[%s8800_s17] ss:$0 sm:$0xff]  ;;  %v10489_v53 = vld [vmem:[%s8800_s17 + $0x1] ss:$0 sm:$0xff]  ;;  %v260_v54 = vld [vmem:[%s10437_s9 + $0xf8] sm:$0xff]  ;;  %s11743_s9 = sld [smem:[%s15256_s0 + %s10400_s6]]   ;;  %s10407_s6 = smov 22  }
  0x16   :  { %341 = vperm.xlu1 %9982, %v230_v5   ;;  %v10496_v61 = vld [vmem:[%s8801_s21] ss:$0 sm:$0xff]  ;;  %v174_v3 = vld [vmem:[%s10485_s25 + $0x48] sm:$0xff]  ;;  %v175_v6 = vld [vmem:[%s10485_s25 + $0x50] sm:$0xff]  ;;  %s10416_s12 = smov 21   ;;  %s10417_s17 = smov 28  }
  0x17   :  { %9801 = vmatpush3.bf16.msra.mxu0 %v9798_v16  ;;  %v173_v63 = vld [vmem:[%s10485_s25 + $0x40] sm:$0xff]  ;;  %v176_v12 = vld [vmem:[%s10485_s25 + $0x58] sm:$0xff]  ;;  %v179_v17 = vld [vmem:[%s10485_s25 + $0x70] sm:$0xff]  ;;  %s13487_s16 = sld [smem:[%s15256_s0 + %s10416_s12]]   ;;  %s10418_s22 = smov 30  }
  0x18   :  { %9803 = vmatprep.subr.bf16.mxu0 %v9802_v20  ;;  %v177_v9 = vld [vmem:[%s10485_s25 + $0x60] sm:$0xff]  ;;  %s13604_s21 = sld [smem:[%s15256_s0 + %s10417_s17]]   ;;  %s10420_s30 = smov 26  }
  0x19   :  { %540 = vperm.xlu0 %9979, %v231_v7   ;;  %v8832_v11 = vld [vmem:[%s8798_s29] ss:$0 sm:$0xff]  ;;  %s13667_s26 = sld [smem:[%s15256_s0 + %s10418_s22]]   ;;  %s10421_s4 = smov 38  }
  0x1a   :  { %346 = vperm.xlu1 %9982, %v231_v7   ;;  %s10422_s8 = smov 4  }
  0x1b   :  { %9805 = vmatpush3.bf16.msra.mxu0 %v9802_v20 }
  0x1d   :  { %544 = vperm.xlu0 %9979, %v232_v15  }
  0x1e   :  { %351 = vperm.xlu1 %9982, %v232_v15  }
  0x21   :  { %548 = vperm.xlu0 %9979, %v233_v19  }
  0x22   :  { %356 = vperm.xlu1 %9982, %v233_v19  }
  0x25   :  { %552 = vperm.xlu0 %9979, %v234_v21  }
  0x26   :  { %361 = vperm.xlu1 %9982, %v234_v21   ;;  %v178_v21 = vld [vmem:[%s10485_s25 + $0x68] sm:$0xff] }
  0x29   :  { %556 = vperm.xlu0 %9979, %v235_v22  }
  0x2a   :  { %366 = vperm.xlu1 %9982, %v235_v22  }
  0x2d   :  { %560 = vperm.xlu0 %9979, %v236_v23  }
  0x2e   :  { %371 = vperm.xlu1 %9982, %v236_v23  }
  0x31   :  { %564 = vperm.xlu0 %9979, %v237_v24  }
  0x32   :  { %376 = vperm.xlu1 %9982, %v237_v24  }
  0x35   :  { %568 = vperm.xlu0 %9979, %v238_v25  }
  0x36   :  { %381 = vperm.xlu1 %9982, %v238_v25   ;;  %v10542_v25 = vld [vmem:[%s10519_s3 + $0x1] ss:$0 sm:$0xff] }
  0x39   :  { %572 = vperm.xlu0 %9979, %v239_v26  }
  0x3a   :  { %386 = vperm.xlu1 %9982, %v239_v26   ;;  %v10545_v26 = vld [vmem:[%s10519_s3] ss:$0 sm:$0xff] }
  0x3d   :  { %576 = vperm.xlu0 %9979, %v240_v27  }
  0x3e   :  { %391 = vperm.xlu1 %9982, %v240_v27  }
  0x41   :  { %580 = vperm.xlu0 %9979, %v241_v28  }
  0x42   :  { %396 = vperm.xlu1 %9982, %v241_v28   ;;  %v181_v28 = vld [vmem:[%s10485_s25 + $0x80] sm:$0xff] }
  0x45   :  { %584 = vperm.xlu0 %9979, %v242_v29  }
  0x46   :  { %401 = vperm.xlu1 %9982, %v242_v29   ;;  %v8834_v29 = vld [vmem:[%s8799_s7] ss:$0 sm:$0xff]  ;;  %s8830_s7 = sld [smem:[%s15256_s0 + %s10421_s4]]  }
  0x49   :  { %588 = vperm.xlu0 %9979, %v243_v30  }
  0x4a   :  { %406 = vperm.xlu1 %9982, %v243_v30  }
  0x4d   :  { %592 = vperm.xlu0 %9979, %v244_v31  }
  0x4e   :  { %411 = vperm.xlu1 %9982, %v244_v31  }
  0x51   :  { %596 = vperm.xlu0 %9979, %v245_v32  }
  0x52   :  { %416 = vperm.xlu1 %9982, %v245_v32  }
  0x55   :  { %600 = vperm.xlu0 %9979, %v246_v33  }
  0x56   :  { %421 = vperm.xlu1 %9982, %v246_v33   ;;  %v10556_v33 = vsub.s32 0, %v734_v56 }
  0x58   :  { %15502 = vst [vmem:[#allocation13_spill] sm:$0xff] %v10556_v33 }
  0x59   :  { %604 = vperm.xlu0 %9979, %v247_v34  }
  0x5a   :  { %426 = vperm.xlu1 %9982, %v247_v34  }
  0x5d   :  { %608 = vperm.xlu0 %9979, %v248_v35  }
  0x5e   :  { %431 = vperm.xlu1 %9982, %v248_v35  }
  0x61   :  { %612 = vperm.xlu0 %9979, %v249_v36  }
  0x62   :  { %436 = vperm.xlu1 %9982, %v249_v36  }
  0x65   :  { %616 = vperm.xlu0 %9979, %v250_v37  }
  0x66   :  { %441 = vperm.xlu1 %9982, %v250_v37  }
  0x69   :  { %620 = vperm.xlu0 %9979, %v251_v38  }
  0x6a   :  { %446 = vperm.xlu1 %9982, %v251_v38  }
  0x6d   :  { %624 = vperm.xlu0 %9979, %v252_v39  }
  0x6e   :  { %451 = vperm.xlu1 %9982, %v252_v39   ;;  %v180_v39 = vld [vmem:[%s10485_s25 + $0x78] sm:$0xff] }
  0x71   :  { %628 = vperm.xlu0 %9979, %v253_v40  }
  0x72   :  { %456 = vperm.xlu1 %9982, %v253_v40  }
  0x75   :  { %632 = vperm.xlu0 %9979, %v254_v41  }
  0x76   :  { %461 = vperm.xlu1 %9982, %v254_v41  }
  0x79   :  { %636 = vperm.xlu0 %9979, %v255_v42  }
  0x7a   :  { %466 = vperm.xlu1 %9982, %v255_v42  }
  0x7d   :  { %640 = vperm.xlu0 %9979, %v256_v43  }
  0x7e   :  { %471 = vperm.xlu1 %9982, %v256_v43  }
  0x81   :  { %644 = vperm.xlu0 %9979, %v257_v44  }
  0x82   :  { %476 = vperm.xlu1 %9982, %v257_v44   ;;  %v183_v44 = vld [vmem:[%s10485_s25 + $0x90] sm:$0xff] }
  0x85   :  { %648 = vperm.xlu0 %9979, %v258_v45  }
  0x86   :  { %481 = vperm.xlu1 %9982, %v258_v45  }
  0x87   :  { %v10480_v47 = vpop.permute.xlu1 %273  ;;  %v269_v48 = vpop.permute.xlu0 %268 }
  0x88   :  { %v313_v59 = vmul.f32 %v10487_v52, %v269_v48  ;;  %v281_v19 = vmul.f32 %v8832_v11, %v10480_v47  ;;  %v280_v20 = vmul.f32 %v8832_v11, %v269_v48 }
  0x89   :  { %652 = vperm.xlu0 %9979, %v259_v46  }
  0x8a   :  { %486 = vperm.xlu1 %9982, %v259_v46  }
  0x8c   :  { %v10492_v57 = vpop.permute.xlu1 %288  ;;  %v285_v58 = vpop.permute.xlu0 %284 }
  0x8d   :  { %v320_v60 = vmul.f32 %v10489_v53, %v285_v58  ;;  %656 = vperm.xlu0 %9979, %v260_v54  }
  0x8e   :  { %491 = vperm.xlu1 %9982, %v260_v54  }
  0x8f   :  { %v322_v62 = vadd.f32 %v320_v60, %v313_v59 }
  0x90   :  { %v10504_v2 = vpop.permute.xlu0 %532 }
  0x91   :  { %15494 = vst [vmem:[#allocation5_spill] sm:$0xff] %v10504_v2  ;;  %v10508_v4 = vadd.f32 %v10496_v61, %v322_v62  ;;  %v10510_v5 = vpop.permute.xlu1 %336  ;;  %9983 = vset.pattern.permute.xlu0 %v10382_v0  ;;  %v8833_v0 = vld [vmem:[%s8798_s29 + $0x1] ss:$0 sm:$0xff]  ;;  %v663_v36 = vmul.f32 %v10542_v25, %v10504_v2 }
  0x92   :  { %15495 = vst [vmem:[#allocation6_spill] sm:$0xff] %v10510_v5  ;;  %1439 = vperm.xlu1 %9982, %v173_v63   ;;  %1444 = vperm.xlu0 %9983, %v174_v3   ;;  %v296_v13 = vmul.f32 %v8833_v0, %v10492_v57  ;;  %v295_v14 = vmul.f32 %v8833_v0, %v285_v58  ;;  %v182_v58 = vld [vmem:[%s10485_s25 + $0x88] sm:$0xff]  ;;  %v185_v63 = vld [vmem:[%s10485_s25 + $0xa0] sm:$0xff] }
  0x93   :  { %v736_v7 = vrot.slane %v10508_v4, %v10502_v1  ;;  %v498_v37 = vmul.f32 %v10545_v26, %v10510_v5 }
  0x94   :  { %v10521_v8 = vpop.permute.xlu0 %536  ;;  %v298_v22 = vadd.f32 %v296_v13, %v281_v19  ;;  %v297_v23 = vadd.f32 %v295_v14, %v280_v20  ;;  %v184_v20 = vld [vmem:[%s10485_s25 + $0x98] sm:$0xff] }
  0x95   :  { %15496 = vst [vmem:[#allocation7_spill] sm:$0xff] %v10521_v8  ;;  %v10527_v10 = vpop.permute.xlu1 %341  ;;  %v744_v15 = vcombine.high %v736_v7, %v736_v7  ;;  %v664_v30 = vmul.f32 %v10542_v25, %v10521_v8  ;;  %v752_v38 = vrot.slane %v736_v7, %v10502_v1  ;;  %v695_v54 = vadd.f32 %v663_v36, %v498_v37 }
  0x96   :  { %15497 = vst [vmem:[#allocation8_spill] sm:$0xff] %v10527_v10  ;;  %1449 = vperm.xlu1 %9982, %v175_v6   ;;  %1459 = vperm.xlu0 %9983, %v177_v9   ;;  %v499_v31 = vmul.f32 %v10545_v26, %v10527_v10  ;;  %v10568_v40 = vadd.f32 %v8834_v29, %v298_v22 }
  0x97   :  { %v10539_v24 = vrot.slane %v744_v15, %v10502_v1  ;;  %v10570_v41 = vadd.f32 %v8834_v29, %v297_v23  ;;  %v830_v48 = vrot.slane %v752_v38, %v10556_v33  ;;  %v774_v59 = vcombine.high %v752_v38, %v752_v38 }
  0x98   :  { %v10531_v16 = vpop.permute.xlu0 %540  ;;  %15503 = vst [vmem:[#allocation14_spill] sm:$0xff] %v10568_v40  ;;  %v696_v50 = vadd.f32 %v664_v30, %v499_v31  ;;  %v729_v22 = vcombine.high %v10508_v4, %v10508_v4 }
  0x99   :  { %15498 = vst [vmem:[#allocation9_spill] sm:$0xff] %v10531_v16  ;;  %v10534_v18 = vpop.permute.xlu1 %346  ;;  %v665_v34 = vmul.f32 %v10542_v25, %v10531_v16  ;;  %15504 = vst [vmem:[#allocation15_spill] sm:$0xff] %v10570_v41  ;;  %v834_v43 = vrot.slane %v10539_v24, %v10556_v33  ;;  %v907_v55 = vadd.f32 %v830_v48, %v10570_v41 }
  0x9a   :  { %15499 = vst [vmem:[#allocation10_spill] sm:$0xff] %v10534_v18  ;;  %1454 = vperm.xlu1 %9982, %v176_v12   ;;  %1469 = vperm.xlu0 %9983, %v179_v17   ;;  %v500_v35 = vmul.f32 %v10545_v26, %v10534_v18  ;;  %v908_v56 = vadd.f32 %v830_v48, %v10568_v40 }
  0x9b   :  { %v909_v60 = vadd.f32 %v834_v43, %v10570_v41  ;;  %v939_v3 = vadd.f32 %v907_v55, %v695_v54  ;;  %v910_v13 = vadd.f32 %v834_v43, %v10568_v40  ;;  %v186_v43 = vld [vmem:[%s10485_s25 + $0xa8] sm:$0xff] }
  0x9c   :  { %v10547_v27 = vpop.permute.xlu0 %544  ;;  %v697_v51 = vadd.f32 %v665_v34, %v500_v35  ;;  %v940_v6 = vadd.f32 %v908_v56, %v696_v50  ;;  %v165_v35 = vld [vmem:[%s10485_s25] sm:$0xff]  ;;  %v776_v50 = vcombine.high %v10539_v24, %v10539_v24 }
  0x9d   :  { %15500 = vst [vmem:[#allocation11_spill] sm:$0xff] %v10547_v27  ;;  %v10554_v32 = vpop.permute.xlu1 %351  ;;  %v666_v45 = vmul.f32 %v10542_v25, %v10547_v27  ;;  %vm971_vm1 = vcmp.gt.f32.partialorder %v939_v3, 0.0  ;;  %v1003_v14 = vmul.f32 0.2, %v939_v3 }
  0x9e   :  { %15501 = vst [vmem:[#allocation12_spill] sm:$0xff] %v10554_v32  ;;  %1464 = vperm.xlu1 %9982, %v178_v21   ;;  %1479 = vperm.xlu0 %9983, %v181_v28   ;;  %v501_v46 = vmul.f32 %v10545_v26, %v10554_v32  ;;  %v941_v12 = vadd.f32 %v909_v60, %v697_v51  ;;  %vm972_vm2 = vcmp.gt.f32.partialorder %v940_v6, 0.0  ;;  %v1004_v15 = vmul.f32 0.2, %v940_v6  ;;  %v187_v51 = vld [vmem:[%s10485_s25 + $0xb0] sm:$0xff] }
  0x9f   :  { %v838_v21 = vrot.slane %v774_v59, %v10556_v33  ;;  %v1035_v23 = vsel %vm971_vm1, %v939_v3, %v1003_v14  ;;  %v842_v14 = vrot.slane %v776_v50, %v10556_v33 }
  0xa0   :  { %v10572_v42 = vpop.permute.xlu0 %548  ;;  %v698_v9 = vadd.f32 %v666_v45, %v501_v46  ;;  %vm973_vm3 = vcmp.gt.f32.partialorder %v941_v12, 0.0  ;;  %v1005_v17 = vmul.f32 0.2, %v941_v12  ;;  %v1036_v28 = vsel %vm972_vm2, %v940_v6, %v1004_v15  ;;  %9356 = vmatprep.mubr.msk.f32.mxu0 %vm1075_vm0, %v1035_v23 }
  0xa1   :  { %15505 = vst [vmem:[#allocation16_spill] sm:$0xff] %v10572_v42  ;;  %v10582_v49 = vpop.permute.xlu1 %356  ;;  %v667_v0 = vmul.f32 %v10542_v25, %v10572_v42  ;;  %9357 = vmatmul.mubr.msk.f32.vlgmr.msra.gmra.mrb[0].mxu0 %vm1075_vm0, %v1036_v28  ;;  %v911_v38 = vadd.f32 %v838_v21, %v10570_v41  ;;  %v912_v59 = vadd.f32 %v838_v21, %v10568_v40 }
  0xa2   :  { %15506 = vst [vmem:[#allocation17_spill] sm:$0xff] %v10582_v49  ;;  %1474 = vperm.xlu1 %9982, %v180_v39   ;;  %1489 = vperm.xlu0 %9983, %v183_v44   ;;  %v502_v11 = vmul.f32 %v10545_v26, %v10582_v49  ;;  %v942_v29 = vadd.f32 %v910_v13, %v698_v9 }
  0xa3   :  { %v1037_v31 = vsel %vm973_vm3, %v941_v12, %v1005_v17  ;;  %v10619_v44 = vrot.slane %v729_v22, %v10502_v1  ;;  %v167_v12 = vld [vmem:[%s10485_s25 + $0x10] sm:$0xff]  ;;  %v188_v22 = vld [vmem:[%s10485_s25 + $0xb8] sm:$0xff]  ;;  %v913_v23 = vadd.f32 %v842_v14, %v10570_v41 }
  0xa4   :  { %v10588_v62 = vpop.permute.xlu0 %552  ;;  %v699_v34 = vadd.f32 %v667_v0, %v502_v11  ;;  %vm974_vm4 = vcmp.gt.f32.partialorder %v942_v29, 0.0  ;;  %v1006_v37 = vmul.f32 0.2, %v942_v29  ;;  %9359 = vmatprep.mubr.msk.f32.mxu0 %vm1075_vm0, %v1037_v31 }
  0xa5   :  { %15507 = vst [vmem:[#allocation18_spill] sm:$0xff] %v10588_v62  ;;  %v10591_v7 = vpop.permute.xlu1 %361  ;;  %v668_v36 = vmul.f32 %v10542_v25, %v10588_v62  ;;  %v10637_v24 = vrot.slane %v10619_v44, %v10502_v1 }
  0xa6   :  { %15508 = vst [vmem:[#allocation19_spill] sm:$0xff] %v10591_v7  ;;  %1484 = vperm.xlu1 %9982, %v182_v58   ;;  %1499 = vperm.xlu0 %9983, %v185_v63   ;;  %v503_v4 = vmul.f32 %v10545_v26, %v10591_v7  ;;  %v1038_v45 = vsel %vm974_vm4, %v942_v29, %v1006_v37  ;;  %v166_v63 = vld [vmem:[%s10485_s25 + $0x8] sm:$0xff] }
  0xa7   :  { %v943_v48 = vadd.f32 %v911_v38, %v699_v34  ;;  %9360 = vmatmul.mubr.msk.f32.gmra.mrb[2].mxu0 %vm1075_vm0, %v1038_v45  ;;  %v745_v37 = vcombine.high %v10619_v44, %v10619_v44 }
  0xa8   :  { %v10598_v19 = vpop.permute.xlu0 %556  ;;  %v700_v56 = vadd.f32 %v668_v36, %v503_v4  ;;  %v846_v36 = vrot.slane %v10637_v24, %v10556_v33  ;;  %v189_v4 = vld [vmem:[%s10485_s25 + $0xc0] sm:$0xff] }
  0xa9   :  { %15509 = vst [vmem:[#allocation20_spill] sm:$0xff] %v10598_v19  ;;  %v10604_v30 = vpop.permute.xlu1 %366  ;;  %v669_v54 = vmul.f32 %v10542_v25, %v10598_v19  ;;  %vm975_vm5 = vcmp.gt.f32.partialorder %v943_v48, 0.0  ;;  %v1007_v58 = vmul.f32 0.2, %v943_v48 }
  0xaa   :  { %15510 = vst [vmem:[#allocation21_spill] sm:$0xff] %v10604_v30  ;;  %1494 = vperm.xlu1 %9982, %v184_v20   ;;  %1399 = vperm.xlu0 %9983, %v165_v35   ;;  %v504_v55 = vmul.f32 %v10545_v26, %v10604_v30  ;;  %v944_v11 = vadd.f32 %v912_v59, %v700_v56  ;;  %v205_v59 = vld [vmem:[%s10658_s11 + $0x40] sm:$0xff] }
  0xab   :  { %v1039_v6 = vsel %vm975_vm5, %v943_v48, %v1007_v58  ;;  %v168_v48 = vld [vmem:[%s10485_s25 + $0x18] sm:$0xff]  ;;  %v915_v44 = vadd.f32 %v846_v36, %v10570_v41  ;;  %v916_v58 = vadd.f32 %v846_v36, %v10568_v40 }
  0xac   :  { %v10615_v39 = vpop.permute.xlu0 %560  ;;  %9362 = vmatprep.mubr.msk.f32.mxu0 %vm1075_vm0, %v1039_v6  ;;  %v701_v13 = vadd.f32 %v669_v54, %v504_v55  ;;  %vm976_vm6 = vcmp.gt.f32.partialorder %v944_v11, 0.0  ;;  %v1008_v15 = vmul.f32 0.2, %v944_v11  ;;  %v10683_v6 = vrot.slane %v745_v37, %v10502_v1 }
  0xad   :  { %15511 = vst [vmem:[#allocation22_spill] sm:$0xff] %v10615_v39  ;;  %v10621_v46 = vpop.permute.xlu1 %371  ;;  %v670_v9 = vmul.f32 %v10542_v25, %v10615_v39 }
  0xae   :  { %15512 = vst [vmem:[#allocation23_spill] sm:$0xff] %v10621_v46  ;;  %1504 = vperm.xlu1 %9982, %v186_v43   ;;  %1509 = vperm.xlu0 %9983, %v187_v51   ;;  %v505_v0 = vmul.f32 %v10545_v26, %v10621_v46  ;;  %v1040_v31 = vsel %vm976_vm6, %v944_v11, %v1008_v15 }
  0xaf   :  { %9363 = vmatmul.mubr.msk.f32.gmra.mrb[4].mxu0 %vm1075_vm0, %v1040_v31  ;;  %v945_v38 = vadd.f32 %v913_v23, %v701_v13  ;;  %v914_v43 = vadd.f32 %v842_v14, %v10568_v40  ;;  %v321_v14 = vmul.f32 %v10489_v53, %v10492_v57  ;;  %v169_v31 = vld [vmem:[%s10485_s25 + $0x20] sm:$0xff] }
  0xb0   :  { %v10632_v60 = vpop.permute.xlu0 %564  ;;  %v702_v35 = vadd.f32 %v670_v9, %v505_v0 }
  0xb1   :  { %15513 = vst [vmem:[#allocation24_spill] sm:$0xff] %v10632_v60  ;;  %v10639_v3 = vpop.permute.xlu1 %376  ;;  %v671_v17 = vmul.f32 %v10542_v25, %v10632_v60  ;;  %vm977_vm7 = vcmp.gt.f32.partialorder %v945_v38, 0.0  ;;  %v1009_v54 = vmul.f32 0.2, %v945_v38 }
  0xb2   :  { %15514 = vst [vmem:[#allocation25_spill] sm:$0xff] %v10639_v3  ;;  %1404 = vperm.xlu1 %9982, %v166_v63   ;;  %v506_v20 = vmul.f32 %v10545_v26, %v10639_v3  ;;  %1409 = vperm.xlu0 %9983, %v167_v12   ;;  %v946_v56 = vadd.f32 %v914_v43, %v702_v35  ;;  %v190_v12 = vld [vmem:[%s10485_s25 + $0xc8] sm:$0xff] }
  0xb3   :  { %v1041_v63 = vsel %vm977_vm7, %v945_v38, %v1009_v54 }
  0xb4   :  { %v10652_v21 = vpop.permute.xlu0 %568  ;;  %v703_v50 = vadd.f32 %v671_v17, %v506_v20  ;;  %9365 = vmatprep.mubr.msk.f32.mxu0 %vm1075_vm0, %v1041_v63  ;;  %vm978_vm8 = vcmp.gt.f32.partialorder %v946_v56, 0.0  ;;  %v1010_v9 = vmul.f32 0.2, %v946_v56 }
  0xb5   :  { %15515 = vst [vmem:[#allocation26_spill] sm:$0xff] %v10652_v21  ;;  %v672_v28 = vmul.f32 %v10542_v25, %v10652_v21  ;;  %v10663_v29 = vpop.permute.xlu1 %381 }
  0xb6   :  { %15516 = vst [vmem:[#allocation27_spill] sm:$0xff] %v10663_v29  ;;  %v507_v34 = vmul.f32 %v10545_v26, %v10663_v29  ;;  %1514 = vperm.xlu1 %9982, %v188_v22   ;;  %1519 = vperm.xlu0 %9983, %v189_v4   ;;  %v947_v0 = vadd.f32 %v915_v44, %v703_v50  ;;  %v206_v4 = vld [vmem:[%s10658_s11 + $0x48] sm:$0xff] }
  0xb7   :  { %v1042_v22 = vsel %vm978_vm8, %v946_v56, %v1010_v9  ;;  %v170_v56 = vld [vmem:[%s10485_s25 + $0x28] sm:$0xff]  ;;  %v775_v44 = vcombine.high %v10637_v24, %v10637_v24 }
  0xb8   :  { %v10674_v45 = vpop.permute.xlu0 %572  ;;  %v704_v51 = vadd.f32 %v672_v28, %v507_v34  ;;  %vm979_vm9 = vcmp.gt.f32.partialorder %v947_v0, 0.0  ;;  %v1011_v23 = vmul.f32 0.2, %v947_v0  ;;  %v314_v28 = vmul.f32 %v10487_v52, %v10480_v47  ;;  %9366 = vmatmul.mubr.msk.f32.gmra.mrb[6].mxu0 %vm1075_vm0, %v1042_v22 }
  0xb9   :  { %15517 = vst [vmem:[#allocation28_spill] sm:$0xff] %v10674_v45  ;;  %v10677_v55 = vpop.permute.xlu1 %386  ;;  %v673_v15 = vmul.f32 %v10542_v25, %v10674_v45  ;;  %v850_v47 = vrot.slane %v10683_v6, %v10556_v33  ;;  %v854_v22 = vrot.slane %v775_v44, %v10556_v33 }
  0xba   :  { %15518 = vst [vmem:[#allocation29_spill] sm:$0xff] %v10677_v55  ;;  %1414 = vperm.xlu1 %9982, %v168_v48   ;;  %v948_v13 = vadd.f32 %v916_v58, %v704_v51  ;;  %v508_v17 = vmul.f32 %v10545_v26, %v10677_v55  ;;  %1872 = vperm.xlu0 %9983, %v205_v59   ;;  %v191_v51 = vld [vmem:[%s10485_s25 + $0xd0] sm:$0xff] }
  0xbb   :  { %v1043_v34 = vsel %vm979_vm9, %v947_v0, %v1011_v23  ;;  %v323_v52 = vadd.f32 %v321_v14, %v314_v28  ;;  %v917_v48 = vadd.f32 %v850_v47, %v10570_v41  ;;  %v918_v9 = vadd.f32 %v850_v47, %v10568_v40 }
  0xbc   :  { %v10686_v11 = vpop.permute.xlu0 %576  ;;  %vm980_vm10 = vcmp.gt.f32.partialorder %v948_v13, 0.0  ;;  %v1012_v35 = vmul.f32 0.2, %v948_v13  ;;  %9368 = vmatprep.mubr.msk.f32.mxu0 %vm1075_vm0, %v1043_v34  ;;  %v705_v38 = vadd.f32 %v673_v15, %v508_v17  ;;  %v192_v17 = vld [vmem:[%s10485_s25 + $0xd8] sm:$0xff]  ;;  %v920_v44 = vadd.f32 %v854_v22, %v10568_v40 }
  0xbd   :  { %15519 = vst [vmem:[#allocation30_spill] sm:$0xff] %v10686_v11  ;;  %v10695_v20 = vpop.permute.xlu1 %391  ;;  %v674_v53 = vmul.f32 %v10542_v25, %v10686_v11  ;;  %v10722_v58 = vadd.f32 %v10496_v61, %v323_v52 }
  0xbe   :  { %15520 = vst [vmem:[#allocation31_spill] sm:$0xff] %v10695_v20  ;;  %v509_v57 = vmul.f32 %v10545_v26, %v10695_v20  ;;  %1524 = vperm.xlu1 %9982, %v190_v12   ;;  %v1044_v43 = vsel %vm980_vm10, %v948_v13, %v1012_v35  ;;  %1419 = vperm.xlu0 %9983, %v169_v31   ;;  %v207_v31 = vld [vmem:[%s10658_s11 + $0x50] sm:$0xff] }
  0xbf   :  { %9369 = vmatmul.mubr.msk.f32.gmra.mrb[8].mxu0 %vm1075_vm0, %v1044_v43  ;;  %v949_v59 = vadd.f32 %v917_v48, %v705_v38  ;;  %v10741_v23 = vrot.slane %v10722_v58, %v10502_v1  ;;  %v777_v35 = vcombine.high %v10683_v6, %v10683_v6  ;;  %v919_v43 = vadd.f32 %v854_v22, %v10570_v41 }
  0xc0   :  { %v10705_v36 = vpop.permute.xlu0 %580  ;;  %v706_v50 = vadd.f32 %v674_v53, %v509_v57 }
  0xc1   :  { %15521 = vst [vmem:[#allocation32_spill] sm:$0xff] %v10705_v36  ;;  %v10711_v37 = vpop.permute.xlu1 %396  ;;  %v675_v0 = vmul.f32 %v10542_v25, %v10705_v36  ;;  %vm981_vm11 = vcmp.gt.f32.partialorder %v949_v59, 0.0  ;;  %v1013_v24 = vmul.f32 0.2, %v949_v59  ;;  %v10760_v6 = vrot.slane %v10741_v23, %v10502_v1  ;;  %v213_v36 = vld [vmem:[%s10658_s11 + $0x80] sm:$0xff] }
  0xc2   :  { %15522 = vst [vmem:[#allocation33_spill] sm:$0xff] %v10711_v37  ;;  %1877 = vperm.xlu1 %9982, %v206_v4   ;;  %v510_v12 = vmul.f32 %v10545_v26, %v10711_v37  ;;  %1529 = vperm.xlu0 %9983, %v191_v51   ;;  %v950_v14 = vadd.f32 %v918_v9, %v706_v50  ;;  %v208_v50 = vld [vmem:[%s10658_s11 + $0x58] sm:$0xff] }
  0xc3   :  { %v1045_v28 = vsel %vm981_vm11, %v949_v59, %v1013_v24  ;;  %v171_v59 = vld [vmem:[%s10485_s25 + $0x30] sm:$0xff] }
  0xc4   :  { %v10716_v54 = vpop.permute.xlu0 %584  ;;  %vm982_vm12 = vcmp.gt.f32.partialorder %v950_v14, 0.0  ;;  %v1014_v53 = vmul.f32 0.2, %v950_v14  ;;  %9371 = vmatprep.mubr.msk.f32.mxu0 %vm1075_vm0, %v1045_v28  ;;  %v707_v34 = vadd.f32 %v675_v0, %v510_v12  ;;  %v858_v12 = vrot.slane %v777_v35, %v10556_v33 }
  0xc5   :  { %15523 = vst [vmem:[#allocation34_spill] sm:$0xff] %v10716_v54  ;;  %v10724_v63 = vpop.permute.xlu1 %401  ;;  %v676_v13 = vmul.f32 %v10542_v25, %v10716_v54 }
  0xc6   :  { %15524 = vst [vmem:[#allocation35_spill] sm:$0xff] %v10724_v63  ;;  %v511_v61 = vmul.f32 %v10545_v26, %v10724_v63  ;;  %1424 = vperm.xlu1 %9982, %v170_v56   ;;  %v1046_v4 = vsel %vm982_vm12, %v950_v14, %v1014_v53  ;;  %1882 = vperm.xlu0 %9983, %v207_v31   ;;  %v172_v31 = vld [vmem:[%s10485_s25 + $0x38] sm:$0xff] }
  0xc7   :  { %9372 = vmatmul.mubr.msk.f32.gmra.mrb[10].mxu0 %vm1075_vm0, %v1046_v4  ;;  %v951_v9 = vadd.f32 %v919_v43, %v707_v34  ;;  %v862_v34 = vrot.slane %v10760_v6, %v10556_v33  ;;  %v793_v43 = vcombine.high %v10741_v23, %v10741_v23  ;;  %v194_v23 = vld [vmem:[%s10485_s25 + $0xe8] sm:$0xff] }
  0xc8   :  { %v10735_v15 = vpop.permute.xlu0 %588  ;;  %v708_v47 = vadd.f32 %v676_v13, %v511_v61 }
  0xc9   :  { %15525 = vst [vmem:[#allocation36_spill] sm:$0xff] %v10735_v15  ;;  %v10743_v57 = vpop.permute.xlu1 %406  ;;  %v677_v52 = vmul.f32 %v10542_v25, %v10735_v15  ;;  %vm983_vm13 = vcmp.gt.f32.partialorder %v951_v9, 0.0  ;;  %v1015_v24 = vmul.f32 0.2, %v951_v9 }
  0xca   :  { %15526 = vst [vmem:[#allocation37_spill] sm:$0xff] %v10743_v57  ;;  %1534 = vperm.xlu1 %9982, %v192_v17   ;;  %v512_v38 = vmul.f32 %v10545_v26, %v10743_v57  ;;  %v952_v13 = vadd.f32 %v920_v44, %v708_v47  ;;  %1429 = vperm.xlu0 %9983, %v171_v59  }
  0xcb   :  { %v1047_v35 = vsel %vm983_vm13, %v951_v9, %v1015_v24  ;;  %v921_v47 = vadd.f32 %v858_v12, %v10570_v41 }
  0xcc   :  { %v10755_v48 = vpop.permute.xlu0 %592  ;;  %v709_v14 = vadd.f32 %v677_v52, %v512_v38  ;;  %vm984_vm14 = vcmp.gt.f32.partialorder %v952_v13, 0.0  ;;  %v1016_v22 = vmul.f32 0.2, %v952_v13  ;;  %v922_v52 = vadd.f32 %v858_v12, %v10568_v40  ;;  %v193_v38 = vld [vmem:[%s10485_s25 + $0xe0] sm:$0xff]  ;;  %9374 = vmatprep.mubr.msk.f32.mxu0 %vm1075_vm0, %v1047_v35 }
  0xcd   :  { %15527 = vst [vmem:[#allocation38_spill] sm:$0xff] %v10755_v48  ;;  %v678_v51 = vmul.f32 %v10542_v25, %v10755_v48  ;;  %v10764_v56 = vpop.permute.xlu1 %411  ;;  %v10884_v48 = vld [vmem:[%s10819_s23] ss:$0 sm:$0xff] }
  0xce   :  { %15528 = vst [vmem:[#allocation39_spill] sm:$0xff] %v10764_v56  ;;  %v513_v0 = vmul.f32 %v10545_v26, %v10764_v56  ;;  %1887 = vperm.xlu1 %9982, %v208_v50   ;;  %v1048_v50 = vsel %vm984_vm14, %v952_v13, %v1016_v22  ;;  %1539 = vperm.xlu0 %9983, %v193_v38   ;;  %v212_v56 = vld [vmem:[%s10658_s11 + $0x78] sm:$0xff] }
  0xcf   :  { %9375 = vmatmul.mubr.msk.f32.gmra.mrb[12].mxu0 %vm1075_vm0, %v1048_v50  ;;  %v924_v50 = vadd.f32 %v862_v34, %v10568_v40 }
  0xd0   :  { %v10771_v61 = vpop.permute.xlu0 %596  ;;  %v710_v17 = vadd.f32 %v678_v51, %v513_v0  ;;  %v953_v51 = vadd.f32 %v921_v47, %v709_v14  ;;  %v778_v0 = vcombine.high %v10722_v58, %v10722_v58  ;;  %v923_v14 = vadd.f32 %v862_v34, %v10570_v41  ;;  %v209_v47 = vld [vmem:[%s10658_s11 + $0x60] sm:$0xff]  ;;  %v195_v34 = vld [vmem:[%s10485_s25 + $0xf0] sm:$0xff] }
  0xd1   :  { %15529 = vst [vmem:[#allocation40_spill] sm:$0xff] %v10771_v61  ;;  %v679_v28 = vmul.f32 %v10542_v25, %v10771_v61  ;;  %v10775_v53 = vpop.permute.xlu1 %416 }
  0xd2   :  { %15530 = vst [vmem:[#allocation41_spill] sm:$0xff] %v10775_v53  ;;  %v514_v4 = vmul.f32 %v10545_v26, %v10775_v53  ;;  %1434 = vperm.xlu1 %9982, %v172_v31   ;;  %v954_v59 = vadd.f32 %v922_v52, %v710_v17  ;;  %vm985_vm15 = vcmp.gt.f32.partialorder %v953_v51, 0.0  ;;  %v1017_v13 = vmul.f32 0.2, %v953_v51  ;;  %1892 = vperm.xlu0 %9983, %v209_v47   ;;  %v10866_v47 = vld [vmem:[%s10819_s23 + $0x1] ss:$0 sm:$0xff] }
  0xd3   :  { %v10802_v17 = vrot.slane %v793_v43, %v10502_v1  ;;  %v210_v43 = vld [vmem:[%s10658_s11 + $0x68] sm:$0xff] }
  0xd4   :  { %v10789_v44 = vpop.permute.xlu0 %600  ;;  %v711_v9 = vadd.f32 %v679_v28, %v514_v4  ;;  %vm986_vm1 = vcmp.gt.f32.partialorder %v954_v59, 0.0  ;;  %v1018_v58 = vmul.f32 0.2, %v954_v59  ;;  %v823_v28 = vcombine.high %v10760_v6, %v10760_v6 }
  0xd5   :  { %15531 = vst [vmem:[#allocation42_spill] sm:$0xff] %v10789_v44  ;;  %v680_v12 = vmul.f32 %v10542_v25, %v10789_v44  ;;  %v10795_v24 = vpop.permute.xlu1 %421  ;;  %v1049_v31 = vsel %vm985_vm15, %v953_v51, %v1017_v13 }
  0xd6   :  { %15532 = vst [vmem:[#allocation43_spill] sm:$0xff] %v10795_v24  ;;  %v515_v22 = vmul.f32 %v10545_v26, %v10795_v24  ;;  %1544 = vperm.xlu1 %9982, %v194_v23   ;;  %v955_v4 = vadd.f32 %v923_v14, %v711_v9  ;;  %9377 = vmatprep.mubr.msk.f32.mxu0 %vm1075_vm0, %v1049_v31  ;;  %v196_v31 = vld [vmem:[%s10485_s25 + $0xf8] sm:$0xff]  ;;  %s10404_s25 = smov 16  }
  0xd7   :  { %v1050_v6 = vsel %vm986_vm1, %v954_v59, %v1018_v58  ;;  %v10830_v24 = vrot.slane %v778_v0, %v10502_v1  ;;  %v866_v0 = vrot.slane %v10802_v17, %v10556_v33  ;;  %v870_v13 = vrot.slane %v823_v28, %v10556_v33  ;;  %1549 = vperm.xlu0 %9983, %v195_v34   ;;  %s8808_s28 = sld [smem:[%s15256_s0 + %s10404_s25]]   ;;  %s10411_s25 = smov 37  }
  0xd8   :  { %v10821_v35 = vpop.permute.xlu0 %604  ;;  %v712_v52 = vadd.f32 %v680_v12, %v515_v22  ;;  %9378 = vmatmul.mubr.msk.f32.gmra.mrb[14].mxu0 %vm1075_vm0, %v1050_v6  ;;  %vm987_vm2 = vcmp.gt.f32.partialorder %v955_v4, 0.0  ;;  %v1019_v12 = vmul.f32 0.2, %v955_v4 }
  0xd9   :  { %15533 = vst [vmem:[#allocation44_spill] sm:$0xff] %v10821_v35  ;;  %v10825_v38 = vpop.permute.xlu1 %426  ;;  %v681_v51 = vmul.f32 %v10542_v25, %v10821_v35  ;;  %v926_v35 = vadd.f32 %v866_v0, %v10568_v40  ;;  %v927_v34 = vadd.f32 %v870_v13, %v10570_v41  ;;  %v928_v63 = vadd.f32 %v870_v13, %v10568_v40 }
  0xda   :  { %15534 = vst [vmem:[#allocation45_spill] sm:$0xff] %v10825_v38  ;;  %v516_v9 = vmul.f32 %v10545_v26, %v10825_v38  ;;  %v956_v59 = vadd.f32 %v924_v50, %v712_v52  ;;  %1897 = vperm.xlu1 %9982, %v210_v43   ;;  %v1051_v22 = vsel %vm987_vm2, %v955_v4, %v1019_v12  ;;  %v10858_v4 = vld [vmem:[%s10807_s15 + $0x1] ss:$0 sm:$0xff] }
  0xdb   :  { %v10852_v52 = vrot.slane %v10830_v24, %v10502_v1  ;;  %9380 = vmatprep.mubr.msk.f32.mxu0 %vm1075_vm0, %v1051_v22  ;;  %v825_v50 = vcombine.high %v10802_v17, %v10802_v17  ;;  %v10863_v12 = vld [vmem:[%s10814_s19 + $0x1] ss:$0 sm:$0xff] }
  0xdc   :  { %v10837_v23 = vpop.permute.xlu0 %608  ;;  %vm988_vm3 = vcmp.gt.f32.partialorder %v956_v59, 0.0  ;;  %v1020_v6 = vmul.f32 0.2, %v956_v59  ;;  %v713_v43 = vadd.f32 %v681_v51, %v516_v9  ;;  %v10873_v51 = vld [vmem:[%s10807_s15] ss:$0 sm:$0xff] }
  0xdd   :  { %15535 = vst [vmem:[#allocation46_spill] sm:$0xff] %v10837_v23  ;;  %v682_v14 = vmul.f32 %v10542_v25, %v10837_v23  ;;  %v10845_v58 = vpop.permute.xlu1 %431  ;;  %v211_v23 = vld [vmem:[%s10658_s11 + $0x70] sm:$0xff]  ;;  %v10876_v9 = vld [vmem:[%s10814_s19] ss:$0 sm:$0xff]  ;;  %v10899_v20 = vrot.slane %v825_v50, %v10556_v33 }
  0xde   :  { %15536 = vst [vmem:[#allocation47_spill] sm:$0xff] %v10845_v58  ;;  %v517_v28 = vmul.f32 %v10545_v26, %v10845_v58  ;;  %1554 = vperm.xlu1 %9982, %v196_v31   ;;  %v925_v58 = vadd.f32 %v866_v0, %v10570_v41  ;;  %v1052_v17 = vsel %vm988_vm3, %v956_v59, %v1020_v6  ;;  %vm15441_vm3 = vcmask 130048  }
  0xdf   :  { %9381 = vmatmul.mubr.msk.f32.gmra.mrb[16].mxu0 %vm1075_vm0, %v1052_v17  ;;  %1902 = vperm.xlu0 %9983, %v211_v23  }
  0xe0   :  { %v613_v22 = vpop.permute.xlu0 %612  ;;  %v714_v38 = vadd.f32 %v682_v14, %v517_v28  ;;  %v957_v57 = vadd.f32 %v925_v58, %v713_v43 }
  0xe1   :  { %v683_v44 = vmul.f32 %v10542_v25, %v613_v22  ;;  %v3312_v53 = vmul.f32 %v10858_v4, %v613_v22  ;;  %v5611_v31 = vmul.f32 %v10863_v12, %v613_v22  ;;  %v437_v61 = vpop.permute.xlu1 %436  ;;  %v7297_v0 = vmul.f32 %v10866_v47, %v613_v22 }
  0xe2   :  { %v518_v14 = vmul.f32 %v10545_v26, %v437_v61  ;;  %v3275_v28 = vmul.f32 %v10873_v51, %v437_v61  ;;  %v5574_v59 = vmul.f32 %v10876_v9, %v437_v61  ;;  %v7260_v6 = vmul.f32 %v10884_v48, %v437_v61  ;;  %1907 = vperm.xlu1 %9982, %v212_v56  }
  0xe3   :  { %v958_v15 = vadd.f32 %v926_v35, %v714_v38  ;;  %vm989_vm4 = vcmp.gt.f32.partialorder %v957_v57, 0.0  ;;  %v1021_v61 = vmul.f32 0.2, %v957_v57  ;;  %v214_v38 = vld [vmem:[%s10658_s11 + $0x88] sm:$0xff]  ;;  %1912 = vperm.xlu0 %9983, %v213_v36  }
  0xe4   :  { %v715_v54 = vadd.f32 %v683_v44, %v518_v14  ;;  %v10893_v37 = vadd.f32 %v3312_v53, %v3275_v28  ;;  %v10895_v17 = vadd.f32 %v5611_v31, %v5574_v59  ;;  %v617_v22 = vpop.permute.xlu0 %616  ;;  %v10901_v11 = vadd.f32 %v7297_v0, %v7260_v6 }
  0xe5   :  { %v684_v23 = vmul.f32 %v10542_v25, %v617_v22  ;;  %v442_v35 = vpop.permute.xlu1 %441  ;;  %v3313_v44 = vmul.f32 %v10858_v4, %v617_v22  ;;  %v5612_v53 = vmul.f32 %v10863_v12, %v617_v22  ;;  %v7298_v13 = vmul.f32 %v10866_v47, %v617_v22 }
  0xe6   :  { %15537 = vst [vmem:[#allocation48_spill] sm:$0xff] %v10893_v37  ;;  %15538 = vst [vmem:[#allocation49_spill] sm:$0xff] %v10895_v17  ;;  %v519_v56 = vmul.f32 %v10545_v26, %v442_v35  ;;  %v1053_v58 = vsel %vm989_vm4, %v957_v57, %v1021_v61  ;;  %v3276_v43 = vmul.f32 %v10873_v51, %v442_v35  ;;  %1917 = vperm.xlu1 %9982, %v214_v38   ;;  %v216_v17 = vld [vmem:[%s10658_s11 + $0x98] sm:$0xff]  ;;  %vm2767_vm4 = vcmask 1041409  }
  0xe7   :  { %15539 = vst [vmem:[#allocation50_spill] sm:$0xff] %v10901_v11  ;;  %v5575_v50 = vmul.f32 %v10876_v9, %v442_v35  ;;  %v7261_v31 = vmul.f32 %v10884_v48, %v442_v35  ;;  %9383 = vmatprep.mubr.msk.f32.mxu0 %vm1075_vm0, %v1053_v58  ;;  %vm990_vm5 = vcmp.gt.f32.partialorder %v958_v15, 0.0  ;;  %v1022_v14 = vmul.f32 0.2, %v958_v15  ;;  %v215_v35 = vld [vmem:[%s10658_s11 + $0x90] sm:$0xff] }
  0xe8   :  { %v716_v0 = vadd.f32 %v684_v23, %v519_v56  ;;  %v621_v28 = vpop.permute.xlu0 %620  ;;  %v959_v59 = vadd.f32 %v927_v34, %v715_v54  ;;  %v10913_v6 = vadd.f32 %v3313_v44, %v3276_v43  ;;  %1922 = vperm.xlu0 %9983, %v215_v35   ;;  %v929_v43 = vadd.f32 %v10899_v20, %v10570_v41 }
  0xe9   :  { %v10915_v57 = vadd.f32 %v5612_v53, %v5575_v50  ;;  %v10917_v22 = vadd.f32 %v7298_v13, %v7261_v31  ;;  %v685_v61 = vmul.f32 %v10542_v25, %v621_v28  ;;  %v447_v11 = vpop.permute.xlu1 %446  ;;  %v1054_v36 = vsel %vm990_vm5, %v958_v15, %v1022_v14 }
  0xea   :  { %15540 = vst [vmem:[#allocation51_spill] sm:$0xff] %v10913_v6  ;;  %v3314_v58 = vmul.f32 %v10858_v4, %v621_v28  ;;  %v5613_v23 = vmul.f32 %v10863_v12, %v621_v28  ;;  %v7299_v38 = vmul.f32 %v10866_v47, %v621_v28  ;;  %9384 = vmatmul.mubr.msk.f32.gmra.mrb[18].mxu0 %vm1075_vm0, %v1054_v36  ;;  %vm991_vm6 = vcmp.gt.f32.partialorder %v959_v59, 0.0  ;;  %v203_v6 = vld [vmem:[%s10658_s11 + $0x30] sm:$0xff] }
  0xeb   :  { %15541 = vst [vmem:[#allocation52_spill] sm:$0xff] %v10915_v57  ;;  %15542 = vst [vmem:[#allocation53_spill] sm:$0xff] %v10917_v22  ;;  %v520_v54 = vmul.f32 %v10545_v26, %v447_v11  ;;  %v3277_v34 = vmul.f32 %v10873_v51, %v447_v11  ;;  %v5576_v44 = vmul.f32 %v10876_v9, %v447_v11  ;;  %1927 = vperm.xlu1 %9982, %v216_v17   ;;  %v218_v22 = vld [vmem:[%s10658_s11 + $0xa8] sm:$0xff]  ;;  %v217_v57 = vld [vmem:[%s10658_s11 + $0xa0] sm:$0xff]  ;;  %vm2770_vm5 = vcmask 1042434  }
  0xec   :  { %v7262_v53 = vmul.f32 %v10884_v48, %v447_v11  ;;  %v1023_v15 = vmul.f32 0.2, %v959_v59  ;;  %v625_v13 = vpop.permute.xlu0 %624  ;;  %v960_v56 = vadd.f32 %v928_v63, %v716_v0  ;;  %1932 = vperm.xlu0 %9983, %v217_v57  }
  0xed   :  { %v717_v50 = vadd.f32 %v685_v61, %v520_v54  ;;  %v10932_v31 = vadd.f32 %v3314_v58, %v3277_v34  ;;  %v10934_v14 = vadd.f32 %v5613_v23, %v5576_v44  ;;  %v452_v36 = vpop.permute.xlu1 %451  ;;  %v686_v17 = vmul.f32 %v10542_v25, %v625_v13 }
  0xee   :  { %v10936_v28 = vadd.f32 %v7299_v38, %v7262_v53  ;;  %v1055_v11 = vsel %vm991_vm6, %v959_v59, %v1023_v15  ;;  %v3315_v35 = vmul.f32 %v10858_v4, %v625_v13  ;;  %v5614_v63 = vmul.f32 %v10863_v12, %v625_v13 }
  0xef   :  { %15543 = vst [vmem:[#allocation54_spill] sm:$0xff] %v10932_v31  ;;  %15544 = vst [vmem:[#allocation55_spill] sm:$0xff] %v10934_v14  ;;  %9386 = vmatprep.mubr.msk.f32.mxu0 %vm1075_vm0, %v1055_v11  ;;  %v7300_v0 = vmul.f32 %v10866_v47, %v625_v13  ;;  %v521_v61 = vmul.f32 %v10545_v26, %v452_v36  ;;  %v3278_v58 = vmul.f32 %v10873_v51, %v452_v36  ;;  %v198_v11 = vld [vmem:[%s10658_s11 + $0x8] sm:$0xff]  ;;  %vm2773_vm6 = vcmask 1043459  }
  0xf0   :  { %15545 = vst [vmem:[#allocation56_spill] sm:$0xff] %v10936_v28  ;;  %v5577_v23 = vmul.f32 %v10876_v9, %v452_v36  ;;  %v7263_v59 = vmul.f32 %v10884_v48, %v452_v36  ;;  %1937 = vperm.xlu1 %9982, %v218_v22   ;;  %vm992_vm7 = vcmp.gt.f32.partialorder %v960_v56, 0.0  ;;  %v1024_v38 = vmul.f32 0.2, %v960_v56  ;;  %v629_v54 = vpop.permute.xlu0 %628  ;;  %v197_v28 = vld [vmem:[%s10658_s11] sm:$0xff] }
  0xf1   :  { %v961_v34 = vadd.f32 %v929_v43, %v717_v50  ;;  %v718_v44 = vadd.f32 %v686_v17, %v521_v61  ;;  %v10949_v53 = vadd.f32 %v3315_v35, %v3278_v58  ;;  %v457_v13 = vpop.permute.xlu1 %456  ;;  %v10957_v14 = vrot.slane %v10852_v52, %v10556_v33  ;;  %1832 = vperm.xlu0 %9983, %v197_v28  }
  0xf2   :  { %v10951_v15 = vadd.f32 %v5614_v63, %v5577_v23  ;;  %v10959_v31 = vadd.f32 %v7300_v0, %v7263_v59  ;;  %v1056_v22 = vsel %vm992_vm7, %v960_v56, %v1024_v38  ;;  %v3316_v36 = vmul.f32 %v10858_v4, %v629_v54 }
  0xf3   :  { %15546 = vst [vmem:[#allocation57_spill] sm:$0xff] %v10949_v53  ;;  %v5615_v57 = vmul.f32 %v10863_v12, %v629_v54  ;;  %9387 = vmatmul.mubr.msk.f32.gmra.mrb[20].mxu0 %vm1075_vm0, %v1056_v22  ;;  %v687_v43 = vmul.f32 %v10542_v25, %v629_v54  ;;  %v7301_v50 = vmul.f32 %v10866_v47, %v629_v54  ;;  %vm993_vm8 = vcmp.gt.f32.partialorder %v961_v34, 0.0  ;;  %v220_v54 = vld [vmem:[%s10658_s11 + $0xb8] sm:$0xff] }
  0xf4   :  { %15547 = vst [vmem:[#allocation58_spill] sm:$0xff] %v10951_v15  ;;  %15548 = vst [vmem:[#allocation59_spill] sm:$0xff] %v10959_v31  ;;  %v3279_v17 = vmul.f32 %v10873_v51, %v457_v13  ;;  %v5578_v35 = vmul.f32 %v10876_v9, %v457_v13  ;;  %v522_v63 = vmul.f32 %v10545_v26, %v457_v13  ;;  %1837 = vperm.xlu1 %9982, %v198_v11   ;;  %v633_v61 = vpop.permute.xlu0 %632  ;;  %v219_v31 = vld [vmem:[%s10658_s11 + $0xb0] sm:$0xff]  ;;  %vm2776_vm7 = vcmask 1044484  }
  0xf5   :  { %v7264_v56 = vmul.f32 %v10884_v48, %v457_v13  ;;  %v1025_v0 = vmul.f32 0.2, %v961_v34  ;;  %v688_v59 = vmul.f32 %v10542_v25, %v633_v61  ;;  %v462_v38 = vpop.permute.xlu1 %461  ;;  %v930_v22 = vadd.f32 %v10899_v20, %v10568_v40  ;;  %1942 = vperm.xlu0 %9983, %v219_v31  }
  0xf6   :  { %v10970_v58 = vadd.f32 %v3316_v36, %v3279_v17  ;;  %v10972_v23 = vadd.f32 %v5615_v57, %v5578_v35  ;;  %v3317_v11 = vmul.f32 %v10858_v4, %v633_v61  ;;  %v5616_v28 = vmul.f32 %v10863_v12, %v633_v61 }
  0xf7   :  { %v10979_v15 = vadd.f32 %v7301_v50, %v7264_v56  ;;  %v1057_v13 = vsel %vm993_vm8, %v961_v34, %v1025_v0  ;;  %v7302_v36 = vmul.f32 %v10866_v47, %v633_v61  ;;  %v523_v57 = vmul.f32 %v10545_v26, %v462_v38 }
  0xf8   :  { %15549 = vst [vmem:[#allocation60_spill] sm:$0xff] %v10970_v58  ;;  %15550 = vst [vmem:[#allocation61_spill] sm:$0xff] %v10972_v23  ;;  %9389 = vmatprep.mubr.msk.f32.mxu0 %vm1075_vm0, %v1057_v13  ;;  %v3280_v17 = vmul.f32 %v10873_v51, %v462_v38  ;;  %v5579_v35 = vmul.f32 %v10876_v9, %v462_v38  ;;  %v719_v20 = vadd.f32 %v687_v43, %v522_v63  ;;  %v637_v56 = vpop.permute.xlu0 %636  ;;  %v200_v23 = vld [vmem:[%s10658_s11 + $0x18] sm:$0xff]  ;;  %vm2779_vm8 = vcmask 1045509  }
  0xf9   :  { %15551 = vst [vmem:[#allocation62_spill] sm:$0xff] %v10979_v15  ;;  %v7265_v50 = vmul.f32 %v10884_v48, %v462_v38  ;;  %1947 = vperm.xlu1 %9982, %v220_v54   ;;  %v962_v34 = vadd.f32 %v930_v22, %v718_v44  ;;  %v720_v0 = vadd.f32 %v688_v59, %v523_v57  ;;  %v467_v61 = vpop.permute.xlu1 %466  ;;  %v199_v38 = vld [vmem:[%s10658_s11 + $0x10] sm:$0xff] }
  0xfa   :  { %v10989_v15 = vadd.f32 %v3317_v11, %v3280_v17  ;;  %v10991_v13 = vadd.f32 %v5616_v28, %v5579_v35  ;;  %v931_v58 = vadd.f32 %v10957_v14, %v10570_v41  ;;  %v3318_v63 = vmul.f32 %v10858_v4, %v637_v56  ;;  %1842 = vperm.xlu0 %9983, %v199_v38  }
  0xfb   :  { %v10996_v53 = vadd.f32 %v7302_v36, %v7265_v50  ;;  %vm994_vm9 = vcmp.gt.f32.partialorder %v962_v34, 0.0  ;;  %v1026_v43 = vmul.f32 0.2, %v962_v34  ;;  %v689_v31 = vmul.f32 %v10542_v25, %v637_v56 }
  0xfc   :  { %15552 = vst [vmem:[#allocation63_spill] sm:$0xff] %v10989_v15  ;;  %15553 = vst [vmem:[#allocation64_spill] sm:$0xff] %v10991_v13  ;;  %v5617_v44 = vmul.f32 %v10863_v12, %v637_v56  ;;  %v7303_v59 = vmul.f32 %v10866_v47, %v637_v56  ;;  %v3281_v54 = vmul.f32 %v10873_v51, %v467_v61  ;;  %v641_v57 = vpop.permute.xlu0 %640  ;;  %v204_v15 = vld [vmem:[%s10658_s11 + $0x38] sm:$0xff] }
  0xfd   :  { %15554 = vst [vmem:[#allocation65_spill] sm:$0xff] %v10996_v53  ;;  %v1058_v22 = vsel %vm994_vm9, %v962_v34, %v1026_v43  ;;  %v5580_v11 = vmul.f32 %v10876_v9, %v467_v61  ;;  %v7266_v28 = vmul.f32 %v10884_v48, %v467_v61  ;;  %1847 = vperm.xlu1 %9982, %v200_v23   ;;  %v472_v56 = vpop.permute.xlu1 %471  ;;  %v222_v53 = vld [vmem:[%s10658_s11 + $0xc8] sm:$0xff]  ;;  %v221_v23 = vld [vmem:[%s10658_s11 + $0xc0] sm:$0xff]  ;;  %vm2782_vm9 = vcmask 1046534  }
  0xfe   :  { %v963_v36 = vadd.f32 %v931_v58, %v719_v20  ;;  %9390 = vmatmul.mubr.msk.f32.gmra.mrb[22].mxu0 %vm1075_vm0, %v1058_v22  ;;  %v524_v17 = vmul.f32 %v10545_v26, %v467_v61  ;;  %v11008_v35 = vadd.f32 %v3318_v63, %v3281_v54  ;;  %v690_v50 = vmul.f32 %v10542_v25, %v641_v57 }
  0xff   :  { %v11012_v34 = vadd.f32 %v5617_v44, %v5580_v11  ;;  %v11014_v43 = vadd.f32 %v7303_v59, %v7266_v28  ;;  %v3319_v58 = vmul.f32 %v10858_v4, %v641_v57  ;;  %v5618_v20 = vmul.f32 %v10863_v12, %v641_v57  ;;  %1952 = vperm.xlu0 %9983, %v221_v23  }
 0x100   :  { %15555 = vst [vmem:[#allocation66_spill] sm:$0xff] %v11008_v35  ;;  %vm995_vm10 = vcmp.gt.f32.partialorder %v963_v36, 0.0  ;;  %v1027_v13 = vmul.f32 0.2, %v963_v36  ;;  %v7304_v61 = vmul.f32 %v10866_v47, %v641_v57  ;;  %v525_v63 = vmul.f32 %v10545_v26, %v472_v56  ;;  %v645_v54 = vpop.permute.xlu0 %644 }
 0x101   :  { %15556 = vst [vmem:[#allocation67_spill] sm:$0xff] %v11012_v34  ;;  %15557 = vst [vmem:[#allocation68_spill] sm:$0xff] %v11014_v43  ;;  %v3282_v25 = vmul.f32 %v10873_v51, %v472_v56  ;;  %v5581_v44 = vmul.f32 %v10876_v9, %v472_v56  ;;  %v7267_v59 = vmul.f32 %v10884_v48, %v472_v56  ;;  %1957 = vperm.xlu1 %9982, %v222_v53   ;;  %v477_v26 = vpop.permute.xlu1 %476  ;;  %v201_v56 = vld [vmem:[%s10658_s11 + $0x20] sm:$0xff]  ;;  %v223_v34 = vld [vmem:[%s10658_s11 + $0xd0] sm:$0xff] }
 0x102   :  { %v1059_v38 = vsel %vm995_vm10, %v963_v36, %v1027_v13  ;;  %v721_v22 = vadd.f32 %v689_v31, %v524_v17  ;;  %v722_v11 = vadd.f32 %v690_v50, %v525_v63  ;;  %v932_v28 = vadd.f32 %v10957_v14, %v10568_v40  ;;  %v202_v13 = vld [vmem:[%s10658_s11 + $0x28] sm:$0xff]  ;;  %v11037_v17 = vld [vmem:[%s10519_s3 + $0x1] ss:$0 sm:$0xff] }
 0x103   :  { %9392 = vmatprep.mubr.msk.f32.mxu0 %vm1075_vm0, %v1059_v38  ;;  %v11028_v36 = vadd.f32 %v3319_v58, %v3282_v25  ;;  %v11030_v57 = vadd.f32 %v5618_v20, %v5581_v44  ;;  %v11032_v43 = vadd.f32 %v7304_v61, %v7267_v59  ;;  %v3320_v53 = vmul.f32 %v10858_v4, %v645_v54  ;;  %v11052_v44 = vld [vmem:[%s10519_s3] ss:$0 sm:$0xff]  ;;  %s15224_s3 = sld [smem:[%s15256_s0 + %s10420_s30]]  }
 0x104   :  { %v964_v31 = vadd.f32 %v932_v28, %v720_v0  ;;  %v691_v50 = vmul.f32 %v11037_v17, %v645_v54  ;;  %v5619_v14 = vmul.f32 %v10863_v12, %v645_v54  ;;  %v7305_v23 = vmul.f32 %v10866_v47, %v645_v54  ;;  %v649_v38 = vpop.permute.xlu0 %648  ;;  %1852 = vperm.xlu0 %9983, %v201_v56  }
 0x105   :  { %15558 = vst [vmem:[#allocation69_spill] sm:$0xff] %v11028_v36  ;;  %15559 = vst [vmem:[#allocation70_spill] sm:$0xff] %v11030_v57  ;;  %v3283_v58 = vmul.f32 %v10873_v51, %v477_v26  ;;  %v5582_v20 = vmul.f32 %v10876_v9, %v477_v26  ;;  %v7268_v61 = vmul.f32 %v10884_v48, %v477_v26  ;;  %1857 = vperm.xlu1 %9982, %v202_v13   ;;  %v482_v28 = vpop.permute.xlu1 %481  ;;  %vm15470_vm10 = vcmask 1047559  }
 0x106   :  { %15560 = vst [vmem:[#allocation71_spill] sm:$0xff] %v11032_v43  ;;  %v15561_v0 = vcombine.high %v10830_v24, %v10830_v24  ;;  %vm996_vm11 = vcmp.gt.f32.partialorder %v964_v31, 0.0  ;;  %v1028_v25 = vmul.f32 0.2, %v964_v31  ;;  %v526_v59 = vmul.f32 %v11052_v44, %v477_v26 }
 0x107   :  { %v692_v54 = vmul.f32 %v11037_v17, %v649_v38  ;;  %v11056_v43 = vadd.f32 %v3320_v53, %v3283_v58  ;;  %v11058_v13 = vadd.f32 %v5619_v14, %v5582_v20  ;;  %v11060_v57 = vadd.f32 %v7305_v23, %v7268_v61 }
 0x108   :  { %v11049_v63 = vrot.slane %v15561_v0, %v10502_v1  ;;  %v224_v0 = vld [vmem:[%s10658_s11 + $0xd8] sm:$0xff]  ;;  %v1060_v36 = vsel %vm996_vm11, %v964_v31, %v1028_v25  ;;  %v3321_v35 = vmul.f32 %v10858_v4, %v649_v38  ;;  %v5620_v26 = vmul.f32 %v10863_v12, %v649_v38  ;;  %v653_v20 = vpop.permute.xlu0 %652  ;;  %1962 = vperm.xlu0 %9983, %v223_v34  }
 0x109   :  { %15562 = vst [vmem:[#allocation72_spill] sm:$0xff] %v11056_v43  ;;  %15563 = vst [vmem:[#allocation73_spill] sm:$0xff] %v11058_v13  ;;  %v7306_v56 = vmul.f32 %v10866_v47, %v649_v38  ;;  %9393 = vmatmul.mubr.msk.f32.gmra.mrb[24].mxu0 %vm1075_vm0, %v1060_v36  ;;  %v527_v14 = vmul.f32 %v11052_v44, %v482_v28  ;;  %v3284_v23 = vmul.f32 %v10873_v51, %v482_v28  ;;  %v487_v38 = vpop.permute.xlu1 %486 }
 0x10a   :  { %15564 = vst [vmem:[#allocation74_spill] sm:$0xff] %v11060_v57  ;;  %v882_v24 = vrot.slane %v11049_v63, %v10556_v33  ;;  %v5583_v58 = vmul.f32 %v10876_v9, %v482_v28  ;;  %v723_v31 = vadd.f32 %v691_v50, %v526_v59  ;;  %v7269_v61 = vmul.f32 %v10884_v48, %v482_v28 }
 0x10b   :  { %1967 = vperm.xlu1 %9982, %v224_v0   ;;  %v11076_v57 = vadd.f32 %v3321_v35, %v3284_v23  ;;  %v693_v43 = vmul.f32 %v11037_v17, %v653_v20  ;;  %v3322_v50 = vmul.f32 %v10858_v4, %v653_v20  ;;  %v5621_v59 = vmul.f32 %v10863_v12, %v653_v20 }
 0x10c   :  { %v933_v53 = vadd.f32 %v882_v24, %v10570_v41  ;;  %v934_v25 = vadd.f32 %v882_v24, %v10568_v40  ;;  %v11078_v13 = vadd.f32 %v5620_v26, %v5583_v58  ;;  %v11083_v37 = vadd.f32 %v7306_v56, %v7269_v61  ;;  %1862 = vperm.xlu0 %9983, %v203_v6   ;;  %v225_v6 = vld [vmem:[%s10658_s11 + $0xe0] sm:$0xff] }
 0x10d   :  { %15565 = vst [vmem:[#allocation75_spill] sm:$0xff] %v11076_v57  ;;  %v724_v28 = vadd.f32 %v692_v54, %v527_v14  ;;  %v7307_v35 = vmul.f32 %v10866_v47, %v653_v20  ;;  %v3285_v0 = vmul.f32 %v10873_v51, %v487_v38  ;;  %v5584_v26 = vmul.f32 %v10876_v9, %v487_v38  ;;  %v226_v14 = vld [vmem:[%s10658_s11 + $0xe8] sm:$0xff] }
 0x10e   :  { %v965_v36 = vadd.f32 %v933_v53, %v721_v22  ;;  %15566 = vst [vmem:[#allocation76_spill] sm:$0xff] %v11078_v13  ;;  %15567 = vst [vmem:[#allocation77_spill] sm:$0xff] %v11083_v37  ;;  %v966_v1 = vadd.f32 %v934_v25, %v722_v11  ;;  %v657_v22 = vpop.permute.xlu0 %656  ;;  %v492_v11 = vpop.permute.xlu1 %491  ;;  %v528_v53 = vmul.f32 %v11052_v44, %v487_v38 }
 0x10f   :  { %1867 = vperm.xlu1 %9982, %v204_v15   ;;  %v7270_v23 = vmul.f32 %v10884_v48, %v487_v38  ;;  %v824_v54 = vcombine.high %v10852_v52, %v10852_v52  ;;  %v11096_v20 = vadd.f32 %v3322_v50, %v3285_v0  ;;  %v11098_v61 = vadd.f32 %v5621_v59, %v5584_v26 }
 0x110   :  { %vm997_vm12 = vcmp.gt.f32.partialorder %v965_v36, 0.0  ;;  %v1029_v34 = vmul.f32 0.2, %v965_v36  ;;  %vm998_vm13 = vcmp.gt.f32.partialorder %v966_v1, 0.0  ;;  %v1030_v24 = vmul.f32 0.2, %v966_v1  ;;  %1972 = vperm.xlu0 %9983, %v225_v6  }
 0x111   :  { %15568 = vst [vmem:[#allocation78_spill] sm:$0xff] %v11096_v20  ;;  %15569 = vst [vmem:[#allocation79_spill] sm:$0xff] %v11098_v61  ;;  %v694_v15 = vmul.f32 %v11037_v17, %v657_v22  ;;  %v11103_v25 = vadd.f32 %v7307_v35, %v7270_v23  ;;  %v886_v38 = vrot.slane %v824_v54, %v10556_v33 }
 0x112   :  { %v1061_v56 = vsel %vm997_vm12, %v965_v36, %v1029_v34  ;;  %v1062_v58 = vsel %vm998_vm13, %v966_v1, %v1030_v24  ;;  %v3323_v52 = vmul.f32 %v10858_v4, %v657_v22  ;;  %v5622_v36 = vmul.f32 %v10863_v12, %v657_v22  ;;  %v11112_v34 = vpop.permute.xlu1 %1439  ;;  %v228_v12 = vld [vmem:[%s10658_s11 + $0xf8] sm:$0xff] }
 0x113   :  { %9395 = vmatprep.mubr.msk.f32.mxu0 %vm1075_vm0, %v1061_v56  ;;  %15570 = vst [vmem:[#allocation80_spill] sm:$0xff] %v11103_v25  ;;  %v7308_v1 = vmul.f32 %v10866_v47, %v657_v22  ;;  %v529_v50 = vmul.f32 %v11052_v44, %v492_v11  ;;  %v3286_v59 = vmul.f32 %v10873_v51, %v492_v11  ;;  %15571 = vst [vmem:[#allocation81_spill] sm:$0xff] %v11112_v34  ;;  %v11120_v22 = vpop.permute.xlu0 %1444 }
 0x114   :  { %9396 = vmatmul.mubr.msk.f32.gmra.mrb[26].mxu0 %vm1075_vm0, %v1062_v58  ;;  %v5585_v17 = vmul.f32 %v10876_v9, %v492_v11  ;;  %1977 = vperm.xlu1 %9982, %v226_v14   ;;  %v935_v35 = vadd.f32 %v886_v38, %v10570_v41  ;;  %v7271_v24 = vmul.f32 %v10884_v48, %v492_v11  ;;  %v227_v9 = vld [vmem:[%s10658_s11 + $0xf0] sm:$0xff] }
 0x115   :  { %v936_v4 = vadd.f32 %v886_v38, %v10568_v40  ;;  %v826_v47 = vcombine.high %v11049_v63, %v11049_v63  ;;  %15572 = vst [vmem:[#allocation82_spill] sm:$0xff] %v11120_v22  ;;  %v11122_v44 = vadd.f32 %v3323_v52, %v3286_v59  ;;  %v725_v11 = vadd.f32 %v693_v43, %v528_v53 }
 0x116   :  { %v11124_v51 = vadd.f32 %v5622_v36, %v5585_v17  ;;  %v967_v0 = vadd.f32 %v935_v35, %v723_v31  ;;  %v11127_v26 = vadd.f32 %v7308_v1, %v7271_v24  ;;  %v726_v23 = vadd.f32 %v694_v15, %v529_v50  ;;  %v11130_v54 = vpop.permute.xlu1 %1449  ;;  %1982 = vperm.xlu0 %9983, %v227_v9  }
 0x117   :  { %15573 = vst [vmem:[#allocation83_spill] sm:$0xff] %v11122_v44  ;;  %v968_v56 = vadd.f32 %v936_v4, %v724_v28  ;;  %v890_v48 = vrot.slane %v826_v47, %v10556_v33  ;;  %15576 = vst [vmem:[#allocation86_spill] sm:$0xff] %v11130_v54  ;;  %v11132_v58 = vpop.permute.xlu0 %1459 }
 0x118   :  { %15574 = vst [vmem:[#allocation84_spill] sm:$0xff] %v11124_v51  ;;  %15575 = vst [vmem:[#allocation85_spill] sm:$0xff] %v11127_v26  ;;  %1987 = vperm.xlu1 %9982, %v228_v12   ;;  %vm999_vm14 = vcmp.gt.f32.partialorder %v967_v0, 0.0  ;;  %v1031_v63 = vmul.f32 0.2, %v967_v0 }
 0x119   :  { %vm1000_vm15 = vcmp.gt.f32.partialorder %v968_v56, 0.0  ;;  %v1032_v14 = vmul.f32 0.2, %v968_v56  ;;  %15577 = vst [vmem:[#allocation87_spill] sm:$0xff] %v11132_v58  ;;  %v937_v6 = vadd.f32 %v890_v48, %v10570_v41  ;;  %v938_v31 = vadd.f32 %v890_v48, %v10568_v40 }
 0x11a   :  { %v1063_v38 = vsel %vm999_vm14, %v967_v0, %v1031_v63  ;;  %v11137_v15 = vpop.permute.xlu1 %1454 }
 0x11b   :  { %v1064_v28 = vsel %vm1000_vm15, %v968_v56, %v1032_v14  ;;  %9398 = vmatprep.mubr.msk.f32.mxu0 %vm1075_vm0, %v1063_v38  ;;  %v969_v43 = vadd.f32 %v937_v6, %v725_v11  ;;  %v970_v53 = vadd.f32 %v938_v31, %v726_v23  ;;  %15578 = vst [vmem:[#allocation88_spill] sm:$0xff] %v11137_v15  ;;  %v11140_v52 = vpop.permute.xlu0 %1469 }
 0x11c   :  { %9399 = vmatmul.mubr.msk.f32.gmra.mrb[28].mxu0 %vm1075_vm0, %v1064_v28  ;;  %15579 = vst [vmem:[#allocation89_spill] sm:$0xff] %v11140_v52 }
 0x11d   :  { %vm1001_vm1 = vcmp.gt.f32.partialorder %v969_v43, 0.0  ;;  %v1033_v36 = vmul.f32 0.2, %v969_v43  ;;  %vm1002_vm2 = vcmp.gt.f32.partialorder %v970_v53, 0.0  ;;  %v1034_v1 = vmul.f32 0.2, %v970_v53 }
 0x11e   :  { %v11142_v17 = vpop.permute.xlu1 %1464 }
 0x11f   :  { %v1065_v50 = vsel %vm1001_vm1, %v969_v43, %v1033_v36  ;;  %v1066_v59 = vsel %vm1002_vm2, %v970_v53, %v1034_v1  ;;  %15580 = vst [vmem:[#allocation90_spill] sm:$0xff] %v11142_v17  ;;  %v11145_v35 = vpop.permute.xlu0 %1479 }
 0x120   :  { %9401 = vmatprep.mubr.msk.f32.mxu0 %vm1075_vm0, %v1065_v50  ;;  %15581 = vst [vmem:[#allocation91_spill] sm:$0xff] %v11145_v35  ;;  %v261_v50 = vld [vmem:[%s8797_s27] sm:$0xff] }
 0x121   :  { %9402 = vmatmul.mubr.msk.f32.gmra.mrb[30].mxu0 %vm1075_vm0, %v1066_v59  ;;  %v262_v59 = vld [vmem:[%s8797_s27 + $0x8] sm:$0xff]  ;;  %s10419_s27 = smov 33  }
 0x122   :  { %v11148_v24 = vpop.permute.xlu1 %1474  ;;  %v11191_v26 = vpack.c.bf16 %v262_v59, %v261_v50  ;;  %s15216_s29 = sld [smem:[%s15256_s0 + %s10419_s27]]  }
 0x123   :  { %15582 = vst [vmem:[#allocation92_spill] sm:$0xff] %v11148_v24  ;;  %v11150_v4 = vpop.permute.xlu0 %1489 }
 0x124   :  { %15583 = vst [vmem:[#allocation93_spill] sm:$0xff] %v11150_v4  ;;  %15602 = vst [vmem:[#allocation112_spill] sm:$0xff] %v11191_v26  ;;  %9807 = vmatprep.subr.bf16.mxu0 %v11191_v26  ;;  %9934 = vmatprep.subr.bf16.mxu1 %v11191_v26 }
 0x125   :  { %9809 = vmatpush3.bf16.msra.mxu0 %v11191_v26  ;;  %9935 = vmatpush3.bf16.msra.mxu1 %v11191_v26 }
 0x126   :  { %v11152_v12 = vpop.permute.xlu1 %1484 }
 0x127   :  { %15584 = vst [vmem:[#allocation94_spill] sm:$0xff] %v11152_v12  ;;  %v11154_v47 = vpop.permute.xlu0 %1499 }
 0x128   :  { %15585 = vst [vmem:[#allocation95_spill] sm:$0xff] %v11154_v47 }
 0x12a   :  { %v11156_v9 = vpop.permute.xlu1 %1494 }
 0x12b   :  { %15586 = vst [vmem:[#allocation96_spill] sm:$0xff] %v11156_v9  ;;  %v11160_v56 = vpop.permute.xlu0 %1399 }
 0x12c   :  { %15588 = vst [vmem:[#allocation98_spill] sm:$0xff] %v11160_v56 }
 0x12e   :  { %v11158_v0 = vpop.permute.xlu1 %1504 }
 0x12f   :  { %15587 = vst [vmem:[#allocation97_spill] sm:$0xff] %v11158_v0  ;;  %v11164_v11 = vpop.permute.xlu0 %1509 }
 0x130   :  { %15590 = vst [vmem:[#allocation100_spill] sm:$0xff] %v11164_v11 }
 0x132   :  { %v11162_v48 = vpop.permute.xlu1 %1404 }
 0x133   :  { %15589 = vst [vmem:[#allocation99_spill] sm:$0xff] %v11162_v48  ;;  %v11168_v63 = vpop.permute.xlu0 %1409 }
 0x134   :  { %15592 = vst [vmem:[#allocation102_spill] sm:$0xff] %v11168_v63 }
 0x136   :  { %v11166_v23 = vpop.permute.xlu1 %1514 }
 0x137   :  { %15591 = vst [vmem:[#allocation101_spill] sm:$0xff] %v11166_v23  ;;  %v11172_v6 = vpop.permute.xlu0 %1519 }
 0x138   :  { %15594 = vst [vmem:[#allocation104_spill] sm:$0xff] %v11172_v6 }
 0x13a   :  { %v11170_v14 = vpop.permute.xlu1 %1414 }
 0x13b   :  { %15593 = vst [vmem:[#allocation103_spill] sm:$0xff] %v11170_v14  ;;  %v11176_v38 = vpop.permute.xlu0 %1872 }
 0x13c   :  { %15596 = vst [vmem:[#allocation106_spill] sm:$0xff] %v11176_v38 }
 0x13e   :  { %v11174_v31 = vpop.permute.xlu1 %1524 }
 0x13f   :  { %15595 = vst [vmem:[#allocation105_spill] sm:$0xff] %v11174_v31  ;;  %v11180_v43 = vpop.permute.xlu0 %1419 }
 0x140   :  { %15598 = vst [vmem:[#allocation108_spill] sm:$0xff] %v11180_v43 }
 0x142   :  { %v11178_v28 = vpop.permute.xlu1 %1877 }
 0x143   :  { %15597 = vst [vmem:[#allocation107_spill] sm:$0xff] %v11178_v28  ;;  %v11187_v36 = vpop.permute.xlu0 %1529 }
 0x144   :  { %15600 = vst [vmem:[#allocation110_spill] sm:$0xff] %v11187_v36 }
 0x146   :  { %v11182_v53 = vpop.permute.xlu1 %1424 }
 0x147   :  { %15599 = vst [vmem:[#allocation109_spill] sm:$0xff] %v11182_v53  ;;  %v11193_v25 = vpop.permute.xlu0 %1882 }
 0x148   :  { %15603 = vst [vmem:[#allocation113_spill] sm:$0xff] %v11193_v25 }
 0x14a   :  { %v11189_v1 = vpop.permute.xlu1 %1534 }
 0x14b   :  { %15601 = vst [vmem:[#allocation111_spill] sm:$0xff] %v11189_v1  ;;  %v11201_v51 = vpop.permute.xlu0 %1429 }
 0x14c   :  { %15605 = vst [vmem:[#allocation115_spill] sm:$0xff] %v11201_v51 }
 0x14e   :  { %v11197_v37 = vpop.permute.xlu1 %1887 }
 0x14f   :  { %15604 = vst [vmem:[#allocation114_spill] sm:$0xff] %v11197_v37  ;;  %v11205_v13 = vpop.permute.xlu0 %1539 }
 0x150   :  { %15607 = vst [vmem:[#allocation117_spill] sm:$0xff] %v11205_v13 }
 0x152   :  { %v11203_v61 = vpop.permute.xlu1 %1434 }
 0x153   :  { %15606 = vst [vmem:[#allocation116_spill] sm:$0xff] %v11203_v61  ;;  %v11209_v59 = vpop.permute.xlu0 %1892 }
 0x154   :  { %15609 = vst [vmem:[#allocation119_spill] sm:$0xff] %v11209_v59 }
 0x156   :  { %v11207_v50 = vpop.permute.xlu1 %1544 }
 0x157   :  { %15608 = vst [vmem:[#allocation118_spill] sm:$0xff] %v11207_v50  ;;  %v11213_v20 = vpop.permute.xlu0 %1549 }
 0x158   :  { %15611 = vst [vmem:[#allocation121_spill] sm:$0xff] %v11213_v20 }
 0x15a   :  { %v11211_v44 = vpop.permute.xlu1 %1897 }
 0x15b   :  { %15610 = vst [vmem:[#allocation120_spill] sm:$0xff] %v11211_v44 }
 0x15e   :  { %v11215_v57 = vpop.permute.xlu1 %1554  ;;  %v11217_v55 = vpop.permute.xlu0 %1902 }
 0x15f   :  { %15612 = vst [vmem:[#allocation122_spill] sm:$0xff] %v11215_v57  ;;  %15613 = vst [vmem:[#allocation123_spill] sm:$0xff] %v11217_v55 }
 0x162   :  { %v11219_v45 = vpop.permute.xlu1 %1907  ;;  %v11221_v29 = vpop.permute.xlu0 %1912 }
 0x163   :  { %15614 = vst [vmem:[#allocation124_spill] sm:$0xff] %v11219_v45  ;;  %15615 = vst [vmem:[#allocation125_spill] sm:$0xff] %v11221_v29 }
 0x166   :  { %v11223_v21 = vpop.permute.xlu1 %1917 }
 0x167   :  { %15616 = vst [vmem:[#allocation126_spill] sm:$0xff] %v11223_v21  ;;  %v11229_v62 = vpop.permute.xlu0 %1922 }
 0x168   :  { %15617 = vst [vmem:[#allocation127_spill] sm:$0xff] %v11229_v62 }
 0x16a   :  { %v11232_v27 = vpop.permute.xlu1 %1927 }
 0x16b   :  { %15618 = vst [vmem:[#allocation128_spill] sm:$0xff] %v11232_v27  ;;  %v11237_v5 = vpop.permute.xlu0 %1932 }
 0x16c   :  { %15619 = vst [vmem:[#allocation129_spill] sm:$0xff] %v11237_v5 }
 0x16f   :  { %v11239_v8 = vpop.permute.xlu1 %1937 }
 0x170   :  { %15620 = vst [vmem:[#allocation130_spill] sm:$0xff] %v11239_v8 }
 0x173   :  { %v11247_v20 = vpop.permute.xlu1 %1837 }
 0x174   :  { %v9358_v3 = vpop.f32.mrb[0].mxu0  ;;  %15622 = vst [vmem:[#allocation132_spill] sm:$0xff] %v11247_v20 }
 0x175   :  { %v1558_v60 = vadd.f32 %v9358_v3, %v11162_v48  ;;  %v1238_v46 = vpop.f32.mrb[1].mxu0 }
 0x176   :  { %v1557_v39 = vadd.f32 %v11160_v56, %v1238_v46 }
 0x177   :  { %v1591_v30 = vsel %vm15441_vm3, %v1558_v60, -inf }
 0x178   :  { %v1590_v19 = vsel %vm15441_vm3, %v1557_v39, -inf }
 0x179   :  { %v1592_v49 = vmax.f32 %v1590_v19, %v1591_v30 }
 0x17a   :  { %v9361_v7 = vpop.f32.mrb[2].mxu0 }
 0x17b   :  { %v1560_v42 = vadd.f32 %v9361_v7, %v11170_v14  ;;  %v1248_v32 = vpop.f32.mrb[3].mxu0  ;;  %v1593_v16 = vrot.slane %v1592_v49, 4 }
 0x17c   :  { %v1559_v18 = vadd.f32 %v11168_v63, %v1248_v32 }
 0x17d   :  { %v1600_v3 = vsel %vm15441_vm3, %v1560_v42, -inf  ;;  %v1594_v56 = vmax.f32 %v1592_v49, %v1593_v16  ;;  %v11245_v49 = vpop.permute.xlu0 %1832 }
 0x17e   :  { %v1599_v46 = vsel %vm15441_vm3, %v1559_v18, -inf  ;;  %15621 = vst [vmem:[#allocation131_spill] sm:$0xff] %v11245_v49 }
 0x17f   :  { %v1601_v48 = vmax.f32 %v1599_v46, %v1600_v3  ;;  %v1595_v2 = vrot.slane %v1594_v56, 2 }
 0x181   :  { %v1602_v10 = vrot.slane %v1601_v48, 4  ;;  %v1596_v7 = vmax.f32 %v1594_v56, %v1595_v2 }
 0x182   :  { %v9364_v19 = vpop.f32.mrb[4].mxu0 }
 0x183   :  { %v1603_v30 = vmax.f32 %v1601_v48, %v1602_v10  ;;  %v1562_v14 = vadd.f32 %v9364_v19, %v11182_v53  ;;  %v1258_v33 = vpop.f32.mrb[5].mxu0  ;;  %v1597_v63 = vrot.slane %v1596_v7, 1 }
 0x184   :  { %v1561_v32 = vadd.f32 %v11180_v43, %v1258_v33 }
 0x185   :  { %v1604_v26 = vrot.slane %v1603_v30, 2  ;;  %v1609_v41 = vsel %vm15441_vm3, %v1562_v14, -inf  ;;  %v1598_v3 = vmax.f32 %v1596_v7, %v1597_v63  ;;  %v11257_v63 = vpop.permute.xlu1 %1947 }
 0x186   :  { %v1608_v16 = vsel %vm15441_vm3, %v1561_v32, -inf  ;;  %15624 = vst [vmem:[#allocation134_spill] sm:$0xff] %v11257_v63 }
 0x187   :  { %v1605_v46 = vmax.f32 %v1603_v30, %v1604_v26  ;;  %v1610_v40 = vmax.f32 %v1608_v16, %v1609_v41  ;;  %v1734_v2 = vsub.f32 %v1557_v39, %v1598_v3  ;;  %v1735_v10 = vsub.f32 %v1558_v60, %v1598_v3  ;;  %v11255_v41 = vpop.permute.xlu0 %1942 }
 0x188   :  { %15623 = vst [vmem:[#allocation133_spill] sm:$0xff] %v11255_v41 }
 0x189   :  { %v1606_v56 = vrot.slane %v1605_v46, 1  ;;  %v1611_v48 = vrot.slane %v1610_v40, 4  ;;  %v1766_v53 = vmul.f32 1.442695, %v1734_v2  ;;  %v1768_v33 = vmul.f32 1.442695, %v1735_v10 }
 0x18b   :  { %v9367_v19 = vpop.f32.mrb[6].mxu0  ;;  %v1607_v43 = vmax.f32 %v1605_v46, %v1606_v56  ;;  %v1612_v57 = vmax.f32 %v1610_v40, %v1611_v48  ;;  %9984 = vpow2.f32 %v1766_v53  ;;  %v11273_v48 = vpop.permute.xlu0 %1842 }
 0x18c   :  { %v1268_v13 = vpop.f32.mrb[7].mxu0  ;;  %v11250_v50 = vadd.f32 %v9367_v19, %v11203_v61  ;;  %9986 = vpow2.f32 %v1768_v33  ;;  %15625 = vst [vmem:[#allocation135_spill] sm:$0xff] %v11273_v48 }
 0x18d   :  { %v11253_v8 = vadd.f32 %v11201_v51, %v1268_v13  ;;  %v1736_v26 = vsub.f32 %v1559_v18, %v1607_v43  ;;  %v1737_v39 = vsub.f32 %v1560_v42, %v1607_v43  ;;  %v1613_v60 = vrot.slane %v1612_v57, 2 }
 0x18e   :  { %v1618_v7 = vsel %vm15441_vm3, %v11250_v50, -inf }
 0x18f   :  { %v1617_v40 = vsel %vm15441_vm3, %v11253_v8, -inf  ;;  %v1770_v16 = vmul.f32 1.442695, %v1736_v26  ;;  %v1772_v3 = vmul.f32 1.442695, %v1737_v39  ;;  %v1614_v13 = vmax.f32 %v1612_v57, %v1613_v60  ;;  %v11275_v26 = vpop.permute.xlu1 %1847 }
 0x190   :  { %v1619_v46 = vmax.f32 %v1617_v40, %v1618_v7  ;;  %15626 = vst [vmem:[#allocation136_spill] sm:$0xff] %v11275_v26 }
 0x191   :  { %9988 = vpow2.f32 %v1770_v16  ;;  %v1615_v42 = vrot.slane %v1614_v13, 1 }
 0x192   :  { %v9370_v30 = vpop.f32.mrb[8].mxu0  ;;  %v1620_v43 = vrot.slane %v1619_v46, 4  ;;  %9990 = vpow2.f32 %v1772_v3 }
 0x193   :  { %v1278_v53 = vpop.f32.mrb[9].mxu0  ;;  %v11264_v2 = vadd.f32 %v9370_v30, %v11120_v22  ;;  %v1616_v57 = vmax.f32 %v1614_v13, %v1615_v42 }
 0x194   :  { %v11267_v18 = vadd.f32 %v11112_v34, %v1278_v53  ;;  %v1621_v19 = vmax.f32 %v1619_v46, %v1620_v43  ;;  %v11283_v46 = vpop.permute.xlu0 %1952  ;;  %v11288_v43 = vpop.permute.xlu1 %1957 }
 0x195   :  { %v1627_v10 = vsel %vm15441_vm3, %v11264_v2, -inf  ;;  %v1738_v39 = vsub.f32 %v1561_v32, %v1616_v57  ;;  %v1739_v60 = vsub.f32 %v1562_v14, %v1616_v57  ;;  %v9985_v30 = vpop.eup %9984  ;;  %15627 = vst [vmem:[#allocation137_spill] sm:$0xff] %v11283_v46  ;;  %15628 = vst [vmem:[#allocation138_spill] sm:$0xff] %v11288_v43 }
 0x196   :  { %v1626_v56 = vsel %vm15441_vm3, %v11267_v18, -inf  ;;  %v1622_v7 = vrot.slane %v1621_v19, 2  ;;  %v9987_v51 = vpop.eup %9986  ;;  %v11281_v13 = vmul.f32 %v9985_v30, %v11245_v49 }
 0x197   :  { %v1628_v33 = vmax.f32 %v1626_v56, %v1627_v10  ;;  %v1774_v16 = vmul.f32 1.442695, %v1738_v39  ;;  %v1776_v3 = vmul.f32 1.442695, %v1739_v60 }
 0x198   :  { %v1623_v53 = vmax.f32 %v1621_v19, %v1622_v7  ;;  %v2022_v39 = vsel %vm15441_vm3, %v11281_v13, 0.0 }
 0x199   :  { %v1629_v40 = vrot.slane %v1628_v33, 4  ;;  %9992 = vpow2.f32 %v1774_v16 }
 0x19a   :  { %v9373_v22 = vpop.f32.mrb[10].mxu0  ;;  %v1624_v14 = vrot.slane %v1623_v53, 1  ;;  %9994 = vpow2.f32 %v1776_v3 }
 0x19b   :  { %v1630_v34 = vmax.f32 %v1628_v33, %v1629_v40  ;;  %v11278_v61 = vadd.f32 %v9373_v22, %v11137_v15  ;;  %v1288_v63 = vpop.f32.mrb[11].mxu0  ;;  %v11293_v22 = vmul.f32 %v9987_v51, %v11247_v20  ;;  %v9989_v56 = vpop.eup %9988 }
 0x19c   :  { %v11286_v42 = vadd.f32 %v11130_v54, %v1288_v63  ;;  %v1625_v57 = vmax.f32 %v1623_v53, %v1624_v14  ;;  %v9991_v63 = vpop.eup %9990  ;;  %v11300_v60 = vmul.f32 %v9989_v56, %v11273_v48  ;;  %v11315_v20 = vpop.permute.xlu1 %1857 }
 0x19d   :  { %v1631_v32 = vrot.slane %v1630_v34, 2  ;;  %v1636_v10 = vsel %vm15441_vm3, %v11278_v61, -inf  ;;  %v2023_v40 = vsel %vm15441_vm3, %v11293_v22, 0.0  ;;  %v11305_v51 = vmul.f32 %v9991_v63, %v11275_v26  ;;  %15630 = vst [vmem:[#allocation140_spill] sm:$0xff] %v11315_v20 }
 0x19e   :  { %v1635_v33 = vsel %vm15441_vm3, %v11286_v42, -inf  ;;  %v1740_v30 = vsub.f32 %v11253_v8, %v1625_v57  ;;  %v2031_v3 = vsel %vm15441_vm3, %v11300_v60, 0.0  ;;  %v2024_v14 = vadd.f32 %v2023_v40, %v2022_v39 }
 0x19f   :  { %v1632_v19 = vmax.f32 %v1630_v34, %v1631_v32  ;;  %v1637_v7 = vmax.f32 %v1635_v33, %v1636_v10  ;;  %v1741_v34 = vsub.f32 %v11250_v50, %v1625_v57  ;;  %v2032_v32 = vsel %vm15441_vm3, %v11305_v51, 0.0  ;;  %v11313_v10 = vpop.permute.xlu0 %1852 }
 0x1a0   :  { %15629 = vst [vmem:[#allocation139_spill] sm:$0xff] %v11313_v10  ;;  %v1778_v56 = vmul.f32 1.442695, %v1740_v30  ;;  %v2033_v26 = vadd.f32 %v2032_v32, %v2031_v3  ;;  %v2025_v49 = vrot.slane %v2024_v14, 4 }
 0x1a1   :  { %v1633_v16 = vrot.slane %v1632_v19, 1  ;;  %v1638_v53 = vrot.slane %v1637_v7, 4  ;;  %v1780_v33 = vmul.f32 1.442695, %v1741_v34 }
 0x1a2   :  { %v9376_v63 = vpop.f32.mrb[12].mxu0  ;;  %9996 = vpow2.f32 %v1778_v56  ;;  %v2034_v30 = vrot.slane %v2033_v26, 4  ;;  %v2026_v32 = vadd.f32 %v2025_v49, %v2024_v14  ;;  %v11339_v49 = vpop.permute.xlu1 %1967 }
 0x1a3   :  { %v1634_v48 = vmax.f32 %v1632_v19, %v1633_v16  ;;  %v1639_v8 = vmax.f32 %v1637_v7, %v1638_v53  ;;  %v11318_v50 = vadd.f32 %v9376_v63, %v11142_v17  ;;  %v1298_v57 = vpop.f32.mrb[13].mxu0  ;;  %9998 = vpow2.f32 %v1780_v33  ;;  %v9993_v7 = vpop.eup %9992  ;;  %15632 = vst [vmem:[#allocation142_spill] sm:$0xff] %v11339_v49 }
 0x1a4   :  { %v11323_v54 = vadd.f32 %v11132_v58, %v1298_v57  ;;  %v9995_v56 = vpop.eup %9994  ;;  %v11335_v57 = vpop.permute.xlu0 %1962 }
 0x1a5   :  { %v1742_v39 = vsub.f32 %v11267_v18, %v1634_v48  ;;  %v1743_v40 = vsub.f32 %v11264_v2, %v1634_v48  ;;  %v1640_v19 = vrot.slane %v1639_v8, 2  ;;  %v1645_v34 = vsel %vm15441_vm3, %v11318_v50, -inf  ;;  %15631 = vst [vmem:[#allocation141_spill] sm:$0xff] %v11335_v57 }
 0x1a6   :  { %v1644_v53 = vsel %vm15441_vm3, %v11323_v54, -inf  ;;  %v2035_v18 = vadd.f32 %v2034_v30, %v2033_v26  ;;  %v11330_v2 = vmul.f32 %v9993_v7, %v11313_v10  ;;  %v11333_v33 = vmul.f32 %v9995_v56, %v11315_v20 }
 0x1a7   :  { %v1782_v16 = vmul.f32 1.442695, %v1742_v39  ;;  %v1784_v3 = vmul.f32 1.442695, %v1743_v40  ;;  %v1641_v48 = vmax.f32 %v1639_v8, %v1640_v19  ;;  %v1646_v63 = vmax.f32 %v1644_v53, %v1645_v34 }
 0x1a8   :  { %v2027_v39 = vrot.slane %v2026_v32, 2  ;;  %v2036_v40 = vrot.slane %v2035_v18, 2  ;;  %v2040_v17 = vsel %vm15441_vm3, %v11330_v2, 0.0  ;;  %v2041_v8 = vsel %vm15441_vm3, %v11333_v33, 0.0 }
 0x1a9   :  { %10000 = vpow2.f32 %v1782_v16  ;;  %v1642_v26 = vrot.slane %v1641_v48, 1  ;;  %v1647_v30 = vrot.slane %v1646_v63, 4  ;;  %v2042_v16 = vadd.f32 %v2041_v8, %v2040_v17 }
 0x1aa   :  { %10002 = vpow2.f32 %v1784_v3  ;;  %v2037_v7 = vadd.f32 %v2036_v40, %v2035_v18  ;;  %v2028_v56 = vadd.f32 %v2027_v39, %v2026_v32  ;;  %v11357_v40 = vpop.permute.xlu1 %1867 }
 0x1ab   :  { %v9379_v58 = vpop.f32.mrb[14].mxu0  ;;  %v1643_v53 = vmax.f32 %v1641_v48, %v1642_v26  ;;  %v1648_v20 = vmax.f32 %v1646_v63, %v1647_v30  ;;  %v2043_v49 = vrot.slane %v2042_v16, 4  ;;  %15634 = vst [vmem:[#allocation144_spill] sm:$0xff] %v11357_v40 }
 0x1ac   :  { %v1308_v14 = vpop.f32.mrb[15].mxu0  ;;  %v11344_v19 = vadd.f32 %v9379_v58, %v11148_v24  ;;  %v2038_v15 = vrot.slane %v2037_v7, 1  ;;  %v9997_v24 = vpop.eup %9996  ;;  %v2029_v48 = vrot.slane %v2028_v56, 1 }
 0x1ad   :  { %v11347_v34 = vadd.f32 %v11140_v52, %v1308_v14  ;;  %v1744_v57 = vsub.f32 %v11286_v42, %v1643_v53  ;;  %v1745_v58 = vsub.f32 %v11278_v61, %v1643_v53  ;;  %v11355_v14 = vpop.permute.xlu0 %1862  ;;  %v1649_v18 = vrot.slane %v1648_v20, 2  ;;  %v9999_v32 = vpop.eup %9998 }
 0x1ae   :  { %v1654_v3 = vsel %vm15441_vm3, %v11344_v19, -inf  ;;  %15633 = vst [vmem:[#allocation143_spill] sm:$0xff] %v11355_v14  ;;  %v2039_v63 = vadd.f32 %v2038_v15, %v2037_v7  ;;  %v2044_v39 = vadd.f32 %v2043_v49, %v2042_v16  ;;  %v11360_v26 = vmul.f32 %v9997_v24, %v11355_v14 }
 0x1af   :  { %v1653_v10 = vsel %vm15441_vm3, %v11347_v34, -inf  ;;  %v1786_v8 = vmul.f32 1.442695, %v1744_v57  ;;  %v11363_v30 = vmul.f32 %v9999_v32, %v11357_v40  ;;  %v1788_v42 = vmul.f32 1.442695, %v1745_v58 }
 0x1b0   :  { %v1655_v17 = vmax.f32 %v1653_v10, %v1654_v3  ;;  %v1650_v61 = vmax.f32 %v1648_v20, %v1649_v18  ;;  %v2167_v43 = vmax.f32 %v2039_v63, 1e-20  ;;  %v2045_v46 = vrot.slane %v2044_v39, 2 }
 0x1b1   :  { %v2049_v10 = vsel %vm15441_vm3, %v11360_v26, 0.0  ;;  %10004 = vpow2.f32 %v1786_v8  ;;  %v2050_v24 = vsel %vm15441_vm3, %v11363_v30, 0.0  ;;  %v2030_v8 = vadd.f32 %v2029_v48, %v2028_v56 }
 0x1b2   :  { %v1656_v53 = vrot.slane %v1655_v17, 4  ;;  %v9382_v52 = vpop.f32.mrb[16].mxu0  ;;  %10006 = vpow2.f32 %v1788_v42  ;;  %v1651_v57 = vrot.slane %v1650_v61, 1  ;;  %v2046_v3 = vadd.f32 %v2045_v46, %v2044_v39 }
 0x1b3   :  { %v1318_v15 = vpop.f32.mrb[17].mxu0  ;;  %v10001_v49 = vpop.eup %10000  ;;  %10008 = vrcp.f32 %v2167_v43  ;;  %v2051_v20 = vadd.f32 %v2050_v24, %v2049_v10  ;;  %v11370_v58 = vadd.f32 %v9382_v52, %v11152_v12  ;;  %v2166_v56 = vmax.f32 %v2030_v8, 1e-20 }
 0x1b4   :  { %v1657_v7 = vmax.f32 %v1655_v17, %v1656_v53  ;;  %v10003_v16 = vpop.eup %10002  ;;  %v1652_v18 = vmax.f32 %v1650_v61, %v1651_v57  ;;  %v11373_v63 = vadd.f32 %v11145_v35, %v1318_v15  ;;  %v2047_v40 = vrot.slane %v2046_v3, 1 }
 0x1b5   :  { %v2052_v14 = vrot.slane %v2051_v20, 4  ;;  %v1663_v42 = vsel %vm15441_vm3, %v11370_v58, -inf  ;;  %v11378_v17 = vmul.f32 %v10001_v49, %v11176_v38  ;;  %v11385_v57 = vmul.f32 %v10003_v16, %v11178_v28 }
 0x1b6   :  { %v1658_v32 = vrot.slane %v1657_v7, 2  ;;  %v1746_v46 = vsub.f32 %v11323_v54, %v1652_v18  ;;  %v1747_v43 = vsub.f32 %v11318_v50, %v1652_v18  ;;  %v1662_v39 = vsel %vm15441_vm3, %v11373_v63, -inf }
 0x1b7   :  { %v2048_v61 = vadd.f32 %v2047_v40, %v2046_v3  ;;  %v2053_v53 = vadd.f32 %v2052_v14, %v2051_v20  ;;  %v1664_v10 = vmax.f32 %v1662_v39, %v1663_v42  ;;  %10010 = vrcp.f32 %v2166_v56 }
 0x1b8   :  { %v1659_v52 = vmax.f32 %v1657_v7, %v1658_v32  ;;  %v1790_v48 = vmul.f32 1.442695, %v1746_v46  ;;  %v1792_v15 = vmul.f32 1.442695, %v1747_v43  ;;  %v2058_v14 = vsel %vm15441_vm3, %v11378_v17, 0.0 }
 0x1b9   :  { %v2168_v49 = vmax.f32 %v2048_v61, 1e-20  ;;  %v2054_v38 = vrot.slane %v2053_v53, 2  ;;  %v1665_v35 = vrot.slane %v1664_v10, 4 }
 0x1ba   :  { %v1660_v24 = vrot.slane %v1659_v52, 1  ;;  %10012 = vpow2.f32 %v1790_v48 }
 0x1bb   :  { %v10005_v3 = vpop.eup %10004  ;;  %10014 = vrcp.f32 %v2168_v49  ;;  %v2055_v20 = vadd.f32 %v2054_v38, %v2053_v53  ;;  %v1666_v18 = vmax.f32 %v1664_v10, %v1665_v35  ;;  %v2059_v35 = vsel %vm15441_vm3, %v11385_v57, 0.0 }
 0x1bc   :  { %v1661_v50 = vmax.f32 %v1659_v52, %v1660_v24  ;;  %v10007_v32 = vpop.eup %10006  ;;  %10016 = vpow2.f32 %v1792_v15  ;;  %v2060_v15 = vadd.f32 %v2059_v35, %v2058_v14  ;;  %v11406_v49 = vmul.f32 %v10005_v3, %v11193_v25 }
 0x1bd   :  { %v9385_v54 = vpop.f32.mrb[18].mxu0  ;;  %v10009_v43 = vpop.eup %10008  ;;  %v2056_v52 = vrot.slane %v2055_v20, 1  ;;  %v1667_v39 = vrot.slane %v1666_v18, 2 }
 0x1be   :  { %v11388_v7 = vadd.f32 %v9385_v54, %v11156_v9  ;;  %v1328_v40 = vpop.f32.mrb[19].mxu0  ;;  %v1748_v8 = vsub.f32 %v11347_v34, %v1661_v50  ;;  %v1749_v42 = vsub.f32 %v11344_v19, %v1661_v50  ;;  %v2200_v56 = vmul.f32 %v10009_v43, %v11300_v60 }
 0x1bf   :  { %v11393_v16 = vadd.f32 %v11150_v4, %v1328_v40  ;;  %v2057_v34 = vadd.f32 %v2056_v52, %v2055_v20  ;;  %v1668_v48 = vmax.f32 %v1666_v18, %v1667_v39  ;;  %v2201_v19 = vmul.f32 %v10009_v43, %v11305_v51 }
 0x1c0   :  { %v1672_v46 = vsel %vm15441_vm3, %v11388_v7, -inf  ;;  %v1794_v38 = vmul.f32 1.442695, %v1748_v8  ;;  %v1796_v53 = vmul.f32 1.442695, %v1749_v42  ;;  %v11409_v54 = vmul.f32 %v10007_v32, %v11197_v37 }
 0x1c1   :  { %v1671_v61 = vsel %vm15441_vm3, %v11393_v16, -inf  ;;  %v2169_v50 = vmax.f32 %v2057_v34, 1e-20  ;;  %v1669_v40 = vrot.slane %v1668_v48, 1  ;;  %v2061_v42 = vrot.slane %v2060_v15, 4  ;;  %v10011_v3 = vpop.eup %10010 }
 0x1c2   :  { %v1673_v10 = vmax.f32 %v1671_v61, %v1672_v46  ;;  %10018 = vpow2.f32 %v1794_v38  ;;  %v2067_v51 = vsel %vm15441_vm3, %v11406_v49, 0.0  ;;  %v2068_v14 = vsel %vm15441_vm3, %v11409_v54, 0.0 }
 0x1c3   :  { %10020 = vpow2.f32 %v1796_v53  ;;  %v1670_v18 = vmax.f32 %v1668_v48, %v1669_v40  ;;  %v2062_v43 = vadd.f32 %v2061_v42, %v2060_v15  ;;  %v2198_v39 = vmul.f32 %v10011_v3, %v11281_v13 }
 0x1c4   :  { %v1674_v24 = vrot.slane %v1673_v10, 4  ;;  %10022 = vrcp.f32 %v2169_v50  ;;  %v10013_v52 = vpop.eup %10012  ;;  %v2199_v61 = vmul.f32 %v10011_v3, %v11293_v22 }
 0x1c5   :  { %v10015_v53 = vpop.eup %10014  ;;  %v1751_v34 = vsub.f32 %v11370_v58, %v1670_v18  ;;  %9408 = vmatprep.mubr.msk.f32.mxu0 %vm15441_vm3, %v2198_v39 }
 0x1c6   :  { %v9388_v8 = vpop.f32.mrb[20].mxu0  ;;  %v1675_v46 = vmax.f32 %v1673_v10, %v1674_v24  ;;  %v1750_v10 = vsub.f32 %v11373_v63, %v1670_v18  ;;  %v2063_v24 = vrot.slane %v2062_v43, 2  ;;  %v10017_v50 = vpop.eup %10016  ;;  %v2202_v22 = vmul.f32 %v10015_v53, %v11330_v2  ;;  %9409 = vmatmul.mubr.msk.f32.vlgmr.msra.gmra.mrb[32].mxu0 %vm15441_vm3, %v2199_v61 }
 0x1c7   :  { %v11412_v60 = vadd.f32 %v9388_v8, %v11158_v0  ;;  %v1338_v20 = vpop.f32.mrb[21].mxu0  ;;  %v2203_v40 = vmul.f32 %v10015_v53, %v11333_v33  ;;  %v1800_v42 = vmul.f32 1.442695, %v1751_v34  ;;  %9411 = vmatprep.mubr.msk.f32.mxu0 %vm15441_vm3, %v2200_v56  ;;  %v11435_v18 = vmul.f32 %v10013_v52, %v11209_v59 }
 0x1c8   :  { %v11419_v32 = vadd.f32 %v11154_v47, %v1338_v20  ;;  %v1676_v35 = vrot.slane %v1675_v46, 2  ;;  %v1798_v8 = vmul.f32 1.442695, %v1750_v10  ;;  %v2064_v63 = vadd.f32 %v2063_v24, %v2062_v43 }
 0x1c9   :  { %v1681_v38 = vsel %vm15441_vm3, %v11412_v60, -inf  ;;  %v2069_v20 = vadd.f32 %v2068_v14, %v2067_v51  ;;  %v2076_v51 = vsel %vm15441_vm3, %v11435_v18, 0.0 }
 0x1ca   :  { %v1680_v48 = vsel %vm15441_vm3, %v11419_v32, -inf  ;;  %v1677_v15 = vmax.f32 %v1675_v46, %v1676_v35  ;;  %v11438_v46 = vmul.f32 %v10017_v50, %v11211_v44  ;;  %10024 = vpow2.f32 %v1798_v8  ;;  %9412 = vmatmul.mubr.msk.f32.gmra.mrb[34].mxu0 %vm15441_vm3, %v2201_v19 }
 0x1cb   :  { %v1682_v13 = vmax.f32 %v1680_v48, %v1681_v38  ;;  %v2065_v2 = vrot.slane %v2064_v63, 1  ;;  %v2070_v39 = vrot.slane %v2069_v20, 4  ;;  %10026 = vpow2.f32 %v1800_v42  ;;  %9414 = vmatprep.mubr.msk.f32.mxu0 %vm15441_vm3, %v2202_v22 }
 0x1cc   :  { %v1678_v58 = vrot.slane %v1677_v15, 1  ;;  %v10019_v33 = vpop.eup %10018  ;;  %v2077_v61 = vsel %vm15441_vm3, %v11438_v46, 0.0 }
 0x1cd   :  { %v1683_v3 = vrot.slane %v1682_v13, 4  ;;  %v10021_v14 = vpop.eup %10020  ;;  %v2066_v43 = vadd.f32 %v2065_v2, %v2064_v63  ;;  %v2071_v52 = vadd.f32 %v2070_v39, %v2069_v20  ;;  %v11446_v53 = vmul.f32 %v10019_v33, %v11217_v55 }
 0x1ce   :  { %v1679_v35 = vmax.f32 %v1677_v15, %v1678_v58  ;;  %v10023_v50 = vpop.eup %10022  ;;  %v2078_v42 = vadd.f32 %v2077_v61, %v2076_v51  ;;  %9415 = vmatmul.mubr.msk.f32.gmra.mrb[36].mxu0 %vm15441_vm3, %v2203_v40 }
 0x1cf   :  { %v1684_v38 = vmax.f32 %v1682_v13, %v1683_v3  ;;  %v2170_v13 = vmax.f32 %v2066_v43, 1e-20  ;;  %v2072_v8 = vrot.slane %v2071_v52, 2  ;;  %v2204_v22 = vmul.f32 %v10023_v50, %v11360_v26 }
 0x1d0   :  { %v1752_v10 = vsub.f32 %v11393_v16, %v1679_v35  ;;  %v1753_v34 = vsub.f32 %v11388_v7, %v1679_v35  ;;  %v2205_v3 = vmul.f32 %v10023_v50, %v11363_v30  ;;  %v2079_v35 = vrot.slane %v2078_v42, 4 }
 0x1d1   :  { %v9391_v56 = vpop.f32.mrb[22].mxu0  ;;  %v1685_v48 = vrot.slane %v1684_v38, 2  ;;  %10028 = vrcp.f32 %v2170_v13  ;;  %v2073_v33 = vadd.f32 %v2072_v8, %v2071_v52  ;;  %9417 = vmatprep.mubr.msk.f32.mxu0 %vm15441_vm3, %v2204_v22  ;;  %v2085_v26 = vsel %vm15441_vm3, %v11446_v53, 0.0 }
 0x1d2   :  { %v11452_v24 = vadd.f32 %v9391_v56, %v11166_v23  ;;  %v1348_v19 = vpop.f32.mrb[23].mxu0  ;;  %v1802_v63 = vmul.f32 1.442695, %v1752_v10  ;;  %v1804_v20 = vmul.f32 1.442695, %v1753_v34  ;;  %9418 = vmatmul.mubr.msk.f32.gmra.mrb[38].mxu0 %vm15441_vm3, %v2205_v3  ;;  %v2080_v30 = vadd.f32 %v2079_v35, %v2078_v42 }
 0x1d3   :  { %v11455_v15 = vadd.f32 %v11164_v11, %v1348_v19  ;;  %v1686_v58 = vmax.f32 %v1684_v38, %v1685_v48  ;;  %v11466_v38 = vmul.f32 %v10021_v14, %v11219_v45  ;;  %v2074_v56 = vrot.slane %v2073_v33, 1 }
 0x1d4   :  { %v1690_v7 = vsel %vm15441_vm3, %v11452_v24, -inf  ;;  %10030 = vpow2.f32 %v1802_v63  ;;  %v10025_v43 = vpop.eup %10024  ;;  %v2081_v19 = vrot.slane %v2080_v30, 2 }
 0x1d5   :  { %v1689_v16 = vsel %vm15441_vm3, %v11455_v15, -inf  ;;  %v1687_v2 = vrot.slane %v1686_v58, 1  ;;  %10032 = vpow2.f32 %v1804_v20  ;;  %v2086_v52 = vsel %vm15441_vm3, %v11466_v38, 0.0  ;;  %v10027_v61 = vpop.eup %10026 }
 0x1d6   :  { %v1691_v39 = vmax.f32 %v1689_v16, %v1690_v7  ;;  %v2075_v48 = vadd.f32 %v2074_v56, %v2073_v33  ;;  %v2087_v50 = vadd.f32 %v2086_v52, %v2085_v26  ;;  %v11476_v13 = vmul.f32 %v10025_v43, %v11221_v29 }
 0x1d7   :  { %v1688_v40 = vmax.f32 %v1686_v58, %v1687_v2  ;;  %v11479_v42 = vmul.f32 %v10027_v61, %v11223_v21 }
 0x1d8   :  { %v1692_v51 = vrot.slane %v1691_v39, 4  ;;  %v2171_v16 = vmax.f32 %v2075_v48, 1e-20  ;;  %v2088_v22 = vrot.slane %v2087_v50, 4 }
 0x1d9   :  { %v1754_v10 = vsub.f32 %v11419_v32, %v1688_v40  ;;  %v1755_v34 = vsub.f32 %v11412_v60, %v1688_v40  ;;  %v2082_v60 = vadd.f32 %v2081_v19, %v2080_v30  ;;  %v2095_v19 = vsel %vm15441_vm3, %v11479_v42, 0.0 }
 0x1da   :  { %v1693_v14 = vmax.f32 %v1691_v39, %v1692_v51  ;;  %v2094_v39 = vsel %vm15441_vm3, %v11476_v13, 0.0  ;;  %v2089_v51 = vadd.f32 %v2088_v22, %v2087_v50 }
 0x1db   :  { %v1806_v8 = vmul.f32 1.442695, %v1754_v10  ;;  %v1808_v63 = vmul.f32 1.442695, %v1755_v34  ;;  %v10029_v33 = vpop.eup %10028  ;;  %v2083_v40 = vrot.slane %v2082_v60, 1 }
 0x1dc   :  { %v1694_v20 = vrot.slane %v1693_v14, 2  ;;  %v9394_v58 = vpop.f32.mrb[24].mxu0  ;;  %v2206_v30 = vmul.f32 %v10029_v33, %v11378_v17  ;;  %v2207_v52 = vmul.f32 %v10029_v33, %v11385_v57 }
 0x1dd   :  { %v11482_v7 = vadd.f32 %v9394_v58, %v11174_v31  ;;  %v1358_v32 = vpop.f32.mrb[25].mxu0  ;;  %10034 = vpow2.f32 %v1806_v8  ;;  %v2084_v34 = vadd.f32 %v2083_v40, %v2082_v60 }
 0x1de   :  { %v1695_v3 = vmax.f32 %v1693_v14, %v1694_v20  ;;  %v11485_v2 = vadd.f32 %v11172_v6, %v1358_v32  ;;  %10036 = vpow2.f32 %v1808_v63  ;;  %v10031_v56 = vpop.eup %10030  ;;  %v2090_v14 = vrot.slane %v2089_v51, 2  ;;  %9420 = vmatprep.mubr.msk.f32.mxu1 %vm15441_vm3, %v2206_v30  ;;  %v15692_v6 = vld [vmem:[#allocation46_spill] sm:$0xff] }
 0x1df   :  { %v1699_v35 = vsel %vm15441_vm3, %v11482_v7, -inf  ;;  %v10033_v61 = vpop.eup %10032  ;;  %10038 = vrcp.f32 %v2171_v16  ;;  %v11499_v50 = vmul.f32 %v10031_v56, %v11229_v62  ;;  %9421 = vmatmul.mubr.msk.f32.vlgmr.msra.gmra.mrb[0].mxu1 %vm15441_vm3, %v2207_v52  ;;  %v2172_v57 = vmax.f32 %v2084_v34, 1e-20 }
 0x1e0   :  { %v1696_v26 = vrot.slane %v1695_v3, 1  ;;  %v1698_v43 = vsel %vm15441_vm3, %v11485_v2, -inf  ;;  %v11502_v8 = vmul.f32 %v10033_v61, %v11232_v27  ;;  %v2091_v63 = vadd.f32 %v2090_v14, %v2089_v51 }
 0x1e1   :  { %v1700_v10 = vmax.f32 %v1698_v43, %v1699_v35  ;;  %v2096_v20 = vadd.f32 %v2095_v19, %v2094_v39  ;;  %v2103_v60 = vsel %vm15441_vm3, %v11499_v50, 0.0  ;;  %10040 = vrcp.f32 %v2172_v57 }
 0x1e2   :  { %v1697_v48 = vmax.f32 %v1695_v3, %v1696_v26  ;;  %v2104_v22 = vsel %vm15441_vm3, %v11502_v8, 0.0  ;;  %v2092_v40 = vrot.slane %v2091_v63, 1 }
 0x1e3   :  { %v1701_v17 = vrot.slane %v1700_v10, 4  ;;  %v2105_v30 = vadd.f32 %v2104_v22, %v2103_v60 }
 0x1e4   :  { %v1756_v58 = vsub.f32 %v11455_v15, %v1697_v48  ;;  %v1757_v32 = vsub.f32 %v11452_v24, %v1697_v48  ;;  %v2097_v24 = vrot.slane %v2096_v20, 4  ;;  %v2093_v43 = vadd.f32 %v2092_v40, %v2091_v63 }
 0x1e5   :  { %v1702_v3 = vmax.f32 %v1700_v10, %v1701_v17  ;;  %v2106_v57 = vrot.slane %v2105_v30, 4 }
 0x1e6   :  { %v1810_v51 = vmul.f32 1.442695, %v1756_v58  ;;  %v1812_v39 = vmul.f32 1.442695, %v1757_v32  ;;  %v2098_v10 = vadd.f32 %v2097_v24, %v2096_v20  ;;  %v2173_v19 = vmax.f32 %v2093_v43, 1e-20 }
 0x1e7   :  { %v9397_v16 = vpop.f32.mrb[26].mxu0  ;;  %v1703_v56 = vrot.slane %v1702_v3, 2  ;;  %v10035_v52 = vpop.eup %10034  ;;  %v15635_v32 = vld [vmem:[#allocation130_spill] sm:$0xff] }
 0x1e8   :  { %v11512_v33 = vadd.f32 %v9397_v16, %v11189_v1  ;;  %v1368_v35 = vpop.f32.mrb[27].mxu0  ;;  %10042 = vpow2.f32 %v1810_v51  ;;  %v10037_v34 = vpop.eup %10036  ;;  %v2099_v17 = vrot.slane %v2098_v10, 2  ;;  %v11522_v58 = vmul.f32 %v10035_v52, %v11237_v5  ;;  %v15690_v1 = vld [vmem:[#allocation44_spill] sm:$0xff] }
 0x1e9   :  { %v11515_v15 = vadd.f32 %v11187_v36, %v1368_v35  ;;  %10044 = vpow2.f32 %v1812_v39  ;;  %v1704_v14 = vmax.f32 %v1702_v3, %v1703_v56  ;;  %v11525_v16 = vmul.f32 %v10037_v34, %v15635_v32  ;;  %v10039_v63 = vpop.eup %10038  ;;  %v15689_v36 = vld [vmem:[#allocation4_spill] sm:$0xff] }
 0x1ea   :  { %v1708_v26 = vsel %vm15441_vm3, %v11512_v33, -inf  ;;  %10046 = vrcp.f32 %v2173_v19  ;;  %v2208_v35 = vmul.f32 %v10039_v63, %v11406_v49  ;;  %v2209_v20 = vmul.f32 %v10039_v63, %v11409_v54  ;;  %v15637_v19 = vld [vmem:[#allocation117_spill] sm:$0xff] }
 0x1eb   :  { %v1707_v61 = vsel %vm15441_vm3, %v11515_v15, -inf  ;;  %v1705_v60 = vrot.slane %v1704_v14, 1  ;;  %v2100_v40 = vadd.f32 %v2099_v17, %v2098_v10  ;;  %v2107_v3 = vadd.f32 %v2106_v57, %v2105_v30  ;;  %v10041_v34 = vpop.eup %10040  ;;  %v15636_v10 = vld [vmem:[#allocation118_spill] sm:$0xff] }
 0x1ec   :  { %v1709_v48 = vmax.f32 %v1707_v61, %v1708_v26  ;;  %v2112_v24 = vsel %vm15441_vm3, %v11522_v58, 0.0  ;;  %v2113_v56 = vsel %vm15441_vm3, %v11525_v16, 0.0  ;;  %9423 = vmatprep.mubr.msk.f32.mxu1 %vm15441_vm3, %v2208_v35  ;;  %v2210_v57 = vmul.f32 %v10041_v34, %v11435_v18 }
 0x1ed   :  { %v1706_v51 = vmax.f32 %v1704_v14, %v1705_v60  ;;  %v2101_v43 = vrot.slane %v2100_v40, 1  ;;  %v2108_v52 = vrot.slane %v2107_v3, 2  ;;  %v2114_v61 = vadd.f32 %v2113_v56, %v2112_v24  ;;  %9424 = vmatmul.mubr.msk.f32.gmra.mrb[2].mxu1 %vm15441_vm3, %v2209_v20 }
 0x1ee   :  { %v1710_v22 = vrot.slane %v1709_v48, 4  ;;  %v2211_v63 = vmul.f32 %v10041_v34, %v11438_v46  ;;  %9426 = vmatprep.mubr.msk.f32.mxu1 %vm15441_vm3, %v2210_v57 }
 0x1ef   :  { %v9400_v26 = vpop.f32.mrb[28].mxu0  ;;  %v1758_v49 = vsub.f32 %v11485_v2, %v1706_v51  ;;  %v1759_v54 = vsub.f32 %v11482_v7, %v1706_v51  ;;  %v2102_v60 = vadd.f32 %v2101_v43, %v2100_v40  ;;  %v2109_v56 = vadd.f32 %v2108_v52, %v2107_v3  ;;  %v15638_v43 = vld [vmem:[#allocation122_spill] sm:$0xff] }
 0x1f0   :  { %v1711_v39 = vmax.f32 %v1709_v48, %v1710_v22  ;;  %v11538_v14 = vadd.f32 %v9400_v26, %v15636_v10  ;;  %v1378_v48 = vpop.f32.mrb[29].mxu0  ;;  %v2115_v26 = vrot.slane %v2114_v61, 4 }
 0x1f1   :  { %v11541_v17 = vadd.f32 %v15637_v19, %v1378_v48  ;;  %v1814_v22 = vmul.f32 1.442695, %v1758_v49  ;;  %v1816_v35 = vmul.f32 1.442695, %v1759_v54  ;;  %v2174_v24 = vmax.f32 %v2102_v60, 1e-20  ;;  %9427 = vmatmul.mubr.msk.f32.gmra.mrb[4].mxu1 %vm15441_vm3, %v2211_v63 }
 0x1f2   :  { %v1712_v30 = vrot.slane %v1711_v39, 2  ;;  %v1717_v7 = vsel %vm15441_vm3, %v11538_v14, -inf  ;;  %v10043_v51 = vpop.eup %10042  ;;  %v2110_v54 = vrot.slane %v2109_v56, 1  ;;  %v15639_v60 = vld [vmem:[#allocation121_spill] sm:$0xff]  ;;  %v15688_v19 = vld [vmem:[#allocation43_spill] sm:$0xff] }
 0x1f3   :  { %v1716_v20 = vsel %vm15441_vm3, %v11541_v17, -inf  ;;  %v10045_v48 = vpop.eup %10044  ;;  %10048 = vpow2.f32 %v1814_v22 }
 0x1f4   :  { %v1713_v2 = vmax.f32 %v1711_v39, %v1712_v30  ;;  %v1718_v46 = vmax.f32 %v1716_v20, %v1717_v7  ;;  %v9403_v40 = vpop.f32.mrb[30].mxu0  ;;  %v11552_v39 = vmul.f32 %v10043_v51, %v11255_v41  ;;  %10050 = vpow2.f32 %v1816_v35  ;;  %v10047_v57 = vpop.eup %10046 }
 0x1f5   :  { %v11555_v34 = vadd.f32 %v9403_v40, %v15638_v43  ;;  %v1388_v49 = vpop.f32.mrb[31].mxu0  ;;  %v2116_v30 = vadd.f32 %v2115_v26, %v2114_v61  ;;  %10052 = vrcp.f32 %v2174_v24  ;;  %v2212_v7 = vmul.f32 %v10047_v57, %v11446_v53 }
 0x1f6   :  { %v1714_v18 = vrot.slane %v1713_v2, 1  ;;  %v1719_v52 = vrot.slane %v1718_v46, 4  ;;  %v11558_v22 = vadd.f32 %v15639_v60, %v1388_v49  ;;  %v2213_v35 = vmul.f32 %v10047_v57, %v11466_v38  ;;  %v15640_v49 = vld [vmem:[#allocation134_spill] sm:$0xff] }
 0x1f7   :  { %v1726_v63 = vsel %vm15441_vm3, %v11555_v34, -inf  ;;  %v2111_v51 = vadd.f32 %v2110_v54, %v2109_v56  ;;  %9429 = vmatprep.mubr.msk.f32.mxu1 %vm15441_vm3, %v2212_v7  ;;  %v11570_v41 = vmul.f32 %v10045_v48, %v15640_v49  ;;  %v15642_v49 = vld [vmem:[#allocation138_spill] sm:$0xff] }
 0x1f8   :  { %v1715_v3 = vmax.f32 %v1713_v2, %v1714_v18  ;;  %v1720_v61 = vmax.f32 %v1718_v46, %v1719_v52  ;;  %v1725_v2 = vsel %vm15441_vm3, %v11558_v22, -inf  ;;  %v2117_v18 = vrot.slane %v2116_v30, 2  ;;  %9430 = vmatmul.mubr.msk.f32.gmra.mrb[6].mxu1 %vm15441_vm3, %v2213_v35  ;;  %v15687_v60 = vld [vmem:[#allocation42_spill] sm:$0xff] }
 0x1f9   :  { %v1727_v26 = vmax.f32 %v1725_v2, %v1726_v63  ;;  %v2175_v24 = vmax.f32 %v2111_v51, 1e-20  ;;  %v2122_v46 = vsel %vm15441_vm3, %v11570_v41, 0.0 }
 0x1fa   :  { %v1760_v20 = vsub.f32 %v11515_v15, %v1715_v3  ;;  %v1761_v40 = vsub.f32 %v11512_v33, %v1715_v3  ;;  %v1721_v38 = vrot.slane %v1720_v61, 2  ;;  %v2121_v33 = vsel %vm15441_vm3, %v11552_v39, 0.0 }
 0x1fb   :  { %v1728_v15 = vrot.slane %v1727_v26, 4  ;;  %10054 = vrcp.f32 %v2175_v24  ;;  %v2118_v56 = vadd.f32 %v2117_v18, %v2116_v30  ;;  %v2123_v57 = vadd.f32 %v2122_v46, %v2121_v33 }
 0x1fc   :  { %v1818_v53 = vmul.f32 1.442695, %v1760_v20  ;;  %v1820_v32 = vmul.f32 1.442695, %v1761_v40  ;;  %v1722_v54 = vmax.f32 %v1720_v61, %v1721_v38  ;;  %v15641_v40 = vld [vmem:[#allocation137_spill] sm:$0xff] }
 0x1fd   :  { %v1729_v48 = vmax.f32 %v1727_v26, %v1728_v15  ;;  %v2119_v3 = vrot.slane %v2118_v56, 1  ;;  %v10049_v52 = vpop.eup %10048  ;;  %v2124_v7 = vrot.slane %v2123_v57, 4 }
 0x1fe   :  { %10056 = vpow2.f32 %v1818_v53  ;;  %v1723_v63 = vrot.slane %v1722_v54, 1  ;;  %v10051_v51 = vpop.eup %10050  ;;  %v11578_v2 = vmul.f32 %v10049_v52, %v15641_v40 }
 0x1ff   :  { %10058 = vpow2.f32 %v1820_v32  ;;  %v1730_v35 = vrot.slane %v1729_v48, 2  ;;  %v2120_v20 = vadd.f32 %v2119_v3, %v2118_v56  ;;  %v10053_v24 = vpop.eup %10052  ;;  %v2125_v18 = vadd.f32 %v2124_v7, %v2123_v57 }
 0x200   :  { %v1724_v30 = vmax.f32 %v1722_v54, %v1723_v63  ;;  %v11581_v5 = vmul.f32 %v10051_v51, %v15642_v49  ;;  %v2214_v32 = vmul.f32 %v10053_v24, %v11476_v13  ;;  %v2215_v26 = vmul.f32 %v10053_v24, %v11479_v42  ;;  %v3165_v49 = vld [vmem:[%s11743_s9 + $0x28] sm:$0xff] }
 0x201   :  { %v1731_v61 = vmax.f32 %v1729_v48, %v1730_v35  ;;  %v2176_v53 = vmax.f32 %v2120_v20, 1e-20  ;;  %v2126_v15 = vrot.slane %v2125_v18, 2  ;;  %v2130_v56 = vsel %vm15441_vm3, %v11578_v2, 0.0 }
 0x202   :  { %v1762_v38 = vsub.f32 %v11541_v17, %v1724_v30  ;;  %v1763_v33 = vsub.f32 %v11538_v14, %v1724_v30  ;;  %9432 = vmatprep.mubr.msk.f32.mxu1 %vm15441_vm3, %v2214_v32  ;;  %v2131_v54 = vsel %vm15441_vm3, %v11581_v5, 0.0 }
 0x203   :  { %v1732_v46 = vrot.slane %v1731_v61, 1  ;;  %10060 = vrcp.f32 %v2176_v53  ;;  %9433 = vmatmul.mubr.msk.f32.gmra.mrb[8].mxu1 %vm15441_vm3, %v2215_v26  ;;  %v2127_v42 = vadd.f32 %v2126_v15, %v2125_v18  ;;  %v2132_v48 = vadd.f32 %v2131_v54, %v2130_v56  ;;  %v15643_v18 = vld [vmem:[#allocation141_spill] sm:$0xff] }
 0x204   :  { %v1822_v57 = vmul.f32 1.442695, %v1762_v38  ;;  %v1824_v13 = vmul.f32 1.442695, %v1763_v33 }
 0x205   :  { %v10055_v17 = vpop.eup %10054  ;;  %v1733_v3 = vmax.f32 %v1731_v61, %v1732_v46  ;;  %v2128_v7 = vrot.slane %v2127_v42, 1  ;;  %v2133_v24 = vrot.slane %v2132_v48, 4  ;;  %v15644_v61 = vld [vmem:[#allocation142_spill] sm:$0xff] }
 0x206   :  { %10062 = vpow2.f32 %v1822_v57  ;;  %v2216_v52 = vmul.f32 %v10055_v17, %v11499_v50  ;;  %v2217_v63 = vmul.f32 %v10055_v17, %v11502_v8 }
 0x207   :  { %10064 = vpow2.f32 %v1824_v13  ;;  %v1764_v35 = vsub.f32 %v11558_v22, %v1733_v3  ;;  %v1765_v20 = vsub.f32 %v11555_v34, %v1733_v3  ;;  %v2129_v30 = vadd.f32 %v2128_v7, %v2127_v42  ;;  %v11611_v42 = vpop.permute.xlu0 %1972 }
 0x208   :  { %v10057_v14 = vpop.eup %10056  ;;  %9435 = vmatprep.mubr.msk.f32.mxu1 %vm15441_vm3, %v2216_v52  ;;  %v2134_v8 = vadd.f32 %v2133_v24, %v2132_v48  ;;  %15645 = vst [vmem:[#allocation145_spill] sm:$0xff] %v11611_v42 }
 0x209   :  { %v10059_v51 = vpop.eup %10058  ;;  %v11599_v32 = vmul.f32 %v10057_v14, %v15643_v18  ;;  %v1826_v50 = vmul.f32 1.442695, %v1764_v35  ;;  %v1828_v53 = vmul.f32 1.442695, %v1765_v20  ;;  %9436 = vmatmul.mubr.msk.f32.gmra.mrb[10].mxu1 %vm15441_vm3, %v2217_v63  ;;  %v2177_v38 = vmax.f32 %v2129_v30, 1e-20  ;;  %v11613_v14 = vpop.permute.xlu1 %1977 }
 0x20a   :  { %v11602_v26 = vmul.f32 %v10059_v51, %v15644_v61  ;;  %v2135_v33 = vrot.slane %v2134_v8, 2  ;;  %15646 = vst [vmem:[#allocation146_spill] sm:$0xff] %v11613_v14  ;;  %v3163_v61 = vld [vmem:[%s11743_s9 + $0x18] sm:$0xff]  ;;  %v3164_v18 = vld [vmem:[%s11743_s9 + $0x20] sm:$0xff] }
 0x20b   :  { %v2139_v22 = vsel %vm15441_vm3, %v11599_v32, 0.0  ;;  %10066 = vpow2.f32 %v1826_v50  ;;  %v11621_v50 = vpop.permute.xlu0 %1982 }
 0x20c   :  { %v2140_v34 = vsel %vm15441_vm3, %v11602_v26, 0.0  ;;  %10068 = vpow2.f32 %v1828_v53  ;;  %v2136_v46 = vadd.f32 %v2135_v33, %v2134_v8  ;;  %15647 = vst [vmem:[#allocation147_spill] sm:$0xff] %v11621_v50 }
 0x20d   :  { %v2141_v15 = vadd.f32 %v2140_v34, %v2139_v22  ;;  %v10061_v56 = vpop.eup %10060  ;;  %10070 = vrcp.f32 %v2177_v38  ;;  %v11623_v22 = vpop.permute.xlu1 %1987 }
 0x20e   :  { %v2218_v57 = vmul.f32 %v10061_v56, %v11522_v58  ;;  %v2219_v13 = vmul.f32 %v10061_v56, %v11525_v16  ;;  %v2137_v48 = vrot.slane %v2136_v46, 1  ;;  %15648 = vst [vmem:[#allocation148_spill] sm:$0xff] %v11623_v22 }
 0x20f   :  { %v2142_v54 = vrot.slane %v2141_v15, 4 }
 0x210   :  { %v10063_v3 = vpop.eup %10062  ;;  %9438 = vmatprep.mubr.msk.f32.mxu1 %vm15441_vm3, %v2218_v57  ;;  %v2138_v63 = vadd.f32 %v2137_v48, %v2136_v46 }
 0x211   :  { %v2143_v17 = vadd.f32 %v2142_v54, %v2141_v15  ;;  %v10065_v52 = vpop.eup %10064  ;;  %9439 = vmatmul.mubr.msk.f32.gmra.mrb[12].mxu1 %vm15441_vm3, %v2219_v13  ;;  %v2018_v51 = vmul.f32 %v10063_v3, %v11611_v42 }
 0x212   :  { %v2019_v58 = vmul.f32 %v10065_v52, %v11613_v14  ;;  %v2178_v35 = vmax.f32 %v2138_v63, 1e-20  ;;  %v3162_v14 = vld [vmem:[%s11743_s9 + $0x10] sm:$0xff] }
 0x213   :  { %v2144_v7 = vrot.slane %v2143_v17, 2  ;;  %v2148_v20 = vsel %vm15441_vm3, %v2018_v51, 0.0 }
 0x214   :  { %v2149_v24 = vsel %vm15441_vm3, %v2019_v58, 0.0  ;;  %10072 = vrcp.f32 %v2178_v35 }
 0x215   :  { %v2145_v16 = vadd.f32 %v2144_v7, %v2143_v17  ;;  %v10067_v30 = vpop.eup %10066  ;;  %v2150_v8 = vadd.f32 %v2149_v24, %v2148_v20 }
 0x216   :  { %v10069_v38 = vpop.eup %10068  ;;  %v2020_v34 = vmul.f32 %v10067_v30, %v11621_v50 }
 0x217   :  { %v2146_v53 = vrot.slane %v2145_v16, 1  ;;  %v10071_v33 = vpop.eup %10070  ;;  %v2151_v56 = vrot.slane %v2150_v8, 4  ;;  %v2021_v46 = vmul.f32 %v10069_v38, %v11623_v22 }
 0x218   :  { %v2220_v54 = vmul.f32 %v10071_v33, %v11552_v39  ;;  %v2221_v57 = vmul.f32 %v10071_v33, %v11570_v41  ;;  %v2157_v13 = vsel %vm15441_vm3, %v2020_v34, 0.0 }
 0x219   :  { %v2147_v15 = vadd.f32 %v2146_v53, %v2145_v16  ;;  %v2152_v17 = vadd.f32 %v2151_v56, %v2150_v8  ;;  %v2158_v3 = vsel %vm15441_vm3, %v2021_v46, 0.0 }
 0x21a   :  { %9441 = vmatprep.mubr.msk.f32.mxu1 %vm15441_vm3, %v2220_v54  ;;  %v2159_v52 = vadd.f32 %v2158_v3, %v2157_v13 }
 0x21b   :  { %v2179_v48 = vmax.f32 %v2147_v15, 1e-20  ;;  %9442 = vmatmul.mubr.msk.f32.gmra.mrb[14].mxu1 %vm15441_vm3, %v2221_v57  ;;  %v2153_v63 = vrot.slane %v2152_v17, 2 }
 0x21c   :  { %v2160_v7 = vrot.slane %v2159_v52, 4 }
 0x21d   :  { %10074 = vrcp.f32 %v2179_v48  ;;  %v2154_v35 = vadd.f32 %v2153_v63, %v2152_v17 }
 0x21e   :  { %v2161_v16 = vadd.f32 %v2160_v7, %v2159_v52  ;;  %v10073_v20 = vpop.eup %10072 }
 0x21f   :  { %v2155_v39 = vrot.slane %v2154_v35, 1  ;;  %v2222_v41 = vmul.f32 %v10073_v20, %v11578_v2  ;;  %v2223_v24 = vmul.f32 %v10073_v20, %v11581_v5 }
 0x220   :  { %v2162_v30 = vrot.slane %v2161_v16, 2 }
 0x221   :  { %v2156_v53 = vadd.f32 %v2155_v39, %v2154_v35  ;;  %9444 = vmatprep.mubr.msk.f32.mxu1 %vm15441_vm3, %v2222_v41  ;;  %v15650_v35 = vld [vmem:[#allocation15_spill] sm:$0xff] }
 0x222   :  { %v2163_v8 = vadd.f32 %v2162_v30, %v2161_v16  ;;  %9445 = vmatmul.mubr.msk.f32.gmra.mrb[16].mxu1 %vm15441_vm3, %v2223_v24 }
 0x223   :  { %v2180_v38 = vmax.f32 %v2156_v53, 1e-20 }
 0x224   :  { %v2164_v33 = vrot.slane %v2163_v8, 1 }
 0x225   :  { %10076 = vrcp.f32 %v2180_v38 }
 0x226   :  { %v2165_v57 = vadd.f32 %v2164_v33, %v2163_v8 }
 0x227   :  { %v10075_v15 = vpop.eup %10074 }
 0x228   :  { %v2224_v56 = vmul.f32 %v10075_v15, %v11599_v32  ;;  %v2225_v54 = vmul.f32 %v10075_v15, %v11602_v26  ;;  %v2181_v2 = vmax.f32 %v2165_v57, 1e-20  ;;  %v15649_v26 = vld [vmem:[#allocation14_spill] sm:$0xff] }
 0x22a   :  { %9447 = vmatprep.mubr.msk.f32.mxu1 %vm15441_vm3, %v2224_v56  ;;  %10078 = vrcp.f32 %v2181_v2 }
 0x22b   :  { %9448 = vmatmul.mubr.msk.f32.gmra.mrb[18].mxu1 %vm15441_vm3, %v2225_v54 }
 0x22f   :  { %v10077_v5 = vpop.eup %10076 }
 0x230   :  { %v2226_v13 = vmul.f32 %v10077_v5, %v2018_v51  ;;  %v2227_v48 = vmul.f32 %v10077_v5, %v2019_v58 }
 0x232   :  { %9450 = vmatprep.mubr.msk.f32.mxu1 %vm15441_vm3, %v2226_v13 }
 0x233   :  { %9451 = vmatmul.mubr.msk.f32.gmra.mrb[20].mxu1 %vm15441_vm3, %v2227_v48 }
 0x234   :  { %v10079_v17 = vpop.eup %10078 }
 0x235   :  { %v2228_v3 = vmul.f32 %v10079_v17, %v2020_v34  ;;  %v2229_v52 = vmul.f32 %v10079_v17, %v2021_v46 }
 0x237   :  { %9453 = vmatprep.mubr.msk.f32.mxu1 %vm15441_vm3, %v2228_v3 }
 0x238   :  { %9454 = vmatmul.mubr.msk.f32.gmra.mrb[22].mxu1 %vm15441_vm3, %v2229_v52 }
 0x299   :  { %v9410_v32 = vpop.f32.mrb[32].mxu0 }
 0x29a   :  { %v2552_v63 = vmul.f32 %v9410_v32, %v15649_v26  ;;  %v2392_v7 = vpop.f32.mrb[33].mxu0 }
 0x29b   :  { %v2551_v16 = vmul.f32 %v2392_v7, %v15650_v35 }
 0x29c   :  { %v2584_v51 = vsel %vm1075_vm0, %v2552_v63, 0.0 }
 0x29d   :  { %v2583_v58 = vsel %vm1075_vm0, %v2551_v16, 0.0  ;;  %v9413_v20 = vpop.f32.mrb[34].mxu0 }
 0x29e   :  { %v2585_v39 = vadd.f32 %v2584_v51, %v2583_v58  ;;  %v2554_v41 = vmul.f32 %v9413_v20, %v15649_v26  ;;  %v2402_v34 = vpop.f32.mrb[35].mxu0 }
 0x29f   :  { %v2553_v46 = vmul.f32 %v2402_v34, %v15650_v35 }
 0x2a0   :  { %v2586_v24 = vrot.slane %v2585_v39, 4  ;;  %v2593_v30 = vsel %vm1075_vm0, %v2554_v41, 0.0 }
 0x2a1   :  { %v2592_v53 = vsel %vm1075_vm0, %v2553_v46, 0.0  ;;  %v9416_v8 = vpop.f32.mrb[36].mxu0 }
 0x2a2   :  { %v2587_v38 = vadd.f32 %v2586_v24, %v2585_v39  ;;  %v2594_v33 = vadd.f32 %v2593_v30, %v2592_v53  ;;  %v2556_v15 = vmul.f32 %v9416_v8, %v15649_v26  ;;  %v2412_v56 = vpop.f32.mrb[37].mxu0 }
 0x2a3   :  { %v2555_v54 = vmul.f32 %v2412_v56, %v15650_v35 }
 0x2a4   :  { %v2588_v57 = vrot.slane %v2587_v38, 2  ;;  %v2595_v2 = vrot.slane %v2594_v33, 4  ;;  %v2602_v5 = vsel %vm1075_vm0, %v2556_v15, 0.0 }
 0x2a5   :  { %v2601_v13 = vsel %vm1075_vm0, %v2555_v54, 0.0  ;;  %v9419_v48 = vpop.f32.mrb[38].mxu0 }
 0x2a6   :  { %v2589_v17 = vadd.f32 %v2588_v57, %v2587_v38  ;;  %v2596_v3 = vadd.f32 %v2595_v2, %v2594_v33  ;;  %v2603_v52 = vadd.f32 %v2602_v5, %v2601_v13  ;;  %v2558_v32 = vmul.f32 %v9419_v48, %v15649_v26  ;;  %v2422_v63 = vpop.f32.mrb[39].mxu0  ;;  %v11664_v38 = vld [vmem:[%s8804_s1] ss:$0 sm:$0xff] }
 0x2a7   :  { %v2557_v7 = vmul.f32 %v2422_v63, %v15650_v35 }
 0x2a8   :  { %v2597_v16 = vrot.slane %v2596_v3, 2  ;;  %v2604_v51 = vrot.slane %v2603_v52, 4  ;;  %v2611_v58 = vsel %vm1075_vm0, %v2558_v32, 0.0  ;;  %v2590_v20 = vrot.slane %v2589_v17, 1 }
 0x2a9   :  { %v2610_v39 = vsel %vm1075_vm0, %v2557_v7, 0.0 }
 0x2aa   :  { %v2598_v41 = vadd.f32 %v2597_v16, %v2596_v3  ;;  %v2605_v34 = vadd.f32 %v2604_v51, %v2603_v52  ;;  %v2612_v46 = vadd.f32 %v2611_v58, %v2610_v39  ;;  %v2591_v8 = vadd.f32 %v2590_v20, %v2589_v17 }
 0x2ac   :  { %v2599_v24 = vrot.slane %v2598_v41, 1  ;;  %v2606_v30 = vrot.slane %v2605_v34, 2  ;;  %v2613_v53 = vrot.slane %v2612_v46, 4  ;;  %v11671_v3 = vadd.f32 %v11664_v38, %v2591_v8 }
 0x2ae   :  { %v2600_v33 = vadd.f32 %v2599_v24, %v2598_v41  ;;  %v2607_v15 = vadd.f32 %v2606_v30, %v2605_v34  ;;  %v2614_v56 = vadd.f32 %v2613_v53, %v2612_v46 }
 0x2b0   :  { %v11667_v57 = vadd.f32 %v11664_v38, %v2600_v33  ;;  %v2608_v2 = vrot.slane %v2607_v15, 1  ;;  %v2615_v5 = vrot.slane %v2614_v56, 2 }
 0x2b2   :  { %v9422_v54 = vpop.f32.mrb[0].mxu1  ;;  %v2766_v52 = vrot.slane %v11667_v57, 7  ;;  %v2609_v32 = vadd.f32 %v2608_v2, %v2607_v15  ;;  %v2616_v63 = vadd.f32 %v2615_v5, %v2614_v56 }
 0x2b3   :  { %v2560_v13 = vmul.f32 %v9422_v54, %v15649_v26  ;;  %v2432_v48 = vpop.f32.mrb[1].mxu1 }
 0x2b4   :  { %v2559_v17 = vmul.f32 %v2432_v48, %v15650_v35  ;;  %v2768_v51 = vsel %vm2767_vm4, %v2766_v52, %v11671_v3  ;;  %v11680_v58 = vadd.f32 %v11664_v38, %v2609_v32  ;;  %v2617_v20 = vrot.slane %v2616_v63, 1 }
 0x2b5   :  { %v2620_v7 = vsel %vm1075_vm0, %v2560_v13, 0.0 }
 0x2b6   :  { %v2619_v16 = vsel %vm1075_vm0, %v2559_v17, 0.0  ;;  %v2769_v41 = vrot.slane %v11680_v58, 6  ;;  %v2618_v34 = vadd.f32 %v2617_v20, %v2616_v63 }
 0x2b7   :  { %v2621_v39 = vadd.f32 %v2620_v7, %v2619_v16 }
 0x2b8   :  { %v2771_v24 = vsel %vm2770_vm5, %v2769_v41, %v2768_v51  ;;  %v11685_v30 = vadd.f32 %v11664_v38, %v2618_v34 }
 0x2b9   :  { %v2622_v46 = vrot.slane %v2621_v39, 4 }
 0x2ba   :  { %v2772_v8 = vrot.slane %v11685_v30, 5 }
 0x2bb   :  { %v2623_v53 = vadd.f32 %v2622_v46, %v2621_v39 }
 0x2bc   :  { %v2774_v56 = vsel %vm2773_vm6, %v2772_v8, %v2771_v24 }
 0x2bd   :  { %v2624_v33 = vrot.slane %v2623_v53, 2 }
 0x2bf   :  { %v2625_v54 = vadd.f32 %v2624_v33, %v2623_v53 }
 0x2c0   :  { %v9425_v15 = vpop.f32.mrb[2].mxu1 }
 0x2c1   :  { %v2562_v2 = vmul.f32 %v9425_v15, %v15649_v26  ;;  %v2442_v5 = vpop.f32.mrb[3].mxu1  ;;  %v2626_v48 = vrot.slane %v2625_v54, 1 }
 0x2c2   :  { %v2561_v13 = vmul.f32 %v2442_v5, %v15650_v35 }
 0x2c3   :  { %v2629_v17 = vsel %vm1075_vm0, %v2562_v2, 0.0  ;;  %v2627_v63 = vadd.f32 %v2626_v48, %v2625_v54 }
 0x2c4   :  { %v2628_v52 = vsel %vm1075_vm0, %v2561_v13, 0.0  ;;  %v9428_v32 = vpop.f32.mrb[4].mxu1 }
 0x2c5   :  { %v2630_v7 = vadd.f32 %v2629_v17, %v2628_v52  ;;  %v2564_v16 = vmul.f32 %v9428_v32, %v15649_v26  ;;  %v2452_v51 = vpop.f32.mrb[5].mxu1  ;;  %v11696_v39 = vadd.f32 %v11664_v38, %v2627_v63 }
 0x2c6   :  { %v2563_v20 = vmul.f32 %v2452_v51, %v15650_v35 }
 0x2c7   :  { %v2631_v41 = vrot.slane %v2630_v7, 4  ;;  %v2638_v34 = vsel %vm1075_vm0, %v2564_v16, 0.0  ;;  %v2775_v24 = vrot.slane %v11696_v39, 4 }
 0x2c8   :  { %v2637_v46 = vsel %vm1075_vm0, %v2563_v20, 0.0 }
 0x2c9   :  { %v2632_v53 = vadd.f32 %v2631_v41, %v2630_v7  ;;  %v2639_v8 = vadd.f32 %v2638_v34, %v2637_v46  ;;  %v2777_v15 = vsel %vm2776_vm7, %v2775_v24, %v2774_v56 }
 0x2cb   :  { %v9431_v33 = vpop.f32.mrb[6].mxu1  ;;  %v2633_v54 = vrot.slane %v2632_v53, 2  ;;  %v2640_v2 = vrot.slane %v2639_v8, 4 }
 0x2cc   :  { %v2566_v5 = vmul.f32 %v9431_v33, %v15649_v26  ;;  %v2462_v13 = vpop.f32.mrb[7].mxu1 }
 0x2cd   :  { %v2565_v48 = vmul.f32 %v2462_v13, %v15650_v35  ;;  %v2634_v17 = vadd.f32 %v2633_v54, %v2632_v53  ;;  %v2641_v52 = vadd.f32 %v2640_v2, %v2639_v8 }
 0x2ce   :  { %v2647_v32 = vsel %vm1075_vm0, %v2566_v5, 0.0 }
 0x2cf   :  { %v2646_v63 = vsel %vm1075_vm0, %v2565_v48, 0.0  ;;  %v2635_v16 = vrot.slane %v2634_v17, 1  ;;  %v2642_v51 = vrot.slane %v2641_v52, 2 }
 0x2d0   :  { %v2648_v7 = vadd.f32 %v2647_v32, %v2646_v63 }
 0x2d1   :  { %v2636_v20 = vadd.f32 %v2635_v16, %v2634_v17  ;;  %v2643_v41 = vadd.f32 %v2642_v51, %v2641_v52 }
 0x2d2   :  { %v2649_v34 = vrot.slane %v2648_v7, 4 }
 0x2d3   :  { %v11707_v56 = vadd.f32 %v11664_v38, %v2636_v20  ;;  %v2644_v46 = vrot.slane %v2643_v41, 1 }
 0x2d4   :  { %v2650_v24 = vadd.f32 %v2649_v34, %v2648_v7 }
 0x2d5   :  { %v2778_v53 = vrot.slane %v11707_v56, 3  ;;  %v2645_v8 = vadd.f32 %v2644_v46, %v2643_v41 }
 0x2d6   :  { %v9434_v33 = vpop.f32.mrb[8].mxu1  ;;  %v2651_v54 = vrot.slane %v2650_v24, 2 }
 0x2d7   :  { %v2568_v2 = vmul.f32 %v9434_v33, %v15649_v26  ;;  %v2472_v5 = vpop.f32.mrb[9].mxu1  ;;  %v2780_v48 = vsel %vm2779_vm8, %v2778_v53, %v2777_v15  ;;  %v11714_v17 = vadd.f32 %v11664_v38, %v2645_v8 }
 0x2d8   :  { %v2567_v13 = vmul.f32 %v2472_v5, %v15650_v35  ;;  %v2652_v52 = vadd.f32 %v2651_v54, %v2650_v24 }
 0x2d9   :  { %v2656_v32 = vsel %vm1075_vm0, %v2568_v2, 0.0  ;;  %v2781_v16 = vrot.slane %v11714_v17, 2 }
 0x2da   :  { %v2655_v63 = vsel %vm1075_vm0, %v2567_v13, 0.0  ;;  %v2653_v51 = vrot.slane %v2652_v52, 1 }
 0x2db   :  { %v2657_v7 = vadd.f32 %v2656_v32, %v2655_v63  ;;  %v2783_v46 = vsel %vm2782_vm9, %v2781_v16, %v2780_v48 }
 0x2dc   :  { %v9437_v20 = vpop.f32.mrb[10].mxu1  ;;  %v2654_v15 = vadd.f32 %v2653_v51, %v2652_v52 }
 0x2dd   :  { %v2570_v41 = vmul.f32 %v9437_v20, %v15649_v26  ;;  %v2482_v34 = vpop.f32.mrb[11].mxu1  ;;  %v2658_v33 = vrot.slane %v2657_v7, 4 }
 0x2de   :  { %v2569_v53 = vmul.f32 %v2482_v34, %v15650_v35  ;;  %v11724_v8 = vadd.f32 %v11664_v38, %v2654_v15 }
 0x2df   :  { %v2665_v24 = vsel %vm1075_vm0, %v2570_v41, 0.0  ;;  %v2659_v54 = vadd.f32 %v2658_v33, %v2657_v7 }
 0x2e0   :  { %v2664_v2 = vsel %vm1075_vm0, %v2569_v53, 0.0  ;;  %v2784_v13 = vrot.slane %v11724_v8, 1 }
 0x2e1   :  { %v2666_v5 = vadd.f32 %v2665_v24, %v2664_v2  ;;  %v2660_v32 = vrot.slane %v2659_v54, 2 }
 0x2e2   :  { %v11729_v48 = vsel %vm15470_vm10, %v2784_v13, %v2783_v46 }
 0x2e3   :  { %v2667_v63 = vrot.slane %v2666_v5, 4  ;;  %v2661_v16 = vadd.f32 %v2660_v32, %v2659_v54 }
 0x2e4   :  { %v9440_v52 = vpop.f32.mrb[12].mxu1 }
 0x2e5   :  { %v2668_v51 = vadd.f32 %v2667_v63, %v2666_v5  ;;  %v2572_v20 = vmul.f32 %v9440_v52, %v15649_v26  ;;  %v2492_v41 = vpop.f32.mrb[13].mxu1  ;;  %v2662_v53 = vrot.slane %v2661_v16, 1 }
 0x2e6   :  { %v2571_v34 = vmul.f32 %v2492_v41, %v15650_v35 }
 0x2e7   :  { %v2669_v7 = vrot.slane %v2668_v51, 2  ;;  %v2674_v15 = vsel %vm1075_vm0, %v2572_v20, 0.0  ;;  %v2663_v46 = vadd.f32 %v2662_v53, %v2661_v16 }
 0x2e8   :  { %v2673_v33 = vsel %vm1075_vm0, %v2571_v34, 0.0  ;;  %v3022_v34 = vld [vmem:[%s11738_s5] sm:$0xff] }
 0x2e9   :  { %v2670_v24 = vadd.f32 %v2669_v7, %v2668_v51  ;;  %v2675_v2 = vadd.f32 %v2674_v15, %v2673_v33  ;;  %v11751_v41 = vadd.f32 %v11664_v38, %v2663_v46  ;;  %v3023_v7 = vld [vmem:[%s11738_s5 + $0x8] sm:$0xff]  ;;  %v3024_v15 = vld [vmem:[%s11738_s5 + $0x10] sm:$0xff] }
 0x2ea   :  { %v9810_v53 = vpack.c.bf16 %v3023_v7, %v3022_v34  ;;  %v3027_v46 = vld [vmem:[%s11738_s5 + $0x28] sm:$0xff]  ;;  %v9830_v7 = vpack.c.bf16 %v3163_v61, %v3162_v14  ;;  %v9834_v14 = vpack.c.bf16 %v3165_v49, %v3164_v18 }
 0x2eb   :  { %v2671_v22 = vrot.slane %v2670_v24, 1  ;;  %v2676_v50 = vrot.slane %v2675_v2, 4 }
 0x2ec   :  { %9811 = vmatprep.subr.bf16.mxu1 %v9810_v53 }
 0x2ed   :  { %v2672_v54 = vadd.f32 %v2671_v22, %v2670_v24  ;;  %v2677_v5 = vadd.f32 %v2676_v50, %v2675_v2  ;;  %v3025_v24 = vld [vmem:[%s11738_s5 + $0x18] sm:$0xff]  ;;  %v3026_v2 = vld [vmem:[%s11738_s5 + $0x20] sm:$0xff]  ;;  %9813 = vmatpush3.bf16.msra.mxu1 %v9810_v53 }
 0x2ee   :  { %v9443_v13 = vpop.f32.mrb[14].mxu1 }
 0x2ef   :  { %v11746_v32 = vadd.f32 %v11664_v38, %v2672_v54  ;;  %v2678_v63 = vrot.slane %v2677_v5, 2  ;;  %v2574_v52 = vmul.f32 %v9443_v13, %v15649_v26  ;;  %v2502_v51 = vpop.f32.mrb[15].mxu1 }
 0x2f0   :  { %v2573_v20 = vmul.f32 %v2502_v51, %v15650_v35  ;;  %v3160_v51 = vld [vmem:[%s11743_s9] sm:$0xff] }
 0x2f1   :  { %v2787_v22 = vrot.slane %v11746_v32, 7  ;;  %v2679_v50 = vadd.f32 %v2678_v63, %v2677_v5  ;;  %v2683_v16 = vsel %vm1075_vm0, %v2574_v52, 0.0  ;;  %v9814_v63 = vpack.c.bf16 %v3025_v24, %v3024_v15  ;;  %v3161_v52 = vld [vmem:[%s11743_s9 + $0x8] sm:$0xff] }
 0x2f2   :  { %v2682_v33 = vsel %vm1075_vm0, %v2573_v20, 0.0  ;;  %v9826_v42 = vpack.c.bf16 %v3161_v52, %v3160_v51  ;;  %v3166_v51 = vld [vmem:[%s11743_s9 + $0x30] sm:$0xff]  ;;  %v3167_v52 = vld [vmem:[%s11743_s9 + $0x38] sm:$0xff]  ;;  %s12823_s9 = sld [smem:[%s15256_s0 + %s10407_s6]]   ;;  %s10414_s6 = smov 32  }
 0x2f3   :  { %v2788_v54 = vsel %vm2767_vm4, %v2787_v22, %v11751_v41  ;;  %v2680_v13 = vrot.slane %v2679_v50, 1  ;;  %v2684_v5 = vadd.f32 %v2683_v16, %v2682_v33  ;;  %9815 = vmatprep.subr.bf16.mxu1 %v9814_v63  ;;  %v9818_v22 = vpack.c.bf16 %v3027_v46, %v3026_v2 }
 0x2f4   :  { %9827 = vmatprep.subr.bf16.mxu0 %v9826_v42  ;;  %9817 = vmatpush3.bf16.msra.mxu1 %v9814_v63  ;;  %v9838_v49 = vpack.c.bf16 %v3167_v52, %v3166_v51 }
 0x2f5   :  { %v2681_v20 = vadd.f32 %v2680_v13, %v2679_v50  ;;  %v2685_v34 = vrot.slane %v2684_v5, 4  ;;  %v9446_v40 = vpop.f32.mrb[16].mxu1  ;;  %9829 = vmatpush3.bf16.msra.mxu0 %v9826_v42  ;;  %v3028_v50 = vld [vmem:[%s11738_s5 + $0x30] sm:$0xff]  ;;  %v3029_v13 = vld [vmem:[%s11738_s5 + $0x38] sm:$0xff]  ;;  %9819 = vmatprep.subr.bf16.mxu1 %v9818_v22  ;;  %s8811_s5 = sld [smem:[%s15256_s0 + %s10406_s2]]   ;;  %s10413_s2 = smov 25  }
 0x2f6   :  { %v2576_v33 = vmul.f32 %v9446_v40, %v15649_v26  ;;  %v2512_v24 = vpop.f32.mrb[17].mxu1  ;;  %9831 = vmatprep.subr.bf16.mxu0 %v9830_v7  ;;  %v9822_v40 = vpack.c.bf16 %v3029_v13, %v3028_v50 }
 0x2f7   :  { %v11771_v16 = vadd.f32 %v11664_v38, %v2681_v20  ;;  %v2686_v15 = vadd.f32 %v2685_v34, %v2684_v5  ;;  %v2575_v61 = vmul.f32 %v2512_v24, %v15650_v35 }
 0x2f8   :  { %v2692_v46 = vsel %vm1075_vm0, %v2576_v33, 0.0  ;;  %9821 = vmatpush3.bf16.msra.mxu1 %v9818_v22 }
 0x2f9   :  { %v2789_v53 = vrot.slane %v11771_v16, 6  ;;  %v2687_v2 = vrot.slane %v2686_v15, 2  ;;  %v2691_v5 = vsel %vm1075_vm0, %v2575_v61, 0.0  ;;  %9833 = vmatpush3.bf16.msra.mxu0 %v9830_v7  ;;  %9823 = vmatprep.subr.bf16.mxu1 %v9822_v40 }
 0x2fa   :  { %v2693_v34 = vadd.f32 %v2692_v46, %v2691_v5  ;;  %9835 = vmatprep.subr.bf16.mxu0 %v9834_v14  ;;  %v15651_v46 = vld [vmem:[#allocation112_spill] sm:$0xff] }
 0x2fb   :  { %v2790_v42 = vsel %vm2770_vm5, %v2789_v53, %v2788_v54  ;;  %v2688_v20 = vadd.f32 %v2687_v2, %v2686_v15 }
 0x2fc   :  { %v2694_v27 = vrot.slane %v2693_v34, 4  ;;  %9825 = vmatpush3.bf16.msra.mxu1 %v9822_v40 }
 0x2fd   :  { %v2689_v18 = vrot.slane %v2688_v20, 1  ;;  %9837 = vmatpush3.bf16.msra.mxu0 %v9834_v14 }
 0x2fe   :  { %v9449_v24 = vpop.f32.mrb[18].mxu1  ;;  %v2695_v21 = vadd.f32 %v2694_v27, %v2693_v34  ;;  %9839 = vmatprep.subr.bf16.mxu0 %v9838_v49 }
 0x2ff   :  { %v2578_v62 = vmul.f32 %v9449_v24, %v15649_v26  ;;  %v2522_v33 = vpop.f32.mrb[19].mxu1  ;;  %v2690_v61 = vadd.f32 %v2689_v18, %v2688_v20 }
 0x300   :  { %v2577_v63 = vmul.f32 %v2522_v33, %v15650_v35  ;;  %v2696_v15 = vrot.slane %v2695_v21, 2 }
 0x301   :  { %v2701_v50 = vsel %vm1075_vm0, %v2578_v62, 0.0  ;;  %v11788_v7 = vadd.f32 %v11664_v38, %v2690_v61  ;;  %9841 = vmatpush3.bf16.msra.mxu0 %v9838_v49 }
 0x302   :  { %v2700_v54 = vsel %vm1075_vm0, %v2577_v63, 0.0  ;;  %v2697_v22 = vadd.f32 %v2696_v15, %v2695_v21  ;;  %9859 = vmatprep.subr.bf16.mxu0 %v15651_v46 }
 0x303   :  { %v2702_v13 = vadd.f32 %v2701_v50, %v2700_v54  ;;  %v2791_v53 = vrot.slane %v11788_v7, 5 }
 0x304   :  { %v2698_v62 = vrot.slane %v2697_v22, 1 }
 0x305   :  { %v2703_v2 = vrot.slane %v2702_v13, 4  ;;  %v2792_v27 = vsel %vm2773_vm6, %v2791_v53, %v2790_v42 }
 0x306   :  { %v9452_v51 = vpop.f32.mrb[20].mxu1  ;;  %v2699_v52 = vadd.f32 %v2698_v62, %v2697_v22 }
 0x307   :  { %v2704_v14 = vadd.f32 %v2703_v2, %v2702_v13  ;;  %v2580_v20 = vmul.f32 %v9452_v51, %v15649_v26  ;;  %v2532_v34 = vpop.f32.mrb[21].mxu1 }
 0x308   :  { %v2579_v24 = vmul.f32 %v2532_v34, %v15650_v35  ;;  %v2746_v40 = vadd.f32 %v11664_v38, %v2699_v52 }
 0x309   :  { %v2705_v5 = vrot.slane %v2704_v14, 2  ;;  %v2710_v21 = vsel %vm1075_vm0, %v2580_v20, 0.0 }
 0x30a   :  { %v2709_v49 = vsel %vm1075_vm0, %v2579_v24, 0.0  ;;  %v2793_v33 = vrot.slane %v2746_v40, 4 }
 0x30b   :  { %v2706_v18 = vadd.f32 %v2705_v5, %v2704_v14  ;;  %v2711_v42 = vadd.f32 %v2710_v21, %v2709_v49  ;;  %v9455_v61 = vpop.f32.mrb[22].mxu1 }
 0x30c   :  { %v2582_v50 = vmul.f32 %v9455_v61, %v15649_v26  ;;  %v2542_v54 = vpop.f32.mrb[23].mxu1  ;;  %v2794_v15 = vsel %vm2776_vm7, %v2793_v33, %v2792_v27 }
 0x30d   :  { %v2707_v63 = vrot.slane %v2706_v18, 1  ;;  %v2712_v53 = vrot.slane %v2711_v42, 4  ;;  %v2581_v22 = vmul.f32 %v2542_v54, %v15650_v35 }
 0x30e   :  { %v2719_v2 = vsel %vm1075_vm0, %v2582_v50, 0.0 }
 0x30f   :  { %v2708_v13 = vadd.f32 %v2707_v63, %v2706_v18  ;;  %v2713_v14 = vadd.f32 %v2712_v53, %v2711_v42  ;;  %v2718_v51 = vsel %vm1075_vm0, %v2581_v22, 0.0 }
 0x310   :  { %v2720_v52 = vadd.f32 %v2719_v2, %v2718_v51 }
 0x311   :  { %v2747_v62 = vadd.f32 %v11664_v38, %v2708_v13  ;;  %v2714_v20 = vrot.slane %v2713_v14, 2 }
 0x312   :  { %v2721_v34 = vrot.slane %v2720_v52, 4 }
 0x313   :  { %v2795_v5 = vrot.slane %v2747_v62, 3  ;;  %v2715_v24 = vadd.f32 %v2714_v20, %v2713_v14 }
 0x314   :  { %v2722_v21 = vadd.f32 %v2721_v34, %v2720_v52 }
 0x315   :  { %v2796_v26 = vsel %vm2779_vm8, %v2795_v5, %v2794_v15  ;;  %v2716_v27 = vrot.slane %v2715_v24, 1  ;;  %v2803_v15 = vsel %vm1075_vm0, %v11729_v48, 0.0 }
 0x316   :  { %v2723_v18 = vrot.slane %v2722_v21, 2 }
 0x317   :  { %v2717_v49 = vadd.f32 %v2716_v27, %v2715_v24 }
 0x318   :  { %v2724_v33 = vadd.f32 %v2723_v18, %v2722_v21  ;;  %v15652_v21 = vld [vmem:[#allocation13_spill] sm:$0xff] }
 0x319   :  { %v2748_v35 = vadd.f32 %v11664_v38, %v2717_v49 }
 0x31a   :  { %v2725_v63 = vrot.slane %v2724_v33, 1 }
 0x31b   :  { %v2797_v61 = vrot.slane %v2748_v35, 2 }
 0x31c   :  { %v2726_v50 = vadd.f32 %v2725_v63, %v2724_v33 }
 0x31d   :  { %v2798_v42 = vsel %vm2782_vm9, %v2797_v61, %v2796_v26 }
 0x31e   :  { %v2749_v54 = vadd.f32 %v11664_v38, %v2726_v50 }
 0x320   :  { %v2799_v13 = vrot.slane %v2749_v54, 1 }
 0x322   :  { %v2800_v53 = vsel %vm15470_vm10, %v2799_v13, %v2798_v42 }
 0x323   :  { %v2804_v22 = vsel %vm1075_vm0, %v2800_v53, 0.0 }
 0x324   :  { %v2805_v2 = vadd.f32 %v2804_v22, %v2803_v15 }
 0x326   :  { %v2806_v14 = vrot.slane %v2805_v2, 4 }
 0x328   :  { %v2807_v51 = vadd.f32 %v2806_v14, %v2805_v2 }
 0x32a   :  { %v2808_v52 = vrot.slane %v2807_v51, 2 }
 0x32c   :  { %v2809_v5 = vadd.f32 %v2808_v52, %v2807_v51 }
 0x32e   :  { %v2810_v20 = vrot.slane %v2809_v5, 1 }
 0x330   :  { %v2811_v34 = vadd.f32 %v2810_v20, %v2809_v5 }
 0x332   :  { %v2813_v24 = vmul.f32 0.0625, %v2811_v34 }
 0x334   :  { %v2817_v26 = vrot.slane %v2813_v24, %v15652_v21 }
 0x336   :  { %v11814_v38 = vsub.f32 %v11671_v3, %v2817_v26  ;;  %v11817_v27 = vsub.f32 %v11667_v57, %v2817_v26  ;;  %v11820_v48 = vsub.f32 %v11680_v58, %v2817_v26  ;;  %v11823_v18 = vsub.f32 %v11685_v30, %v2817_v26 }
 0x337   :  { %v11826_v49 = vsub.f32 %v11696_v39, %v2817_v26  ;;  %v11829_v33 = vsub.f32 %v11707_v56, %v2817_v26  ;;  %v11832_v63 = vsub.f32 %v11714_v17, %v2817_v26  ;;  %v11835_v3 = vsub.f32 %v11724_v8, %v2817_v26 }
 0x338   :  { %v11838_v57 = vsub.f32 %v11751_v41, %v2817_v26  ;;  %v11841_v58 = vsub.f32 %v11746_v32, %v2817_v26  ;;  %v11844_v30 = vsub.f32 %v11771_v16, %v2817_v26  ;;  %v11847_v39 = vsub.f32 %v11788_v7, %v2817_v26 }
 0x339   :  { %v11849_v56 = vsub.f32 %v2746_v40, %v2817_v26  ;;  %v11851_v61 = vsub.f32 %v2747_v62, %v2817_v26  ;;  %v11853_v17 = vsub.f32 %v2748_v35, %v2817_v26  ;;  %v11855_v8 = vsub.f32 %v2749_v54, %v2817_v26 }
 0x33a   :  { %v2835_v41 = vmul.f32 %v11817_v27, %v11817_v27  ;;  %v2836_v32 = vmul.f32 %v11820_v48, %v11820_v48  ;;  %v2834_v16 = vmul.f32 %v11814_v38, %v11814_v38  ;;  %v2837_v7 = vmul.f32 %v11823_v18, %v11823_v18 }
 0x33b   :  { %v2843_v40 = vmul.f32 %v11841_v58, %v11841_v58  ;;  %v2844_v62 = vmul.f32 %v11844_v30, %v11844_v30  ;;  %v2838_v35 = vmul.f32 %v11826_v49, %v11826_v49  ;;  %v2839_v50 = vmul.f32 %v11829_v33, %v11829_v33 }
 0x33c   :  { %v2840_v42 = vmul.f32 %v11832_v63, %v11832_v63  ;;  %v2845_v54 = vmul.f32 %v11847_v39, %v11847_v39  ;;  %v2841_v13 = vmul.f32 %v11835_v3, %v11835_v3  ;;  %v2846_v53 = vmul.f32 %v11849_v56, %v11849_v56 }
 0x33d   :  { %v2866_v15 = vrot.slane %v2835_v41, 7  ;;  %v2868_v22 = vrot.slane %v2836_v32, 6  ;;  %v2842_v2 = vmul.f32 %v11838_v57, %v11838_v57  ;;  %v2847_v14 = vmul.f32 %v11851_v61, %v11851_v61 }
 0x33e   :  { %v2848_v51 = vmul.f32 %v11853_v17, %v11853_v17  ;;  %v2880_v52 = vrot.slane %v2843_v40, 7  ;;  %v2849_v5 = vmul.f32 %v11855_v8, %v11855_v8  ;;  %v2870_v34 = vrot.slane %v2837_v7, 5 }
 0x33f   :  { %v2867_v20 = vsel %vm2767_vm4, %v2866_v15, %v2834_v16  ;;  %v2882_v24 = vrot.slane %v2844_v62, 6  ;;  %v2872_v41 = vrot.slane %v2838_v35, 4  ;;  %v2884_v29 = vrot.slane %v2845_v54, 5 }
 0x340   :  { %v2869_v26 = vsel %vm2770_vm5, %v2868_v22, %v2867_v20  ;;  %v2881_v32 = vsel %vm2767_vm4, %v2880_v52, %v2842_v2  ;;  %v2874_v55 = vrot.slane %v2839_v50, 3  ;;  %v2886_v59 = vrot.slane %v2846_v53, 4 }
 0x341   :  { %v2871_v45 = vsel %vm2773_vm6, %v2870_v34, %v2869_v26  ;;  %v2883_v44 = vsel %vm2770_vm5, %v2882_v24, %v2881_v32  ;;  %v2876_v37 = vrot.slane %v2840_v42, 2  ;;  %v2888_v16 = vrot.slane %v2847_v14, 3  ;;  %v11914_v34 = vld [vmem:[%s8826_s13] ss:$0 sm:$0xff]  ;;  %s12837_s13 = sld [smem:[%s15256_s0 + %s10408_s10]]   ;;  %s10423_s10 = smov 39  }
 0x342   :  { %v2873_v40 = vsel %vm2776_vm7, %v2872_v41, %v2871_v45  ;;  %v2885_v25 = vsel %vm2773_vm6, %v2884_v29, %v2883_v44  ;;  %v2878_v62 = vrot.slane %v2841_v13, 1  ;;  %v2890_v15 = vrot.slane %v2848_v51, 2 }
 0x343   :  { %v2875_v7 = vsel %vm2779_vm8, %v2874_v55, %v2873_v40  ;;  %v2887_v35 = vsel %vm2776_vm7, %v2886_v59, %v2885_v25  ;;  %v2892_v50 = vrot.slane %v2849_v5, 1 }
 0x344   :  { %v2877_v54 = vsel %vm2782_vm9, %v2876_v37, %v2875_v7  ;;  %v2889_v22 = vsel %vm2779_vm8, %v2888_v16, %v2887_v35 }
 0x345   :  { %v2879_v2 = vsel %vm15470_vm10, %v2878_v62, %v2877_v54  ;;  %v2891_v53 = vsel %vm2782_vm9, %v2890_v15, %v2889_v22  ;;  %v11932_v62 = vld [vmem:[%s8827_s18] ss:$0 sm:$0xff]  ;;  %s12891_s18 = sld [smem:[%s15256_s0 + %s10409_s14]]  }
 0x346   :  { %v2893_v45 = vsel %vm15470_vm10, %v2892_v50, %v2891_v53  ;;  %v2896_v29 = vsel %vm1075_vm0, %v2879_v2, 0.0 }
 0x347   :  { %v2897_v44 = vsel %vm1075_vm0, %v2893_v45, 0.0 }
 0x348   :  { %v2898_v55 = vadd.f32 %v2897_v44, %v2896_v29 }
 0x34a   :  { %v2899_v42 = vrot.slane %v2898_v55, 4 }
 0x34c   :  { %v2900_v13 = vadd.f32 %v2899_v42, %v2898_v55 }
 0x34e   :  { %v2901_v25 = vrot.slane %v2900_v13, 2 }
 0x350   :  { %v2902_v59 = vadd.f32 %v2901_v25, %v2900_v13 }
 0x352   :  { %v2903_v14 = vrot.slane %v2902_v59, 1 }
 0x354   :  { %v2904_v37 = vadd.f32 %v2903_v14, %v2902_v59 }
 0x356   :  { %v2905_v51 = vmul.f32 0.0625, %v2904_v37 }
 0x358   :  { %v2906_v52 = vadd.f32 1e-05, %v2905_v51 }
 0x35a   :  { %10080 = vrsqrt.f32 %v2906_v52 }
 0x364   :  { %v10081_v5 = vpop.eup %10080 }
 0x365   :  { %v11912_v20 = vrot.slane %v10081_v5, %v15652_v21 }
 0x367   :  { %v2927_v24 = vmul.f32 %v11912_v20, %v11855_v8  ;;  %v2912_v26 = vmul.f32 %v11912_v20, %v11814_v38  ;;  %v2913_v41 = vmul.f32 %v11912_v20, %v11817_v27  ;;  %v2914_v32 = vmul.f32 %v11912_v20, %v11820_v48 }
 0x368   :  { %v2915_v40 = vmul.f32 %v11912_v20, %v11823_v18  ;;  %v2916_v16 = vmul.f32 %v11912_v20, %v11826_v49  ;;  %v2917_v7 = vmul.f32 %v11912_v20, %v11829_v33  ;;  %v2918_v8 = vmul.f32 %v11912_v20, %v11832_v63 }
 0x369   :  { %v11935_v38 = vmul.f32 %v11914_v34, %v2927_v24  ;;  %v2919_v27 = vmul.f32 %v11912_v20, %v11835_v3  ;;  %v2935_v48 = vmul.f32 %v11914_v34, %v2912_v26  ;;  %v2936_v18 = vmul.f32 %v11914_v34, %v2913_v41 }
 0x36a   :  { %v2937_v49 = vmul.f32 %v11914_v34, %v2914_v32  ;;  %v2938_v35 = vmul.f32 %v11914_v34, %v2915_v40  ;;  %v2939_v33 = vmul.f32 %v11914_v34, %v2916_v16  ;;  %v2940_v63 = vmul.f32 %v11914_v34, %v2917_v7 }
 0x36b   :  { %v2941_v15 = vmul.f32 %v11914_v34, %v2918_v8  ;;  %v2942_v54 = vmul.f32 %v11914_v34, %v2919_v27  ;;  %v2958_v22 = vadd.f32 %v11932_v62, %v2935_v48  ;;  %v2959_v3 = vadd.f32 %v11932_v62, %v2936_v18 }
 0x36c   :  { %v2960_v50 = vadd.f32 %v11932_v62, %v2937_v49  ;;  %v2961_v2 = vadd.f32 %v11932_v62, %v2938_v35  ;;  %v2962_v53 = vadd.f32 %v11932_v62, %v2939_v33  ;;  %v2963_v45 = vadd.f32 %v11932_v62, %v2940_v63 }
 0x36d   :  { %v2964_v29 = vadd.f32 %v11932_v62, %v2941_v15  ;;  %v2965_v44 = vadd.f32 %v11932_v62, %v2942_v54  ;;  %vm2974_vm11 = vcmp.gt.f32.partialorder %v2958_v22, 0.0  ;;  %vm2975_vm12 = vcmp.gt.f32.partialorder %v2959_v3, 0.0 }
 0x36e   :  { %vm2976_vm13 = vcmp.gt.f32.partialorder %v2960_v50, 0.0  ;;  %vm2977_vm14 = vcmp.gt.f32.partialorder %v2961_v2, 0.0  ;;  %vm2978_vm15 = vcmp.gt.f32.partialorder %v2962_v53, 0.0  ;;  %vm2979_vm1 = vcmp.gt.f32.partialorder %v2963_v45, 0.0 }
 0x36f   :  { %vm2980_vm2 = vcmp.gt.f32.partialorder %v2964_v29, 0.0  ;;  %vm2981_vm3 = vcmp.gt.f32.partialorder %v2965_v44, 0.0  ;;  %v2990_v55 = vmul.f32 0.01, %v2958_v22  ;;  %v2991_v42 = vmul.f32 0.01, %v2959_v3 }
 0x370   :  { %v2992_v13 = vmul.f32 0.01, %v2960_v50  ;;  %v2993_v25 = vmul.f32 0.01, %v2961_v2  ;;  %v2994_v59 = vmul.f32 0.01, %v2962_v53  ;;  %v2920_v14 = vmul.f32 %v11912_v20, %v11838_v57 }
 0x371   :  { %v2995_v37 = vmul.f32 0.01, %v2963_v45  ;;  %v2996_v51 = vmul.f32 0.01, %v2964_v29  ;;  %v2997_v52 = vmul.f32 0.01, %v2965_v44  ;;  %v3006_v5 = vsel %vm2974_vm11, %v2958_v22, %v2990_v55 }
 0x372   :  { %v3007_v24 = vsel %vm2975_vm12, %v2959_v3, %v2991_v42  ;;  %v3008_v26 = vsel %vm2976_vm13, %v2960_v50, %v2992_v13  ;;  %v3009_v41 = vsel %vm2977_vm14, %v2961_v2, %v2993_v25  ;;  %v3010_v32 = vsel %vm2978_vm15, %v2962_v53, %v2994_v59 }
 0x373   :  { %v3011_v40 = vsel %vm2979_vm1, %v2963_v45, %v2995_v37  ;;  %v3012_v16 = vsel %vm2980_vm2, %v2964_v29, %v2996_v51  ;;  %v3013_v7 = vsel %vm2981_vm3, %v2965_v44, %v2997_v52  ;;  %v3053_v57 = vrot.slane %v3007_v24, 7 }
 0x374   :  { %v3055_v8 = vrot.slane %v3008_v26, 6  ;;  %v3057_v27 = vrot.slane %v3009_v41, 5  ;;  %v3059_v48 = vrot.slane %v3010_v32, 4  ;;  %v3061_v18 = vrot.slane %v3011_v40, 3 }
 0x375   :  { %v3054_v49 = vsel %vm2767_vm4, %v3053_v57, %v3006_v5  ;;  %v3063_v35 = vrot.slane %v3012_v16, 2  ;;  %v3065_v33 = vrot.slane %v3013_v7, 1  ;;  %v2921_v63 = vmul.f32 %v11912_v20, %v11841_v58 }
 0x376   :  { %v3056_v15 = vsel %vm2770_vm5, %v3055_v8, %v3054_v49  ;;  %v2922_v54 = vmul.f32 %v11912_v20, %v11844_v30  ;;  %v2923_v22 = vmul.f32 %v11912_v20, %v11847_v39  ;;  %v2924_v3 = vmul.f32 %v11912_v20, %v11849_v56 }
 0x377   :  { %v3058_v50 = vsel %vm2773_vm6, %v3057_v27, %v3056_v15  ;;  %v2925_v2 = vmul.f32 %v11912_v20, %v11851_v61  ;;  %v2926_v53 = vmul.f32 %v11912_v20, %v11853_v17  ;;  %v2943_v58 = vmul.f32 %v11914_v34, %v2920_v14 }
 0x378   :  { %v3060_v45 = vsel %vm2776_vm7, %v3059_v48, %v3058_v50  ;;  %v2944_v30 = vmul.f32 %v11914_v34, %v2921_v63  ;;  %v2945_v29 = vmul.f32 %v11914_v34, %v2922_v54  ;;  %v2946_v39 = vmul.f32 %v11914_v34, %v2923_v22 }
 0x379   :  { %v3062_v56 = vsel %vm2779_vm8, %v3061_v18, %v3060_v45  ;;  %v2947_v44 = vmul.f32 %v11914_v34, %v2924_v3  ;;  %v2948_v55 = vmul.f32 %v11914_v34, %v2925_v2  ;;  %v2949_v61 = vmul.f32 %v11914_v34, %v2926_v53 }
 0x37a   :  { %v3064_v17 = vsel %vm2782_vm9, %v3063_v35, %v3062_v56  ;;  %v2966_v20 = vadd.f32 %v11932_v62, %v2943_v58  ;;  %v2967_v42 = vadd.f32 %v11932_v62, %v2944_v30  ;;  %v2968_v13 = vadd.f32 %v11932_v62, %v2945_v29  ;;  %v3696_v29 = vld [vmem:[%s8810_s24] sm:$0xff]  ;;  %v3698_v56 = vld [vmem:[%s8810_s24 + $0x10] sm:$0xff] }
 0x37b   :  { %v3066_v25 = vsel %vm15470_vm10, %v3065_v33, %v3064_v17  ;;  %v2969_v59 = vadd.f32 %v11932_v62, %v2946_v39  ;;  %v2970_v14 = vadd.f32 %v11932_v62, %v2947_v44  ;;  %v2971_v34 = vadd.f32 %v11932_v62, %v2948_v55  ;;  %v3697_v39 = vld [vmem:[%s8810_s24 + $0x8] sm:$0xff]  ;;  %v3699_v55 = vld [vmem:[%s8810_s24 + $0x18] sm:$0xff]  ;;  %v3700_v17 = vld [vmem:[%s8810_s24 + $0x20] sm:$0xff] }
 0x37c   :  { %9472 = vmatprep.mubr.msk.f32.mxu1 %vm1075_vm0, %v3066_v25  ;;  %9491 = vmatprep.mubr.msk.f32.mxu0 %vm1075_vm0, %v3066_v25  ;;  %v2972_v37 = vadd.f32 %v11932_v62, %v2949_v61  ;;  %v2973_v51 = vadd.f32 %v11932_v62, %v11935_v38  ;;  %vm2982_vm3 = vcmp.gt.f32.partialorder %v2966_v20, 0.0  ;;  %vm2983_vm11 = vcmp.gt.f32.partialorder %v2967_v42, 0.0 }
 0x37d   :  { %vm2984_vm12 = vcmp.gt.f32.partialorder %v2968_v13, 0.0  ;;  %vm2985_vm13 = vcmp.gt.f32.partialorder %v2969_v59, 0.0  ;;  %vm2986_vm14 = vcmp.gt.f32.partialorder %v2970_v14, 0.0  ;;  %v2998_v52 = vmul.f32 0.01, %v2966_v20 }
 0x37e   :  { %v2999_v5 = vmul.f32 0.01, %v2967_v42  ;;  %v3000_v24 = vmul.f32 0.01, %v2968_v13  ;;  %v3001_v26 = vmul.f32 0.01, %v2969_v59  ;;  %v9842_v44 = vpack.c.bf16 %v3697_v39, %v3696_v29 }
 0x37f   :  { %v3002_v41 = vmul.f32 0.01, %v2970_v14  ;;  %vm2987_vm15 = vcmp.gt.f32.partialorder %v2971_v34, 0.0  ;;  %vm2988_vm1 = vcmp.gt.f32.partialorder %v2972_v37, 0.0  ;;  %v3003_v32 = vmul.f32 0.01, %v2971_v34 }
 0x380   :  { %v3004_v40 = vmul.f32 0.01, %v2972_v37  ;;  %v3005_v16 = vmul.f32 0.01, %v2973_v51  ;;  %v3015_v7 = vsel %vm2983_vm11, %v2967_v42, %v2999_v5  ;;  %v3016_v57 = vsel %vm2984_vm12, %v2968_v13, %v3000_v24  ;;  %9843 = vmatprep.subr.bf16.mxu1 %v9842_v44  ;;  %v3703_v13 = vld [vmem:[%s8810_s24 + $0x38] sm:$0xff]  ;;  %v15655_v5 = vld [vmem:[#allocation5_spill] sm:$0xff] }
 0x381   :  { %v3017_v8 = vsel %vm2985_vm13, %v2969_v59, %v3001_v26  ;;  %vm2989_vm2 = vcmp.gt.f32.partialorder %v2973_v51, 0.0  ;;  %v3018_v62 = vsel %vm2986_vm14, %v2970_v14, %v3002_v41  ;;  %v3067_v38 = vrot.slane %v3015_v7, 7  ;;  %v10376_v59 = vld [vmem:[%s10807_s15 + $0x1] ss:$0 sm:$0xff]  ;;  %v15656_v26 = vld [vmem:[#allocation6_spill] sm:$0xff]  ;;  %v15669_v29 = vld [vmem:[#allocation24_spill] sm:$0xff] }
 0x382   :  { %v3014_v27 = vsel %vm2982_vm3, %v2966_v20, %v2998_v52  ;;  %v3019_v48 = vsel %vm2987_vm15, %v2971_v34, %v3003_v32  ;;  %v3069_v18 = vrot.slane %v3016_v57, 6  ;;  %v3020_v49 = vsel %vm2988_vm1, %v2972_v37, %v3004_v40  ;;  %v3701_v20 = vld [vmem:[%s8810_s24 + $0x28] sm:$0xff]  ;;  %v15653_v14 = vld [vmem:[#allocation7_spill] sm:$0xff]  ;;  %v15658_v7 = vld [vmem:[#allocation10_spill] sm:$0xff] }
 0x383   :  { %v3068_v35 = vsel %vm2767_vm4, %v3067_v38, %v3014_v27  ;;  %v3071_v33 = vrot.slane %v3017_v8, 5  ;;  %v3021_v63 = vsel %vm2989_vm2, %v2973_v51, %v3005_v16  ;;  %v3073_v54 = vrot.slane %v3018_v62, 4  ;;  %v10377_v37 = vld [vmem:[%s10807_s15] ss:$0 sm:$0xff]  ;;  %v15654_v51 = vld [vmem:[#allocation8_spill] sm:$0xff]  ;;  %v15657_v40 = vld [vmem:[#allocation9_spill] sm:$0xff] }
 0x384   :  { %v3070_v15 = vsel %vm2770_vm5, %v3069_v18, %v3068_v35  ;;  %v3075_v3 = vrot.slane %v3019_v48, 3  ;;  %v3077_v2 = vrot.slane %v3020_v49, 2  ;;  %v3079_v58 = vrot.slane %v3021_v63, 1  ;;  %v15659_v8 = vld [vmem:[#allocation11_spill] sm:$0xff]  ;;  %v15660_v38 = vld [vmem:[#allocation12_spill] sm:$0xff]  ;;  %v15662_v49 = vld [vmem:[#allocation17_spill] sm:$0xff] }
 0x385   :  { %v3072_v22 = vsel %vm2773_vm6, %v3071_v33, %v3070_v15  ;;  %v9846_v61 = vpack.c.bf16 %v3699_v55, %v3698_v56  ;;  %v9850_v42 = vpack.c.bf16 %v3701_v20, %v3700_v17  ;;  %v3293_v34 = vmul.f32 %v10376_v59, %v15653_v14  ;;  %v15661_v48 = vld [vmem:[#allocation16_spill] sm:$0xff]  ;;  %v15663_v33 = vld [vmem:[#allocation18_spill] sm:$0xff]  ;;  %v15664_v15 = vld [vmem:[#allocation19_spill] sm:$0xff]  ;;  %s10405_s15 = smov 14  }
 0x386   :  { %v3074_v50 = vsel %vm2776_vm7, %v3073_v54, %v3072_v22  ;;  %v3256_v52 = vmul.f32 %v10377_v37, %v15654_v51  ;;  %v3292_v24 = vmul.f32 %v10376_v59, %v15655_v5  ;;  %v3255_v41 = vmul.f32 %v10377_v37, %v15656_v26  ;;  %v15665_v22 = vld [vmem:[#allocation20_spill] sm:$0xff]  ;;  %v15670_v56 = vld [vmem:[#allocation25_spill] sm:$0xff]  ;;  %v15671_v55 = vld [vmem:[#allocation26_spill] sm:$0xff]  ;;  %s12053_s1 = sld [smem:[%s15256_s0 + %s10405_s15]]   ;;  %s10412_s15 = smov 29  }
 0x387   :  { %v3076_v53 = vsel %vm2779_vm8, %v3075_v3, %v3074_v50  ;;  %v3294_v16 = vmul.f32 %v10376_v59, %v15657_v40  ;;  %v3257_v57 = vmul.f32 %v10377_v37, %v15658_v7  ;;  %v3295_v62 = vmul.f32 %v10376_v59, %v15659_v8  ;;  %v15666_v50 = vld [vmem:[#allocation21_spill] sm:$0xff]  ;;  %v8910_v17 = vld [vmem:[%s8808_s28] ss:$0 sm:$0xff]  ;;  %s8829_s28 = sld [smem:[%s15256_s0 + %s10411_s25]]  }
 0x388   :  { %v3078_v45 = vsel %vm2782_vm9, %v3077_v2, %v3076_v53  ;;  %v12025_v32 = vadd.f32 %v3293_v34, %v3256_v52  ;;  %v3258_v27 = vmul.f32 %v10377_v37, %v15660_v38  ;;  %v3296_v18 = vmul.f32 %v10376_v59, %v15661_v48  ;;  %v15667_v53 = vld [vmem:[#allocation22_spill] sm:$0xff]  ;;  %v15672_v20 = vld [vmem:[#allocation27_spill] sm:$0xff]  ;;  %v15682_v7 = vld [vmem:[#allocation37_spill] sm:$0xff] }
 0x389   :  { %v3080_v30 = vsel %vm15470_vm10, %v3079_v58, %v3078_v45  ;;  %v3259_v35 = vmul.f32 %v10377_v37, %v15662_v49  ;;  %v3297_v63 = vmul.f32 %v10376_v59, %v15663_v33  ;;  %v3260_v54 = vmul.f32 %v10377_v37, %v15664_v15  ;;  %v15668_v45 = vld [vmem:[#allocation23_spill] sm:$0xff]  ;;  %v15675_v52 = vld [vmem:[#allocation30_spill] sm:$0xff]  ;;  %v15686_v14 = vld [vmem:[#allocation41_spill] sm:$0xff] }
 0x38a   :  { %9473 = vmatmul.mubr.msk.f32.vlgmr.msra.gmra.mrb[24].mxu1 %vm1075_vm0, %v3080_v30  ;;  %9492 = vmatmul.mubr.msk.f32.vlgmr.msra.gmra.mrb[40].mxu0 %vm1075_vm0, %v3080_v30  ;;  %v3298_v3 = vmul.f32 %v10376_v59, %v15665_v22  ;;  %v3261_v2 = vmul.f32 %v10377_v37, %v15666_v50  ;;  %v3299_v58 = vmul.f32 %v10376_v59, %v15667_v53  ;;  %v15676_v53 = vld [vmem:[#allocation31_spill] sm:$0xff] }
 0x38b   :  { %9861 = vmatpush3.bf16.msra.mxu0 %v15651_v46  ;;  %9845 = vmatpush3.bf16.msra.mxu1 %v9842_v44  ;;  %v3702_v46 = vld [vmem:[%s8810_s24 + $0x30] sm:$0xff]  ;;  %v3262_v30 = vmul.f32 %v10377_v37, %v15668_v45  ;;  %v3300_v39 = vmul.f32 %v10376_v59, %v15669_v29  ;;  %v3263_v44 = vmul.f32 %v10377_v37, %v15670_v56  ;;  %v15677_v45 = vld [vmem:[#allocation32_spill] sm:$0xff]  ;;  %s8828_s24 = sld [smem:[%s15256_s0 + %s10410_s20]]  }
 0x38c   :  { %9847 = vmatprep.subr.bf16.mxu1 %v9846_v61  ;;  %v9854_v25 = vpack.c.bf16 %v3703_v13, %v3702_v46  ;;  %v15673_v46 = vld [vmem:[#allocation28_spill] sm:$0xff]  ;;  %v3303_v22 = vmul.f32 %v10376_v59, %v15675_v52  ;;  %v3266_v33 = vmul.f32 %v10377_v37, %v15676_v53  ;;  %v3304_v49 = vmul.f32 %v10376_v59, %v15677_v45  ;;  %v15678_v29 = vld [vmem:[#allocation33_spill] sm:$0xff]  ;;  %v15679_v56 = vld [vmem:[#allocation34_spill] sm:$0xff] }
 0x38d   :  { %v3302_v13 = vmul.f32 %v10376_v59, %v15673_v46  ;;  %v3267_v48 = vmul.f32 %v10377_v37, %v15678_v29  ;;  %v3305_v38 = vmul.f32 %v10376_v59, %v15679_v56  ;;  %v3269_v53 = vmul.f32 %v10377_v37, %v15682_v7  ;;  %v15683_v45 = vld [vmem:[#allocation38_spill] sm:$0xff]  ;;  %v15684_v29 = vld [vmem:[#allocation39_spill] sm:$0xff]  ;;  %v15685_v56 = vld [vmem:[#allocation40_spill] sm:$0xff] }
 0x38e   :  { %v3307_v26 = vmul.f32 %v10376_v59, %v15683_v45  ;;  %v3270_v5 = vmul.f32 %v10377_v37, %v15684_v29  ;;  %v3308_v51 = vmul.f32 %v10376_v59, %v15685_v56  ;;  %v3271_v28 = vmul.f32 %v10377_v37, %v15686_v14  ;;  %v15693_v56 = vld [vmem:[#allocation47_spill] sm:$0xff] }
 0x38f   :  { %9849 = vmatpush3.bf16.msra.mxu1 %v9846_v61  ;;  %v3301_v61 = vmul.f32 %v10376_v59, %v15671_v55  ;;  %v15681_v55 = vld [vmem:[#allocation36_spill] sm:$0xff]  ;;  %v12063_v43 = vmul.f32 %v10376_v59, %v15687_v60  ;;  %v12066_v10 = vmul.f32 %v10377_v37, %v15688_v19  ;;  %v3310_v7 = vmul.f32 %v10376_v59, %v15690_v1 }
 0x390   :  { %9851 = vmatprep.subr.bf16.mxu1 %v9850_v42  ;;  %v3306_v8 = vmul.f32 %v10376_v59, %v15681_v55  ;;  %v3311_v29 = vmul.f32 %v10376_v59, %v15692_v6  ;;  %v3274_v11 = vmul.f32 %v10377_v37, %v15693_v56  ;;  %v3324_v23 = vadd.f32 %v3292_v24, %v3255_v41  ;;  %v8907_v59 = vld [vmem:[%s12053_s1] ss:$0 sm:$0xff]  ;;  %s8821_s1 = sld [smem:[%s15256_s0 + %s10412_s15]]  }
 0x391   :  { %v3326_v60 = vadd.f32 %v3294_v16, %v3257_v57  ;;  %v3327_v47 = vadd.f32 %v3295_v62, %v3258_v27  ;;  %v3328_v0 = vadd.f32 %v3296_v18, %v3259_v35  ;;  %v12073_v19 = vadd.f32 %v3297_v63, %v3260_v54 }
 0x392   :  { %v12090_v57 = vadd.f32 %v3303_v22, %v3266_v33  ;;  %v12092_v62 = vadd.f32 %v3304_v49, %v3267_v48  ;;  %v12098_v18 = vadd.f32 %v3307_v26, %v3270_v5  ;;  %v12100_v35 = vadd.f32 %v3308_v51, %v3271_v28 }
 0x393   :  { %9853 = vmatpush3.bf16.msra.mxu1 %v9850_v42  ;;  %v3264_v42 = vmul.f32 %v10377_v37, %v15672_v20  ;;  %v15680_v20 = vld [vmem:[#allocation35_spill] sm:$0xff]  ;;  %v12113_v51 = vadd.f32 %v3311_v29, %v3274_v11 }
 0x394   :  { %9855 = vmatprep.subr.bf16.mxu1 %v9854_v25  ;;  %v3268_v52 = vmul.f32 %v10377_v37, %v15680_v20 }
 0x395   :  { %v12085_v24 = vadd.f32 %v3301_v61, %v3264_v42 }
 0x396   :  { %v12094_v27 = vadd.f32 %v3305_v38, %v3268_v52 }
 0x397   :  { %9857 = vmatpush3.bf16.msra.mxu1 %v9854_v25  ;;  %v15674_v25 = vld [vmem:[#allocation29_spill] sm:$0xff] }
 0x398   :  { %v3265_v34 = vmul.f32 %v10377_v37, %v15674_v25 }
 0x39a   :  { %v12087_v41 = vadd.f32 %v3302_v13, %v3265_v34 }
 0x45d   :  { %v9474_v50 = vpop.f32.mrb[24].mxu1  ;;  %v9493_v15 = vpop.f32.mrb[40].mxu0 }
 0x45e   :  { %v3151_v46 = vpop.f32.mrb[25].mxu1  ;;  %v3241_v25 = vpop.f32.mrb[41].mxu0  ;;  %v3247_v20 = vadd.f32 %v9493_v15, %v8910_v17  ;;  %v12075_v15 = vadd.f32 %v3298_v3, %v3261_v2  ;;  %v12104_v63 = vadd.f32 %v9474_v50, %v8907_v59 }
 0x45f   :  { %v3242_v40 = vadd.f32 %v8910_v17, %v3241_v25  ;;  %v15691_v25 = vld [vmem:[#allocation45_spill] sm:$0xff]  ;;  %v12107_v33 = vadd.f32 %v8907_v59, %v3151_v46 }
 0x460   :  { %v3273_v45 = vmul.f32 %v10377_v37, %v15691_v25  ;;  %v3407_v17 = vcombine.high %v3247_v20, %v3247_v20  ;;  %v12079_v25 = vadd.f32 %v3299_v58, %v3262_v30  ;;  %v12083_v37 = vadd.f32 %v3300_v39, %v3263_v44 }
 0x461   :  { %v3365_v55 = vrot.slane %v3242_v40, %v15689_v36  ;;  %v3358_v31 = vcombine.high %v3242_v40, %v3242_v40  ;;  %v3414_v16 = vrot.slane %v3247_v20, %v15689_v36 }
 0x462   :  { %v3421_v54 = vrot.slane %v3407_v17, %v15689_v36 }
 0x463   :  { %v3373_v14 = vcombine.high %v3365_v55, %v3365_v55  ;;  %v3381_v1 = vrot.slane %v3365_v55, %v15689_v36  ;;  %v3372_v40 = vrot.slane %v3358_v31, %v15689_v36  ;;  %v12102_v31 = vadd.f32 %v3310_v7, %v3273_v45 }
 0x464   :  { %v3422_v49 = vcombine.high %v3414_v16, %v3414_v16  ;;  %v12116_v26 = vrot.slane %v3414_v16, %v15689_v36  ;;  %v12129_v46 = vrot.slane %v3421_v54, %v15689_v36 }
 0x465   :  { %v3395_v4 = vrot.slane %v3373_v14, %v15689_v36  ;;  %v12096_v14 = vadd.f32 %v3306_v8, %v3269_v53  ;;  %v3403_v3 = vcombine.high %v3381_v1, %v3381_v1  ;;  %v3374_v48 = vcombine.high %v3372_v40, %v3372_v40 }
 0x466   :  { %v3459_v38 = vrot.slane %v3381_v1, %v15652_v21  ;;  %v3423_v53 = vcombine.high %v3421_v54, %v3421_v54  ;;  %v3388_v1 = vrot.slane %v3372_v40, %v15689_v36  ;;  %v3444_v40 = vrot.slane %v3422_v49, %v15689_v36 }
 0x467   :  { %v3405_v2 = vcombine.high %v3395_v4, %v3395_v4  ;;  %v3463_v8 = vrot.slane %v3395_v4, %v15652_v21  ;;  %v3467_v5 = vrot.slane %v3403_v3, %v15652_v21  ;;  %v3402_v45 = vrot.slane %v3374_v48, %v15689_v36 }
 0x468   :  { %v3536_v7 = vadd.f32 %v3459_v38, %v12107_v33  ;;  %v3537_v22 = vadd.f32 %v3459_v38, %v12104_v63  ;;  %v3475_v13 = vrot.slane %v3388_v1, %v15652_v21  ;;  %v3404_v34 = vcombine.high %v3388_v1, %v3388_v1 }
 0x469   :  { %v3471_v28 = vrot.slane %v3405_v2, %v15652_v21  ;;  %v3538_v50 = vadd.f32 %v3463_v8, %v12107_v33  ;;  %v3539_v4 = vadd.f32 %v3463_v8, %v12104_v63  ;;  %v3540_v58 = vadd.f32 %v3467_v5, %v12107_v33 }
 0x46a   :  { %v3568_v11 = vadd.f32 %v3536_v7, %v3324_v23  ;;  %v3569_v30 = vadd.f32 %v3537_v22, %v12025_v32  ;;  %v3541_v55 = vadd.f32 %v3467_v5, %v12104_v63  ;;  %v3479_v32 = vrot.slane %v3402_v45, %v15652_v21 }
 0x46b   :  { %v3570_v29 = vadd.f32 %v3538_v50, %v3326_v60  ;;  %v3571_v39 = vadd.f32 %v3539_v4, %v3327_v47  ;;  %v3572_v44 = vadd.f32 %v3540_v58, %v3328_v0  ;;  %v3542_v61 = vadd.f32 %v3471_v28, %v12107_v33 }
 0x46c   :  { %vm3600_vm3 = vcmp.gt.f32.partialorder %v3568_v11, 0.0  ;;  %v3632_v20 = vmul.f32 0.2, %v3568_v11  ;;  %vm3601_vm11 = vcmp.gt.f32.partialorder %v3569_v30, 0.0  ;;  %v3633_v42 = vmul.f32 0.2, %v3569_v30 }
 0x46d   :  { %vm3602_vm12 = vcmp.gt.f32.partialorder %v3570_v29, 0.0  ;;  %v3634_v23 = vmul.f32 0.2, %v3570_v29  ;;  %v3543_v0 = vadd.f32 %v3471_v28, %v12104_v63  ;;  %v3635_v17 = vmul.f32 0.2, %v3571_v39 }
 0x46e   :  { %v3664_v60 = vsel %vm3600_vm3, %v3568_v11, %v3632_v20  ;;  %v3665_v47 = vsel %vm3601_vm11, %v3569_v30, %v3633_v42  ;;  %v3573_v59 = vadd.f32 %v3541_v55, %v12073_v19  ;;  %vm3603_vm13 = vcmp.gt.f32.partialorder %v3571_v39, 0.0 }
 0x46f   :  { %9510 = vmatprep.mubr.msk.f32.mxu1 %vm1075_vm0, %v3664_v60  ;;  %v3666_v52 = vsel %vm3602_vm12, %v3570_v29, %v3634_v23  ;;  %v3636_v16 = vmul.f32 0.2, %v3572_v44  ;;  %v3574_v54 = vadd.f32 %v3542_v61, %v12075_v15  ;;  %v3452_v3 = vcombine.high %v12116_v26, %v12116_v26 }
 0x470   :  { %9511 = vmatmul.mubr.msk.f32.vlgmr.msra.gmra.mrb[26].mxu1 %vm1075_vm0, %v3665_v47  ;;  %vm3604_vm14 = vcmp.gt.f32.partialorder %v3572_v44, 0.0  ;;  %v3544_v2 = vadd.f32 %v3475_v13, %v12107_v33  ;;  %v3545_v48 = vadd.f32 %v3475_v13, %v12104_v63  ;;  %v12145_v19 = vrot.slane %v3423_v53, %v15689_v36 }
 0x471   :  { %9513 = vmatprep.mubr.msk.f32.mxu1 %vm1075_vm0, %v3666_v52  ;;  %v3491_v38 = vrot.slane %v12116_v26, %v15652_v21  ;;  %v3575_v8 = vadd.f32 %v3543_v0, %v12079_v25  ;;  %v3546_v15 = vadd.f32 %v3479_v32, %v12107_v33  ;;  %v3406_v49 = vcombine.high %v3402_v45, %v3402_v45 }
 0x472   :  { %v3483_v5 = vrot.slane %v3404_v34, %v15652_v21  ;;  %v3667_v28 = vsel %vm3603_vm13, %v3571_v39, %v3635_v17  ;;  %v3637_v7 = vmul.f32 0.2, %v3573_v59  ;;  %v3668_v22 = vsel %vm3604_vm14, %v3572_v44, %v3636_v16 }
 0x473   :  { %vm3605_vm15 = vcmp.gt.f32.partialorder %v3573_v59, 0.0  ;;  %v3638_v50 = vmul.f32 0.2, %v3574_v54  ;;  %v3576_v53 = vadd.f32 %v3544_v2, %v12083_v37  ;;  %v3453_v1 = vcombine.high %v12129_v46, %v12129_v46 }
 0x474   :  { %9514 = vmatmul.mubr.msk.f32.gmra.mrb[28].mxu1 %vm1075_vm0, %v3667_v28  ;;  %vm3606_vm1 = vcmp.gt.f32.partialorder %v3574_v54, 0.0  ;;  %v3577_v25 = vadd.f32 %v3545_v48, %v12085_v24  ;;  %v3547_v26 = vadd.f32 %v3479_v32, %v12104_v63  ;;  %v3454_v4 = vcombine.high %v3444_v40, %v3444_v40 }
 0x475   :  { %9516 = vmatprep.mubr.msk.f32.mxu1 %vm1075_vm0, %v3668_v22  ;;  %v3495_v58 = vrot.slane %v3444_v40, %v15652_v21  ;;  %v3639_v45 = vmul.f32 0.2, %v3575_v8  ;;  %v3578_v11 = vadd.f32 %v3546_v15, %v12087_v41  ;;  %v3669_v30 = vsel %vm3605_vm15, %v3573_v59, %v3637_v7 }
 0x476   :  { %vm3607_vm2 = vcmp.gt.f32.partialorder %v3575_v8, 0.0  ;;  %v3548_v37 = vadd.f32 %v3483_v5, %v12107_v33  ;;  %v3487_v29 = vrot.slane %v3406_v49, %v15652_v21  ;;  %v3499_v39 = vrot.slane %v3452_v3, %v15652_v21 }
 0x477   :  { %v3507_v44 = vrot.slane %v12129_v46, %v15652_v21  ;;  %v3670_v24 = vsel %vm3606_vm1, %v3574_v54, %v3638_v50  ;;  %v3640_v55 = vmul.f32 0.2, %v3576_v53  ;;  %v3553_v61 = vadd.f32 %v3491_v38, %v12104_v63 }
 0x478   :  { %9517 = vmatmul.mubr.msk.f32.gmra.mrb[30].mxu1 %vm1075_vm0, %v3669_v30  ;;  %vm3608_vm3 = vcmp.gt.f32.partialorder %v3576_v53, 0.0  ;;  %v3641_v41 = vmul.f32 0.2, %v3577_v25  ;;  %v3579_v20 = vadd.f32 %v3547_v26, %v12090_v57  ;;  %v3671_v42 = vsel %vm3607_vm2, %v3575_v8, %v3639_v45  ;;  %v15696_v26 = vld [vmem:[#allocation54_spill] sm:$0xff] }
 0x479   :  { %9519 = vmatprep.mubr.msk.f32.mxu1 %vm1075_vm0, %v3670_v24  ;;  %vm3609_vm11 = vcmp.gt.f32.partialorder %v3577_v25, 0.0  ;;  %v3642_v13 = vmul.f32 0.2, %v3578_v11  ;;  %v3549_v23 = vadd.f32 %v3483_v5, %v12104_v63  ;;  %vm3610_vm12 = vcmp.gt.f32.partialorder %v3578_v11, 0.0 }
 0x47a   :  { %v3580_v46 = vadd.f32 %v3548_v37, %v12092_v62  ;;  %v3550_v32 = vadd.f32 %v3487_v29, %v12107_v33  ;;  %v3554_v60 = vadd.f32 %v3495_v58, %v12107_v33  ;;  %v3503_v47 = vrot.slane %v3454_v4, %v15652_v21  ;;  %v15698_v37 = vld [vmem:[#allocation60_spill] sm:$0xff] }
 0x47b   :  { %v3511_v0 = vrot.slane %v12145_v19, %v15652_v21  ;;  %v3552_v34 = vadd.f32 %v3491_v38, %v12107_v33  ;;  %v3672_v57 = vsel %vm3608_vm3, %v3576_v53, %v3640_v55  ;;  %v3673_v52 = vsel %vm3609_vm11, %v3577_v25, %v3641_v41 }
 0x47c   :  { %9520 = vmatmul.mubr.msk.f32.gmra.mrb[32].mxu1 %vm1075_vm0, %v3671_v42  ;;  %vm3611_vm13 = vcmp.gt.f32.partialorder %v3579_v20, 0.0  ;;  %v3643_v17 = vmul.f32 0.2, %v3579_v20  ;;  %v12181_v62 = vadd.f32 %v3554_v60, %v12102_v31  ;;  %v3674_v59 = vsel %vm3610_vm12, %v3578_v11, %v3642_v13  ;;  %v15694_v31 = vld [vmem:[#allocation48_spill] sm:$0xff] }
 0x47d   :  { %9522 = vmatprep.mubr.msk.f32.mxu1 %vm1075_vm0, %v3672_v57  ;;  %v3581_v40 = vadd.f32 %v3549_v23, %v12094_v27  ;;  %v3555_v16 = vadd.f32 %v3495_v58, %v12104_v63  ;;  %v3556_v54 = vadd.f32 %v3499_v39, %v12107_v33  ;;  %v3644_v3 = vmul.f32 0.2, %v3580_v46  ;;  %v15697_v58 = vld [vmem:[#allocation57_spill] sm:$0xff]  ;;  %v15702_v60 = vld [vmem:[#allocation72_spill] sm:$0xff] }
 0x47e   :  { %v3582_v2 = vadd.f32 %v3550_v32, %v12096_v14  ;;  %v3551_v48 = vadd.f32 %v3487_v29, %v12104_v63  ;;  %v3557_v38 = vadd.f32 %v3499_v39, %v12104_v63  ;;  %v3558_v27 = vadd.f32 %v3503_v47, %v12107_v33  ;;  %v15695_v14 = vld [vmem:[#allocation51_spill] sm:$0xff] }
 0x47f   :  { %v12191_v8 = vadd.f32 %v3555_v16, %v12113_v51  ;;  %v12194_v15 = vadd.f32 %v3556_v54, %v15694_v31  ;;  %v3559_v49 = vadd.f32 %v3503_v47, %v12104_v63  ;;  %vm3612_vm14 = vcmp.gt.f32.partialorder %v3580_v46, 0.0 }
 0x480   :  { %9523 = vmatmul.mubr.msk.f32.gmra.mrb[34].mxu1 %vm1075_vm0, %v3673_v52  ;;  %v12200_v5 = vadd.f32 %v3557_v38, %v15695_v14  ;;  %v3560_v28 = vadd.f32 %v3507_v44, %v12107_v33  ;;  %v3561_v7 = vadd.f32 %v3507_v44, %v12104_v63  ;;  %v3515_v51 = vrot.slane %v3453_v1, %v15652_v21  ;;  %v15699_v1 = vld [vmem:[#allocation63_spill] sm:$0xff] }
 0x481   :  { %9525 = vmatprep.mubr.msk.f32.mxu1 %vm1075_vm0, %v3674_v59  ;;  %v3675_v22 = vsel %vm3611_vm13, %v3579_v20, %v3643_v17  ;;  %v3645_v50 = vmul.f32 0.2, %v3581_v40  ;;  %v3584_v53 = vadd.f32 %v3552_v34, %v12100_v35  ;;  %vm3613_vm15 = vcmp.gt.f32.partialorder %v3581_v40, 0.0  ;;  %v15705_v38 = vld [vmem:[#allocation83_spill] sm:$0xff] }
 0x482   :  { %v3583_v25 = vadd.f32 %v3551_v48, %v12098_v18  ;;  %v3590_v4 = vadd.f32 %v3558_v27, %v15696_v26  ;;  %v12210_v45 = vadd.f32 %v3559_v49, %v15697_v58  ;;  %v3676_v11 = vsel %vm3612_vm14, %v3580_v46, %v3644_v3  ;;  %v15701_v46 = vld [vmem:[#allocation69_spill] sm:$0xff] }
 0x483   :  { %v3646_v30 = vmul.f32 0.2, %v3582_v2  ;;  %v12214_v29 = vadd.f32 %v3560_v28, %v15698_v37  ;;  %v12217_v39 = vadd.f32 %v3561_v7, %v15699_v1  ;;  %v3455_v35 = vcombine.high %v12145_v19, %v12145_v19 }
 0x484   :  { %9526 = vmatmul.mubr.msk.f32.gmra.mrb[36].mxu1 %vm1075_vm0, %v3675_v22  ;;  %vm3614_vm1 = vcmp.gt.f32.partialorder %v3582_v2, 0.0  ;;  %v3341_v18 = vadd.f32 %v12063_v43, %v12066_v10  ;;  %v3677_v44 = vsel %vm3613_vm15, %v3581_v40, %v3645_v50  ;;  %v3648_v24 = vmul.f32 0.2, %v3584_v53  ;;  %v15700_v10 = vld [vmem:[#allocation66_spill] sm:$0xff] }
 0x485   :  { %9528 = vmatprep.mubr.msk.f32.mxu1 %vm1075_vm0, %v3676_v11  ;;  %v3647_v55 = vmul.f32 0.2, %v3583_v25  ;;  %v3562_v20 = vadd.f32 %v3511_v0, %v12107_v33  ;;  %v3563_v42 = vadd.f32 %v3511_v0, %v12104_v63  ;;  %v3678_v13 = vsel %vm3614_vm1, %v3582_v2, %v3646_v30  ;;  %v15703_v0 = vld [vmem:[#allocation75_spill] sm:$0xff]  ;;  %v15704_v2 = vld [vmem:[#allocation78_spill] sm:$0xff] }
 0x486   :  { %v3585_v41 = vadd.f32 %v3553_v61, %v3341_v18  ;;  %vm3615_vm2 = vcmp.gt.f32.partialorder %v3583_v25, 0.0  ;;  %v3564_v19 = vadd.f32 %v3515_v51, %v12107_v33  ;;  %v3565_v23 = vadd.f32 %v3515_v51, %v12104_v63 }
 0x487   :  { %vm3616_vm3 = vcmp.gt.f32.partialorder %v3584_v53, 0.0  ;;  %v3594_v43 = vadd.f32 %v3562_v20, %v15700_v10  ;;  %v3595_v32 = vadd.f32 %v3563_v42, %v15701_v46  ;;  %v3519_v61 = vrot.slane %v3455_v35, %v15652_v21  ;;  %v15707_v20 = vld [vmem:[#allocation98_spill] sm:$0xff] }
 0x488   :  { %9529 = vmatmul.mubr.msk.f32.gmra.mrb[38].mxu1 %vm1075_vm0, %v3677_v44  ;;  %v3596_v47 = vadd.f32 %v3564_v19, %v15702_v60  ;;  %v3597_v34 = vadd.f32 %v3565_v23, %v15703_v0  ;;  %v3679_v57 = vsel %vm3615_vm2, %v3583_v25, %v3647_v55  ;;  %v3649_v52 = vmul.f32 0.2, %v3585_v41 }
 0x489   :  { %9531 = vmatprep.mubr.msk.f32.mxu1 %vm1075_vm0, %v3678_v13  ;;  %v3680_v17 = vsel %vm3616_vm3, %v3584_v53, %v3648_v24  ;;  %vm3617_vm11 = vcmp.gt.f32.partialorder %v3585_v41, 0.0  ;;  %v3650_v59 = vmul.f32 0.2, %v12181_v62  ;;  %vm3618_vm12 = vcmp.gt.f32.partialorder %v12181_v62, 0.0  ;;  %v15706_v24 = vld [vmem:[#allocation99_spill] sm:$0xff] }
 0x48a   :  { %v3566_v40 = vadd.f32 %v3519_v61, %v12107_v33  ;;  %v3567_v16 = vadd.f32 %v3519_v61, %v12104_v63  ;;  %v3681_v54 = vsel %vm3617_vm11, %v3585_v41, %v3649_v52  ;;  %v3651_v3 = vmul.f32 0.2, %v12191_v8  ;;  %v15711_v61 = vld [vmem:[#allocation102_spill] sm:$0xff] }
 0x48b   :  { %v3682_v27 = vsel %vm3618_vm12, %v12181_v62, %v3650_v59  ;;  %vm3619_vm13 = vcmp.gt.f32.partialorder %v12191_v8, 0.0  ;;  %v3652_v49 = vmul.f32 0.2, %v12194_v15  ;;  %vm3620_vm14 = vcmp.gt.f32.partialorder %v12194_v15, 0.0  ;;  %v15714_v59 = vld [vmem:[#allocation109_spill] sm:$0xff] }
 0x48c   :  { %9532 = vmatmul.mubr.msk.f32.gmra.mrb[40].mxu1 %vm1075_vm0, %v3679_v57  ;;  %v3598_v48 = vadd.f32 %v3566_v40, %v15704_v2  ;;  %v3599_v31 = vadd.f32 %v3567_v16, %v15705_v38  ;;  %v3683_v14 = vsel %vm3619_vm13, %v12191_v8, %v3651_v3  ;;  %v3653_v28 = vmul.f32 0.2, %v12200_v5 }
 0x48d   :  { %9534 = vmatprep.mubr.msk.f32.mxu1 %vm1075_vm0, %v3680_v17  ;;  %v3684_v7 = vsel %vm3620_vm14, %v12194_v15, %v3652_v49  ;;  %vm3621_vm15 = vcmp.gt.f32.partialorder %v12200_v5, 0.0  ;;  %v3654_v51 = vmul.f32 0.2, %v3590_v4  ;;  %vm3622_vm1 = vcmp.gt.f32.partialorder %v3590_v4, 0.0 }
 0x48e   :  { %v3685_v62 = vsel %vm3621_vm15, %v12200_v5, %v3653_v28  ;;  %v3655_v22 = vmul.f32 0.2, %v12210_v45  ;;  %vm3623_vm2 = vcmp.gt.f32.partialorder %v12210_v45, 0.0  ;;  %v3656_v8 = vmul.f32 0.2, %v12214_v29 }
 0x48f   :  { %v3686_v50 = vsel %vm3622_vm1, %v3590_v4, %v3654_v51  ;;  %vm3624_vm3 = vcmp.gt.f32.partialorder %v12214_v29, 0.0  ;;  %v3657_v53 = vmul.f32 0.2, %v12217_v39  ;;  %vm3625_vm11 = vcmp.gt.f32.partialorder %v12217_v39, 0.0 }
 0x490   :  { %9535 = vmatmul.mubr.msk.f32.gmra.mrb[42].mxu1 %vm1075_vm0, %v3681_v54  ;;  %v3687_v15 = vsel %vm3623_vm2, %v12210_v45, %v3655_v22  ;;  %v3688_v5 = vsel %vm3624_vm3, %v12214_v29, %v3656_v8  ;;  %v3658_v25 = vmul.f32 0.2, %v3594_v43  ;;  %vm3626_vm12 = vcmp.gt.f32.partialorder %v3594_v43, 0.0  ;;  %v15715_v54 = vld [vmem:[#allocation108_spill] sm:$0xff]  ;;  %v15719_v22 = vld [vmem:[#allocation115_spill] sm:$0xff] }
 0x491   :  { %9537 = vmatprep.mubr.msk.f32.mxu1 %vm1075_vm0, %v3682_v27  ;;  %v3689_v26 = vsel %vm3625_vm11, %v12217_v39, %v3657_v53  ;;  %v3659_v4 = vmul.f32 0.2, %v3595_v32  ;;  %vm3627_vm13 = vcmp.gt.f32.partialorder %v3595_v32, 0.0  ;;  %v3660_v45 = vmul.f32 0.2, %v3596_v47 }
 0x492   :  { %v3690_v58 = vsel %vm3626_vm12, %v3594_v43, %v3658_v25  ;;  %vm3628_vm14 = vcmp.gt.f32.partialorder %v3596_v47, 0.0  ;;  %v3661_v30 = vmul.f32 0.2, %v3597_v34  ;;  %vm3629_vm15 = vcmp.gt.f32.partialorder %v3597_v34, 0.0  ;;  %v15710_v43 = vld [vmem:[#allocation103_spill] sm:$0xff] }
 0x493   :  { %v3691_v11 = vsel %vm3627_vm13, %v3595_v32, %v3659_v4  ;;  %v3692_v37 = vsel %vm3628_vm14, %v3596_v47, %v3660_v45  ;;  %v3662_v29 = vmul.f32 0.2, %v3598_v48  ;;  %vm3630_vm1 = vcmp.gt.f32.partialorder %v3598_v48, 0.0 }
 0x494   :  { %9538 = vmatmul.mubr.msk.f32.gmra.mrb[44].mxu1 %vm1075_vm0, %v3683_v14  ;;  %v3693_v1 = vsel %vm3629_vm15, %v3597_v34, %v3661_v30  ;;  %v3663_v39 = vmul.f32 0.2, %v3599_v31  ;;  %vm3631_vm2 = vcmp.gt.f32.partialorder %v3599_v31, 0.0  ;;  %vm15708_vm3 = vcmask 130048  }
 0x495   :  { %9540 = vmatprep.mubr.msk.f32.mxu1 %vm1075_vm0, %v3684_v7  ;;  %v3694_v35 = vsel %vm3630_vm1, %v3598_v48, %v3662_v29  ;;  %vm15709_vm11 = vmmov %vm15708_vm3  ;;  %v15718_v7 = vld [vmem:[#allocation116_spill] sm:$0xff] }
 0x496   :  { %v3695_v18 = vsel %vm3631_vm2, %v3599_v31, %v3663_v39  ;;  %vm15712_vm12 = vmmov %vm15708_vm3 }
 0x497   :  { %vm15713_vm13 = vmmov %vm15708_vm3 }
 0x498   :  { %9541 = vmatmul.mubr.msk.f32.gmra.mrb[46].mxu1 %vm1075_vm0, %v3685_v62  ;;  %vm15716_vm14 = vmmov %vm15708_vm3 }
 0x499   :  { %9543 = vmatprep.mubr.msk.f32.mxu1 %vm1075_vm0, %v3686_v50  ;;  %vm15717_vm15 = vmmov %vm15708_vm3 }
 0x49a   :  { %vm15720_vm1 = vmmov %vm15708_vm3 }
 0x49b   :  { %vm15721_vm2 = vmmov %vm15720_vm1 }
 0x49c   :  { %9544 = vmatmul.mubr.msk.f32.gmra.mrb[48].mxu1 %vm1075_vm0, %v3687_v15 }
 0x49d   :  { %9546 = vmatprep.mubr.msk.f32.mxu1 %vm1075_vm0, %v3688_v5 }
 0x4a0   :  { %9547 = vmatmul.mubr.msk.f32.gmra.mrb[50].mxu1 %vm1075_vm0, %v3689_v26 }
 0x4a1   :  { %9549 = vmatprep.mubr.msk.f32.mxu1 %vm1075_vm0, %v3690_v58 }
 0x4a4   :  { %9550 = vmatmul.mubr.msk.f32.gmra.mrb[52].mxu1 %vm1075_vm0, %v3691_v11 }
 0x4a5   :  { %9552 = vmatprep.mubr.msk.f32.mxu1 %vm1075_vm0, %v3692_v37  ;;  %v15722_v37 = vld [vmem:[#allocation82_spill] sm:$0xff] }
 0x4a8   :  { %9553 = vmatmul.mubr.msk.f32.gmra.mrb[54].mxu1 %vm1075_vm0, %v3693_v1  ;;  %v15723_v1 = vld [vmem:[#allocation81_spill] sm:$0xff] }
 0x4a9   :  { %9555 = vmatprep.mubr.msk.f32.mxu1 %vm1075_vm0, %v3694_v35 }
 0x4ac   :  { %9556 = vmatmul.mubr.msk.f32.gmra.mrb[56].mxu1 %vm1075_vm0, %v3695_v18 }
 0x543   :  { %v9512_v44 = vpop.f32.mrb[26].mxu1 }
 0x544   :  { %v4026_v55 = vadd.f32 %v9512_v44, %v15706_v24  ;;  %v3866_v41 = vpop.f32.mrb[27].mxu1  ;;  %v15892_v24 = vld [vmem:[#allocation35_spill] sm:$0xff] }
 0x545   :  { %v4025_v42 = vadd.f32 %v3866_v41, %v15707_v20 }
 0x546   :  { %v4058_v13 = vsel %vm15708_vm3, %v4026_v55, -inf  ;;  %vm15724_vm3 = vmmov %vm15720_vm1 }
 0x547   :  { %v4057_v19 = vsel %vm15709_vm11, %v4025_v42, -inf  ;;  %v9515_v23 = vpop.f32.mrb[28].mxu1  ;;  %vm15725_vm11 = vmmov %vm15720_vm1 }
 0x548   :  { %v4059_v10 = vmax.f32 %v4057_v19, %v4058_v13  ;;  %v12282_v46 = vadd.f32 %v9515_v23, %v15710_v43  ;;  %v3876_v32 = vpop.f32.mrb[29].mxu1  ;;  %v15890_v43 = vld [vmem:[#allocation34_spill] sm:$0xff] }
 0x549   :  { %v4027_v60 = vadd.f32 %v3876_v32, %v15711_v61 }
 0x54a   :  { %v4060_v47 = vrot.slane %v4059_v10, 4  ;;  %v4067_v0 = vsel %vm15712_vm12, %v12282_v46, -inf  ;;  %vm15728_vm12 = vmmov %vm15720_vm1 }
 0x54b   :  { %v4066_v34 = vsel %vm15713_vm13, %v4027_v60, -inf  ;;  %v9518_v57 = vpop.f32.mrb[30].mxu1  ;;  %vm15729_vm13 = vmmov %vm15720_vm1 }
 0x54c   :  { %v4061_v52 = vmax.f32 %v4059_v10, %v4060_v47  ;;  %v4068_v17 = vmax.f32 %v4066_v34, %v4067_v0  ;;  %v12289_v40 = vadd.f32 %v9518_v57, %v15714_v59  ;;  %v3886_v16 = vpop.f32.mrb[31].mxu1 }
 0x54d   :  { %v12292_v3 = vadd.f32 %v3886_v16, %v15715_v54  ;;  %v15726_v16 = vld [vmem:[#allocation88_spill] sm:$0xff] }
 0x54e   :  { %v4062_v2 = vrot.slane %v4061_v52, 2  ;;  %v4069_v48 = vrot.slane %v4068_v17, 4  ;;  %v4076_v38 = vsel %vm15716_vm14, %v12289_v40, -inf  ;;  %vm15732_vm14 = vmmov %vm15720_vm1 }
 0x54f   :  { %v4075_v31 = vsel %vm15717_vm15, %v12292_v3, -inf  ;;  %v9521_v27 = vpop.f32.mrb[32].mxu1  ;;  %vm15733_vm15 = vmmov %vm15720_vm1 }
 0x550   :  { %v4063_v49 = vmax.f32 %v4061_v52, %v4062_v2  ;;  %v4070_v14 = vmax.f32 %v4068_v17, %v4069_v48  ;;  %v4077_v28 = vmax.f32 %v4075_v31, %v4076_v38  ;;  %v12299_v51 = vadd.f32 %v9521_v27, %v15718_v7  ;;  %v3896_v62 = vpop.f32.mrb[33].mxu1 }
 0x551   :  { %v12302_v50 = vadd.f32 %v3896_v62, %v15719_v22 }
 0x552   :  { %v4064_v8 = vrot.slane %v4063_v49, 1  ;;  %v4071_v15 = vrot.slane %v4070_v14, 2  ;;  %v4078_v53 = vrot.slane %v4077_v28, 4  ;;  %v4085_v5 = vsel %vm15720_vm1, %v12299_v51, -inf }
 0x553   :  { %v4084_v25 = vsel %vm15721_vm2, %v12302_v50, -inf  ;;  %v9524_v26 = vpop.f32.mrb[34].mxu1  ;;  %vm15736_vm2 = vmmov %vm15720_vm1 }
 0x554   :  { %v4065_v4 = vmax.f32 %v4063_v49, %v4064_v8  ;;  %v4072_v58 = vmax.f32 %v4070_v14, %v4071_v15  ;;  %v4079_v45 = vmax.f32 %v4077_v28, %v4078_v53  ;;  %v4086_v11 = vmax.f32 %v4084_v25, %v4085_v5  ;;  %v3906_v30 = vpop.f32.mrb[35].mxu1 }
 0x555   :  { %v12309_v29 = vadd.f32 %v9524_v26, %v15722_v37  ;;  %v12312_v39 = vadd.f32 %v3906_v30, %v15723_v1 }
 0x556   :  { %v4201_v35 = vsub.f32 %v4025_v42, %v4065_v4  ;;  %v4202_v18 = vsub.f32 %v4026_v55, %v4065_v4  ;;  %v4073_v44 = vrot.slane %v4072_v58, 1  ;;  %v4080_v41 = vrot.slane %v4079_v45, 2  ;;  %v15727_v55 = vld [vmem:[#allocation86_spill] sm:$0xff] }
 0x557   :  { %v4087_v13 = vrot.slane %v4086_v11, 4  ;;  %v4094_v19 = vsel %vm15724_vm3, %v12309_v29, -inf  ;;  %v4093_v23 = vsel %vm15725_vm11, %v12312_v39, -inf  ;;  %v9527_v10 = vpop.f32.mrb[36].mxu1  ;;  %v15730_v4 = vld [vmem:[#allocation90_spill] sm:$0xff]  ;;  %vm15738_vm3 = vmmov %vm15720_vm1 }
 0x558   :  { %v4233_v32 = vmul.f32 1.442695, %v4201_v35  ;;  %v4235_v47 = vmul.f32 1.442695, %v4202_v18  ;;  %v4074_v0 = vmax.f32 %v4072_v58, %v4073_v44  ;;  %v4081_v34 = vmax.f32 %v4079_v45, %v4080_v41  ;;  %v3916_v57 = vpop.f32.mrb[37].mxu1  ;;  %vm15739_vm11 = vmmov %vm15720_vm1 }
 0x559   :  { %v4088_v52 = vmax.f32 %v4086_v11, %v4087_v13  ;;  %v4095_v17 = vmax.f32 %v4093_v23, %v4094_v19  ;;  %v12319_v42 = vadd.f32 %v9527_v10, %v15726_v16  ;;  %v12322_v2 = vadd.f32 %v3916_v57, %v15727_v55  ;;  %v15731_v11 = vld [vmem:[#allocation87_spill] sm:$0xff]  ;;  %v15764_v16 = vld [vmem:[#allocation121_spill] sm:$0xff] }
 0x55a   :  { %10082 = vpow2.f32 %v4233_v32  ;;  %v4203_v48 = vsub.f32 %v4027_v60, %v4074_v0  ;;  %v4204_v38 = vsub.f32 %v12282_v46, %v4074_v0  ;;  %v4082_v31 = vrot.slane %v4081_v34, 1 }
 0x55b   :  { %10084 = vpow2.f32 %v4235_v47  ;;  %v4089_v27 = vrot.slane %v4088_v52, 2  ;;  %v4096_v49 = vrot.slane %v4095_v17, 4  ;;  %v4103_v14 = vsel %vm15728_vm12, %v12319_v42, -inf  ;;  %v9530_v28 = vpop.f32.mrb[38].mxu1  ;;  %vm15742_vm12 = vmmov %vm15720_vm1 }
 0x55c   :  { %v4237_v62 = vmul.f32 1.442695, %v4203_v48  ;;  %v4239_v8 = vmul.f32 1.442695, %v4204_v38  ;;  %v4083_v15 = vmax.f32 %v4081_v34, %v4082_v31  ;;  %v4102_v53 = vsel %vm15729_vm13, %v12322_v2, -inf  ;;  %v3926_v5 = vpop.f32.mrb[39].mxu1  ;;  %vm15743_vm13 = vmmov %vm15720_vm1 }
 0x55d   :  { %v4090_v25 = vmax.f32 %v4088_v52, %v4089_v27  ;;  %v4097_v26 = vmax.f32 %v4095_v17, %v4096_v49  ;;  %v4104_v60 = vmax.f32 %v4102_v53, %v4103_v14  ;;  %v12330_v46 = vadd.f32 %v9530_v28, %v15730_v4  ;;  %v15734_v34 = vld [vmem:[#allocation92_spill] sm:$0xff]  ;;  %v15735_v52 = vld [vmem:[#allocation89_spill] sm:$0xff] }
 0x55e   :  { %10086 = vpow2.f32 %v4237_v62  ;;  %v4205_v58 = vsub.f32 %v12292_v3, %v4083_v15  ;;  %v4206_v45 = vsub.f32 %v12289_v40, %v4083_v15  ;;  %v12335_v30 = vadd.f32 %v3926_v5, %v15731_v11 }
 0x55f   :  { %10088 = vpow2.f32 %v4239_v8  ;;  %v4091_v35 = vrot.slane %v4090_v25, 1  ;;  %v4098_v18 = vrot.slane %v4097_v26, 2  ;;  %v4105_v44 = vrot.slane %v4104_v60, 4  ;;  %v9533_v41 = vpop.f32.mrb[40].mxu1 }
 0x560   :  { %v4241_v13 = vmul.f32 1.442695, %v4205_v58  ;;  %v4243_v19 = vmul.f32 1.442695, %v4206_v45  ;;  %v4112_v23 = vsel %vm15732_vm14, %v12330_v46, -inf  ;;  %v4111_v10 = vsel %vm15733_vm15, %v12335_v30, -inf  ;;  %vm15746_vm14 = vmmov %vm15720_vm1 }
 0x561   :  { %v4092_v32 = vmax.f32 %v4090_v25, %v4091_v35  ;;  %v4099_v3 = vmax.f32 %v4097_v26, %v4098_v18  ;;  %v4106_v47 = vmax.f32 %v4104_v60, %v4105_v44  ;;  %v4113_v40 = vmax.f32 %v4111_v10, %v4112_v23  ;;  %v3936_v0 = vpop.f32.mrb[41].mxu1  ;;  %v15737_v45 = vld [vmem:[#allocation91_spill] sm:$0xff]  ;;  %vm15747_vm15 = vmmov %vm15720_vm1 }
 0x562   :  { %10090 = vpow2.f32 %v4241_v13  ;;  %v12342_v57 = vadd.f32 %v9533_v41, %v15734_v34  ;;  %v12345_v17 = vadd.f32 %v3936_v0, %v15735_v52 }
 0x563   :  { %10092 = vpow2.f32 %v4243_v19  ;;  %v4207_v48 = vsub.f32 %v12302_v50, %v4092_v32  ;;  %v4208_v38 = vsub.f32 %v12299_v51, %v4092_v32  ;;  %v4100_v31 = vrot.slane %v4099_v3, 1  ;;  %v9536_v27 = vpop.f32.mrb[42].mxu1 }
 0x564   :  { %v10083_v49 = vpop.eup %10082  ;;  %v4107_v14 = vrot.slane %v4106_v47, 2  ;;  %v4114_v28 = vrot.slane %v4113_v40, 4  ;;  %v4121_v62 = vsel %vm15720_vm1, %v12342_v57, -inf  ;;  %v4120_v8 = vsel %vm15736_vm2, %v12345_v17, -inf  ;;  %v3946_v15 = vpop.f32.mrb[43].mxu1  ;;  %vm15750_vm2 = vmmov %vm15720_vm1 }
 0x565   :  { %v12353_v53 = vpop.eup %10084  ;;  %v4245_v5 = vmul.f32 1.442695, %v4207_v48  ;;  %v4247_v25 = vmul.f32 1.442695, %v4208_v38  ;;  %v4101_v26 = vmax.f32 %v4099_v3, %v4100_v31  ;;  %v4122_v50 = vmax.f32 %v4120_v8, %v4121_v62 }
 0x566   :  { %v4108_v60 = vmax.f32 %v4106_v47, %v4107_v14  ;;  %v4115_v51 = vmax.f32 %v4113_v40, %v4114_v28  ;;  %v12356_v58 = vadd.f32 %v9536_v27, %v11152_v12  ;;  %v12359_v35 = vadd.f32 %v3946_v15, %v15737_v45  ;;  %v15740_v28 = vld [vmem:[#allocation93_spill] sm:$0xff]  ;;  %v15741_v15 = vld [vmem:[#allocation131_spill] sm:$0xff] }
 0x567   :  { %10094 = vpow2.f32 %v4245_v5  ;;  %v4209_v18 = vsub.f32 %v12312_v39, %v4101_v26  ;;  %v4210_v44 = vsub.f32 %v12309_v29, %v4101_v26  ;;  %v4123_v41 = vrot.slane %v4122_v50, 4  ;;  %v9539_v13 = vpop.f32.mrb[44].mxu1 }
 0x568   :  { %v12363_v19 = vpop.eup %10086  ;;  %10096 = vpow2.f32 %v4247_v25  ;;  %v4109_v23 = vrot.slane %v4108_v60, 1  ;;  %v4116_v10 = vrot.slane %v4115_v51, 2  ;;  %v4130_v32 = vsel %vm15738_vm3, %v12356_v58, -inf  ;;  %v3956_v3 = vpop.f32.mrb[45].mxu1  ;;  %vm15753_vm3 = vmmov %vm15720_vm1 }
 0x569   :  { %v12367_v47 = vpop.eup %10088  ;;  %v4249_v40 = vmul.f32 1.442695, %v4209_v18  ;;  %v4251_v0 = vmul.f32 1.442695, %v4210_v44  ;;  %v4124_v48 = vmax.f32 %v4122_v50, %v4123_v41  ;;  %v4129_v39 = vsel %vm15739_vm11, %v12359_v35, -inf  ;;  %vm15754_vm11 = vmmov %vm15720_vm1 }
 0x56a   :  { %v4110_v29 = vmax.f32 %v4108_v60, %v4109_v23  ;;  %v4117_v38 = vmax.f32 %v4115_v51, %v4116_v10  ;;  %v4131_v31 = vmax.f32 %v4129_v39, %v4130_v32  ;;  %v12372_v27 = vadd.f32 %v9539_v13, %v11156_v9  ;;  %v15745_v39 = vld [vmem:[#allocation95_spill] sm:$0xff] }
 0x56b   :  { %10098 = vpow2.f32 %v4249_v40  ;;  %v4125_v14 = vrot.slane %v4124_v48, 2  ;;  %v12375_v62 = vadd.f32 %v3956_v3, %v15740_v28  ;;  %v9542_v8 = vpop.f32.mrb[46].mxu1  ;;  %v12378_v5 = vmul.f32 %v10083_v49, %v15741_v15 }
 0x56c   :  { %v12380_v25 = vpop.eup %10090  ;;  %10100 = vpow2.f32 %v4251_v0  ;;  %v4211_v26 = vsub.f32 %v12322_v2, %v4110_v29  ;;  %v4212_v50 = vsub.f32 %v12319_v42, %v4110_v29  ;;  %v4118_v60 = vrot.slane %v4117_v38, 1  ;;  %v3966_v51 = vpop.f32.mrb[47].mxu1  ;;  %v15744_v0 = vld [vmem:[#allocation97_spill] sm:$0xff] }
 0x56d   :  { %v12384_v18 = vpop.eup %10092  ;;  %v4126_v44 = vmax.f32 %v4124_v48, %v4125_v14  ;;  %v4132_v41 = vrot.slane %v4131_v31, 4  ;;  %v4139_v13 = vsel %vm15742_vm12, %v12372_v27, -inf  ;;  %v4138_v49 = vsel %vm15743_vm13, %v12375_v62, -inf  ;;  %vm15756_vm12 = vmmov %vm15720_vm1 }
 0x56e   :  { %v4253_v23 = vmul.f32 1.442695, %v4211_v26  ;;  %v4255_v10 = vmul.f32 1.442695, %v4212_v50  ;;  %v4119_v32 = vmax.f32 %v4117_v38, %v4118_v60  ;;  %v4140_v3 = vmax.f32 %v4138_v49, %v4139_v13  ;;  %vm15758_vm13 = vmmov %vm15720_vm1 }
 0x56f   :  { %v4127_v40 = vrot.slane %v4126_v44, 1  ;;  %v4133_v2 = vmax.f32 %v4131_v31, %v4132_v41  ;;  %v12391_v42 = vadd.f32 %v9542_v8, %v15744_v0  ;;  %v12394_v29 = vadd.f32 %v3966_v51, %v15745_v39  ;;  %v9545_v48 = vpop.f32.mrb[48].mxu1  ;;  %v15749_v39 = vld [vmem:[#allocation100_spill] sm:$0xff] }
 0x570   :  { %10102 = vpow2.f32 %v4253_v23  ;;  %v4213_v14 = vsub.f32 %v12335_v30, %v4119_v32  ;;  %v4214_v28 = vsub.f32 %v12330_v46, %v4119_v32  ;;  %v4141_v9 = vrot.slane %v4140_v3, 4  ;;  %v3976_v45 = vpop.f32.mrb[49].mxu1  ;;  %v15748_v32 = vld [vmem:[#allocation101_spill] sm:$0xff] }
 0x571   :  { %v12398_v26 = vpop.eup %10094  ;;  %10104 = vpow2.f32 %v4255_v10  ;;  %v4128_v38 = vmax.f32 %v4126_v44, %v4127_v40  ;;  %v4134_v50 = vrot.slane %v4133_v2, 2  ;;  %v4148_v31 = vsel %vm15746_vm14, %v12391_v42, -inf  ;;  %vm15761_vm14 = vmmov %vm15720_vm1 }
 0x572   :  { %v12402_v8 = vpop.eup %10096  ;;  %v4257_v60 = vmul.f32 1.442695, %v4213_v14  ;;  %v4259_v51 = vmul.f32 1.442695, %v4214_v28  ;;  %v4142_v41 = vmax.f32 %v4140_v3, %v4141_v9  ;;  %v4147_v30 = vsel %vm15747_vm15, %v12394_v29, -inf  ;;  %vm15762_vm15 = vmmov %vm15720_vm1 }
 0x573   :  { %v4215_v46 = vsub.f32 %v12345_v17, %v4128_v38  ;;  %v4216_v13 = vsub.f32 %v12342_v57, %v4128_v38  ;;  %v4135_v49 = vmax.f32 %v4133_v2, %v4134_v50  ;;  %v4149_v23 = vmax.f32 %v4147_v30, %v4148_v31  ;;  %v9548_v10 = vpop.f32.mrb[50].mxu1  ;;  %v15751_v31 = vld [vmem:[#allocation105_spill] sm:$0xff] }
 0x574   :  { %10106 = vpow2.f32 %v4257_v60  ;;  %v4143_v44 = vrot.slane %v4142_v41, 2  ;;  %v12409_v40 = vadd.f32 %v9545_v48, %v15748_v32  ;;  %v12412_v0 = vadd.f32 %v3976_v45, %v15749_v39  ;;  %v3986_v28 = vpop.f32.mrb[51].mxu1 }
 0x575   :  { %v12414_v9 = vpop.eup %10098  ;;  %10108 = vpow2.f32 %v4259_v51  ;;  %v4261_v3 = vmul.f32 1.442695, %v4215_v46  ;;  %v4263_v14 = vmul.f32 1.442695, %v4216_v13  ;;  %v4136_v17 = vrot.slane %v4135_v49, 1  ;;  %v15752_v13 = vld [vmem:[#allocation104_spill] sm:$0xff] }
 0x576   :  { %v12416_v12 = vpop.eup %10100  ;;  %v4144_v57 = vmax.f32 %v4142_v41, %v4143_v44  ;;  %v4150_v2 = vrot.slane %v4149_v23, 4  ;;  %v4157_v38 = vsel %vm15720_vm1, %v12409_v40, -inf  ;;  %v4156_v48 = vsel %vm15750_vm2, %v12412_v0, -inf  ;;  %vm15765_vm2 = vmmov %vm15720_vm1 }
 0x577   :  { %10110 = vpow2.f32 %v4261_v3  ;;  %v4137_v45 = vmax.f32 %v4135_v49, %v4136_v17  ;;  %v4158_v50 = vmax.f32 %v4156_v48, %v4157_v38  ;;  %v12423_v60 = vadd.f32 %v9548_v10, %v15751_v31  ;;  %v9551_v51 = vpop.f32.mrb[52].mxu1 }
 0x578   :  { %10112 = vpow2.f32 %v4263_v14  ;;  %v4145_v30 = vrot.slane %v4144_v57, 1  ;;  %v4151_v46 = vmax.f32 %v4149_v23, %v4150_v2  ;;  %v12426_v39 = vadd.f32 %v3986_v28, %v15752_v13  ;;  %v3996_v41 = vpop.f32.mrb[53].mxu1  ;;  %v15755_v23 = vld [vmem:[#allocation111_spill] sm:$0xff] }
 0x579   :  { %v4217_v44 = vsub.f32 %v12359_v35, %v4137_v45  ;;  %v4218_v32 = vsub.f32 %v12356_v58, %v4137_v45  ;;  %v4159_v15 = vrot.slane %v4158_v50, 4  ;;  %v4166_v49 = vsel %vm15753_vm3, %v12423_v60, -inf  ;;  %vm15767_vm3 = vmmov %vm15720_vm1 }
 0x57a   :  { %v12432_v3 = vpop.eup %10102  ;;  %v4146_v10 = vmax.f32 %v4144_v57, %v4145_v30  ;;  %v4152_v17 = vrot.slane %v4151_v46, 2  ;;  %v4165_v14 = vsel %vm15754_vm11, %v12426_v39, -inf  ;;  %v12437_v2 = vadd.f32 %v9551_v51, %v15755_v23  ;;  %v15757_v23 = vld [vmem:[#allocation110_spill] sm:$0xff]  ;;  %vm15768_vm11 = vmmov %vm15720_vm1 }
 0x57b   :  { %v12439_v28 = vpop.eup %10104  ;;  %v4265_v38 = vmul.f32 1.442695, %v4217_v44  ;;  %v4267_v35 = vmul.f32 1.442695, %v4218_v32  ;;  %v4160_v48 = vmax.f32 %v4158_v50, %v4159_v15  ;;  %v4167_v58 = vmax.f32 %v4165_v14, %v4166_v49  ;;  %v9554_v45 = vpop.f32.mrb[54].mxu1 }
 0x57c   :  { %v4219_v13 = vsub.f32 %v12375_v62, %v4146_v10  ;;  %v4220_v31 = vsub.f32 %v12372_v27, %v4146_v10  ;;  %v4153_v52 = vmax.f32 %v4151_v46, %v4152_v17  ;;  %v4175_v57 = vsel %vm15756_vm12, %v12437_v2, -inf  ;;  %v4006_v30 = vpop.f32.mrb[55].mxu1  ;;  %v15759_v10 = vld [vmem:[#allocation118_spill] sm:$0xff]  ;;  %vm15771_vm12 = vmmov %vm15720_vm1 }
 0x57d   :  { %10114 = vpow2.f32 %v4265_v38  ;;  %v4161_v34 = vrot.slane %v4160_v48, 2  ;;  %v4168_v51 = vrot.slane %v4167_v58, 4  ;;  %v12446_v11 = vadd.f32 %v3996_v41, %v15757_v23  ;;  %v15760_v23 = vld [vmem:[#allocation117_spill] sm:$0xff] }
 0x57e   :  { %v12448_v44 = vpop.eup %10106  ;;  %10116 = vpow2.f32 %v4267_v35  ;;  %v4269_v15 = vmul.f32 1.442695, %v4219_v13  ;;  %v4271_v32 = vmul.f32 1.442695, %v4220_v31  ;;  %v4154_v50 = vrot.slane %v4153_v52, 1 }
 0x57f   :  { %v12450_v62 = vpop.eup %10108  ;;  %v4162_v27 = vmax.f32 %v4160_v48, %v4161_v34  ;;  %v4169_v46 = vmax.f32 %v4167_v58, %v4168_v51  ;;  %v4174_v49 = vsel %vm15758_vm13, %v12446_v11, -inf  ;;  %v12455_v17 = vadd.f32 %v9554_v45, %v15759_v10  ;;  %v9557_v14 = vpop.f32.mrb[56].mxu1  ;;  %vm15773_vm13 = vmmov %vm15720_vm1 }
 0x580   :  { %10118 = vpow2.f32 %v4269_v15  ;;  %v4155_v41 = vmax.f32 %v4153_v52, %v4154_v50  ;;  %v4176_v38 = vmax.f32 %v4174_v49, %v4175_v57  ;;  %v12458_v4 = vadd.f32 %v4006_v30, %v15760_v23  ;;  %v4016_v13 = vpop.f32.mrb[57].mxu1  ;;  %v15763_v49 = vld [vmem:[#allocation122_spill] sm:$0xff] }
 0x581   :  { %v12460_v31 = vpop.eup %10110  ;;  %10120 = vpow2.f32 %v4271_v32  ;;  %v4163_v35 = vrot.slane %v4162_v27, 1  ;;  %v4170_v34 = vrot.slane %v4169_v46, 2  ;;  %v4184_v48 = vsel %vm15761_vm14, %v12455_v17, -inf  ;;  %vm15775_vm14 = vmmov %vm15720_vm1 }
 0x582   :  { %v12464_v58 = vpop.eup %10112  ;;  %v4221_v45 = vsub.f32 %v12394_v29, %v4155_v41  ;;  %v4222_v51 = vsub.f32 %v12391_v42, %v4155_v41  ;;  %v4177_v52 = vrot.slane %v4176_v38, 4  ;;  %v4183_v57 = vsel %vm15762_vm15, %v12458_v4, -inf  ;;  %vm15776_vm15 = vmmov %vm15720_vm1 }
 0x583   :  { %v4164_v30 = vmax.f32 %v4162_v27, %v4163_v35  ;;  %v4171_v15 = vmax.f32 %v4169_v46, %v4170_v34  ;;  %v4185_v50 = vmax.f32 %v4183_v57, %v4184_v48  ;;  %v12471_v32 = vadd.f32 %v9557_v14, %v15763_v49 }
 0x584   :  { %v4273_v23 = vmul.f32 1.442695, %v4221_v45  ;;  %v4275_v10 = vmul.f32 1.442695, %v4222_v51  ;;  %v4178_v55 = vmax.f32 %v4176_v38, %v4177_v52  ;;  %v12474_v1 = vadd.f32 %v4016_v13, %v15764_v16  ;;  %v15766_v45 = vld [vmem:[#allocation132_spill] sm:$0xff] }
 0x585   :  { %v4223_v29 = vsub.f32 %v12412_v0, %v4164_v30  ;;  %v4224_v42 = vsub.f32 %v12409_v40, %v4164_v30  ;;  %v4172_v41 = vrot.slane %v4171_v15, 1  ;;  %v4186_v37 = vrot.slane %v4185_v50, 4 }
 0x586   :  { %10122 = vpow2.f32 %v4273_v23  ;;  %v4179_v22 = vrot.slane %v4178_v55, 2  ;;  %v4193_v27 = vsel %vm15720_vm1, %v12471_v32, -inf  ;;  %v4192_v46 = vsel %vm15765_vm2, %v12474_v1, -inf  ;;  %vm15780_vm2 = vmmov %vm15720_vm1 }
 0x587   :  { %v12482_v14 = vpop.eup %10114  ;;  %10124 = vpow2.f32 %v4275_v10  ;;  %v4277_v38 = vmul.f32 1.442695, %v4223_v29  ;;  %v4279_v13 = vmul.f32 1.442695, %v4224_v42  ;;  %v4173_v35 = vmax.f32 %v4171_v15, %v4172_v41  ;;  %v15769_v29 = vld [vmem:[#allocation135_spill] sm:$0xff] }
 0x588   :  { %v12484_v34 = vpop.eup %10116  ;;  %v4180_v0 = vmax.f32 %v4178_v55, %v4179_v22  ;;  %v4187_v40 = vmax.f32 %v4185_v50, %v4186_v37  ;;  %v4194_v48 = vmax.f32 %v4192_v46, %v4193_v27  ;;  %v12488_v23 = vmul.f32 %v12353_v53, %v15766_v45  ;;  %v15770_v46 = vld [vmem:[#allocation136_spill] sm:$0xff] }
 0x589   :  { %10126 = vpow2.f32 %v4277_v38  ;;  %v4225_v51 = vsub.f32 %v12426_v39, %v4173_v35  ;;  %v4226_v52 = vsub.f32 %v12423_v60, %v4173_v35  ;;  %v4329_v10 = vsel %vm15767_vm3, %v12378_v5, 0.0  ;;  %v15772_v35 = vld [vmem:[#allocation139_spill] sm:$0xff]  ;;  %vm15782_vm3 = vmmov %vm15720_vm1 }
 0x58a   :  { %v12494_v57 = vpop.eup %10118  ;;  %10128 = vpow2.f32 %v4279_v13  ;;  %v4181_v30 = vrot.slane %v4180_v0, 1  ;;  %v4188_v15 = vrot.slane %v4187_v40, 2  ;;  %v4195_v22 = vrot.slane %v4194_v48, 4 }
 0x58b   :  { %v12496_v37 = vpop.eup %10120  ;;  %v4281_v55 = vmul.f32 1.442695, %v4225_v51  ;;  %v4283_v50 = vmul.f32 1.442695, %v4226_v52  ;;  %v4330_v53 = vsel %vm15768_vm11, %v12488_v23, 0.0  ;;  %v12502_v39 = vmul.f32 %v12363_v19, %v15769_v29  ;;  %vm15783_vm11 = vmmov %vm15720_vm1 }
 0x58c   :  { %v4182_v60 = vmax.f32 %v4180_v0, %v4181_v30  ;;  %v4189_v42 = vmax.f32 %v4187_v40, %v4188_v15  ;;  %v4196_v41 = vmax.f32 %v4194_v48, %v4195_v22  ;;  %v4331_v27 = vadd.f32 %v4330_v53, %v4329_v10 }
 0x58d   :  { %10130 = vpow2.f32 %v4281_v55  ;;  %v12506_v38 = vmul.f32 %v12367_v47, %v15770_v46  ;;  %v4338_v13 = vsel %vm15771_vm12, %v12502_v39, 0.0  ;;  %v12512_v51 = vmul.f32 %v12380_v25, %v15772_v35  ;;  %v15774_v47 = vld [vmem:[#allocation140_spill] sm:$0xff]  ;;  %vm15786_vm12 = vmmov %vm15720_vm1 }
 0x58e   :  { %10132 = vpow2.f32 %v4283_v50  ;;  %v4227_v19 = vsub.f32 %v12446_v11, %v4182_v60  ;;  %v4228_v0 = vsub.f32 %v12437_v2, %v4182_v60  ;;  %v4190_v40 = vrot.slane %v4189_v42, 1 }
 0x58f   :  { %v4197_v48 = vrot.slane %v4196_v41, 2  ;;  %v4332_v52 = vrot.slane %v4331_v27, 4  ;;  %v4339_v10 = vsel %vm15773_vm13, %v12506_v38, 0.0  ;;  %v12520_v30 = vmul.f32 %v12384_v18, %v15774_v47  ;;  %vm15788_vm13 = vmmov %vm15720_vm1 }
 0x590   :  { %v12522_v15 = vpop.eup %10122  ;;  %v4285_v22 = vmul.f32 1.442695, %v4227_v19  ;;  %v4287_v25 = vmul.f32 1.442695, %v4228_v0  ;;  %v4191_v55 = vmax.f32 %v4189_v42, %v4190_v40  ;;  %v4340_v50 = vadd.f32 %v4339_v10, %v4338_v13 }
 0x591   :  { %v12524_v53 = vpop.eup %10124  ;;  %v4198_v11 = vmax.f32 %v4196_v41, %v4197_v48  ;;  %v4333_v2 = vadd.f32 %v4332_v52, %v4331_v27  ;;  %v4347_v60 = vsel %vm15775_vm14, %v12512_v51, 0.0  ;;  %v4348_v16 = vsel %vm15776_vm15, %v12520_v30, 0.0  ;;  %v15777_v52 = vld [vmem:[#allocation143_spill] sm:$0xff]  ;;  %vm15790_vm14 = vmmov %vm15720_vm1 }
 0x592   :  { %10134 = vpow2.f32 %v4285_v22  ;;  %v4229_v18 = vsub.f32 %v12458_v4, %v4191_v55  ;;  %v4230_v49 = vsub.f32 %v12455_v17, %v4191_v55  ;;  %v4341_v47 = vrot.slane %v4340_v50, 4  ;;  %v15778_v17 = vld [vmem:[#allocation144_spill] sm:$0xff]  ;;  %vm15791_vm15 = vmmov %vm15720_vm1 }
 0x593   :  { %v12532_v19 = vpop.eup %10126  ;;  %10136 = vpow2.f32 %v4287_v25  ;;  %v4199_v42 = vrot.slane %v4198_v11, 1  ;;  %v4334_v13 = vrot.slane %v4333_v2, 2  ;;  %v4349_v0 = vadd.f32 %v4348_v16, %v4347_v60  ;;  %v15779_v60 = vld [vmem:[#allocation106_spill] sm:$0xff] }
 0x594   :  { %v12534_v41 = vpop.eup %10128  ;;  %v4289_v27 = vmul.f32 1.442695, %v4229_v18  ;;  %v4291_v40 = vmul.f32 1.442695, %v4230_v49  ;;  %v4342_v48 = vadd.f32 %v4341_v47, %v4340_v50  ;;  %v12538_v10 = vmul.f32 %v12398_v26, %v15777_v52 }
 0x595   :  { %v4200_v22 = vmax.f32 %v4198_v11, %v4199_v42  ;;  %v4335_v4 = vadd.f32 %v4334_v13, %v4333_v2  ;;  %v4350_v35 = vrot.slane %v4349_v0, 4  ;;  %v12542_v55 = vmul.f32 %v12402_v8, %v15778_v17  ;;  %v15781_v13 = vld [vmem:[#allocation107_spill] sm:$0xff] }
 0x596   :  { %10138 = vpow2.f32 %v4289_v27  ;;  %v4343_v25 = vrot.slane %v4342_v48, 2  ;;  %v4356_v16 = vsel %vm15720_vm1, %v12538_v10, 0.0  ;;  %v12548_v49 = vmul.f32 %v12414_v9, %v15779_v60 }
 0x597   :  { %v12550_v47 = vpop.eup %10130  ;;  %10140 = vpow2.f32 %v4291_v40  ;;  %v4231_v26 = vsub.f32 %v12474_v1, %v4200_v22  ;;  %v4232_v50 = vsub.f32 %v12471_v32, %v4200_v22  ;;  %v4336_v11 = vrot.slane %v4335_v4, 1 }
 0x598   :  { %v12554_v2 = vpop.eup %10132  ;;  %v4344_v8 = vadd.f32 %v4343_v25, %v4342_v48  ;;  %v4351_v18 = vadd.f32 %v4350_v35, %v4349_v0  ;;  %v4357_v42 = vsel %vm15780_vm2, %v12542_v55, 0.0  ;;  %v12560_v27 = vmul.f32 %v12416_v12, %v15781_v13  ;;  %v15785_v13 = vld [vmem:[#allocation114_spill] sm:$0xff]  ;;  %vm15795_vm2 = vmmov %vm15720_vm1 }
 0x599   :  { %v4293_v9 = vmul.f32 1.442695, %v4231_v26  ;;  %v4295_v60 = vmul.f32 1.442695, %v4232_v50  ;;  %v4337_v17 = vadd.f32 %v4336_v11, %v4335_v4  ;;  %v4358_v40 = vadd.f32 %v4357_v42, %v4356_v16  ;;  %v15784_v50 = vld [vmem:[#allocation113_spill] sm:$0xff] }
 0x59a   :  { %v4345_v52 = vrot.slane %v4344_v8, 1  ;;  %v4352_v1 = vrot.slane %v4351_v18, 2  ;;  %v4365_v32 = vsel %vm15782_vm3, %v12548_v49, 0.0  ;;  %v4366_v48 = vsel %vm15783_vm11, %v12560_v27, 0.0  ;;  %vm15797_vm3 = vmmov %vm15720_vm1 }
 0x59b   :  { %10142 = vpow2.f32 %v4293_v9  ;;  %v4473_v35 = vmax.f32 %v4337_v17, 1e-20  ;;  %v4359_v0 = vrot.slane %v4358_v40, 4  ;;  %v4367_v22 = vadd.f32 %v4366_v48, %v4365_v32  ;;  %vm15799_vm11 = vmmov %vm15720_vm1 }
 0x59c   :  { %v12566_v25 = vpop.eup %10134  ;;  %10144 = vpow2.f32 %v4295_v60  ;;  %v4346_v12 = vadd.f32 %v4345_v52, %v4344_v8  ;;  %v4353_v26 = vadd.f32 %v4352_v1, %v4351_v18  ;;  %v12570_v4 = vmul.f32 %v12432_v3, %v15784_v50  ;;  %v15787_v52 = vld [vmem:[#allocation119_spill] sm:$0xff] }
 0x59d   :  { %v12572_v16 = vpop.eup %10136  ;;  %10146 = vrcp.f32 %v4473_v35  ;;  %v4360_v11 = vadd.f32 %v4359_v0, %v4358_v40  ;;  %v4368_v42 = vrot.slane %v4367_v22, 4  ;;  %v12576_v9 = vmul.f32 %v12439_v28, %v15785_v13  ;;  %v15789_v40 = vld [vmem:[#allocation120_spill] sm:$0xff] }
 0x59e   :  { %v4474_v17 = vmax.f32 %v4346_v12, 1e-20  ;;  %v4354_v32 = vrot.slane %v4353_v26, 1  ;;  %v4374_v60 = vsel %vm15786_vm12, %v12570_v4, 0.0  ;;  %v12582_v8 = vmul.f32 %v12448_v44, %v15787_v52  ;;  %vm15800_vm12 = vmmov %vm15720_vm1 }
 0x59f   :  { %v4361_v3 = vrot.slane %v4360_v11, 2  ;;  %v4369_v18 = vadd.f32 %v4368_v42, %v4367_v22  ;;  %v4375_v1 = vsel %vm15788_vm13, %v12576_v9, 0.0  ;;  %v12588_v48 = vmul.f32 %v12450_v62, %v15789_v40  ;;  %v15792_v42 = vld [vmem:[#allocation123_spill] sm:$0xff]  ;;  %vm15802_vm13 = vmmov %vm15720_vm1 }
 0x5a0   :  { %v12590_v28 = vpop.eup %10138  ;;  %10148 = vrcp.f32 %v4474_v17  ;;  %v4355_v35 = vadd.f32 %v4354_v32, %v4353_v26  ;;  %v4376_v0 = vadd.f32 %v4375_v1, %v4374_v60  ;;  %v4383_v12 = vsel %vm15790_vm14, %v12582_v8, 0.0  ;;  %v15793_v17 = vld [vmem:[#allocation124_spill] sm:$0xff]  ;;  %vm15803_vm14 = vmmov %vm15720_vm1 }
 0x5a1   :  { %v12594_v13 = vpop.eup %10140  ;;  %v4362_v44 = vadd.f32 %v4361_v3, %v4360_v11  ;;  %v4370_v52 = vrot.slane %v4369_v18, 2  ;;  %v4384_v22 = vsel %vm15791_vm15, %v12588_v48, 0.0  ;;  %v12600_v50 = vmul.f32 %v12460_v31, %v15792_v42  ;;  %v15794_v3 = vld [vmem:[#allocation125_spill] sm:$0xff]  ;;  %v15796_v42 = vld [vmem:[#allocation126_spill] sm:$0xff]  ;;  %vm15804_vm15 = vmmov %vm15720_vm1 }
 0x5a2   :  { %v4475_v62 = vmax.f32 %v4355_v35, 1e-20  ;;  %v4377_v40 = vrot.slane %v4376_v0, 4  ;;  %v4385_v46 = vadd.f32 %v4384_v22, %v4383_v12  ;;  %v12604_v26 = vmul.f32 %v12464_v58, %v15793_v17 }
 0x5a3   :  { %v4363_v32 = vrot.slane %v4362_v44, 1  ;;  %v4371_v60 = vadd.f32 %v4370_v52, %v4369_v18  ;;  %v4392_v11 = vsel %vm15720_vm1, %v12600_v50, 0.0  ;;  %v12610_v1 = vmul.f32 %v12482_v14, %v15794_v3 }
 0x5a4   :  { %10150 = vrcp.f32 %v4475_v62  ;;  %v4378_v29 = vadd.f32 %v4377_v40, %v4376_v0  ;;  %v4386_v31 = vrot.slane %v4385_v46, 4  ;;  %v4393_v35 = vsel %vm15795_vm2, %v12604_v26, 0.0  ;;  %v15798_v0 = vld [vmem:[#allocation127_spill] sm:$0xff]  ;;  %vm15808_vm2 = vmmov %vm15720_vm1 }
 0x5a5   :  { %v12614_v12 = vpop.eup %10142  ;;  %v4364_v22 = vadd.f32 %v4363_v32, %v4362_v44  ;;  %v4372_v58 = vrot.slane %v4371_v60, 1  ;;  %v4394_v17 = vadd.f32 %v4393_v35, %v4392_v11  ;;  %v12618_v52 = vmul.f32 %v12484_v34, %v15796_v42 }
 0x5a6   :  { %v12620_v18 = vpop.eup %10144  ;;  %v4379_v45 = vrot.slane %v4378_v29, 2  ;;  %v4387_v14 = vadd.f32 %v4386_v31, %v4385_v46  ;;  %v4401_v40 = vsel %vm15797_vm3, %v12610_v1, 0.0  ;;  %v12626_v62 = vmul.f32 %v12494_v57, %v15798_v0  ;;  %vm15809_vm3 = vmmov %vm15720_vm1 }
 0x5a7   :  { %v10147_v3 = vpop.eup %10146  ;;  %v4476_v7 = vmax.f32 %v4364_v22, 1e-20  ;;  %v4373_v44 = vadd.f32 %v4372_v58, %v4371_v60  ;;  %v4395_v32 = vrot.slane %v4394_v17, 4  ;;  %v4402_v11 = vsel %vm15799_vm11, %v12618_v52, 0.0  ;;  %v15801_v60 = vld [vmem:[#allocation128_spill] sm:$0xff]  ;;  %vm15810_vm11 = vmmov %vm15720_vm1 }
 0x5a8   :  { %v4505_v34 = vmul.f32 %v10147_v3, %v12378_v5  ;;  %v4506_v35 = vmul.f32 %v10147_v3, %v12488_v23  ;;  %v4380_v42 = vadd.f32 %v4379_v45, %v4378_v29  ;;  %v4388_v46 = vrot.slane %v4387_v14, 2 }
 0x5a9   :  { %10152 = vrcp.f32 %v4476_v7  ;;  %v4477_v31 = vmax.f32 %v4373_v44, 1e-20  ;;  %v4396_v54 = vadd.f32 %v4395_v32, %v4394_v17  ;;  %v4403_v59 = vadd.f32 %v4402_v11, %v4401_v40  ;;  %v15805_v44 = vld [vmem:[#allocation129_spill] sm:$0xff]  ;;  %v15806_v11 = vld [vmem:[#allocation130_spill] sm:$0xff] }
 0x5aa   :  { %v10149_v61 = vpop.eup %10148  ;;  %9562 = vmatprep.mubr.msk.f32.mxu0 %vm15800_vm12, %v4505_v34  ;;  %v4381_v57 = vrot.slane %v4380_v42, 1  ;;  %v4389_v22 = vadd.f32 %v4388_v46, %v4387_v14  ;;  %v12635_v58 = vmul.f32 %v12496_v37, %v15801_v60  ;;  %v4410_v5 = vsel %vm15802_vm13, %v12626_v62, 0.0  ;;  %vm15811_vm12 = vmmov %vm15720_vm1  ;;  %v15888_v60 = vld [vmem:[#allocation33_spill] sm:$0xff] }
 0x5ab   :  { %9563 = vmatmul.mubr.msk.f32.vlgmr.msra.gmra.mrb[42].mxu0 %vm15803_vm14, %v4506_v35  ;;  %v4507_v45 = vmul.f32 %v10149_v61, %v12502_v39  ;;  %v4508_v7 = vmul.f32 %v10149_v61, %v12506_v38  ;;  %10154 = vrcp.f32 %v4477_v31  ;;  %v4397_v23 = vrot.slane %v4396_v54, 2  ;;  %v15807_v35 = vld [vmem:[#allocation133_spill] sm:$0xff]  ;;  %vm15813_vm13 = vmmov %vm15720_vm1 }
 0x5ac   :  { %v4382_v29 = vadd.f32 %v4381_v57, %v4380_v42  ;;  %v4390_v17 = vrot.slane %v4389_v22, 1  ;;  %v4404_v3 = vrot.slane %v4403_v59, 4  ;;  %v4411_v14 = vsel %vm15804_vm15, %v12635_v58, 0.0  ;;  %vm15814_vm14 = vmmov %vm15720_vm1 }
 0x5ad   :  { %9565 = vmatprep.mubr.msk.f32.mxu0 %vm15720_vm1, %v4507_v45  ;;  %v4398_v37 = vadd.f32 %v4397_v23, %v4396_v54  ;;  %v4412_v40 = vadd.f32 %v4411_v14, %v4410_v5  ;;  %v12647_v32 = vmul.f32 %v12522_v15, %v15805_v44  ;;  %v12651_v39 = vmul.f32 %v12524_v53, %v15806_v11  ;;  %vm15815_vm15 = vmmov %vm15720_vm1  ;;  %v15886_v11 = vld [vmem:[#allocation32_spill] sm:$0xff] }
 0x5ae   :  { %v10151_v61 = vpop.eup %10150  ;;  %v4478_v38 = vmax.f32 %v4382_v29, 1e-20  ;;  %v4391_v42 = vadd.f32 %v4390_v17, %v4389_v22  ;;  %v4405_v34 = vadd.f32 %v4404_v3, %v4403_v59  ;;  %v12655_v46 = vmul.f32 %v12532_v19, %v15807_v35 }
 0x5af   :  { %9566 = vmatmul.mubr.msk.f32.gmra.mrb[44].mxu0 %vm15808_vm2, %v4508_v7  ;;  %v4509_v54 = vmul.f32 %v10151_v61, %v12512_v51  ;;  %v4510_v31 = vmul.f32 %v10151_v61, %v12520_v30  ;;  %v4399_v15 = vrot.slane %v4398_v37, 1  ;;  %v4413_v57 = vrot.slane %v4412_v40, 4  ;;  %v15812_v7 = vld [vmem:[#allocation134_spill] sm:$0xff]  ;;  %vm15818_vm2 = vmmov %vm15720_vm1 }
 0x5b0   :  { %10156 = vrcp.f32 %v4478_v38  ;;  %v4479_v5 = vmax.f32 %v4391_v42, 1e-20  ;;  %v4406_v53 = vrot.slane %v4405_v34, 2  ;;  %v4419_v45 = vsel %vm15809_vm3, %v12647_v32, 0.0  ;;  %vm15819_vm3 = vmmov %vm15720_vm1 }
 0x5b1   :  { %9568 = vmatprep.mubr.msk.f32.mxu0 %vm15810_vm11, %v4509_v54  ;;  %v4400_v59 = vadd.f32 %v4399_v15, %v4398_v37  ;;  %v4414_v22 = vadd.f32 %v4413_v57, %v4412_v40  ;;  %v4420_v19 = vsel %vm15811_vm12, %v12651_v39, 0.0  ;;  %v12667_v51 = vmul.f32 %v12534_v41, %v15812_v7  ;;  %v15816_v40 = vld [vmem:[#allocation137_spill] sm:$0xff]  ;;  %vm15820_vm11 = vmmov %vm15720_vm1  ;;  %v15884_v7 = vld [vmem:[#allocation31_spill] sm:$0xff] }
 0x5b2   :  { %10158 = vrcp.f32 %v4479_v5  ;;  %v4407_v30 = vadd.f32 %v4406_v53, %v4405_v34  ;;  %v4421_v23 = vadd.f32 %v4420_v19, %v4419_v45  ;;  %v4428_v29 = vsel %vm15813_vm13, %v12655_v46, 0.0  ;;  %vm15821_vm12 = vmmov %vm15720_vm1 }
 0x5b3   :  { %v10153_v17 = vpop.eup %10152  ;;  %9569 = vmatmul.mubr.msk.f32.gmra.mrb[46].mxu0 %vm15814_vm14, %v4510_v31  ;;  %v4480_v3 = vmax.f32 %v4400_v59, 1e-20  ;;  %v4415_v14 = vrot.slane %v4414_v22, 2  ;;  %v4429_v37 = vsel %vm15815_vm15, %v12667_v51, 0.0  ;;  %v12676_v61 = vmul.f32 %v12550_v47, %v15816_v40  ;;  %v15817_v31 = vld [vmem:[#allocation138_spill] sm:$0xff]  ;;  %vm15825_vm13 = vmmov %vm15720_vm1 }
 0x5b4   :  { %v4511_v41 = vmul.f32 %v10153_v17, %v12538_v10  ;;  %v4512_v38 = vmul.f32 %v10153_v17, %v12542_v55  ;;  %v4408_v42 = vrot.slane %v4407_v30, 1  ;;  %v4422_v34 = vrot.slane %v4421_v23, 4  ;;  %vm15826_vm14 = vmmov %vm15720_vm1 }
 0x5b5   :  { %v10155_v54 = vpop.eup %10154  ;;  %10160 = vrcp.f32 %v4480_v3  ;;  %v4416_v15 = vadd.f32 %v4415_v14, %v4414_v22  ;;  %v4430_v57 = vadd.f32 %v4429_v37, %v4428_v29  ;;  %v12682_v5 = vmul.f32 %v12554_v2, %v15817_v31  ;;  %v15823_v3 = vld [vmem:[#allocation142_spill] sm:$0xff]  ;;  %v15824_v37 = vld [vmem:[#allocation145_spill] sm:$0xff]  ;;  %vm15827_vm15 = vmmov %vm15720_vm1 }
 0x5b6   :  { %9571 = vmatprep.mubr.msk.f32.mxu0 %vm15720_vm1, %v4511_v41  ;;  %v4513_v53 = vmul.f32 %v10155_v54, %v12548_v49  ;;  %v4514_v47 = vmul.f32 %v10155_v54, %v12560_v27  ;;  %v4409_v45 = vadd.f32 %v4408_v42, %v4407_v30  ;;  %v4423_v10 = vadd.f32 %v4422_v34, %v4421_v23  ;;  %v15822_v49 = vld [vmem:[#allocation141_spill] sm:$0xff]  ;;  %v15882_v31 = vld [vmem:[#allocation30_spill] sm:$0xff] }
 0x5b7   :  { %9572 = vmatmul.mubr.msk.f32.gmra.mrb[48].mxu0 %vm15818_vm2, %v4512_v38  ;;  %v4417_v55 = vrot.slane %v4416_v15, 1  ;;  %v4431_v59 = vrot.slane %v4430_v57, 4  ;;  %v4437_v22 = vsel %vm15819_vm3, %v12676_v61, 0.0  ;;  %v4438_v19 = vsel %vm15820_vm11, %v12682_v5, 0.0  ;;  %vm15829_vm2 = vmmov %vm15720_vm1 }
 0x5b8   :  { %9574 = vmatprep.mubr.msk.f32.mxu0 %vm15821_vm12, %v4513_v53  ;;  %v4481_v2 = vmax.f32 %v4409_v45, 1e-20  ;;  %v4424_v29 = vrot.slane %v4423_v10, 2  ;;  %v4439_v17 = vadd.f32 %v4438_v19, %v4437_v22  ;;  %v12695_v27 = vmul.f32 %v12566_v25, %v15822_v49  ;;  %vm15830_vm3 = vmmov %vm15720_vm1 }
 0x5b9   :  { %v4418_v30 = vadd.f32 %v4417_v55, %v4416_v15  ;;  %v4432_v23 = vadd.f32 %v4431_v59, %v4430_v57  ;;  %v12699_v14 = vmul.f32 %v12572_v16, %v15823_v3  ;;  %v12703_v41 = vmul.f32 %v12590_v28, %v15824_v37  ;;  %v15828_v59 = vld [vmem:[#allocation146_spill] sm:$0xff]  ;;  %vm15831_vm11 = vmmov %vm15720_vm1  ;;  %v15880_v3 = vld [vmem:[#allocation29_spill] sm:$0xff] }
 0x5ba   :  { %v10157_v38 = vpop.eup %10156  ;;  %10162 = vrcp.f32 %v4481_v2  ;;  %v4425_v42 = vadd.f32 %v4424_v29, %v4423_v10  ;;  %v4440_v34 = vrot.slane %v4439_v17, 4  ;;  %v4446_v54 = vsel %vm15825_vm13, %v12695_v27, 0.0  ;;  %vm15834_vm12 = vmmov %vm15720_vm1 }
 0x5bb   :  { %9575 = vmatmul.mubr.msk.f32.gmra.mrb[50].mxu0 %vm15826_vm14, %v4514_v47  ;;  %v4515_v25 = vmul.f32 %v10157_v38, %v12570_v4  ;;  %v4516_v15 = vmul.f32 %v10157_v38, %v12576_v9  ;;  %v4482_v57 = vmax.f32 %v4418_v30, 1e-20  ;;  %v4433_v16 = vrot.slane %v4432_v23, 2  ;;  %v15832_v38 = vld [vmem:[#allocation147_spill] sm:$0xff]  ;;  %vm15835_vm13 = vmmov %vm15720_vm1 }
 0x5bc   :  { %v10159_v53 = vpop.eup %10158  ;;  %v4426_v45 = vrot.slane %v4425_v42, 1  ;;  %v4441_v55 = vadd.f32 %v4440_v34, %v4439_v17  ;;  %v4447_v28 = vsel %vm15827_vm15, %v12699_v14, 0.0  ;;  %v12714_v10 = vmul.f32 %v12594_v13, %v15828_v59  ;;  %vm15836_vm14 = vmmov %vm15720_vm1 }
 0x5bd   :  { %9577 = vmatprep.mubr.msk.f32.mxu0 %vm15720_vm1, %v4515_v25  ;;  %v4517_v47 = vmul.f32 %v10159_v53, %v12582_v8  ;;  %v4518_v4 = vmul.f32 %v10159_v53, %v12588_v48  ;;  %10164 = vrcp.f32 %v4482_v57  ;;  %v4434_v9 = vadd.f32 %v4433_v16, %v4432_v23  ;;  %v15833_v48 = vld [vmem:[#allocation148_spill] sm:$0xff]  ;;  %vm15837_vm15 = vmmov %vm15720_vm1 }
 0x5be   :  { %v4427_v22 = vadd.f32 %v4426_v45, %v4425_v42  ;;  %v4442_v19 = vrot.slane %v4441_v55, 2  ;;  %v4448_v2 = vadd.f32 %v4447_v28, %v4446_v54  ;;  %v4455_v29 = vsel %vm15829_vm2, %v12703_v41, 0.0  ;;  %vm15838_vm2 = vmmov %vm15720_vm1 }
 0x5bf   :  { %v10161_v17 = vpop.eup %10160  ;;  %9578 = vmatmul.mubr.msk.f32.gmra.mrb[52].mxu0 %vm15830_vm3, %v4516_v15  ;;  %v4435_v30 = vrot.slane %v4434_v9, 1  ;;  %v4456_v13 = vsel %vm15831_vm11, %v12714_v10, 0.0  ;;  %v12726_v8 = vmul.f32 %v12614_v12, %v15832_v38  ;;  %v12730_v23 = vmul.f32 %v12620_v18, %v15833_v48  ;;  %vm15839_vm3 = vmmov %vm15720_vm1 }
 0x5c0   :  { %9580 = vmatprep.mubr.msk.f32.mxu0 %vm15834_vm12, %v4517_v47  ;;  %v4519_v42 = vmul.f32 %v10161_v17, %v12600_v50  ;;  %v4520_v34 = vmul.f32 %v10161_v17, %v12604_v26  ;;  %v4483_v54 = vmax.f32 %v4427_v22, 1e-20  ;;  %v4443_v25 = vadd.f32 %v4442_v19, %v4441_v55  ;;  %vm15840_vm11 = vmmov %vm15720_vm1 }
 0x5c1   :  { %v4436_v15 = vadd.f32 %v4435_v30, %v4434_v9  ;;  %v4449_v57 = vrot.slane %v4448_v2, 4  ;;  %v4457_v16 = vadd.f32 %v4456_v13, %v4455_v29  ;;  %v4464_v53 = vsel %vm15835_vm13, %v12726_v8, 0.0  ;;  %vm15841_vm12 = vmmov %vm15720_vm1 }
 0x5c2   :  { %10166 = vrcp.f32 %v4483_v54  ;;  %v4444_v12 = vrot.slane %v4443_v25, 1  ;;  %v4465_v18 = vsel %vm15836_vm14, %v12730_v23, 0.0  ;;  %vm15842_vm13 = vmmov %vm15720_vm1 }
 0x5c3   :  { %9581 = vmatmul.mubr.msk.f32.gmra.mrb[54].mxu0 %vm15837_vm15, %v4518_v4  ;;  %v4484_v45 = vmax.f32 %v4436_v15, 1e-20  ;;  %v4450_v28 = vadd.f32 %v4449_v57, %v4448_v2  ;;  %v4458_v50 = vrot.slane %v4457_v16, 4  ;;  %v4466_v47 = vadd.f32 %v4465_v18, %v4464_v53  ;;  %vm15843_vm14 = vmmov %vm15720_vm1 }
 0x5c4   :  { %v10163_v26 = vpop.eup %10162  ;;  %9583 = vmatprep.mubr.msk.f32.mxu0 %vm15720_vm1, %v4519_v42  ;;  %v4445_v55 = vadd.f32 %v4444_v12, %v4443_v25  ;;  %vm15844_vm15 = vmmov %vm15720_vm1 }
 0x5c5   :  { %v4521_v9 = vmul.f32 %v10163_v26, %v12610_v1  ;;  %v4522_v22 = vmul.f32 %v10163_v26, %v12618_v52  ;;  %10168 = vrcp.f32 %v4484_v45  ;;  %v4451_v19 = vrot.slane %v4450_v28, 2 }
 0x5c6   :  { %v4485_v29 = vmax.f32 %v4445_v55, 1e-20  ;;  %v4459_v17 = vadd.f32 %v4458_v50, %v4457_v16  ;;  %v4467_v30 = vrot.slane %v4466_v47, 4 }
 0x5c7   :  { %v10165_v13 = vpop.eup %10164  ;;  %9584 = vmatmul.mubr.msk.f32.gmra.mrb[56].mxu0 %vm15838_vm2, %v4520_v34  ;;  %v4452_v4 = vadd.f32 %v4451_v19, %v4450_v28  ;;  %vm15845_vm2 = vmmov %vm15720_vm1 }
 0x5c8   :  { %9586 = vmatprep.mubr.msk.f32.mxu0 %vm15839_vm3, %v4521_v9  ;;  %v4523_v2 = vmul.f32 %v10165_v13, %v12626_v62  ;;  %v4524_v42 = vmul.f32 %v10165_v13, %v12635_v58  ;;  %10170 = vrcp.f32 %v4485_v29  ;;  %v4460_v54 = vrot.slane %v4459_v17, 2  ;;  %vm15846_vm3 = vmmov %vm15720_vm1 }
 0x5c9   :  { %v4453_v1 = vrot.slane %v4452_v4, 1  ;;  %v4468_v25 = vadd.f32 %v4467_v30, %v4466_v47 }
 0x5ca   :  { %v4461_v52 = vadd.f32 %v4460_v54, %v4459_v17 }
 0x5cb   :  { %9587 = vmatmul.mubr.msk.f32.gmra.mrb[58].mxu0 %vm15840_vm11, %v4522_v22  ;;  %v4454_v15 = vadd.f32 %v4453_v1, %v4452_v4  ;;  %v4469_v57 = vrot.slane %v4468_v25, 2  ;;  %vm15847_vm11 = vmmov %vm15720_vm1 }
 0x5cc   :  { %v10167_v16 = vpop.eup %10166  ;;  %9589 = vmatprep.mubr.msk.f32.mxu0 %vm15841_vm12, %v4523_v2  ;;  %v4462_v34 = vrot.slane %v4461_v52, 1  ;;  %vm15848_vm12 = vmmov %vm15720_vm1 }
 0x5cd   :  { %v4525_v53 = vmul.f32 %v10167_v16, %v12647_v32  ;;  %v4526_v12 = vmul.f32 %v10167_v16, %v12651_v39  ;;  %v4486_v62 = vmax.f32 %v4454_v15, 1e-20  ;;  %v4470_v18 = vadd.f32 %v4469_v57, %v4468_v25 }
 0x5ce   :  { %v4463_v58 = vadd.f32 %v4462_v34, %v4461_v52 }
 0x5cf   :  { %v10169_v45 = vpop.eup %10168  ;;  %9590 = vmatmul.mubr.msk.f32.gmra.mrb[60].mxu0 %vm15842_vm13, %v4524_v42  ;;  %10172 = vrcp.f32 %v4486_v62  ;;  %v4471_v28 = vrot.slane %v4470_v18, 1  ;;  %vm15849_vm13 = vmmov %vm15720_vm1 }
 0x5d0   :  { %9592 = vmatprep.mubr.msk.f32.mxu0 %vm15843_vm14, %v4525_v53  ;;  %v4527_v50 = vmul.f32 %v10169_v45, %v12655_v46  ;;  %v4528_v47 = vmul.f32 %v10169_v45, %v12667_v51  ;;  %v4487_v26 = vmax.f32 %v4463_v58, 1e-20  ;;  %vm15850_vm14 = vmmov %vm15720_vm1 }
 0x5d1   :  { %v4472_v55 = vadd.f32 %v4471_v28, %v4470_v18 }
 0x5d2   :  { %v10171_v9 = vpop.eup %10170  ;;  %10174 = vrcp.f32 %v4487_v26 }
 0x5d3   :  { %9593 = vmatmul.mubr.msk.f32.gmra.mrb[62].mxu0 %vm15844_vm15, %v4526_v12  ;;  %v4529_v32 = vmul.f32 %v10171_v9, %v12676_v61  ;;  %v4530_v39 = vmul.f32 %v10171_v9, %v12682_v5  ;;  %v4488_v22 = vmax.f32 %v4472_v55, 1e-20  ;;  %vm15851_vm15 = vmmov %vm15720_vm1 }
 0x5d4   :  { %9595 = vmatprep.mubr.msk.f32.mxu0 %vm15720_vm1, %v4527_v50 }
 0x5d5   :  { %10176 = vrcp.f32 %v4488_v22 }
 0x5d7   :  { %9596 = vmatmul.mubr.msk.f32.gmra.mrb[64].mxu0 %vm15845_vm2, %v4528_v47  ;;  %vm15852_vm2 = vmmov %vm15720_vm1 }
 0x5d8   :  { %9598 = vmatprep.mubr.msk.f32.mxu0 %vm15846_vm3, %v4529_v32 }
 0x5d9   :  { %v10173_v46 = vpop.eup %10172 }
 0x5da   :  { %v4531_v51 = vmul.f32 %v10173_v46, %v12695_v27  ;;  %v4532_v19 = vmul.f32 %v10173_v46, %v12699_v14 }
 0x5db   :  { %9599 = vmatmul.mubr.msk.f32.gmra.mrb[66].mxu0 %vm15847_vm11, %v4530_v39 }
 0x5dc   :  { %v10175_v29 = vpop.eup %10174  ;;  %9601 = vmatprep.mubr.msk.f32.mxu0 %vm15848_vm12, %v4531_v51 }
 0x5dd   :  { %v4533_v61 = vmul.f32 %v10175_v29, %v12703_v41  ;;  %v4534_v5 = vmul.f32 %v10175_v29, %v12714_v10 }
 0x5df   :  { %v10177_v17 = vpop.eup %10176  ;;  %9602 = vmatmul.mubr.msk.f32.gmra.mrb[68].mxu0 %vm15849_vm13, %v4532_v19 }
 0x5e0   :  { %9604 = vmatprep.mubr.msk.f32.mxu0 %vm15850_vm14, %v4533_v61  ;;  %v4535_v30 = vmul.f32 %v10177_v17, %v12726_v8  ;;  %v4536_v27 = vmul.f32 %v10177_v17, %v12730_v23 }
 0x5e3   :  { %9605 = vmatmul.mubr.msk.f32.gmra.mrb[70].mxu0 %vm15851_vm15, %v4534_v5 }
 0x5e4   :  { %9607 = vmatprep.mubr.msk.f32.mxu0 %vm15720_vm1, %v4535_v30 }
 0x5e7   :  { %9608 = vmatmul.mubr.msk.f32.gmra.mrb[72].mxu0 %vm15852_vm2, %v4536_v27 }
 0x67e   :  { %v9564_v14 = vpop.f32.mrb[42].mxu0 }
 0x67f   :  { %v4859_v41 = vmul.f32 %v9564_v14, %v12104_v63  ;;  %v4699_v13 = vpop.f32.mrb[43].mxu0 }
 0x680   :  { %v4858_v10 = vmul.f32 %v4699_v13, %v12107_v33 }
 0x681   :  { %v4891_v4 = vsel %vm1075_vm0, %v4859_v41, 0.0 }
 0x682   :  { %v4890_v2 = vsel %vm1075_vm0, %v4858_v10, 0.0  ;;  %v9567_v42 = vpop.f32.mrb[44].mxu0 }
 0x683   :  { %v4892_v8 = vadd.f32 %v4891_v4, %v4890_v2  ;;  %v4861_v23 = vmul.f32 %v9567_v42, %v12104_v63  ;;  %v4709_v54 = vpop.f32.mrb[45].mxu0 }
 0x684   :  { %v4860_v1 = vmul.f32 %v4709_v54, %v12107_v33  ;;  %v12797_v54 = vld [vmem:[%s8811_s5] ss:$0 sm:$0xff]  ;;  %s8817_s5 = sld [smem:[%s15256_s0 + %s10413_s2]]  }
 0x685   :  { %v4893_v25 = vrot.slane %v4892_v8, 4  ;;  %v4900_v52 = vsel %vm1075_vm0, %v4861_v23, 0.0 }
 0x686   :  { %v4899_v15 = vsel %vm1075_vm0, %v4860_v1, 0.0  ;;  %v9570_v57 = vpop.f32.mrb[46].mxu0 }
 0x687   :  { %v4894_v16 = vadd.f32 %v4893_v25, %v4892_v8  ;;  %v4901_v34 = vadd.f32 %v4900_v52, %v4899_v15  ;;  %v4863_v53 = vmul.f32 %v9570_v57, %v12104_v63  ;;  %v4719_v12 = vpop.f32.mrb[47].mxu0 }
 0x688   :  { %v4862_v62 = vmul.f32 %v4719_v12, %v12107_v33 }
 0x689   :  { %v4895_v18 = vrot.slane %v4894_v16, 2  ;;  %v4902_v58 = vrot.slane %v4901_v34, 4  ;;  %v4909_v45 = vsel %vm1075_vm0, %v4863_v53, 0.0 }
 0x68a   :  { %v4908_v28 = vsel %vm1075_vm0, %v4862_v62, 0.0  ;;  %v9573_v50 = vpop.f32.mrb[48].mxu0 }
 0x68b   :  { %v4896_v47 = vadd.f32 %v4895_v18, %v4894_v16  ;;  %v4903_v26 = vadd.f32 %v4902_v58, %v4901_v34  ;;  %v4910_v55 = vadd.f32 %v4909_v45, %v4908_v28  ;;  %v4865_v9 = vmul.f32 %v9573_v50, %v12104_v63  ;;  %v4729_v32 = vpop.f32.mrb[49].mxu0 }
 0x68c   :  { %v4864_v39 = vmul.f32 %v4729_v32, %v12107_v33 }
 0x68d   :  { %v4904_v22 = vrot.slane %v4903_v26, 2  ;;  %v4911_v46 = vrot.slane %v4910_v55, 4  ;;  %v4918_v51 = vsel %vm1075_vm0, %v4865_v9, 0.0  ;;  %v4897_v19 = vrot.slane %v4896_v47, 1 }
 0x68e   :  { %v4917_v29 = vsel %vm1075_vm0, %v4864_v39, 0.0  ;;  %v9576_v61 = vpop.f32.mrb[50].mxu0 }
 0x68f   :  { %v4905_v5 = vadd.f32 %v4904_v22, %v4903_v26  ;;  %v4912_v17 = vadd.f32 %v4911_v46, %v4910_v55  ;;  %v4919_v30 = vadd.f32 %v4918_v51, %v4917_v29  ;;  %v4739_v27 = vpop.f32.mrb[51].mxu0  ;;  %v4867_v14 = vmul.f32 %v9576_v61, %v12104_v63 }
 0x690   :  { %v4866_v41 = vmul.f32 %v4739_v27, %v12107_v33  ;;  %v4898_v2 = vadd.f32 %v4897_v19, %v4896_v47 }
 0x691   :  { %v4906_v13 = vrot.slane %v4905_v5, 1  ;;  %v4913_v10 = vrot.slane %v4912_v17, 2  ;;  %v4920_v4 = vrot.slane %v4919_v30, 4  ;;  %v4927_v42 = vsel %vm1075_vm0, %v4867_v14, 0.0 }
 0x692   :  { %v4926_v8 = vsel %vm1075_vm0, %v4866_v41, 0.0  ;;  %v9579_v23 = vpop.f32.mrb[52].mxu0  ;;  %v12805_v58 = vadd.f32 %v12797_v54, %v4898_v2 }
 0x693   :  { %v4907_v1 = vadd.f32 %v4906_v13, %v4905_v5  ;;  %v4914_v25 = vadd.f32 %v4913_v10, %v4912_v17  ;;  %v4921_v52 = vadd.f32 %v4920_v4, %v4919_v30  ;;  %v4928_v15 = vadd.f32 %v4927_v42, %v4926_v8  ;;  %v4749_v57 = vpop.f32.mrb[53].mxu0 }
 0x694   :  { %v4869_v16 = vmul.f32 %v9579_v23, %v12104_v63  ;;  %v4868_v34 = vmul.f32 %v4749_v57, %v12107_v33 }
 0x695   :  { %v12802_v53 = vadd.f32 %v12797_v54, %v4907_v1  ;;  %v4915_v12 = vrot.slane %v4914_v25, 1  ;;  %v4922_v62 = vrot.slane %v4921_v52, 2  ;;  %v4929_v18 = vrot.slane %v4928_v15, 4 }
 0x696   :  { %v4936_v45 = vsel %vm1075_vm0, %v4869_v16, 0.0  ;;  %v4935_v28 = vsel %vm1075_vm0, %v4868_v34, 0.0  ;;  %v9582_v50 = vpop.f32.mrb[54].mxu0 }
 0x697   :  { %v5073_v47 = vrot.slane %v12802_v53, 7  ;;  %v4916_v26 = vadd.f32 %v4915_v12, %v4914_v25  ;;  %v4923_v55 = vadd.f32 %v4922_v62, %v4921_v52  ;;  %v4930_v9 = vadd.f32 %v4929_v18, %v4928_v15  ;;  %v4759_v32 = vpop.f32.mrb[55].mxu0 }
 0x698   :  { %v4937_v39 = vadd.f32 %v4936_v45, %v4935_v28  ;;  %v4871_v22 = vmul.f32 %v9582_v50, %v12104_v63  ;;  %v4870_v46 = vmul.f32 %v4759_v32, %v12107_v33 }
 0x699   :  { %v5074_v51 = vsel %vm2767_vm4, %v5073_v47, %v12805_v58  ;;  %v12815_v19 = vadd.f32 %v12797_v54, %v4916_v26  ;;  %v4924_v29 = vrot.slane %v4923_v55, 1  ;;  %v4931_v61 = vrot.slane %v4930_v9, 2 }
 0x69a   :  { %v4938_v5 = vrot.slane %v4937_v39, 4  ;;  %v4945_v17 = vsel %vm1075_vm0, %v4871_v22, 0.0  ;;  %v4944_v30 = vsel %vm1075_vm0, %v4870_v46, 0.0  ;;  %v9585_v27 = vpop.f32.mrb[56].mxu0  ;;  %v5459_v22 = vld [vmem:[%s12823_s9] sm:$0xff]  ;;  %v5460_v46 = vld [vmem:[%s12823_s9 + $0x8] sm:$0xff] }
 0x69b   :  { %v5075_v14 = vrot.slane %v12815_v19, 6  ;;  %v4925_v41 = vadd.f32 %v4924_v29, %v4923_v55  ;;  %v4932_v13 = vadd.f32 %v4931_v61, %v4930_v9  ;;  %v4946_v10 = vadd.f32 %v4945_v17, %v4944_v30  ;;  %v4769_v4 = vpop.f32.mrb[57].mxu0 }
 0x69c   :  { %v4939_v2 = vadd.f32 %v4938_v5, %v4937_v39  ;;  %v4873_v42 = vmul.f32 %v9585_v27, %v12104_v63  ;;  %v4872_v8 = vmul.f32 %v4769_v4, %v12107_v33  ;;  %v9878_v30 = vpack.c.bf16 %v5460_v46, %v5459_v22  ;;  %v5462_v27 = vld [vmem:[%s12823_s9 + $0x18] sm:$0xff]  ;;  %v5321_v46 = vld [vmem:[%s12837_s13] sm:$0xff] }
 0x69d   :  { %v5076_v23 = vsel %vm2770_vm5, %v5075_v14, %v5074_v51  ;;  %v12829_v1 = vadd.f32 %v12797_v54, %v4925_v41  ;;  %v4933_v25 = vrot.slane %v4932_v13, 1  ;;  %v4947_v52 = vrot.slane %v4946_v10, 4  ;;  %v5461_v51 = vld [vmem:[%s12823_s9 + $0x10] sm:$0xff] }
 0x69e   :  { %v4940_v15 = vrot.slane %v4939_v2, 2  ;;  %v4954_v57 = vsel %vm1075_vm0, %v4873_v42, 0.0  ;;  %v4953_v16 = vsel %vm1075_vm0, %v4872_v8, 0.0  ;;  %v9588_v34 = vpop.f32.mrb[58].mxu0  ;;  %v5464_v42 = vld [vmem:[%s12823_s9 + $0x28] sm:$0xff]  ;;  %9879 = vmatprep.subr.bf16.mxu1 %v9878_v30 }
 0x69f   :  { %v5077_v12 = vrot.slane %v12829_v1, 5  ;;  %v4934_v62 = vadd.f32 %v4933_v25, %v4932_v13  ;;  %v4948_v18 = vadd.f32 %v4947_v52, %v4946_v10  ;;  %v4955_v45 = vadd.f32 %v4954_v57, %v4953_v16  ;;  %v4779_v28 = vpop.f32.mrb[59].mxu0  ;;  %9881 = vmatpush3.bf16.msra.mxu1 %v9878_v30 }
 0x6a0   :  { %v4941_v50 = vadd.f32 %v4940_v15, %v4939_v2  ;;  %v4875_v47 = vmul.f32 %v9588_v34, %v12104_v63  ;;  %v4874_v26 = vmul.f32 %v4779_v28, %v12107_v33  ;;  %v5463_v2 = vld [vmem:[%s12823_s9 + $0x20] sm:$0xff]  ;;  %v9882_v52 = vpack.c.bf16 %v5462_v27, %v5461_v51  ;;  %v5322_v51 = vld [vmem:[%s12837_s13 + $0x8] sm:$0xff] }
 0x6a1   :  { %v5078_v55 = vsel %vm2773_vm6, %v5077_v12, %v5076_v23  ;;  %v12843_v9 = vadd.f32 %v12797_v54, %v4934_v62  ;;  %v4949_v32 = vrot.slane %v4948_v18, 2  ;;  %v4956_v39 = vrot.slane %v4955_v45, 4  ;;  %v5465_v12 = vld [vmem:[%s12823_s9 + $0x30] sm:$0xff]  ;;  %v5466_v62 = vld [vmem:[%s12823_s9 + $0x38] sm:$0xff]  ;;  %s8824_s9 = sld [smem:[%s15256_s0 + %s10414_s6]]  }
 0x6a2   :  { %v4942_v29 = vrot.slane %v4941_v50, 1  ;;  %v4963_v61 = vsel %vm1075_vm0, %v4875_v47, 0.0  ;;  %v4962_v5 = vsel %vm1075_vm0, %v4874_v26, 0.0  ;;  %v9591_v17 = vpop.f32.mrb[60].mxu0  ;;  %9883 = vmatprep.subr.bf16.mxu1 %v9882_v52  ;;  %v9886_v47 = vpack.c.bf16 %v5464_v42, %v5463_v2 }
 0x6a3   :  { %v5079_v14 = vrot.slane %v12843_v9, 4  ;;  %v4950_v41 = vadd.f32 %v4949_v32, %v4948_v18  ;;  %v4957_v13 = vadd.f32 %v4956_v39, %v4955_v45  ;;  %v4964_v10 = vadd.f32 %v4963_v61, %v4962_v5  ;;  %v4789_v4 = vpop.f32.mrb[61].mxu0  ;;  %9885 = vmatpush3.bf16.msra.mxu1 %v9882_v52 }
 0x6a4   :  { %v4943_v8 = vadd.f32 %v4942_v29, %v4941_v50  ;;  %v4877_v23 = vmul.f32 %v9591_v17, %v12104_v63  ;;  %v4876_v25 = vmul.f32 %v4789_v4, %v12107_v33  ;;  %v9890_v17 = vpack.c.bf16 %v5466_v62, %v5465_v12  ;;  %9887 = vmatprep.subr.bf16.mxu1 %v9886_v47  ;;  %v5325_v62 = vld [vmem:[%s12837_s13 + $0x20] sm:$0xff] }
 0x6a5   :  { %v5080_v15 = vsel %vm2776_vm7, %v5079_v14, %v5078_v55  ;;  %v4951_v57 = vrot.slane %v4950_v41, 1  ;;  %v4958_v16 = vrot.slane %v4957_v13, 2  ;;  %v4965_v34 = vrot.slane %v4964_v10, 4 }
 0x6a6   :  { %v12860_v18 = vadd.f32 %v12797_v54, %v4943_v8  ;;  %v4972_v45 = vsel %vm1075_vm0, %v4877_v23, 0.0  ;;  %v4971_v28 = vsel %vm1075_vm0, %v4876_v25, 0.0  ;;  %v9594_v50 = vpop.f32.mrb[62].mxu0  ;;  %v9862_v23 = vpack.c.bf16 %v5322_v51, %v5321_v46 }
 0x6a7   :  { %v4952_v26 = vadd.f32 %v4951_v57, %v4950_v41  ;;  %v4959_v55 = vadd.f32 %v4958_v16, %v4957_v13  ;;  %v4966_v32 = vadd.f32 %v4965_v34, %v4964_v10  ;;  %v4973_v39 = vadd.f32 %v4972_v45, %v4971_v28  ;;  %v4799_v22 = vpop.f32.mrb[63].mxu0  ;;  %v5323_v13 = vld [vmem:[%s12837_s13 + $0x10] sm:$0xff]  ;;  %v5324_v10 = vld [vmem:[%s12837_s13 + $0x18] sm:$0xff]  ;;  %v5326_v45 = vld [vmem:[%s12837_s13 + $0x28] sm:$0xff]  ;;  %9889 = vmatpush3.bf16.msra.mxu1 %v9886_v47 }
 0x6a8   :  { %v5081_v29 = vrot.slane %v12860_v18, 3  ;;  %v4879_v61 = vmul.f32 %v9594_v50, %v12104_v63  ;;  %v4878_v5 = vmul.f32 %v4799_v22, %v12107_v33  ;;  %9863 = vmatprep.subr.bf16.mxu0 %v9862_v23  ;;  %v9866_v50 = vpack.c.bf16 %v5324_v10, %v5323_v13  ;;  %9891 = vmatprep.subr.bf16.mxu1 %v9890_v17  ;;  %v5328_v13 = vld [vmem:[%s12837_s13 + $0x38] sm:$0xff] }
 0x6a9   :  { %v12870_v30 = vadd.f32 %v12797_v54, %v4952_v26  ;;  %v4960_v27 = vrot.slane %v4959_v55, 1  ;;  %v4967_v14 = vrot.slane %v4966_v32, 2  ;;  %v4974_v41 = vrot.slane %v4973_v39, 4  ;;  %9865 = vmatpush3.bf16.msra.mxu0 %v9862_v23 }
 0x6aa   :  { %v5082_v4 = vsel %vm2779_vm8, %v5081_v29, %v5080_v15  ;;  %v4981_v2 = vsel %vm1075_vm0, %v4879_v61, 0.0  ;;  %v4980_v42 = vsel %vm1075_vm0, %v4878_v5, 0.0  ;;  %v9597_v8 = vpop.f32.mrb[64].mxu0  ;;  %9867 = vmatprep.subr.bf16.mxu0 %v9866_v50  ;;  %v9870_v61 = vpack.c.bf16 %v5326_v45, %v5325_v62 }
 0x6ab   :  { %v5083_v25 = vrot.slane %v12870_v30, 2  ;;  %v4961_v57 = vadd.f32 %v4960_v27, %v4959_v55  ;;  %v4968_v16 = vadd.f32 %v4967_v14, %v4966_v32  ;;  %v4975_v34 = vadd.f32 %v4974_v41, %v4973_v39  ;;  %v4809_v12 = vpop.f32.mrb[65].mxu0  ;;  %v5327_v41 = vld [vmem:[%s12837_s13 + $0x30] sm:$0xff]  ;;  %9893 = vmatpush3.bf16.msra.mxu1 %v9890_v17  ;;  %v7055_v17 = vld [vmem:[%s12891_s18] sm:$0xff]  ;;  %s8831_s13 = sld [smem:[%s15256_s0 + %s10423_s10]]  }
 0x6ac   :  { %v4982_v52 = vadd.f32 %v4981_v2, %v4980_v42  ;;  %v4881_v28 = vmul.f32 %v9597_v8, %v12104_v63  ;;  %v4880_v15 = vmul.f32 %v4809_v12, %v12107_v33  ;;  %v9874_v45 = vpack.c.bf16 %v5328_v13, %v5327_v41 }
 0x6ad   :  { %v5084_v26 = vsel %vm2782_vm9, %v5083_v25, %v5082_v4  ;;  %v12884_v22 = vadd.f32 %v12797_v54, %v4961_v57  ;;  %v4969_v46 = vrot.slane %v4968_v16, 1  ;;  %v4976_v51 = vrot.slane %v4975_v34, 2  ;;  %9869 = vmatpush3.bf16.msra.mxu0 %v9866_v50 }
 0x6ae   :  { %v4983_v55 = vrot.slane %v4982_v52, 4  ;;  %v4990_v32 = vsel %vm1075_vm0, %v4881_v28, 0.0  ;;  %v4989_v39 = vsel %vm1075_vm0, %v4880_v15, 0.0  ;;  %v9600_v29 = vpop.f32.mrb[66].mxu0  ;;  %9871 = vmatprep.subr.bf16.mxu0 %v9870_v61 }
 0x6af   :  { %v5085_v5 = vrot.slane %v12884_v22, 1  ;;  %v4977_v47 = vadd.f32 %v4976_v51, %v4975_v34  ;;  %v4991_v27 = vadd.f32 %v4990_v32, %v4989_v39  ;;  %v4819_v14 = vpop.f32.mrb[67].mxu0  ;;  %v4883_v4 = vmul.f32 %v9600_v29, %v12104_v63 }
 0x6b0   :  { %v4984_v10 = vadd.f32 %v4983_v55, %v4982_v52  ;;  %v4882_v2 = vmul.f32 %v4819_v14, %v12107_v33  ;;  %v4970_v8 = vadd.f32 %v4969_v46, %v4968_v16  ;;  %v7056_v55 = vld [vmem:[%s12891_s18 + $0x8] sm:$0xff] }
 0x6b1   :  { %v12899_v42 = vsel %vm15470_vm10, %v5085_v5, %v5084_v26  ;;  %v4978_v23 = vrot.slane %v4977_v47, 1  ;;  %v4992_v25 = vrot.slane %v4991_v27, 4  ;;  %v4999_v34 = vsel %vm1075_vm0, %v4883_v4, 0.0  ;;  %9873 = vmatpush3.bf16.msra.mxu0 %v9870_v61 }
 0x6b2   :  { %v4985_v57 = vrot.slane %v4984_v10, 2  ;;  %v4998_v12 = vsel %vm1075_vm0, %v4882_v2, 0.0  ;;  %v9603_v62 = vpop.f32.mrb[68].mxu0  ;;  %v12912_v5 = vadd.f32 %v12797_v54, %v4970_v8  ;;  %9875 = vmatprep.subr.bf16.mxu0 %v9874_v45  ;;  %v12915_v41 = vpack.c.bf16 %v7056_v55, %v7055_v17 }
 0x6b3   :  { %v4979_v52 = vadd.f32 %v4978_v23, %v4977_v47  ;;  %v4993_v28 = vadd.f32 %v4992_v25, %v4991_v27  ;;  %v5000_v15 = vadd.f32 %v4999_v34, %v4998_v12  ;;  %v4885_v26 = vmul.f32 %v9603_v62, %v12104_v63  ;;  %v4829_v16 = vpop.f32.mrb[69].mxu0 }
 0x6b4   :  { %v4986_v46 = vadd.f32 %v4985_v57, %v4984_v10  ;;  %v4884_v51 = vmul.f32 %v4829_v16, %v12107_v33  ;;  %9899 = vmatprep.subr.bf16.mxu1 %v12915_v41 }
 0x6b5   :  { %v12908_v50 = vadd.f32 %v12797_v54, %v4979_v52  ;;  %v4994_v32 = vrot.slane %v4993_v28, 2  ;;  %v5001_v39 = vrot.slane %v5000_v15, 4  ;;  %v5008_v29 = vsel %vm1075_vm0, %v4885_v26, 0.0  ;;  %9877 = vmatpush3.bf16.msra.mxu0 %v9874_v45 }
 0x6b6   :  { %v4987_v47 = vrot.slane %v4986_v46, 1  ;;  %v5007_v27 = vsel %vm1075_vm0, %v4884_v51, 0.0  ;;  %v9606_v14 = vpop.f32.mrb[70].mxu0 }
 0x6b7   :  { %v5087_v13 = vrot.slane %v12908_v50, 7  ;;  %v4995_v10 = vadd.f32 %v4994_v32, %v4993_v28  ;;  %v5002_v4 = vadd.f32 %v5001_v39, %v5000_v15  ;;  %v5009_v2 = vadd.f32 %v5008_v29, %v5007_v27  ;;  %v4839_v23 = vpop.f32.mrb[71].mxu0 }
 0x6b8   :  { %v4988_v25 = vadd.f32 %v4987_v47, %v4986_v46  ;;  %v4887_v57 = vmul.f32 %v9606_v14, %v12104_v63  ;;  %v4886_v61 = vmul.f32 %v4839_v23, %v12107_v33 }
 0x6b9   :  { %v5088_v8 = vsel %vm2767_vm4, %v5087_v13, %v12912_v5  ;;  %v4996_v34 = vrot.slane %v4995_v10, 1  ;;  %v5003_v12 = vrot.slane %v5002_v4, 2  ;;  %v5010_v62 = vrot.slane %v5009_v2, 4 }
 0x6ba   :  { %v12924_v52 = vadd.f32 %v12797_v54, %v4988_v25  ;;  %v5017_v28 = vsel %vm1075_vm0, %v4887_v57, 0.0  ;;  %v5016_v15 = vsel %vm1075_vm0, %v4886_v61, 0.0  ;;  %v9609_v26 = vpop.f32.mrb[72].mxu0 }
 0x6bb   :  { %v4997_v16 = vadd.f32 %v4996_v34, %v4995_v10  ;;  %v5004_v46 = vadd.f32 %v5003_v12, %v5002_v4  ;;  %v5011_v51 = vadd.f32 %v5010_v62, %v5009_v2  ;;  %v5018_v17 = vadd.f32 %v5017_v28, %v5016_v15  ;;  %v4849_v55 = vpop.f32.mrb[73].mxu0 }
 0x6bc   :  { %v5089_v32 = vrot.slane %v12924_v52, 6  ;;  %v4889_v39 = vmul.f32 %v9609_v26, %v12104_v63  ;;  %v4888_v29 = vmul.f32 %v4849_v55, %v12107_v33 }
 0x6bd   :  { %v5052_v45 = vadd.f32 %v12797_v54, %v4997_v16  ;;  %v5005_v47 = vrot.slane %v5004_v46, 1  ;;  %v5012_v27 = vrot.slane %v5011_v51, 2  ;;  %v5019_v14 = vrot.slane %v5018_v17, 4 }
 0x6be   :  { %v5090_v13 = vsel %vm2770_vm5, %v5089_v32, %v5088_v8  ;;  %v5026_v23 = vsel %vm1075_vm0, %v4889_v39, 0.0  ;;  %v5025_v10 = vsel %vm1075_vm0, %v4888_v29, 0.0 }
 0x6bf   :  { %v5091_v4 = vrot.slane %v5052_v45, 5  ;;  %v5006_v2 = vadd.f32 %v5005_v47, %v5004_v46  ;;  %v5013_v25 = vadd.f32 %v5012_v27, %v5011_v51  ;;  %v5020_v57 = vadd.f32 %v5019_v14, %v5018_v17 }
 0x6c0   :  { %v5027_v61 = vadd.f32 %v5026_v23, %v5025_v10 }
 0x6c1   :  { %v5092_v63 = vsel %vm2773_vm6, %v5091_v4, %v5090_v13  ;;  %v5053_v33 = vadd.f32 %v12797_v54, %v5006_v2  ;;  %v5014_v34 = vrot.slane %v5013_v25, 1  ;;  %v5021_v12 = vrot.slane %v5020_v57, 2 }
 0x6c2   :  { %v5028_v62 = vrot.slane %v5027_v61, 4 }
 0x6c3   :  { %v5093_v28 = vrot.slane %v5053_v33, 4  ;;  %v5015_v15 = vadd.f32 %v5014_v34, %v5013_v25  ;;  %v5022_v26 = vadd.f32 %v5021_v12, %v5020_v57  ;;  %v5103_v25 = vsel %vm1075_vm0, %v12899_v42, 0.0 }
 0x6c4   :  { %v5029_v8 = vadd.f32 %v5028_v62, %v5027_v61 }
 0x6c5   :  { %v5094_v16 = vsel %vm2776_vm7, %v5093_v28, %v5092_v63  ;;  %v5054_v55 = vadd.f32 %v12797_v54, %v5015_v15  ;;  %v5023_v32 = vrot.slane %v5022_v26, 1 }
 0x6c6   :  { %v5030_v46 = vrot.slane %v5029_v8, 2 }
 0x6c7   :  { %v5095_v51 = vrot.slane %v5054_v55, 3  ;;  %v5024_v17 = vadd.f32 %v5023_v32, %v5022_v26 }
 0x6c8   :  { %v5031_v39 = vadd.f32 %v5030_v46, %v5029_v8 }
 0x6c9   :  { %v5096_v29 = vsel %vm2779_vm8, %v5095_v51, %v5094_v16  ;;  %v5055_v47 = vadd.f32 %v12797_v54, %v5024_v17 }
 0x6ca   :  { %v5032_v27 = vrot.slane %v5031_v39, 1 }
 0x6cb   :  { %v5097_v14 = vrot.slane %v5055_v47, 2 }
 0x6cc   :  { %v5033_v13 = vadd.f32 %v5032_v27, %v5031_v39 }
 0x6cd   :  { %v5098_v23 = vsel %vm2782_vm9, %v5097_v14, %v5096_v29 }
 0x6ce   :  { %v5056_v10 = vadd.f32 %v12797_v54, %v5033_v13 }
 0x6d0   :  { %v5099_v4 = vrot.slane %v5056_v10, 1 }
 0x6d2   :  { %v5100_v2 = vsel %vm15470_vm10, %v5099_v4, %v5098_v23 }
 0x6d3   :  { %v5104_v57 = vsel %vm1075_vm0, %v5100_v2, 0.0 }
 0x6d4   :  { %v5105_v61 = vadd.f32 %v5104_v57, %v5103_v25 }
 0x6d6   :  { %v5106_v63 = vrot.slane %v5105_v61, 4 }
 0x6d8   :  { %v5107_v34 = vadd.f32 %v5106_v63, %v5105_v61 }
 0x6da   :  { %v5108_v12 = vrot.slane %v5107_v34, 2 }
 0x6dc   :  { %v5109_v62 = vadd.f32 %v5108_v12, %v5107_v34 }
 0x6de   :  { %v5110_v28 = vrot.slane %v5109_v62, 1 }
 0x6e0   :  { %v5111_v15 = vadd.f32 %v5110_v28, %v5109_v62 }
 0x6e2   :  { %v5112_v26 = vmul.f32 0.0625, %v5111_v15 }
 0x6e4   :  { %v5116_v8 = vrot.slane %v5112_v26, %v15652_v21 }
 0x6e6   :  { %v12949_v54 = vsub.f32 %v12805_v58, %v5116_v8  ;;  %v12952_v16 = vsub.f32 %v12802_v53, %v5116_v8  ;;  %v12955_v42 = vsub.f32 %v12815_v19, %v5116_v8  ;;  %v12958_v32 = vsub.f32 %v12829_v1, %v5116_v8 }
 0x6e7   :  { %v12961_v46 = vsub.f32 %v12843_v9, %v5116_v8  ;;  %v12964_v51 = vsub.f32 %v12860_v18, %v5116_v8  ;;  %v12967_v17 = vsub.f32 %v12870_v30, %v5116_v8  ;;  %v12970_v58 = vsub.f32 %v12884_v22, %v5116_v8 }
 0x6e8   :  { %v12973_v53 = vsub.f32 %v12912_v5, %v5116_v8  ;;  %v12976_v19 = vsub.f32 %v12908_v50, %v5116_v8  ;;  %v12979_v1 = vsub.f32 %v12924_v52, %v5116_v8  ;;  %v12981_v9 = vsub.f32 %v5052_v45, %v5116_v8 }
 0x6e9   :  { %v12983_v39 = vsub.f32 %v5053_v33, %v5116_v8  ;;  %v12985_v18 = vsub.f32 %v5054_v55, %v5116_v8  ;;  %v12987_v30 = vsub.f32 %v5055_v47, %v5116_v8  ;;  %v12989_v29 = vsub.f32 %v5056_v10, %v5116_v8 }
 0x6ea   :  { %v5134_v22 = vmul.f32 %v12952_v16, %v12952_v16  ;;  %v5135_v50 = vmul.f32 %v12955_v42, %v12955_v42  ;;  %v5133_v5 = vmul.f32 %v12949_v54, %v12949_v54  ;;  %v5136_v52 = vmul.f32 %v12958_v32, %v12958_v32 }
 0x6eb   :  { %v5142_v45 = vmul.f32 %v12976_v19, %v12976_v19  ;;  %v5143_v33 = vmul.f32 %v12979_v1, %v12979_v1  ;;  %v5137_v55 = vmul.f32 %v12961_v46, %v12961_v46  ;;  %v5138_v47 = vmul.f32 %v12964_v51, %v12964_v51 }
 0x6ec   :  { %v5139_v27 = vmul.f32 %v12967_v17, %v12967_v17  ;;  %v5144_v14 = vmul.f32 %v12981_v9, %v12981_v9  ;;  %v5140_v13 = vmul.f32 %v12970_v58, %v12970_v58  ;;  %v5145_v23 = vmul.f32 %v12983_v39, %v12983_v39 }
 0x6ed   :  { %v5165_v10 = vrot.slane %v5134_v22, 7  ;;  %v5167_v4 = vrot.slane %v5135_v50, 6  ;;  %v5141_v2 = vmul.f32 %v12973_v53, %v12973_v53  ;;  %v5146_v25 = vmul.f32 %v12985_v18, %v12985_v18 }
 0x6ee   :  { %v5147_v57 = vmul.f32 %v12987_v30, %v12987_v30  ;;  %v5179_v61 = vrot.slane %v5142_v45, 7  ;;  %v5148_v63 = vmul.f32 %v12989_v29, %v12989_v29  ;;  %v5169_v12 = vrot.slane %v5136_v52, 5 }
 0x6ef   :  { %v5166_v34 = vsel %vm2767_vm4, %v5165_v10, %v5133_v5  ;;  %v5181_v62 = vrot.slane %v5143_v33, 6  ;;  %v5171_v15 = vrot.slane %v5137_v55, 4  ;;  %v5183_v8 = vrot.slane %v5144_v14, 5 }
 0x6f0   :  { %v5168_v28 = vsel %vm2770_vm5, %v5167_v4, %v5166_v34  ;;  %v5180_v26 = vsel %vm2767_vm4, %v5179_v61, %v5141_v2  ;;  %v5173_v50 = vrot.slane %v5138_v47, 3  ;;  %v5185_v38 = vrot.slane %v5145_v23, 4 }
 0x6f1   :  { %v5170_v22 = vsel %vm2773_vm6, %v5169_v12, %v5168_v28  ;;  %v5182_v48 = vsel %vm2770_vm5, %v5181_v62, %v5180_v26  ;;  %v5175_v59 = vrot.slane %v5139_v27, 2  ;;  %v5187_v5 = vrot.slane %v5146_v25, 3 }
 0x6f2   :  { %v5172_v45 = vsel %vm2776_vm7, %v5171_v15, %v5170_v22  ;;  %v5184_v37 = vsel %vm2773_vm6, %v5183_v8, %v5182_v48  ;;  %v5177_v33 = vrot.slane %v5140_v13, 1  ;;  %v5189_v10 = vrot.slane %v5147_v57, 2  ;;  %v13048_v15 = vld [vmem:[%s8828_s24] ss:$0 sm:$0xff] }
 0x6f3   :  { %v5174_v52 = vsel %vm2779_vm8, %v5173_v50, %v5172_v45  ;;  %v5186_v55 = vsel %vm2776_vm7, %v5185_v38, %v5184_v37  ;;  %v5191_v47 = vrot.slane %v5148_v63, 1 }
 0x6f4   :  { %v5176_v14 = vsel %vm2782_vm9, %v5175_v59, %v5174_v52  ;;  %v5188_v4 = vsel %vm2779_vm8, %v5187_v5, %v5186_v55 }
 0x6f5   :  { %v5178_v2 = vsel %vm15470_vm10, %v5177_v33, %v5176_v14  ;;  %v5190_v23 = vsel %vm2782_vm9, %v5189_v10, %v5188_v4  ;;  %v13066_v33 = vld [vmem:[%s8829_s28] ss:$0 sm:$0xff] }
 0x6f6   :  { %v5192_v27 = vsel %vm15470_vm10, %v5191_v47, %v5190_v23  ;;  %v5195_v48 = vsel %vm1075_vm0, %v5178_v2, 0.0 }
 0x6f7   :  { %v5196_v25 = vsel %vm1075_vm0, %v5192_v27, 0.0 }
 0x6f8   :  { %v5197_v61 = vadd.f32 %v5196_v25, %v5195_v48 }
 0x6fa   :  { %v5198_v13 = vrot.slane %v5197_v61, 4 }
 0x6fc   :  { %v5199_v34 = vadd.f32 %v5198_v13, %v5197_v61 }
 0x6fe   :  { %v5200_v37 = vrot.slane %v5199_v34, 2 }
 0x700   :  { %v5201_v38 = vadd.f32 %v5200_v37, %v5199_v34 }
 0x702   :  { %v5202_v57 = vrot.slane %v5201_v38, 1 }
 0x704   :  { %v5203_v59 = vadd.f32 %v5202_v57, %v5201_v38 }
 0x706   :  { %v5204_v12 = vmul.f32 0.0625, %v5203_v59 }
 0x708   :  { %v5205_v62 = vadd.f32 1e-05, %v5204_v12 }
 0x70a   :  { %10178 = vrsqrt.f32 %v5205_v62 }
 0x714   :  { %v10179_v63 = vpop.eup %10178 }
 0x715   :  { %v13046_v28 = vrot.slane %v10179_v63, %v15652_v21 }
 0x717   :  { %v5226_v26 = vmul.f32 %v13046_v28, %v12989_v29  ;;  %v5211_v8 = vmul.f32 %v13046_v28, %v12949_v54  ;;  %v5212_v22 = vmul.f32 %v13046_v28, %v12952_v16  ;;  %v5213_v50 = vmul.f32 %v13046_v28, %v12955_v42 }
 0x718   :  { %v5214_v45 = vmul.f32 %v13046_v28, %v12958_v32  ;;  %v5215_v5 = vmul.f32 %v13046_v28, %v12961_v46  ;;  %v5216_v52 = vmul.f32 %v13046_v28, %v12964_v51  ;;  %v5217_v29 = vmul.f32 %v13046_v28, %v12967_v17 }
 0x719   :  { %v13069_v54 = vmul.f32 %v13048_v15, %v5226_v26  ;;  %v5218_v16 = vmul.f32 %v13046_v28, %v12970_v58  ;;  %v5234_v42 = vmul.f32 %v13048_v15, %v5211_v8  ;;  %v5235_v32 = vmul.f32 %v13048_v15, %v5212_v22 }
 0x71a   :  { %v5236_v46 = vmul.f32 %v13048_v15, %v5213_v50  ;;  %v5237_v55 = vmul.f32 %v13048_v15, %v5214_v45  ;;  %v5238_v51 = vmul.f32 %v13048_v15, %v5215_v5  ;;  %v5239_v17 = vmul.f32 %v13048_v15, %v5216_v52 }
 0x71b   :  { %v5240_v10 = vmul.f32 %v13048_v15, %v5217_v29  ;;  %v5241_v14 = vmul.f32 %v13048_v15, %v5218_v16  ;;  %v5257_v4 = vadd.f32 %v13066_v33, %v5234_v42  ;;  %v5258_v58 = vadd.f32 %v13066_v33, %v5235_v32 }
 0x71c   :  { %v5259_v47 = vadd.f32 %v13066_v33, %v5236_v46  ;;  %v5260_v2 = vadd.f32 %v13066_v33, %v5237_v55  ;;  %v5261_v23 = vadd.f32 %v13066_v33, %v5238_v51  ;;  %v5262_v27 = vadd.f32 %v13066_v33, %v5239_v17 }
 0x71d   :  { %v5263_v48 = vadd.f32 %v13066_v33, %v5240_v10  ;;  %v5264_v25 = vadd.f32 %v13066_v33, %v5241_v14  ;;  %vm5273_vm3 = vcmp.gt.f32.partialorder %v5257_v4, 0.0  ;;  %vm5274_vm11 = vcmp.gt.f32.partialorder %v5258_v58, 0.0 }
 0x71e   :  { %vm5275_vm12 = vcmp.gt.f32.partialorder %v5259_v47, 0.0  ;;  %vm5276_vm13 = vcmp.gt.f32.partialorder %v5260_v2, 0.0  ;;  %vm5277_vm14 = vcmp.gt.f32.partialorder %v5261_v23, 0.0  ;;  %vm5278_vm15 = vcmp.gt.f32.partialorder %v5262_v27, 0.0 }
 0x71f   :  { %vm5279_vm1 = vcmp.gt.f32.partialorder %v5263_v48, 0.0  ;;  %vm5280_vm2 = vcmp.gt.f32.partialorder %v5264_v25, 0.0  ;;  %v5289_v61 = vmul.f32 0.01, %v5257_v4  ;;  %v5290_v13 = vmul.f32 0.01, %v5258_v58 }
 0x720   :  { %v5291_v34 = vmul.f32 0.01, %v5259_v47  ;;  %v5292_v37 = vmul.f32 0.01, %v5260_v2  ;;  %v5293_v38 = vmul.f32 0.01, %v5261_v23  ;;  %v5219_v57 = vmul.f32 %v13046_v28, %v12973_v53 }
 0x721   :  { %v5294_v59 = vmul.f32 0.01, %v5262_v27  ;;  %v5295_v12 = vmul.f32 0.01, %v5263_v48  ;;  %v5296_v62 = vmul.f32 0.01, %v5264_v25  ;;  %v5305_v63 = vsel %vm5273_vm3, %v5257_v4, %v5289_v61 }
 0x722   :  { %v5306_v26 = vsel %vm5274_vm11, %v5258_v58, %v5290_v13  ;;  %v5307_v8 = vsel %vm5275_vm12, %v5259_v47, %v5291_v34  ;;  %v5308_v22 = vsel %vm5276_vm13, %v5260_v2, %v5292_v37  ;;  %v5309_v50 = vsel %vm5277_vm14, %v5261_v23, %v5293_v38 }
 0x723   :  { %v5310_v45 = vsel %vm5278_vm15, %v5262_v27, %v5294_v59  ;;  %v5311_v5 = vsel %vm5279_vm1, %v5263_v48, %v5295_v12  ;;  %v5312_v52 = vsel %vm5280_vm2, %v5264_v25, %v5296_v62  ;;  %v5352_v53 = vrot.slane %v5306_v26, 7 }
 0x724   :  { %v5354_v29 = vrot.slane %v5307_v8, 6  ;;  %v5356_v16 = vrot.slane %v5308_v22, 5  ;;  %v5358_v42 = vrot.slane %v5309_v50, 4  ;;  %v5360_v32 = vrot.slane %v5310_v45, 3 }
 0x725   :  { %v5353_v46 = vsel %vm2767_vm4, %v5352_v53, %v5305_v63  ;;  %v5362_v55 = vrot.slane %v5311_v5, 2  ;;  %v5364_v51 = vrot.slane %v5312_v52, 1  ;;  %v5220_v17 = vmul.f32 %v13046_v28, %v12976_v19 }
 0x726   :  { %v5355_v10 = vsel %vm2770_vm5, %v5354_v29, %v5353_v46  ;;  %v5221_v14 = vmul.f32 %v13046_v28, %v12979_v1  ;;  %v5222_v4 = vmul.f32 %v13046_v28, %v12981_v9  ;;  %v5223_v58 = vmul.f32 %v13046_v28, %v12983_v39 }
 0x727   :  { %v5357_v47 = vsel %vm2773_vm6, %v5356_v16, %v5355_v10  ;;  %v5224_v2 = vmul.f32 %v13046_v28, %v12985_v18  ;;  %v5225_v23 = vmul.f32 %v13046_v28, %v12987_v30  ;;  %v5242_v19 = vmul.f32 %v13048_v15, %v5219_v57 }
 0x728   :  { %v5359_v27 = vsel %vm2776_vm7, %v5358_v42, %v5357_v47  ;;  %v5243_v1 = vmul.f32 %v13048_v15, %v5220_v17  ;;  %v5244_v48 = vmul.f32 %v13048_v15, %v5221_v14  ;;  %v5245_v9 = vmul.f32 %v13048_v15, %v5222_v4  ;;  %v7057_v47 = vld [vmem:[%s12891_s18 + $0x10] sm:$0xff] }
 0x729   :  { %v5361_v39 = vsel %vm2779_vm8, %v5360_v32, %v5359_v27  ;;  %v5246_v25 = vmul.f32 %v13048_v15, %v5223_v58  ;;  %v5247_v61 = vmul.f32 %v13048_v15, %v5224_v2  ;;  %v5248_v18 = vmul.f32 %v13048_v15, %v5225_v23  ;;  %v7058_v2 = vld [vmem:[%s12891_s18 + $0x18] sm:$0xff] }
 0x72a   :  { %v5363_v30 = vsel %vm2782_vm9, %v5362_v55, %v5361_v39  ;;  %v5265_v28 = vadd.f32 %v13066_v33, %v5242_v19  ;;  %v5266_v13 = vadd.f32 %v13066_v33, %v5243_v1  ;;  %v5267_v34 = vadd.f32 %v13066_v33, %v5244_v48 }
 0x72b   :  { %v13128_v37 = vsel %vm15470_vm10, %v5364_v51, %v5363_v30  ;;  %v5268_v38 = vadd.f32 %v13066_v33, %v5245_v9  ;;  %v5269_v57 = vadd.f32 %v13066_v33, %v5246_v25  ;;  %v5270_v15 = vadd.f32 %v13066_v33, %v5247_v61  ;;  %v7059_v25 = vld [vmem:[%s12891_s18 + $0x20] sm:$0xff]  ;;  %v7060_v61 = vld [vmem:[%s12891_s18 + $0x28] sm:$0xff]  ;;  %v7061_v30 = vld [vmem:[%s12891_s18 + $0x30] sm:$0xff] }
 0x72c   :  { %9626 = vmatprep.mubr.msk.f32.mxu0 %vm1075_vm0, %v13128_v37  ;;  %9645 = vmatprep.mubr.msk.f32.mxu1 %vm1075_vm0, %v13128_v37  ;;  %v5271_v59 = vadd.f32 %v13066_v33, %v5248_v18  ;;  %v5272_v12 = vadd.f32 %v13066_v33, %v13069_v54  ;;  %vm5281_vm3 = vcmp.gt.f32.partialorder %v5265_v28, 0.0  ;;  %vm5282_vm11 = vcmp.gt.f32.partialorder %v5266_v13, 0.0 }
 0x72d   :  { %vm5283_vm12 = vcmp.gt.f32.partialorder %v5267_v34, 0.0  ;;  %vm5284_vm13 = vcmp.gt.f32.partialorder %v5268_v38, 0.0  ;;  %vm5285_vm14 = vcmp.gt.f32.partialorder %v5269_v57, 0.0  ;;  %v5297_v62 = vmul.f32 0.01, %v5265_v28 }
 0x72e   :  { %v5298_v63 = vmul.f32 0.01, %v5266_v13  ;;  %v5299_v26 = vmul.f32 0.01, %v5267_v34  ;;  %v5300_v8 = vmul.f32 0.01, %v5268_v38  ;;  %v9902_v9 = vpack.c.bf16 %v7058_v2, %v7057_v47 }
 0x72f   :  { %v5301_v22 = vmul.f32 0.01, %v5269_v57  ;;  %vm5286_vm15 = vcmp.gt.f32.partialorder %v5270_v15, 0.0  ;;  %vm5287_vm1 = vcmp.gt.f32.partialorder %v5271_v59, 0.0  ;;  %v5302_v50 = vmul.f32 0.01, %v5270_v15 }
 0x730   :  { %v5303_v45 = vmul.f32 0.01, %v5271_v59  ;;  %v5304_v5 = vmul.f32 0.01, %v5272_v12  ;;  %v5314_v52 = vsel %vm5282_vm11, %v5266_v13, %v5298_v63  ;;  %v5315_v53 = vsel %vm5283_vm12, %v5267_v34, %v5299_v26  ;;  %v7145_v34 = vld [vmem:[%s8821_s1] sm:$0xff]  ;;  %v7151_v26 = vld [vmem:[%s8821_s1 + $0x30] sm:$0xff] }
 0x731   :  { %v5316_v29 = vsel %vm5284_vm13, %v5268_v38, %v5300_v8  ;;  %vm5288_vm2 = vcmp.gt.f32.partialorder %v5272_v12, 0.0  ;;  %v5317_v33 = vsel %vm5285_vm14, %v5269_v57, %v5301_v22  ;;  %v5366_v54 = vrot.slane %v5314_v52, 7  ;;  %v7146_v38 = vld [vmem:[%s8821_s1 + $0x8] sm:$0xff]  ;;  %v7152_v8 = vld [vmem:[%s8821_s1 + $0x38] sm:$0xff] }
 0x732   :  { %v5313_v16 = vsel %vm5281_vm3, %v5265_v28, %v5297_v62  ;;  %v5318_v42 = vsel %vm5286_vm15, %v5270_v15, %v5302_v50  ;;  %v5368_v32 = vrot.slane %v5315_v53, 6  ;;  %v5319_v46 = vsel %vm5287_vm1, %v5271_v59, %v5303_v45  ;;  %v7062_v28 = vld [vmem:[%s12891_s18 + $0x38] sm:$0xff]  ;;  %v7147_v15 = vld [vmem:[%s8821_s1 + $0x10] sm:$0xff]  ;;  %v7150_v62 = vld [vmem:[%s8821_s1 + $0x28] sm:$0xff] }
 0x733   :  { %v5367_v55 = vsel %vm2767_vm4, %v5366_v54, %v5313_v16  ;;  %v5370_v51 = vrot.slane %v5316_v29, 5  ;;  %v5320_v17 = vsel %vm5288_vm2, %v5272_v12, %v5304_v5  ;;  %v5372_v14 = vrot.slane %v5317_v33, 4  ;;  %v7148_v59 = vld [vmem:[%s8821_s1 + $0x18] sm:$0xff]  ;;  %v7149_v12 = vld [vmem:[%s8821_s1 + $0x20] sm:$0xff]  ;;  %v5996_v50 = vld [vmem:[%s8817_s5 + $0x8] sm:$0xff] }
 0x734   :  { %v5369_v10 = vsel %vm2770_vm5, %v5368_v32, %v5367_v55  ;;  %v5374_v58 = vrot.slane %v5318_v42, 3  ;;  %v5376_v19 = vrot.slane %v5319_v46, 2  ;;  %v5378_v1 = vrot.slane %v5320_v17, 1  ;;  %v7681_v5 = vld [vmem:[%s8824_s9] sm:$0xff]  ;;  %v7682_v52 = vld [vmem:[%s8824_s9 + $0x8] sm:$0xff] }
 0x735   :  { %v5371_v4 = vsel %vm2773_vm6, %v5370_v51, %v5369_v10  ;;  %v9906_v18 = vpack.c.bf16 %v7060_v61, %v7059_v25  ;;  %v9910_v13 = vpack.c.bf16 %v7062_v28, %v7061_v30  ;;  %v9914_v57 = vpack.c.bf16 %v7146_v38, %v7145_v34  ;;  %v13173_v29 = vld [vmem:[%s10814_s19 + $0x1] ss:$0 sm:$0xff]  ;;  %v13183_v32 = vld [vmem:[%s10814_s19] ss:$0 sm:$0xff]  ;;  %v15854_v46 = vld [vmem:[#allocation8_spill] sm:$0xff]  ;;  %s10415_s19 = smov 23  }
 0x736   :  { %v5373_v23 = vsel %vm2776_vm7, %v5372_v14, %v5371_v4  ;;  %v9922_v63 = vpack.c.bf16 %v7150_v62, %v7149_v12  ;;  %v9926_v22 = vpack.c.bf16 %v7152_v8, %v7151_v26  ;;  %v9930_v53 = vpack.c.bf16 %v7682_v52, %v7681_v5  ;;  %v15853_v33 = vld [vmem:[#allocation7_spill] sm:$0xff]  ;;  %v15855_v10 = vld [vmem:[#allocation5_spill] sm:$0xff]  ;;  %v15862_v28 = vld [vmem:[#allocation12_spill] sm:$0xff]  ;;  %s13397_s11 = sld [smem:[%s15256_s0 + %s10415_s19]]  }
 0x737   :  { %v5375_v27 = vsel %vm2779_vm8, %v5374_v58, %v5373_v23  ;;  %v5592_v54 = vmul.f32 %v13173_v29, %v15853_v33  ;;  %v13178_v16 = vld [vmem:[%s10819_s23 + $0x1] ss:$0 sm:$0xff]  ;;  %v5555_v55 = vmul.f32 %v13183_v32, %v15854_v46  ;;  %v13188_v51 = vld [vmem:[%s10819_s23] ss:$0 sm:$0xff]  ;;  %v13194_v14 = vmul.f32 %v13173_v29, %v15855_v10  ;;  %v15856_v58 = vld [vmem:[#allocation6_spill] sm:$0xff]  ;;  %s8796_s23 = sld [smem:[%s15256_s0 + %s10422_s8]]  }
 0x738   :  { %v5377_v48 = vsel %vm2782_vm9, %v5376_v19, %v5375_v27  ;;  %v7278_v42 = vmul.f32 %v13178_v16, %v15853_v33  ;;  %v7241_v17 = vmul.f32 %v13188_v51, %v15854_v46  ;;  %v13198_v4 = vmul.f32 %v13178_v16, %v15855_v10  ;;  %v15857_v23 = vld [vmem:[#allocation9_spill] sm:$0xff]  ;;  %v15861_v61 = vld [vmem:[#allocation11_spill] sm:$0xff]  ;;  %v15863_v38 = vld [vmem:[#allocation16_spill] sm:$0xff] }
 0x739   :  { %v5379_v39 = vsel %vm15470_vm10, %v5378_v1, %v5377_v48  ;;  %v13202_v47 = vmul.f32 %v13183_v32, %v15856_v58  ;;  %v13206_v2 = vmul.f32 %v13188_v51, %v15856_v58  ;;  %v13210_v19 = vmul.f32 %v13173_v29, %v15857_v23  ;;  %v15865_v62 = vld [vmem:[#allocation18_spill] sm:$0xff]  ;;  %v15866_v8 = vld [vmem:[#allocation19_spill] sm:$0xff]  ;;  %v15868_v52 = vld [vmem:[#allocation21_spill] sm:$0xff] }
 0x73a   :  { %9627 = vmatmul.mubr.msk.f32.vlgmr.msra.gmra.mrb[74].mxu0 %vm1075_vm0, %v5379_v39  ;;  %9646 = vmatmul.mubr.msk.f32.vlgmr.msra.gmra.mrb[58].mxu1 %vm1075_vm0, %v5379_v39  ;;  %v13212_v27 = vadd.f32 %v5592_v54, %v5555_v55  ;;  %v13214_v1 = vadd.f32 %v7278_v42, %v7241_v17  ;;  %v13218_v48 = vmul.f32 %v13178_v16, %v15857_v23  ;;  %v15869_v54 = vld [vmem:[#allocation22_spill] sm:$0xff]  ;;  %v15870_v55 = vld [vmem:[#allocation23_spill] sm:$0xff]  ;;  %v15871_v58 = vld [vmem:[#allocation24_spill] sm:$0xff]  ;;  %vm15946_vm13 = vcmask 130048  }
 0x73b   :  { %9901 = vmatpush3.bf16.msra.mxu1 %v12915_v41  ;;  %9716 = vmatprep.mubr.msk.f32.mxu1 %vm1075_vm0, %v13128_v37  ;;  %v9918_v41 = vpack.c.bf16 %v7148_v59, %v7147_v15  ;;  %v13234_v30 = vmul.f32 %v13178_v16, %v15861_v61  ;;  %v13242_v34 = vmul.f32 %v13188_v51, %v15862_v28  ;;  %v15864_v59 = vld [vmem:[#allocation17_spill] sm:$0xff]  ;;  %vm15947_vm15 = vmmov %vm15946_vm13 }
 0x73c   :  { %9903 = vmatprep.subr.bf16.mxu1 %v9902_v9  ;;  %15858 = vst [vmem:[#allocation14_spill] sm:$0xff] %v13212_v27  ;;  %15859 = vst [vmem:[#allocation15_spill] sm:$0xff] %v13214_v1  ;;  %v13250_v15 = vmul.f32 %v13178_v16, %v15863_v38  ;;  %v13258_v12 = vmul.f32 %v13188_v51, %v15864_v59  ;;  %v13266_v26 = vmul.f32 %v13178_v16, %v15865_v62  ;;  %v15894_v27 = vld [vmem:[#allocation36_spill] sm:$0xff] }
 0x73d   :  { %v13288_v33 = vmul.f32 %v13188_v51, %v15868_v52  ;;  %v5598_v42 = vmul.f32 %v13173_v29, %v15869_v54  ;;  %v13294_v46 = vmul.f32 %v13178_v16, %v15869_v54  ;;  %v5561_v17 = vmul.f32 %v13183_v32, %v15870_v55  ;;  %vm15948_vm1 = vmmov %vm15946_vm13 }
 0x73e   :  { %v13300_v10 = vmul.f32 %v13188_v51, %v15870_v55  ;;  %v5599_v23 = vmul.f32 %v13173_v29, %v15871_v58  ;;  %v15878_v55 = vld [vmem:[#allocation28_spill] sm:$0xff]  ;;  %v5564_v49 = vmul.f32 %v13183_v32, %v15880_v3  ;;  %v5602_v40 = vmul.f32 %v13173_v29, %v15882_v31 }
 0x73f   :  { %9905 = vmatpush3.bf16.msra.mxu1 %v9902_v9  ;;  %v15860_v9 = vld [vmem:[#allocation10_spill] sm:$0xff]  ;;  %v5565_v35 = vmul.f32 %v13183_v32, %v15884_v7  ;;  %v5603_v44 = vmul.f32 %v13173_v29, %v15886_v11  ;;  %v5566_v0 = vmul.f32 %v13183_v32, %v15888_v60  ;;  %v5604_v20 = vmul.f32 %v13173_v29, %v15890_v43 }
 0x740   :  { %9907 = vmatprep.subr.bf16.mxu1 %v9906_v18  ;;  %v13226_v25 = vmul.f32 %v13188_v51, %v15860_v9  ;;  %v5567_v1 = vmul.f32 %v13183_v32, %v15892_v24  ;;  %v5605_v21 = vmul.f32 %v13173_v29, %v15894_v27 }
 0x743   :  { %9909 = vmatpush3.bf16.msra.mxu1 %v9906_v18  ;;  %v13230_v18 = vmul.f32 %v13173_v29, %v15861_v61  ;;  %v15873_v61 = vld [vmem:[#allocation25_spill] sm:$0xff] }
 0x744   :  { %9911 = vmatprep.subr.bf16.mxu1 %v9910_v13 }
 0x747   :  { %9913 = vmatpush3.bf16.msra.mxu1 %v9910_v13  ;;  %v13238_v13 = vmul.f32 %v13183_v32, %v15862_v28  ;;  %v5562_v28 = vmul.f32 %v13183_v32, %v15873_v61 }
 0x748   :  { %9915 = vmatprep.subr.bf16.mxu1 %v9914_v57 }
 0x74a   :  { %9717 = vmatmul.mubr.msk.f32.vlgmr.msra.gmra.mrb[60].mxu1 %vm1075_vm0, %v5379_v39 }
 0x74b   :  { %9917 = vmatpush3.bf16.msra.mxu1 %v9914_v57  ;;  %9735 = vmatprep.mubr.msk.f32.mxu1 %vm1075_vm0, %v13128_v37  ;;  %v5995_v37 = vld [vmem:[%s8817_s5] sm:$0xff]  ;;  %v13246_v57 = vmul.f32 %v13173_v29, %v15863_v38  ;;  %v13312_v38 = vmul.f32 %v13188_v51, %v15873_v61  ;;  %v13330_v61 = vmul.f32 %v13178_v16, %v15878_v55 }
 0x74c   :  { %9919 = vmatprep.subr.bf16.mxu1 %v9918_v41  ;;  %v9894_v45 = vpack.c.bf16 %v5996_v50, %v5995_v37  ;;  %v13274_v37 = vmul.f32 %v13188_v51, %v15866_v8  ;;  %v15867_v50 = vld [vmem:[#allocation20_spill] sm:$0xff] }
 0x74d   :  { %v13282_v5 = vmul.f32 %v13178_v16, %v15867_v50  ;;  %15879 = vst [vmem:[#allocation48_spill] sm:$0xff] %v13330_v61  ;;  %v15906_v61 = vld [vmem:[#allocation42_spill] sm:$0xff] }
 0x74e   :  { %9895 = vmatprep.subr.bf16.mxu0 %v9894_v45 }
 0x74f   :  { %9921 = vmatpush3.bf16.msra.mxu1 %v9918_v41  ;;  %9897 = vmatpush3.bf16.msra.mxu0 %v9894_v45  ;;  %v13254_v41 = vmul.f32 %v13183_v32, %v15864_v59  ;;  %v13278_v45 = vmul.f32 %v13173_v29, %v15867_v50  ;;  %v15874_v59 = vld [vmem:[#allocation26_spill] sm:$0xff]  ;;  %v15876_v50 = vld [vmem:[#allocation27_spill] sm:$0xff] }
 0x750   :  { %9923 = vmatprep.subr.bf16.mxu1 %v9922_v63  ;;  %v13324_v54 = vmul.f32 %v13188_v51, %v15876_v50 }
 0x752   :  { %15877 = vst [vmem:[#allocation47_spill] sm:$0xff] %v13324_v54 }
 0x753   :  { %9925 = vmatpush3.bf16.msra.mxu1 %v9922_v63  ;;  %v13262_v63 = vmul.f32 %v13173_v29, %v15865_v62  ;;  %v5600_v62 = vmul.f32 %v13173_v29, %v15874_v59 }
 0x754   :  { %9927 = vmatprep.subr.bf16.mxu1 %v9926_v22 }
 0x757   :  { %9929 = vmatpush3.bf16.msra.mxu1 %v9926_v22  ;;  %v13270_v22 = vmul.f32 %v13183_v32, %v15866_v8  ;;  %v13318_v8 = vmul.f32 %v13178_v16, %v15874_v59  ;;  %v13336_v59 = vmul.f32 %v13188_v51, %v15880_v3  ;;  %v13354_v3 = vmul.f32 %v13178_v16, %v15886_v11 }
 0x758   :  { %9931 = vmatprep.subr.bf16.mxu1 %v9930_v53  ;;  %v13372_v11 = vmul.f32 %v13188_v51, %v15892_v24 }
 0x759   :  { %15875 = vst [vmem:[#allocation46_spill] sm:$0xff] %v13318_v8  ;;  %15881 = vst [vmem:[#allocation51_spill] sm:$0xff] %v13336_v59  ;;  %v5608_v59 = vmul.f32 %v13173_v29, %v15906_v61 }
 0x75a   :  { %9736 = vmatmul.mubr.msk.f32.vlgmr.msra.gmra.mrb[62].mxu1 %vm1075_vm0, %v5379_v39  ;;  %v13222_v39 = vmul.f32 %v13183_v32, %v15860_v9  ;;  %v13306_v9 = vmul.f32 %v13178_v16, %v15871_v58  ;;  %v5601_v58 = vmul.f32 %v13173_v29, %v15878_v55  ;;  %v13348_v55 = vmul.f32 %v13188_v51, %v15884_v7 }
 0x75b   :  { %9933 = vmatpush3.bf16.msra.mxu1 %v9930_v53  ;;  %v5560_v53 = vmul.f32 %v13183_v32, %v15868_v52  ;;  %v5563_v52 = vmul.f32 %v13183_v32, %v15876_v50  ;;  %v13342_v50 = vmul.f32 %v13178_v16, %v15882_v31  ;;  %15887 = vst [vmem:[#allocation60_spill] sm:$0xff] %v13354_v3  ;;  %15893 = vst [vmem:[#allocation69_spill] sm:$0xff] %v13372_v11  ;;  %v15896_v3 = vld [vmem:[#allocation37_spill] sm:$0xff]  ;;  %v15900_v11 = vld [vmem:[#allocation39_spill] sm:$0xff] }
 0x75c   :  { %15872 = vst [vmem:[#allocation112_spill] sm:$0xff] %v13306_v9  ;;  %15885 = vst [vmem:[#allocation57_spill] sm:$0xff] %v13348_v55  ;;  %v13360_v31 = vmul.f32 %v13188_v51, %v15888_v60  ;;  %v13366_v7 = vmul.f32 %v13178_v16, %v15890_v43  ;;  %v13378_v60 = vmul.f32 %v13178_v16, %v15894_v27 }
 0x75d   :  { %15883 = vst [vmem:[#allocation54_spill] sm:$0xff] %v13342_v50  ;;  %v13384_v43 = vmul.f32 %v13188_v51, %v15896_v3  ;;  %v5569_v55 = vmul.f32 %v13183_v32, %v15900_v11  ;;  %v13401_v27 = vmul.f32 %v13188_v51, %v15900_v11  ;;  %v13419_v11 = vmul.f32 %v13178_v16, %v15906_v61 }
 0x75e   :  { %15889 = vst [vmem:[#allocation63_spill] sm:$0xff] %v13360_v31  ;;  %15891 = vst [vmem:[#allocation66_spill] sm:$0xff] %v13366_v7  ;;  %v5568_v31 = vmul.f32 %v13183_v32, %v15896_v3  ;;  %v15898_v7 = vld [vmem:[#allocation38_spill] sm:$0xff]  ;;  %v15902_v3 = vld [vmem:[#allocation40_spill] sm:$0xff] }
 0x75f   :  { %15895 = vst [vmem:[#allocation72_spill] sm:$0xff] %v13378_v60  ;;  %15897 = vst [vmem:[#allocation75_spill] sm:$0xff] %v13384_v43  ;;  %v5606_v50 = vmul.f32 %v13173_v29, %v15898_v7  ;;  %v13390_v24 = vmul.f32 %v13178_v16, %v15898_v7  ;;  %v5607_v60 = vmul.f32 %v13173_v29, %v15902_v3 }
 0x760   :  { %15901 = vst [vmem:[#allocation83_spill] sm:$0xff] %v13401_v27  ;;  %v13407_v7 = vmul.f32 %v13178_v16, %v15902_v3  ;;  %15907 = vst [vmem:[#allocation5_spill] sm:$0xff] %v13419_v11  ;;  %v15908_v27 = vld [vmem:[#allocation43_spill] sm:$0xff]  ;;  %v5610_v11 = vmul.f32 %v13173_v29, %v15692_v6 }
 0x761   :  { %15899 = vst [vmem:[#allocation78_spill] sm:$0xff] %v13390_v24  ;;  %v15904_v24 = vld [vmem:[#allocation41_spill] sm:$0xff]  ;;  %v5571_v8 = vmul.f32 %v13183_v32, %v15908_v27  ;;  %v13425_v3 = vmul.f32 %v13188_v51, %v15908_v27  ;;  %v13443_v27 = vmul.f32 %v13178_v16, %v15692_v6  ;;  %v13461_v6 = vadd.f32 %v13230_v18, %v13238_v13 }
 0x762   :  { %15903 = vst [vmem:[#allocation7_spill] sm:$0xff] %v13407_v7  ;;  %v5570_v43 = vmul.f32 %v13183_v32, %v15904_v24  ;;  %v13413_v36 = vmul.f32 %v13188_v51, %v15904_v24  ;;  %v15910_v7 = vld [vmem:[#allocation44_spill] sm:$0xff]  ;;  %v13490_v18 = vadd.f32 %v5603_v44, %v5566_v0  ;;  %v13492_v13 = vadd.f32 %v5604_v20, %v5567_v1 }
 0x763   :  { %15909 = vst [vmem:[#allocation6_spill] sm:$0xff] %v13425_v3  ;;  %v5609_v54 = vmul.f32 %v13173_v29, %v15910_v7  ;;  %v13431_v24 = vmul.f32 %v13178_v16, %v15910_v7  ;;  %v5573_v3 = vmul.f32 %v13183_v32, %v15693_v56  ;;  %v13449_v7 = vmul.f32 %v13188_v51, %v15693_v56 }
 0x764   :  { %15905 = vst [vmem:[#allocation8_spill] sm:$0xff] %v13413_v36  ;;  %v15912_v36 = vld [vmem:[#allocation45_spill] sm:$0xff]  ;;  %v13465_v29 = vadd.f32 %v13246_v57, %v13254_v41  ;;  %v13469_v56 = vadd.f32 %v13262_v63, %v13270_v22  ;;  %v13472_v16 = vadd.f32 %v13278_v45, %v5560_v53  ;;  %v13494_v57 = vadd.f32 %v5605_v21, %v5568_v31  ;;  %v15913_v53 = vld [vmem:[#allocation112_spill] sm:$0xff] }
 0x765   :  { %15911 = vst [vmem:[#allocation9_spill] sm:$0xff] %v13431_v24  ;;  %v5572_v9 = vmul.f32 %v13183_v32, %v15912_v36  ;;  %v13437_v61 = vmul.f32 %v13188_v51, %v15912_v36  ;;  %v13453_v24 = vadd.f32 %v13194_v14, %v13202_v47  ;;  %v13457_v36 = vadd.f32 %v13210_v19, %v13222_v39  ;;  %v8985_v39 = vld [vmem:[%s13397_s11] ss:$0 sm:$0xff] }
 0x766   :  { %v13474_v32 = vadd.f32 %v5598_v42, %v5561_v17  ;;  %v13476_v51 = vadd.f32 %v5599_v23, %v5562_v28  ;;  %v13478_v14 = vadd.f32 %v5600_v62, %v5563_v52  ;;  %v13480_v47 = vadd.f32 %v5601_v58, %v5564_v49  ;;  %v15915_v42 = vld [vmem:[#allocation46_spill] sm:$0xff]  ;;  %v15919_v28 = vld [vmem:[#allocation57_spill] sm:$0xff]  ;;  %v15921_v62 = vld [vmem:[#allocation63_spill] sm:$0xff] }
 0x767   :  { %v13482_v19 = vadd.f32 %v5602_v40, %v5565_v35  ;;  %v13496_v41 = vadd.f32 %v5606_v50, %v5569_v55  ;;  %v13498_v63 = vadd.f32 %v5607_v60, %v5570_v43  ;;  %v13502_v35 = vadd.f32 %v13198_v4, %v13206_v2  ;;  %v15924_v58 = vld [vmem:[#allocation69_spill] sm:$0xff]  ;;  %v15927_v55 = vld [vmem:[#allocation75_spill] sm:$0xff]  ;;  %v15928_v31 = vld [vmem:[#allocation72_spill] sm:$0xff] }
 0x768   :  { %v13504_v40 = vadd.f32 %v5608_v59, %v5571_v8  ;;  %v13508_v49 = vadd.f32 %v13218_v48, %v13226_v25  ;;  %v13510_v20 = vadd.f32 %v5609_v54, %v5572_v9  ;;  %v13514_v21 = vadd.f32 %v13234_v30, %v13242_v34  ;;  %v15922_v8 = vld [vmem:[#allocation60_spill] sm:$0xff]  ;;  %v15925_v59 = vld [vmem:[#allocation66_spill] sm:$0xff] }
 0x769   :  { %v13516_v1 = vadd.f32 %v5610_v11, %v5573_v3  ;;  %v13520_v4 = vadd.f32 %v13250_v15, %v13258_v12  ;;  %v13524_v48 = vadd.f32 %v13266_v26, %v13274_v37  ;;  %v13528_v25 = vadd.f32 %v13282_v5, %v13288_v33  ;;  %v15914_v12 = vld [vmem:[#allocation47_spill] sm:$0xff]  ;;  %v15917_v37 = vld [vmem:[#allocation48_spill] sm:$0xff] }
 0x76a   :  { %v13532_v30 = vadd.f32 %v13294_v46, %v13300_v10  ;;  %v13536_v15 = vadd.f32 %v15913_v53, %v13312_v38  ;;  %v13540_v17 = vadd.f32 %v15915_v42, %v15914_v12  ;;  %v15916_v26 = vld [vmem:[#allocation51_spill] sm:$0xff]  ;;  %v15918_v33 = vld [vmem:[#allocation4_spill] sm:$0xff]  ;;  %v15920_v46 = vld [vmem:[#allocation54_spill] sm:$0xff]  ;;  %v13553_v52 = vadd.f32 %v15922_v8, %v15921_v62 }
 0x76b   :  { %v13544_v23 = vadd.f32 %v15917_v37, %v15916_v26  ;;  %v13549_v10 = vadd.f32 %v15920_v46, %v15919_v28  ;;  %v13558_v50 = vadd.f32 %v15925_v59, %v15924_v58  ;;  %v13562_v60 = vadd.f32 %v15928_v31, %v15927_v55  ;;  %v15933_v12 = vld [vmem:[#allocation8_spill] sm:$0xff]  ;;  %v15934_v42 = vld [vmem:[#allocation7_spill] sm:$0xff]  ;;  %v15936_v37 = vld [vmem:[#allocation6_spill] sm:$0xff] }
 0x76c   :  { %15923 = vst [vmem:[#allocation10_spill] sm:$0xff] %v13553_v52  ;;  %v13574_v26 = vadd.f32 %v15934_v42, %v15933_v12  ;;  %v15937_v28 = vld [vmem:[#allocation5_spill] sm:$0xff] }
 0x76d   :  { %15926 = vst [vmem:[#allocation11_spill] sm:$0xff] %v13558_v50  ;;  %15929 = vst [vmem:[#allocation12_spill] sm:$0xff] %v13562_v60  ;;  %v13578_v46 = vadd.f32 %v15937_v28, %v15936_v37  ;;  %v15939_v58 = vld [vmem:[#allocation13_spill] sm:$0xff]  ;;  %v9023_v50 = vld [vmem:[%s13604_s21] ss:$0 sm:$0xff] }
 0x76e   :  { %15935 = vst [vmem:[#allocation17_spill] sm:$0xff] %v13574_v26  ;;  %v15940_v31 = vld [vmem:[#allocation9_spill] sm:$0xff]  ;;  %v15944_v26 = vld [vmem:[#allocation14_spill] sm:$0xff] }
 0x76f   :  { %15938 = vst [vmem:[#allocation18_spill] sm:$0xff] %v13578_v46 }
 0x80d   :  { %v9628_v0 = vpop.f32.mrb[74].mxu0  ;;  %v9647_v44 = vpop.f32.mrb[58].mxu1 }
 0x80e   :  { %v5546_v2 = vadd.f32 %v9647_v44, %v8985_v39  ;;  %v5450_v22 = vpop.f32.mrb[75].mxu0  ;;  %v5540_v45 = vpop.f32.mrb[59].mxu1  ;;  %v15931_v44 = vld [vmem:[#allocation78_spill] sm:$0xff] }
 0x80f   :  { %v5541_v34 = vadd.f32 %v8985_v39, %v5540_v45  ;;  %v15930_v39 = vld [vmem:[#allocation83_spill] sm:$0xff] }
 0x810   :  { %v5706_v5 = vcombine.high %v5546_v2, %v5546_v2  ;;  %v5713_v9 = vrot.slane %v5546_v2, %v15918_v33  ;;  %v13568_v2 = vadd.f32 %v15931_v44, %v15930_v39  ;;  %v8982_v45 = vld [vmem:[%s13487_s16] ss:$0 sm:$0xff]  ;;  %v13587_v39 = vadd.f32 %v15940_v31, %v13437_v61 }
 0x811   :  { %v5657_v38 = vcombine.high %v5541_v34, %v5541_v34  ;;  %v5664_v54 = vrot.slane %v5541_v34, %v15918_v33  ;;  %v13589_v44 = vadd.f32 %v9628_v0, %v8982_v45 }
 0x812   :  { %v5720_v43 = vrot.slane %v5706_v5, %v15918_v33  ;;  %v5721_v11 = vcombine.high %v5713_v9, %v5713_v9  ;;  %v5729_v3 = vrot.slane %v5713_v9, %v15918_v33  ;;  %15932 = vst [vmem:[#allocation16_spill] sm:$0xff] %v13568_v2  ;;  %15941 = vst [vmem:[#allocation19_spill] sm:$0xff] %v13587_v39 }
 0x813   :  { %v5671_v34 = vrot.slane %v5657_v38, %v15918_v33  ;;  %v5672_v53 = vcombine.high %v5664_v54, %v5664_v54  ;;  %v5680_v55 = vrot.slane %v5664_v54, %v15918_v33 }
 0x814   :  { %v5722_v5 = vcombine.high %v5720_v43, %v5720_v43  ;;  %v5736_v62 = vrot.slane %v5720_v43, %v15918_v33  ;;  %v5743_v9 = vrot.slane %v5721_v11, %v15918_v33  ;;  %v5751_v8 = vcombine.high %v5729_v3, %v5729_v3 }
 0x815   :  { %v5790_v59 = vrot.slane %v5729_v3, %v15939_v58  ;;  %v5694_v38 = vrot.slane %v5672_v53, %v15918_v33  ;;  %v13596_v43 = vadd.f32 %v13443_v27, %v13449_v7  ;;  %v13598_v3 = vadd.f32 %v8982_v45, %v5450_v22 }
 0x816   :  { %v13592_v12 = vrot.slane %v5722_v5, %v15918_v33  ;;  %v5753_v42 = vcombine.high %v5743_v9, %v5743_v9  ;;  %v5752_v11 = vcombine.high %v5736_v62, %v5736_v62  ;;  %v5673_v54 = vcombine.high %v5671_v34, %v5671_v34 }
 0x817   :  { %15943 = vst [vmem:[#allocation21_spill] sm:$0xff] %v13596_v43  ;;  %v5687_v53 = vrot.slane %v5671_v34, %v15918_v33  ;;  %v13607_v61 = vrot.slane %v5743_v9, %v15939_v58  ;;  %v13610_v0 = vrot.slane %v5751_v8, %v15939_v58  ;;  %v13613_v27 = vrot.slane %v5736_v62, %v15939_v58 }
 0x818   :  { %15942 = vst [vmem:[#allocation20_spill] sm:$0xff] %v13592_v12  ;;  %v13616_v7 = vadd.f32 %v5790_v59, %v13589_v44  ;;  %v5851_v45 = vadd.f32 %v5790_v59, %v13598_v3  ;;  %v5702_v34 = vcombine.high %v5680_v55, %v5680_v55  ;;  %v5704_v37 = vcombine.high %v5694_v38, %v5694_v38 }
 0x819   :  { %v13622_v28 = vrot.slane %v5753_v42, %v15939_v58  ;;  %v13626_v5 = vrot.slane %v13592_v12, %v15939_v58  ;;  %v5758_v62 = vrot.slane %v5680_v55, %v15939_v58  ;;  %v5762_v9 = vrot.slane %v5694_v38, %v15939_v58 }
 0x81a   :  { %v13631_v8 = vrot.slane %v5752_v11, %v15939_v58  ;;  %v13634_v31 = vrot.slane %v5673_v54, %v15918_v33  ;;  %v5766_v59 = vrot.slane %v5702_v34, %v15939_v58  ;;  %v5770_v22 = vrot.slane %v5704_v37, %v15939_v58 }
 0x81b   :  { %v5703_v42 = vcombine.high %v5687_v53, %v5687_v53  ;;  %v5835_v43 = vadd.f32 %v5758_v62, %v13598_v3  ;;  %v5836_v39 = vadd.f32 %v5758_v62, %v13589_v44  ;;  %v5837_v55 = vadd.f32 %v5762_v9, %v13598_v3 }
 0x81c   :  { %v5774_v38 = vrot.slane %v5687_v53, %v15939_v58  ;;  %v5838_v11 = vadd.f32 %v5762_v9, %v13589_v44  ;;  %v5839_v54 = vadd.f32 %v5766_v59, %v13598_v3  ;;  %v13645_v46 = vadd.f32 %v5851_v45, %v13498_v63 }
 0x81d   :  { %v9718_v2 = vpop.f32.mrb[60].mxu1  ;;  %v5867_v37 = vadd.f32 %v5835_v43, %v13453_v24  ;;  %v5868_v60 = vadd.f32 %v5836_v39, %v15944_v26  ;;  %v5869_v12 = vadd.f32 %v5837_v55, %v13457_v36  ;;  %v5840_v62 = vadd.f32 %v5766_v59, %v13589_v44 }
 0x81e   :  { %v7136_v34 = vpop.f32.mrb[61].mxu1  ;;  %v5705_v53 = vcombine.high %v13634_v31, %v13634_v31  ;;  %v5870_v9 = vadd.f32 %v5838_v11, %v13461_v6  ;;  %v5871_v52 = vadd.f32 %v5839_v54, %v13465_v29  ;;  %v5841_v63 = vadd.f32 %v5770_v22, %v13598_v3 }
 0x81f   :  { %vm5899_vm0 = vcmp.gt.f32.partialorder %v5867_v37, 0.0  ;;  %v5931_v45 = vmul.f32 0.2, %v5867_v37  ;;  %vm5900_vm3 = vcmp.gt.f32.partialorder %v5868_v60, 0.0  ;;  %v5932_v24 = vmul.f32 0.2, %v5868_v60 }
 0x820   :  { %v5778_v26 = vrot.slane %v13634_v31, %v15939_v58  ;;  %vm5901_vm11 = vcmp.gt.f32.partialorder %v5869_v12, 0.0  ;;  %v5933_v36 = vmul.f32 0.2, %v5869_v12  ;;  %v5934_v39 = vmul.f32 0.2, %v5870_v9 }
 0x821   :  { %v5963_v43 = vsel %vm5899_vm0, %v5867_v37, %v5931_v45  ;;  %v5964_v59 = vsel %vm5900_vm3, %v5868_v60, %v5932_v24  ;;  %vm5902_vm12 = vcmp.gt.f32.partialorder %v5870_v9, 0.0  ;;  %v5872_v55 = vadd.f32 %v5840_v62, %v13469_v56  ;;  %vm15950_vm0 = vmmov %vm15948_vm1 }
 0x822   :  { %v5782_v6 = vrot.slane %v5703_v42, %v15939_v58  ;;  %v13661_v29 = vadd.f32 %v9718_v2, %v9023_v50  ;;  %9652 = vmatprep.mubr.msk.f32.mxu0 %vm15946_vm13, %v5963_v43  ;;  %v5965_v11 = vsel %vm5901_vm11, %v5869_v12, %v5933_v36  ;;  %vm5903_vm14 = vcmp.gt.f32.partialorder %v5871_v52, 0.0  ;;  %vm15951_vm3 = vmmov %vm15950_vm0 }
 0x823   :  { %9653 = vmatmul.mubr.msk.f32.vlgmr.msra.gmra.mrb[76].mxu0 %vm15947_vm15, %v5964_v59  ;;  %v5935_v60 = vmul.f32 0.2, %v5871_v52  ;;  %v5873_v54 = vadd.f32 %v5841_v63, %v13472_v16  ;;  %v5842_v56 = vadd.f32 %v5770_v22, %v13589_v44  ;;  %v5843_v2 = vadd.f32 %v5774_v38, %v13598_v3 }
 0x824   :  { %15945 = vst [vmem:[#allocation22_spill] sm:$0xff] %v13661_v29  ;;  %9655 = vmatprep.mubr.msk.f32.mxu0 %vm15948_vm1, %v5965_v11  ;;  %v5966_v42 = vsel %vm5902_vm12, %v5870_v9, %v5934_v39  ;;  %v5844_v12 = vadd.f32 %v5774_v38, %v13589_v44  ;;  %v5845_v37 = vadd.f32 %v5778_v26, %v13598_v3  ;;  %vm5904_vm2 = vcmp.gt.f32.partialorder %v5872_v55, 0.0 }
 0x825   :  { %v5846_v62 = vadd.f32 %v5778_v26, %v13589_v44  ;;  %v5936_v45 = vmul.f32 0.2, %v5872_v55  ;;  %v5874_v24 = vadd.f32 %v5842_v56, %v13474_v32  ;;  %v5875_v36 = vadd.f32 %v5843_v2, %v13476_v51 }
 0x826   :  { %v5876_v16 = vadd.f32 %v5844_v12, %v13478_v14  ;;  %v5877_v22 = vadd.f32 %v5845_v37, %v13480_v47  ;;  %v5847_v9 = vadd.f32 %v5782_v6, %v13598_v3  ;;  %v13683_v38 = vadd.f32 %v9023_v50, %v7136_v34 }
 0x827   :  { %v5878_v63 = vadd.f32 %v5846_v62, %v13482_v19  ;;  %9656 = vmatmul.mubr.msk.f32.gmra.mrb[78].mxu0 %vm15950_vm0, %v5966_v42  ;;  %v5967_v26 = vsel %vm5903_vm14, %v5871_v52, %v5935_v60  ;;  %v5937_v39 = vmul.f32 0.2, %v5873_v54  ;;  %v5938_v43 = vmul.f32 0.2, %v5874_v24  ;;  %v9026_v19 = vld [vmem:[%s13667_s26] ss:$0 sm:$0xff]  ;;  %vm15952_vm14 = vmmov %vm15950_vm0 }
 0x828   :  { %15949 = vst [vmem:[#allocation23_spill] sm:$0xff] %v13683_v38  ;;  %9658 = vmatprep.mubr.msk.f32.mxu0 %vm15951_vm3, %v5967_v26  ;;  %vm5905_vm11 = vcmp.gt.f32.partialorder %v5873_v54, 0.0  ;;  %vm5906_vm12 = vcmp.gt.f32.partialorder %v5874_v24, 0.0  ;;  %v5939_v32 = vmul.f32 0.2, %v5875_v36  ;;  %v5968_v14 = vsel %vm5904_vm2, %v5872_v55, %v5936_v45  ;;  %vm15953_vm2 = vmmov %vm15951_vm3 }
 0x829   :  { %v5940_v51 = vmul.f32 0.2, %v5876_v16  ;;  %vm5907_vm13 = vcmp.gt.f32.partialorder %v5875_v36, 0.0  ;;  %vm5908_vm15 = vcmp.gt.f32.partialorder %v5876_v16, 0.0  ;;  %v5941_v47 = vmul.f32 0.2, %v5877_v22 }
 0x82a   :  { %vm5909_vm1 = vcmp.gt.f32.partialorder %v5877_v22, 0.0  ;;  %v5942_v50 = vmul.f32 0.2, %v5878_v63  ;;  %v5879_v34 = vadd.f32 %v5847_v9, %v13490_v18  ;;  %v5848_v52 = vadd.f32 %v5782_v6, %v13589_v44 }
 0x82b   :  { %9659 = vmatmul.mubr.msk.f32.gmra.mrb[80].mxu0 %vm15952_vm14, %v5968_v14  ;;  %v5969_v59 = vsel %vm5905_vm11, %v5873_v54, %v5937_v39  ;;  %v5970_v11 = vsel %vm5906_vm12, %v5874_v24, %v5938_v43  ;;  %vm5910_vm0 = vcmp.gt.f32.partialorder %v5878_v63, 0.0  ;;  %v5786_v55 = vrot.slane %v5705_v53, %v15939_v58  ;;  %vm15954_vm12 = vmmov %vm15953_vm2 }
 0x82c   :  { %9661 = vmatprep.mubr.msk.f32.mxu0 %vm15953_vm2, %v5969_v59  ;;  %v5971_v60 = vsel %vm5907_vm13, %v5875_v36, %v5939_v32  ;;  %v5972_v2 = vsel %vm5908_vm15, %v5876_v16, %v5940_v51  ;;  %v5943_v42 = vmul.f32 0.2, %v5879_v34  ;;  %v5880_v18 = vadd.f32 %v5848_v52, %v13492_v13  ;;  %vm15955_vm13 = vmmov %vm15953_vm2 }
 0x82d   :  { %v9737_v56 = vpop.f32.mrb[62].mxu1  ;;  %v5973_v37 = vsel %vm5909_vm1, %v5877_v22, %v5941_v47  ;;  %vm5911_vm3 = vcmp.gt.f32.partialorder %v5879_v34, 0.0  ;;  %v5849_v54 = vadd.f32 %v5786_v55, %v13598_v3  ;;  %v5974_v45 = vsel %vm5910_vm0, %v5878_v63, %v5942_v50  ;;  %vm15956_vm1 = vmmov %vm15953_vm2 }
 0x82e   :  { %v7232_v12 = vadd.f32 %v9737_v56, %v9026_v19  ;;  %v7226_v6 = vpop.f32.mrb[63].mxu1  ;;  %vm5915_vm11 = vcmp.gt.f32.partialorder %v13645_v46, 0.0  ;;  %v5947_v31 = vmul.f32 0.2, %v13645_v46  ;;  %v5850_v13 = vadd.f32 %v5786_v55, %v13589_v44  ;;  %vm15957_vm14 = vmmov %vm15956_vm1 }
 0x82f   :  { %v7227_v62 = vadd.f32 %v9026_v19, %v7226_v6  ;;  %9662 = vmatmul.mubr.msk.f32.gmra.mrb[82].mxu0 %vm15954_vm12, %v5970_v11  ;;  %v13708_v36 = vadd.f32 %v13616_v7, %v13504_v40  ;;  %v5975_v63 = vsel %vm5911_vm3, %v5879_v34, %v5943_v42  ;;  %v5944_v9 = vmul.f32 0.2, %v5880_v18  ;;  %vm15958_vm2 = vmmov %vm15956_vm1 }
 0x830   :  { %v7392_v53 = vcombine.high %v7232_v12, %v7232_v12  ;;  %v7399_v24 = vrot.slane %v7232_v12, %v15918_v33  ;;  %9664 = vmatprep.mubr.msk.f32.mxu0 %vm15955_vm13, %v5971_v60  ;;  %v5881_v32 = vadd.f32 %v5849_v54, %v13494_v57  ;;  %vm5912_vm15 = vcmp.gt.f32.partialorder %v5880_v18, 0.0  ;;  %vm15959_vm3 = vmmov %vm15956_vm1 }
 0x831   :  { %v7343_v16 = vcombine.high %v7227_v62, %v7227_v62  ;;  %v7350_v22 = vrot.slane %v7227_v62, %v15918_v33  ;;  %v5976_v11 = vsel %vm5912_vm15, %v5880_v18, %v5944_v9  ;;  %v5882_v60 = vadd.f32 %v5850_v13, %v13496_v41  ;;  %vm15961_vm13 = vmmov %vm15956_vm1 }
 0x832   :  { %v7406_v26 = vrot.slane %v7392_v53, %v15918_v33  ;;  %v7407_v39 = vcombine.high %v7399_v24, %v7399_v24  ;;  %v7415_v43 = vrot.slane %v7399_v24, %v15918_v33  ;;  %v5945_v55 = vmul.f32 0.2, %v5881_v32 }
 0x833   :  { %v7357_v51 = vrot.slane %v7343_v16, %v15918_v33  ;;  %v7358_v14 = vcombine.high %v7350_v22, %v7350_v22  ;;  %v7366_v40 = vrot.slane %v7350_v22, %v15918_v33  ;;  %9665 = vmatmul.mubr.msk.f32.gmra.mrb[84].mxu0 %vm15956_vm1, %v5972_v2  ;;  %v5979_v56 = vsel %vm5915_vm11, %v13645_v46, %v5947_v31  ;;  %vm15960_vm11 = vmmov %vm15956_vm1 }
 0x834   :  { %v7408_v7 = vcombine.high %v7406_v26, %v7406_v26  ;;  %v13718_v47 = vrot.slane %v7406_v26, %v15918_v33  ;;  %v13721_v19 = vrot.slane %v7407_v39, %v15918_v33  ;;  %v7437_v50 = vcombine.high %v7415_v43, %v7415_v43  ;;  %9667 = vmatprep.mubr.msk.f32.mxu0 %vm15957_vm14, %v5973_v37 }
 0x835   :  { %v7476_v34 = vrot.slane %v7415_v43, %v15939_v58  ;;  %v7359_v52 = vcombine.high %v7357_v51, %v7357_v51  ;;  %v7373_v57 = vrot.slane %v7357_v51, %v15918_v33  ;;  %v7380_v59 = vrot.slane %v7358_v14, %v15918_v33 }
 0x836   :  { %v13733_v42 = vrot.slane %v7408_v7, %v15918_v33  ;;  %v7438_v2 = vcombine.high %v13718_v47, %v13718_v47  ;;  %v7439_v12 = vcombine.high %v13721_v19, %v13721_v19  ;;  %vm5913_vm0 = vcmp.gt.f32.partialorder %v5881_v32, 0.0 }
 0x837   :  { %v13741_v18 = vrot.slane %v13721_v19, %v15939_v58  ;;  %v13744_v41 = vrot.slane %v7437_v50, %v15939_v58  ;;  %v13747_v6 = vadd.f32 %v7476_v34, %v13683_v38  ;;  %v13750_v46 = vadd.f32 %v7476_v34, %v13661_v29  ;;  %9668 = vmatmul.mubr.msk.f32.gmra.mrb[86].mxu0 %vm15958_vm2, %v5974_v45  ;;  %vm15963_vm2 = vmmov %vm15956_vm1 }
 0x838   :  { %v13754_v37 = vrot.slane %v7359_v52, %v15918_v33  ;;  %v7388_v54 = vcombine.high %v7366_v40, %v7366_v40  ;;  %v7389_v62 = vcombine.high %v7373_v57, %v7373_v57  ;;  %v7390_v31 = vcombine.high %v7380_v59, %v7380_v59  ;;  %9670 = vmatprep.mubr.msk.f32.mxu0 %vm15959_vm3, %v5975_v63 }
 0x839   :  { %v7444_v53 = vrot.slane %v7366_v40, %v15939_v58  ;;  %v7448_v24 = vrot.slane %v7380_v59, %v15939_v58  ;;  %v13760_v13 = vrot.slane %v7373_v57, %v15939_v58  ;;  %v5977_v16 = vsel %vm5913_vm0, %v5881_v32, %v5945_v55  ;;  %v15962_v40 = vld [vmem:[#allocation15_spill] sm:$0xff] }
 0x83a   :  { %v7391_v22 = vcombine.high %v13754_v37, %v13754_v37  ;;  %v7452_v45 = vrot.slane %v7388_v54, %v15939_v58  ;;  %v13766_v33 = vrot.slane %v7390_v31, %v15939_v58  ;;  %v13770_v9 = vrot.slane %v13754_v37, %v15939_v58 }
 0x83b   :  { %v13773_v63 = vrot.slane %v7389_v62, %v15939_v58  ;;  %v7521_v26 = vadd.f32 %v7444_v53, %v13683_v38  ;;  %v7522_v39 = vadd.f32 %v7444_v53, %v13661_v29  ;;  %9671 = vmatmul.mubr.msk.f32.gmra.mrb[88].mxu0 %vm15960_vm11, %v5976_v11  ;;  %vm5914_vm12 = vcmp.gt.f32.partialorder %v5882_v60, 0.0  ;;  %vm15964_vm11 = vmmov %vm15956_vm1 }
 0x83c   :  { %9673 = vmatprep.mubr.msk.f32.mxu0 %vm15961_vm13, %v5977_v16  ;;  %v5946_v43 = vmul.f32 0.2, %v5882_v60  ;;  %vm5916_vm15 = vcmp.gt.f32.partialorder %v13708_v36, 0.0  ;;  %v5948_v32 = vmul.f32 0.2, %v13708_v36  ;;  %v7523_v51 = vadd.f32 %v7448_v24, %v13683_v38 }
 0x83d   :  { %v7553_v14 = vadd.f32 %v7521_v26, %v13502_v35  ;;  %v7554_v7 = vadd.f32 %v7522_v39, %v15962_v40  ;;  %v5853_v50 = vadd.f32 %v13607_v61, %v13598_v3  ;;  %v7524_v34 = vadd.f32 %v7448_v24, %v13661_v29 }
 0x83e   :  { %v5978_v52 = vsel %vm5914_vm12, %v5882_v60, %v5946_v43  ;;  %v5980_v57 = vsel %vm5916_vm15, %v13708_v36, %v5948_v32  ;;  %v7555_v59 = vadd.f32 %v7523_v51, %v13508_v49  ;;  %v5854_v11 = vadd.f32 %v13607_v61, %v13589_v44  ;;  %vm15965_vm15 = vmmov %vm15956_vm1 }
 0x83f   :  { %9674 = vmatmul.mubr.msk.f32.gmra.mrb[90].mxu0 %vm15956_vm1, %v5978_v52  ;;  %vm7585_vm14 = vcmp.gt.f32.partialorder %v7553_v14, 0.0  ;;  %v7617_v55 = vmul.f32 0.2, %v7553_v14  ;;  %vm7586_vm0 = vcmp.gt.f32.partialorder %v7554_v7, 0.0  ;;  %v7618_v35 = vmul.f32 0.2, %v7554_v7 }
 0x840   :  { %9676 = vmatprep.mubr.msk.f32.mxu0 %vm15963_vm2, %v5979_v56  ;;  %vm7587_vm3 = vcmp.gt.f32.partialorder %v7555_v59, 0.0  ;;  %v7619_v54 = vmul.f32 0.2, %v7555_v59  ;;  %v5885_v62 = vadd.f32 %v5853_v50, %v13510_v20  ;;  %v7556_v60 = vadd.f32 %v7524_v34, %v13514_v21 }
 0x841   :  { %v7649_v36 = vsel %vm7585_vm14, %v7553_v14, %v7617_v55  ;;  %v7650_v31 = vsel %vm7586_vm0, %v7554_v7, %v7618_v35  ;;  %v5886_v49 = vadd.f32 %v5854_v11, %v13516_v1  ;;  %v7525_v61 = vadd.f32 %v7452_v45, %v13683_v38  ;;  %vm15966_vm14 = vmmov %vm15956_vm1  ;;  %v15968_v14 = vld [vmem:[#allocation49_spill] sm:$0xff]  ;;  %v15969_v7 = vld [vmem:[#allocation52_spill] sm:$0xff] }
 0x842   :  { %9742 = vmatprep.mubr.msk.f32.mxu1 %vm15964_vm11, %v7649_v36  ;;  %v7651_v53 = vsel %vm7587_vm3, %v7555_v59, %v7619_v54  ;;  %vm5917_vm12 = vcmp.gt.f32.partialorder %v5885_v62, 0.0  ;;  %v5949_v24 = vmul.f32 0.2, %v5885_v62  ;;  %vm7588_vm13 = vcmp.gt.f32.partialorder %v7556_v60, 0.0  ;;  %vm15967_vm0 = vmmov %vm15956_vm1  ;;  %v15973_v55 = vld [vmem:[#allocation55_spill] sm:$0xff] }
 0x843   :  { %9743 = vmatmul.mubr.msk.f32.vlgmr.msra.gmra.mrb[64].mxu1 %vm15965_vm15, %v7650_v31  ;;  %9677 = vmatmul.mubr.msk.f32.gmra.mrb[92].mxu0 %vm15956_vm1, %v5980_v57  ;;  %v7620_v56 = vmul.f32 0.2, %v7556_v60  ;;  %vm5918_vm2 = vcmp.gt.f32.partialorder %v5886_v49, 0.0  ;;  %v5950_v20 = vmul.f32 0.2, %v5886_v49  ;;  %v7557_v21 = vadd.f32 %v7525_v61, %v13520_v4  ;;  %vm15970_vm11 = vmmov %vm15967_vm0  ;;  %v15976_v61 = vld [vmem:[#allocation58_spill] sm:$0xff] }
 0x844   :  { %9745 = vmatprep.mubr.msk.f32.mxu1 %vm15966_vm14, %v7651_v53  ;;  %v5981_v1 = vsel %vm5917_vm12, %v5885_v62, %v5949_v24  ;;  %v5855_v16 = vadd.f32 %v13610_v0, %v13598_v3  ;;  %v7526_v26 = vadd.f32 %v7452_v45, %v13661_v29  ;;  %v5856_v39 = vadd.f32 %v13610_v0, %v13589_v44  ;;  %vm15971_vm12 = vmmov %vm15967_vm0 }
 0x845   :  { %9679 = vmatprep.mubr.msk.f32.mxu0 %vm15967_vm0, %v5981_v1  ;;  %v7652_v43 = vsel %vm7588_vm13, %v7556_v60, %v7620_v56  ;;  %v5982_v32 = vsel %vm5918_vm2, %v5886_v49, %v5950_v20  ;;  %vm7589_vm3 = vcmp.gt.f32.partialorder %v7557_v21, 0.0  ;;  %v7621_v51 = vmul.f32 0.2, %v7557_v21  ;;  %vm15972_vm13 = vmmov %vm15967_vm0 }
 0x846   :  { %v5887_v40 = vadd.f32 %v5855_v16, %v15968_v14  ;;  %v7558_v4 = vadd.f32 %v7526_v26, %v13524_v48  ;;  %v5888_v50 = vadd.f32 %v5856_v39, %v15969_v7  ;;  %v7527_v34 = vadd.f32 %v13766_v33, %v13683_v38  ;;  %vm15974_vm14 = vmmov %vm15967_vm0  ;;  %v15980_v26 = vld [vmem:[#allocation61_spill] sm:$0xff]  ;;  %v15981_v7 = vld [vmem:[#allocation64_spill] sm:$0xff] }
 0x847   :  { %9746 = vmatmul.mubr.msk.f32.gmra.mrb[66].mxu1 %vm15970_vm11, %v7652_v43  ;;  %9680 = vmatmul.mubr.msk.f32.gmra.mrb[94].mxu0 %vm15971_vm12, %v5982_v32  ;;  %v7653_v0 = vsel %vm7589_vm3, %v7557_v21, %v7621_v51  ;;  %v5857_v45 = vadd.f32 %v13622_v28, %v13598_v3  ;;  %v7528_v52 = vadd.f32 %v13766_v33, %v13661_v29  ;;  %vm15975_vm12 = vmmov %vm15967_vm0 }
 0x848   :  { %9748 = vmatprep.mubr.msk.f32.mxu1 %vm15972_vm13, %v7653_v0  ;;  %vm5919_vm15 = vcmp.gt.f32.partialorder %v5887_v40, 0.0  ;;  %v5951_v48 = vmul.f32 0.2, %v5887_v40  ;;  %vm7590_vm1 = vcmp.gt.f32.partialorder %v7558_v4, 0.0  ;;  %v7622_v57 = vmul.f32 0.2, %v7558_v4 }
 0x849   :  { %vm5920_vm2 = vcmp.gt.f32.partialorder %v5888_v50, 0.0  ;;  %v5952_v59 = vmul.f32 0.2, %v5888_v50  ;;  %v7559_v11 = vadd.f32 %v7527_v34, %v13528_v25  ;;  %v5889_v35 = vadd.f32 %v5857_v45, %v15973_v55  ;;  %v15982_v0 = vld [vmem:[#allocation67_spill] sm:$0xff] }
 0x84a   :  { %v5983_v54 = vsel %vm5919_vm15, %v5887_v40, %v5951_v48  ;;  %v7654_v62 = vsel %vm7590_vm1, %v7558_v4, %v7622_v57  ;;  %v7560_v60 = vadd.f32 %v7528_v52, %v13532_v30  ;;  %v5858_v36 = vadd.f32 %v13622_v28, %v13589_v44  ;;  %vm15977_vm15 = vmmov %vm15967_vm0 }
 0x84b   :  { %9682 = vmatprep.mubr.msk.f32.mxu0 %vm15974_vm14, %v5983_v54  ;;  %9749 = vmatmul.mubr.msk.f32.gmra.mrb[68].mxu1 %vm15967_vm0, %v7654_v62  ;;  %v5984_v33 = vsel %vm5920_vm2, %v5888_v50, %v5952_v59  ;;  %vm7591_vm3 = vcmp.gt.f32.partialorder %v7559_v11, 0.0  ;;  %v7623_v31 = vmul.f32 0.2, %v7559_v11  ;;  %vm5921_vm11 = vcmp.gt.f32.partialorder %v5889_v35, 0.0  ;;  %vm15978_vm2 = vmmov %vm15967_vm0 }
 0x84c   :  { %9683 = vmatmul.mubr.msk.f32.gmra.mrb[96].mxu0 %vm15975_vm12, %v5984_v33  ;;  %v5953_v25 = vmul.f32 0.2, %v5889_v35  ;;  %vm7592_vm13 = vcmp.gt.f32.partialorder %v7560_v60, 0.0  ;;  %v7624_v49 = vmul.f32 0.2, %v7560_v60  ;;  %v5890_v53 = vadd.f32 %v5858_v36, %v15976_v61  ;;  %vm15979_vm14 = vmmov %vm15967_vm0 }
 0x84d   :  { %v7655_v24 = vsel %vm7591_vm3, %v7559_v11, %v7623_v31  ;;  %v7529_v30 = vadd.f32 %v13760_v13, %v13683_v38  ;;  %v5859_v28 = vadd.f32 %v13613_v27, %v13598_v3  ;;  %v7530_v56 = vadd.f32 %v13760_v13, %v13661_v29  ;;  %v15990_v31 = vld [vmem:[#allocation10_spill] sm:$0xff] }
 0x84e   :  { %9751 = vmatprep.mubr.msk.f32.mxu1 %vm15977_vm15, %v7655_v24  ;;  %v5985_v20 = vsel %vm5921_vm11, %v5889_v35, %v5953_v25  ;;  %v7656_v21 = vsel %vm7592_vm13, %v7560_v60, %v7624_v49  ;;  %vm5922_vm1 = vcmp.gt.f32.partialorder %v5890_v53, 0.0  ;;  %v5954_v1 = vmul.f32 0.2, %v5890_v53  ;;  %vm15983_vm13 = vmmov %vm15967_vm0  ;;  %v15991_v25 = vld [vmem:[#allocation73_spill] sm:$0xff] }
 0x84f   :  { %9685 = vmatprep.mubr.msk.f32.mxu0 %vm15978_vm2, %v5985_v20  ;;  %9752 = vmatmul.mubr.msk.f32.gmra.mrb[70].mxu1 %vm15979_vm14, %v7656_v21  ;;  %v7561_v16 = vadd.f32 %v7529_v30, %v13536_v15  ;;  %v5891_v39 = vadd.f32 %v5859_v28, %v15980_v26  ;;  %v7562_v43 = vadd.f32 %v7530_v56, %v13540_v17  ;;  %vm15984_vm15 = vmmov %vm15967_vm0  ;;  %v15993_v21 = vld [vmem:[#allocation11_spill] sm:$0xff] }
 0x850   :  { %v5986_v32 = vsel %vm5922_vm1, %v5890_v53, %v5954_v1  ;;  %v5860_v13 = vadd.f32 %v13613_v27, %v13589_v44  ;;  %v7531_v51 = vadd.f32 %v13770_v9, %v13683_v38  ;;  %v5861_v14 = vadd.f32 %v13626_v5, %v13598_v3  ;;  %vm15985_vm14 = vmmov %vm15967_vm0 }
 0x851   :  { %9686 = vmatmul.mubr.msk.f32.gmra.mrb[98].mxu0 %vm15967_vm0, %v5986_v32  ;;  %vm7593_vm3 = vcmp.gt.f32.partialorder %v7561_v16, 0.0  ;;  %v7625_v40 = vmul.f32 0.2, %v7561_v16  ;;  %vm5923_vm11 = vcmp.gt.f32.partialorder %v5891_v39, 0.0  ;;  %v5955_v15 = vmul.f32 0.2, %v5891_v39 }
 0x852   :  { %vm7594_vm12 = vcmp.gt.f32.partialorder %v7562_v43, 0.0  ;;  %v7626_v4 = vmul.f32 0.2, %v7562_v43  ;;  %v5892_v17 = vadd.f32 %v5860_v13, %v15981_v7  ;;  %v7563_v50 = vadd.f32 %v7531_v51, %v13544_v23 }
 0x853   :  { %v7657_v34 = vsel %vm7593_vm3, %v7561_v16, %v7625_v40  ;;  %v5987_v27 = vsel %vm5923_vm11, %v5891_v39, %v5955_v15  ;;  %v5893_v45 = vadd.f32 %v5861_v14, %v15982_v0  ;;  %v7532_v52 = vadd.f32 %v13770_v9, %v13661_v29  ;;  %vm15986_vm3 = vmmov %vm15983_vm13  ;;  %v15994_v16 = vld [vmem:[#allocation76_spill] sm:$0xff] }
 0x854   :  { %9754 = vmatprep.mubr.msk.f32.mxu1 %vm15983_vm13, %v7657_v34  ;;  %9688 = vmatprep.mubr.msk.f32.mxu0 %vm15984_vm15, %v5987_v27  ;;  %v7658_v48 = vsel %vm7594_vm12, %v7562_v43, %v7626_v4  ;;  %vm5924_vm1 = vcmp.gt.f32.partialorder %v5892_v17, 0.0  ;;  %v5956_v57 = vmul.f32 0.2, %v5892_v17  ;;  %vm7595_vm2 = vcmp.gt.f32.partialorder %v7563_v50, 0.0  ;;  %vm15987_vm12 = vmmov %vm15986_vm3  ;;  %v15995_v43 = vld [vmem:[#allocation20_spill] sm:$0xff]  ;;  %v16002_v27 = vld [vmem:[#allocation18_spill] sm:$0xff] }
 0x855   :  { %9755 = vmatmul.mubr.msk.f32.gmra.mrb[72].mxu1 %vm15985_vm14, %v7658_v48  ;;  %v7627_v59 = vmul.f32 0.2, %v7563_v50  ;;  %vm5925_vm0 = vcmp.gt.f32.partialorder %v5893_v45, 0.0  ;;  %v5957_v23 = vmul.f32 0.2, %v5893_v45  ;;  %v7564_v11 = vadd.f32 %v7532_v52, %v13549_v10  ;;  %vm15988_vm13 = vmmov %vm15986_vm3  ;;  %v15989_v10 = vld [vmem:[#allocation70_spill] sm:$0xff] }
 0x856   :  { %v5988_v55 = vsel %vm5924_vm1, %v5892_v17, %v5956_v57  ;;  %v5862_v35 = vadd.f32 %v13626_v5, %v13589_v44  ;;  %v7533_v9 = vadd.f32 %v13773_v63, %v13683_v38  ;;  %v5863_v54 = vadd.f32 %v13631_v8, %v13598_v3  ;;  %vm15992_vm15 = vmmov %vm15986_vm3  ;;  %v16000_v14 = vld [vmem:[#allocation12_spill] sm:$0xff]  ;;  %v16004_v48 = vld [vmem:[#allocation79_spill] sm:$0xff] }
 0x857   :  { %9689 = vmatmul.mubr.msk.f32.gmra.mrb[100].mxu0 %vm15986_vm3, %v5988_v55  ;;  %v7659_v62 = vsel %vm7595_vm2, %v7563_v50, %v7627_v59  ;;  %v5989_v60 = vsel %vm5925_vm0, %v5893_v45, %v5957_v23  ;;  %vm7596_vm11 = vcmp.gt.f32.partialorder %v7564_v11, 0.0  ;;  %v7628_v36 = vmul.f32 0.2, %v7564_v11  ;;  %vm15997_vm0 = vmmov %vm15986_vm3  ;;  %v16001_v50 = vld [vmem:[#allocation17_spill] sm:$0xff]  ;;  %v16006_v23 = vld [vmem:[#allocation16_spill] sm:$0xff] }
 0x858   :  { %9757 = vmatprep.mubr.msk.f32.mxu1 %vm15987_vm12, %v7659_v62  ;;  %9691 = vmatprep.mubr.msk.f32.mxu0 %vm15988_vm13, %v5989_v60  ;;  %v5894_v33 = vadd.f32 %v5862_v35, %v15989_v10  ;;  %v7565_v5 = vadd.f32 %v7533_v9, %v15990_v31  ;;  %v5895_v49 = vadd.f32 %v5863_v54, %v15991_v25  ;;  %vm15998_vm3 = vmmov %vm15997_vm0 }
 0x859   :  { %v7660_v61 = vsel %vm7596_vm11, %v7564_v11, %v7628_v36  ;;  %v7534_v53 = vadd.f32 %v13773_v63, %v13661_v29  ;;  %v5864_v24 = vadd.f32 %v13631_v8, %v13589_v44  ;;  %v7472_v30 = vrot.slane %v7391_v22, %v15939_v58  ;;  %vm15999_vm13 = vmmov %vm15997_vm0 }
 0x85a   :  { %9758 = vmatmul.mubr.msk.f32.gmra.mrb[74].mxu1 %vm15992_vm15, %v7660_v61  ;;  %vm5926_vm1 = vcmp.gt.f32.partialorder %v5894_v33, 0.0  ;;  %v5958_v28 = vmul.f32 0.2, %v5894_v33  ;;  %vm7597_vm2 = vcmp.gt.f32.partialorder %v7565_v5, 0.0  ;;  %v7629_v56 = vmul.f32 0.2, %v7565_v5  ;;  %vm16003_vm15 = vmmov %vm15997_vm0 }
 0x85b   :  { %vm5927_vm14 = vcmp.gt.f32.partialorder %v5895_v49, 0.0  ;;  %v5959_v20 = vmul.f32 0.2, %v5895_v49  ;;  %v7566_v1 = vadd.f32 %v7534_v53, %v15993_v21  ;;  %v5896_v63 = vadd.f32 %v5864_v24, %v15994_v16  ;;  %v16014_v24 = vld [vmem:[#allocation21_spill] sm:$0xff] }
 0x85c   :  { %v5990_v26 = vsel %vm5926_vm1, %v5894_v33, %v5958_v28  ;;  %v7661_v39 = vsel %vm7597_vm2, %v7565_v5, %v7629_v56  ;;  %v7535_v8 = vadd.f32 %v7472_v30, %v13683_v38  ;;  %v15996_v37 = vcombine.high %v15995_v43, %v15995_v43  ;;  %vm16005_vm2 = vmmov %vm15997_vm0 }
 0x85d   :  { %9692 = vmatmul.mubr.msk.f32.gmra.mrb[102].mxu0 %vm15997_vm0, %v5990_v26  ;;  %9760 = vmatprep.mubr.msk.f32.mxu1 %vm15998_vm3, %v7661_v39  ;;  %v5991_v32 = vsel %vm5927_vm14, %v5895_v49, %v5959_v20  ;;  %vm7598_vm11 = vcmp.gt.f32.partialorder %v7566_v1, 0.0  ;;  %v7630_v13 = vmul.f32 0.2, %v7566_v1  ;;  %vm5928_vm12 = vcmp.gt.f32.partialorder %v5896_v63, 0.0  ;;  %vm16008_vm3 = vmmov %vm16005_vm2  ;;  %v16012_v49 = vld [vmem:[#allocation19_spill] sm:$0xff] }
 0x85e   :  { %v5818_v22 = vrot.slane %v15996_v37, %v15939_v58  ;;  %9694 = vmatprep.mubr.msk.f32.mxu0 %vm15999_vm13, %v5991_v32  ;;  %v5960_v51 = vmul.f32 0.2, %v5896_v63  ;;  %v7567_v40 = vadd.f32 %v7535_v8, %v16000_v14  ;;  %v7536_v4 = vadd.f32 %v7472_v30, %v13661_v29  ;;  %vm16009_vm13 = vmmov %vm16005_vm2  ;;  %v16018_v37 = vld [vmem:[#allocation56_spill] sm:$0xff]  ;;  %v16021_v14 = vld [vmem:[#allocation62_spill] sm:$0xff] }
 0x85f   :  { %v7662_v7 = vsel %vm7598_vm11, %v7566_v1, %v7630_v13  ;;  %v7569_v34 = vadd.f32 %v13747_v6, %v16001_v50  ;;  %v7570_v0 = vadd.f32 %v13750_v46, %v16002_v27  ;;  %v7488_v59 = vrot.slane %v7439_v12, %v15939_v58  ;;  %v16007_v6 = vld [vmem:[#allocation84_spill] sm:$0xff]  ;;  %v16016_v1 = vld [vmem:[#allocation53_spill] sm:$0xff]  ;;  %v16020_v13 = vld [vmem:[#allocation59_spill] sm:$0xff] }
 0x860   :  { %v5865_v15 = vadd.f32 %v5818_v22, %v13598_v3  ;;  %v5866_v17 = vadd.f32 %v5818_v22, %v13589_v44  ;;  %9761 = vmatmul.mubr.msk.f32.gmra.mrb[76].mxu1 %vm16003_vm15, %v7662_v7  ;;  %v5992_v45 = vsel %vm5928_vm12, %v5896_v63, %v5960_v51  ;;  %vm7599_vm1 = vcmp.gt.f32.partialorder %v7567_v40, 0.0  ;;  %vm16010_vm15 = vmmov %vm16005_vm2 }
 0x861   :  { %v7631_v52 = vmul.f32 0.2, %v7567_v40  ;;  %9695 = vmatmul.mubr.msk.f32.gmra.mrb[104].mxu0 %vm16005_vm2, %v5992_v45  ;;  %v7568_v11 = vadd.f32 %v7536_v4, %v16006_v23  ;;  %vm7601_vm14 = vcmp.gt.f32.partialorder %v7569_v34, 0.0  ;;  %v7633_v9 = vmul.f32 0.2, %v7569_v34  ;;  %v16026_v23 = vld [vmem:[#allocation71_spill] sm:$0xff] }
 0x862   :  { %v5897_v57 = vadd.f32 %v5865_v15, %v16004_v48  ;;  %v5898_v55 = vadd.f32 %v5866_v17, %v16007_v6  ;;  %v7492_v19 = vrot.slane %v13718_v47, %v15939_v58  ;;  %v7634_v60 = vmul.f32 0.2, %v7570_v0  ;;  %v16023_v47 = vld [vmem:[#allocation65_spill] sm:$0xff] }
 0x863   :  { %v7663_v46 = vsel %vm7599_vm1, %v7567_v40, %v7631_v52  ;;  %vm7600_vm11 = vcmp.gt.f32.partialorder %v7568_v11, 0.0  ;;  %v7632_v54 = vmul.f32 0.2, %v7568_v11  ;;  %v7539_v36 = vadd.f32 %v13741_v18, %v13683_v38  ;;  %vm16011_vm1 = vmmov %vm16005_vm2 }
 0x864   :  { %vm5929_vm0 = vcmp.gt.f32.partialorder %v5897_v57, 0.0  ;;  %v5961_v35 = vmul.f32 0.2, %v5897_v57  ;;  %9763 = vmatprep.mubr.msk.f32.mxu1 %vm16008_vm3, %v7663_v46  ;;  %vm5930_vm12 = vcmp.gt.f32.partialorder %v5898_v55, 0.0  ;;  %v5962_v62 = vmul.f32 0.2, %v5898_v55 }
 0x865   :  { %v7664_v10 = vsel %vm7600_vm11, %v7568_v11, %v7632_v54  ;;  %v7540_v31 = vadd.f32 %v13741_v18, %v13661_v29  ;;  %v7541_v5 = vadd.f32 %v13744_v41, %v13683_v38  ;;  %v7665_v25 = vsel %vm7601_vm14, %v7569_v34, %v7633_v9  ;;  %v16015_v18 = vld [vmem:[#allocation50_spill] sm:$0xff] }
 0x866   :  { %v5993_v12 = vsel %vm5929_vm0, %v5897_v57, %v5961_v35  ;;  %v5994_v33 = vsel %vm5930_vm12, %v5898_v55, %v5962_v62  ;;  %9764 = vmatmul.mubr.msk.f32.gmra.mrb[78].mxu1 %vm16010_vm15, %v7664_v10  ;;  %vm7602_vm2 = vcmp.gt.f32.partialorder %v7570_v0, 0.0  ;;  %v7571_v61 = vadd.f32 %v7539_v36, %v16012_v49  ;;  %vm16013_vm0 = vmmov %vm16011_vm1  ;;  %v16025_v57 = vld [vmem:[#allocation68_spill] sm:$0xff]  ;;  %v16027_v55 = vld [vmem:[#allocation74_spill] sm:$0xff] }
 0x867   :  { %9697 = vmatprep.mubr.msk.f32.mxu0 %vm16009_vm13, %v5993_v12  ;;  %v7542_v53 = vadd.f32 %v13744_v41, %v13661_v29  ;;  %9766 = vmatprep.mubr.msk.f32.mxu1 %vm16013_vm0, %v7665_v25  ;;  %v7572_v30 = vadd.f32 %v7540_v31, %v16014_v24  ;;  %v7573_v28 = vadd.f32 %v7541_v5, %v16015_v18  ;;  %vm16017_vm14 = vmmov %vm16013_vm0  ;;  %v16028_v35 = vld [vmem:[#allocation77_spill] sm:$0xff]  ;;  %v16032_v31 = vld [vmem:[#allocation80_spill] sm:$0xff] }
 0x868   :  { %9698 = vmatmul.mubr.msk.f32.gmra.mrb[106].mxu0 %vm16011_vm1, %v5994_v33  ;;  %v7543_v56 = vadd.f32 %v7488_v59, %v13683_v38  ;;  %v7544_v20 = vadd.f32 %v7488_v59, %v13661_v29  ;;  %vm7603_vm3 = vcmp.gt.f32.partialorder %v7571_v61, 0.0  ;;  %v7635_v21 = vmul.f32 0.2, %v7571_v61  ;;  %vm16019_vm13 = vmmov %vm16013_vm0  ;;  %v16033_v5 = vld [vmem:[#allocation85_spill] sm:$0xff] }
 0x869   :  { %v7574_v16 = vadd.f32 %v7542_v53, %v16016_v1  ;;  %v7545_v63 = vadd.f32 %v7492_v19, %v13683_v38  ;;  %v7496_v26 = vrot.slane %v13733_v42, %v15939_v58  ;;  %v7666_v41 = vsel %vm7602_vm2, %v7570_v0, %v7634_v60  ;;  %vm16022_vm1 = vmmov %vm16013_vm0 }
 0x86a   :  { %v7636_v39 = vmul.f32 0.2, %v7572_v30  ;;  %v7637_v8 = vmul.f32 0.2, %v7573_v28  ;;  %9767 = vmatmul.mubr.msk.f32.gmra.mrb[80].mxu1 %vm16017_vm14, %v7666_v41  ;;  %v7667_v43 = vsel %vm7603_vm3, %v7571_v61, %v7635_v21  ;;  %vm7604_vm11 = vcmp.gt.f32.partialorder %v7572_v30, 0.0  ;;  %vm16024_vm2 = vmmov %vm16013_vm0 }
 0x86b   :  { %vm7605_vm12 = vcmp.gt.f32.partialorder %v7573_v28, 0.0  ;;  %v7575_v22 = vadd.f32 %v7543_v56, %v16018_v37  ;;  %v7500_v32 = vrot.slane %v7438_v2, %v15939_v58  ;;  %9769 = vmatprep.mubr.msk.f32.mxu1 %vm16019_vm13, %v7667_v43  ;;  %v7576_v51 = vadd.f32 %v7544_v20, %v16020_v13  ;;  %vm16029_vm3 = vmmov %vm16022_vm1 }
 0x86c   :  { %v7577_v40 = vadd.f32 %v7545_v63, %v16021_v14  ;;  %v7638_v15 = vmul.f32 0.2, %v7574_v16  ;;  %v7546_v4 = vadd.f32 %v7492_v19, %v13661_v29  ;;  %v7440_v7 = vcombine.high %v13733_v42, %v13733_v42  ;;  %vm16031_vm13 = vmmov %vm16022_vm1 }
 0x86d   :  { %v7668_v17 = vsel %vm7604_vm11, %v7572_v30, %v7636_v39  ;;  %v7669_v50 = vsel %vm7605_vm12, %v7573_v28, %v7637_v8  ;;  %vm7606_vm15 = vcmp.gt.f32.partialorder %v7574_v16, 0.0  ;;  %v7639_v34 = vmul.f32 0.2, %v7575_v22  ;;  %vm16030_vm12 = vmmov %vm16022_vm1  ;;  %v16041_v8 = vld [vmem:[#allocation98_spill] sm:$0xff] }
 0x86e   :  { %9770 = vmatmul.mubr.msk.f32.gmra.mrb[82].mxu1 %vm16022_vm1, %v7668_v17  ;;  %v7578_v2 = vadd.f32 %v7546_v4, %v16023_v47  ;;  %v7547_v27 = vadd.f32 %v7496_v26, %v13683_v38  ;;  %v7548_v0 = vadd.f32 %v7496_v26, %v13661_v29  ;;  %vm7607_vm0 = vcmp.gt.f32.partialorder %v7575_v22, 0.0  ;;  %v16040_v26 = vld [vmem:[#allocation99_spill] sm:$0xff] }
 0x86f   :  { %9772 = vmatprep.mubr.msk.f32.mxu1 %vm16024_vm2, %v7669_v50  ;;  %v7549_v45 = vadd.f32 %v7500_v32, %v13683_v38  ;;  %v7550_v52 = vadd.f32 %v7500_v32, %v13661_v29  ;;  %v7670_v42 = vsel %vm7606_vm15, %v7574_v16, %v7638_v15  ;;  %v7640_v48 = vmul.f32 0.2, %v7576_v51  ;;  %v16045_v15 = vld [vmem:[#allocation102_spill] sm:$0xff] }
 0x870   :  { %v7579_v59 = vadd.f32 %v7547_v27, %v16025_v57  ;;  %v7580_v11 = vadd.f32 %v7548_v0, %v16026_v23  ;;  %v7641_v6 = vmul.f32 0.2, %v7577_v40  ;;  %v7504_v54 = vrot.slane %v7440_v7, %v15939_v58  ;;  %v16048_v27 = vld [vmem:[#allocation109_spill] sm:$0xff] }
 0x871   :  { %v7581_v46 = vadd.f32 %v7549_v45, %v16027_v55  ;;  %v7582_v9 = vadd.f32 %v7550_v52, %v16028_v35  ;;  %v7671_v62 = vsel %vm7607_vm0, %v7575_v22, %v7639_v34  ;;  %vm7608_vm14 = vcmp.gt.f32.partialorder %v7576_v51, 0.0  ;;  %vm16034_vm0 = vmmov %vm16022_vm1  ;;  %v16049_v52 = vld [vmem:[#allocation108_spill] sm:$0xff] }
 0x872   :  { %9773 = vmatmul.mubr.msk.f32.gmra.mrb[84].mxu1 %vm16029_vm3, %v7670_v42  ;;  %vm7609_vm11 = vcmp.gt.f32.partialorder %v7577_v40, 0.0  ;;  %v7551_v19 = vadd.f32 %v7504_v54, %v13683_v38  ;;  %v7552_v12 = vadd.f32 %v7504_v54, %v13661_v29  ;;  %v7672_v60 = vsel %vm7608_vm14, %v7576_v51, %v7640_v48  ;;  %vm16035_vm14 = vmmov %vm16034_vm0  ;;  %v16044_v51 = vld [vmem:[#allocation103_spill] sm:$0xff]  ;;  %v16052_v35 = vld [vmem:[#allocation116_spill] sm:$0xff] }
 0x873   :  { %9775 = vmatprep.mubr.msk.f32.mxu1 %vm16030_vm12, %v7671_v62  ;;  %v7673_v36 = vsel %vm7609_vm11, %v7577_v40, %v7641_v6  ;;  %v7642_v10 = vmul.f32 0.2, %v7578_v2  ;;  %vm7610_vm15 = vcmp.gt.f32.partialorder %v7578_v2, 0.0  ;;  %v7643_v33 = vmul.f32 0.2, %v7579_v59  ;;  %vm16036_vm12 = vmmov %vm16034_vm0  ;;  %v16053_v62 = vld [vmem:[#allocation115_spill] sm:$0xff] }
 0x874   :  { %v7583_v58 = vadd.f32 %v7551_v19, %v16032_v31  ;;  %v7584_v25 = vadd.f32 %v7552_v12, %v16033_v5  ;;  %vm7611_vm2 = vcmp.gt.f32.partialorder %v7579_v59, 0.0  ;;  %v7644_v61 = vmul.f32 0.2, %v7580_v11  ;;  %vm16037_vm10 = vmmov %vm16034_vm0 }
 0x875   :  { %v7674_v49 = vsel %vm7610_vm15, %v7578_v2, %v7642_v10  ;;  %v7675_v53 = vsel %vm7611_vm2, %v7579_v59, %v7643_v33  ;;  %vm7612_vm3 = vcmp.gt.f32.partialorder %v7580_v11, 0.0  ;;  %v7645_v24 = vmul.f32 0.2, %v7581_v46  ;;  %vm16038_vm15 = vmmov %vm16034_vm0 }
 0x876   :  { %9776 = vmatmul.mubr.msk.f32.gmra.mrb[86].mxu1 %vm16031_vm13, %v7672_v60  ;;  %vm7613_vm11 = vcmp.gt.f32.partialorder %v7581_v46, 0.0  ;;  %v7676_v30 = vsel %vm7612_vm3, %v7580_v11, %v7644_v61  ;;  %v7646_v18 = vmul.f32 0.2, %v7582_v9  ;;  %vm7614_vm13 = vcmp.gt.f32.partialorder %v7582_v9, 0.0  ;;  %vm16042_vm3 = vmmov %vm16034_vm0 }
 0x877   :  { %9778 = vmatprep.mubr.msk.f32.mxu1 %vm16022_vm1, %v7673_v36  ;;  %v7677_v28 = vsel %vm7613_vm11, %v7581_v46, %v7645_v24  ;;  %v7647_v56 = vmul.f32 0.2, %v7583_v58  ;;  %vm7615_vm1 = vcmp.gt.f32.partialorder %v7583_v58, 0.0  ;;  %v7648_v21 = vmul.f32 0.2, %v7584_v25  ;;  %vm16046_vm11 = vmmov %vm16034_vm0 }
 0x878   :  { %v7678_v20 = vsel %vm7614_vm13, %v7582_v9, %v7646_v18  ;;  %vm7616_vm2 = vcmp.gt.f32.partialorder %v7584_v25, 0.0  ;;  %vm16050_vm13 = vmmov %vm16034_vm0 }
 0x879   :  { %v7679_v1 = vsel %vm7615_vm1, %v7583_v58, %v7647_v56  ;;  %v7680_v16 = vsel %vm7616_vm2, %v7584_v25, %v7648_v21  ;;  %vm16051_vm1 = vmmov %vm16034_vm0 }
 0x87a   :  { %9779 = vmatmul.mubr.msk.f32.gmra.mrb[88].mxu1 %vm16034_vm0, %v7674_v49  ;;  %vm16055_vm2 = vmmov %vm16034_vm0 }
 0x87b   :  { %9781 = vmatprep.mubr.msk.f32.mxu1 %vm16035_vm14, %v7675_v53  ;;  %vm16039_vm14 = vmmov %vm16034_vm0  ;;  %v16056_v53 = vld [vmem:[#allocation82_spill] sm:$0xff] }
 0x87e   :  { %9782 = vmatmul.mubr.msk.f32.gmra.mrb[90].mxu1 %vm16036_vm12, %v7676_v30  ;;  %vm16047_vm12 = vmmov %vm16034_vm0  ;;  %v16057_v30 = vld [vmem:[#allocation81_spill] sm:$0xff] }
 0x87f   :  { %9784 = vmatprep.mubr.msk.f32.mxu1 %vm16037_vm10, %v7677_v28  ;;  %vm16043_vm10 = vmmov %vm16034_vm0 }
 0x882   :  { %9785 = vmatmul.mubr.msk.f32.gmra.mrb[92].mxu1 %vm16038_vm15, %v7678_v20  ;;  %vm16054_vm15 = vmmov %vm16034_vm0 }
 0x883   :  { %9787 = vmatprep.mubr.msk.f32.mxu1 %vm16034_vm0, %v7679_v1 }
 0x886   :  { %9788 = vmatmul.mubr.msk.f32.gmra.mrb[94].mxu1 %vm16039_vm14, %v7680_v16  ;;  %vm16058_vm14 = vmmov %vm16034_vm0 }
 0x8f6   :  { %v9654_v63 = vpop.f32.mrb[76].mxu0 }
 0x8f7   :  { %v6319_v41 = vadd.f32 %v9654_v63, %v16040_v26  ;;  %v6159_v39 = vpop.f32.mrb[77].mxu0 }
 0x8f8   :  { %v6318_v43 = vadd.f32 %v6159_v39, %v16041_v8 }
 0x8f9   :  { %v6351_v37 = vsel %vm16042_vm3, %v6319_v41, -inf  ;;  %vm16061_vm3 = vmmov %vm16034_vm0 }
 0x8fa   :  { %v6350_v22 = vsel %vm16043_vm10, %v6318_v43, -inf  ;;  %v9657_v32 = vpop.f32.mrb[78].mxu0  ;;  %vm16062_vm10 = vmmov %vm16034_vm0 }
 0x8fb   :  { %v6352_v13 = vmax.f32 %v6350_v22, %v6351_v37  ;;  %v13974_v14 = vadd.f32 %v9657_v32, %v16044_v51  ;;  %v6169_v40 = vpop.f32.mrb[79].mxu0 }
 0x8fc   :  { %v6320_v4 = vadd.f32 %v6169_v40, %v16045_v15 }
 0x8fd   :  { %v6353_v7 = vrot.slane %v6352_v13, 4  ;;  %v6360_v17 = vsel %vm16046_vm11, %v13974_v14, -inf  ;;  %vm16065_vm11 = vmmov %vm16034_vm0 }
 0x8fe   :  { %v6359_v50 = vsel %vm16047_vm12, %v6320_v4, -inf  ;;  %v9660_v34 = vpop.f32.mrb[80].mxu0  ;;  %vm16066_vm12 = vmmov %vm16034_vm0 }
 0x8ff   :  { %v6354_v47 = vmax.f32 %v6352_v13, %v6353_v7  ;;  %v6361_v2 = vmax.f32 %v6359_v50, %v6360_v17  ;;  %v13981_v0 = vadd.f32 %v9660_v34, %v16048_v27  ;;  %v6179_v45 = vpop.f32.mrb[81].mxu0  ;;  %v16059_v50 = vld [vmem:[#allocation88_spill] sm:$0xff] }
 0x900   :  { %v13984_v42 = vadd.f32 %v6179_v45, %v16049_v52 }
 0x901   :  { %v6355_v48 = vrot.slane %v6354_v47, 2  ;;  %v6362_v57 = vrot.slane %v6361_v2, 4  ;;  %v6369_v59 = vsel %vm16050_vm13, %v13981_v0, -inf  ;;  %vm16069_vm13 = vmmov %vm16034_vm0 }
 0x902   :  { %v6368_v23 = vsel %vm16051_vm1, %v13984_v42, -inf  ;;  %v9663_v11 = vpop.f32.mrb[82].mxu0  ;;  %vm16070_vm1 = vmmov %vm16034_vm0 }
 0x903   :  { %v6356_v6 = vmax.f32 %v6354_v47, %v6355_v48  ;;  %v6363_v55 = vmax.f32 %v6361_v2, %v6362_v57  ;;  %v6370_v46 = vmax.f32 %v6368_v23, %v6369_v59  ;;  %v13991_v9 = vadd.f32 %v9663_v11, %v16052_v35  ;;  %v6189_v54 = vpop.f32.mrb[83].mxu0 }
 0x904   :  { %v13994_v19 = vadd.f32 %v6189_v54, %v16053_v62 }
 0x905   :  { %v6357_v12 = vrot.slane %v6356_v6, 1  ;;  %v6364_v60 = vrot.slane %v6363_v55, 2  ;;  %v6371_v36 = vrot.slane %v6370_v46, 4  ;;  %v6378_v10 = vsel %vm16054_vm15, %v13991_v9, -inf  ;;  %vm16073_vm15 = vmmov %vm16034_vm0 }
 0x906   :  { %v6377_v33 = vsel %vm16055_vm2, %v13994_v19, -inf  ;;  %v9666_v31 = vpop.f32.mrb[84].mxu0  ;;  %vm16074_vm2 = vmmov %vm16034_vm0 }
 0x907   :  { %v6358_v58 = vmax.f32 %v6356_v6, %v6357_v12  ;;  %v6365_v5 = vmax.f32 %v6363_v55, %v6364_v60  ;;  %v6372_v25 = vmax.f32 %v6370_v46, %v6371_v36  ;;  %v6379_v49 = vmax.f32 %v6377_v33, %v6378_v10  ;;  %v6199_v61 = vpop.f32.mrb[85].mxu0  ;;  %v16063_v36 = vld [vmem:[#allocation90_spill] sm:$0xff] }
 0x908   :  { %v14001_v24 = vadd.f32 %v9666_v31, %v16056_v53  ;;  %v14004_v18 = vadd.f32 %v6199_v61, %v16057_v30  ;;  %v16064_v31 = vld [vmem:[#allocation87_spill] sm:$0xff] }
 0x909   :  { %v6494_v28 = vsub.f32 %v6318_v43, %v6358_v58  ;;  %v6495_v56 = vsub.f32 %v6319_v41, %v6358_v58  ;;  %v6366_v20 = vrot.slane %v6365_v5, 1  ;;  %v6373_v21 = vrot.slane %v6372_v25, 2  ;;  %v16060_v41 = vld [vmem:[#allocation86_spill] sm:$0xff] }
 0x90a   :  { %v6380_v1 = vrot.slane %v6379_v49, 4  ;;  %v6387_v16 = vsel %vm16034_vm0, %v14001_v24, -inf  ;;  %v6386_v63 = vsel %vm16058_vm14, %v14004_v18, -inf  ;;  %v9669_v39 = vpop.f32.mrb[86].mxu0  ;;  %vm16077_vm14 = vmmov %vm16034_vm0 }
 0x90b   :  { %v6526_v37 = vmul.f32 1.442695, %v6494_v28  ;;  %v6528_v22 = vmul.f32 1.442695, %v6495_v56  ;;  %v6367_v32 = vmax.f32 %v6365_v5, %v6366_v20  ;;  %v6374_v13 = vmax.f32 %v6372_v25, %v6373_v21  ;;  %v6209_v40 = vpop.f32.mrb[87].mxu0 }
 0x90c   :  { %v6381_v7 = vmax.f32 %v6379_v49, %v6380_v1  ;;  %v6388_v17 = vmax.f32 %v6386_v63, %v6387_v16  ;;  %v14011_v43 = vadd.f32 %v9669_v39, %v16059_v50  ;;  %v14014_v34 = vadd.f32 %v6209_v40, %v16060_v41  ;;  %v16067_v39 = vld [vmem:[#allocation92_spill] sm:$0xff] }
 0x90d   :  { %10180 = vpow2.f32 %v6526_v37  ;;  %v6496_v47 = vsub.f32 %v6320_v4, %v6367_v32  ;;  %v6497_v2 = vsub.f32 %v13974_v14, %v6367_v32  ;;  %v6375_v45 = vrot.slane %v6374_v13, 1 }
 0x90e   :  { %10182 = vpow2.f32 %v6528_v22  ;;  %v6382_v48 = vrot.slane %v6381_v7, 2  ;;  %v6389_v57 = vrot.slane %v6388_v17, 4  ;;  %v6396_v59 = vsel %vm16061_vm3, %v14011_v43, -inf  ;;  %v9672_v23 = vpop.f32.mrb[88].mxu0  ;;  %v16068_v22 = vld [vmem:[#allocation89_spill] sm:$0xff]  ;;  %vm16080_vm3 = vmmov %vm16034_vm0 }
 0x90f   :  { %v6530_v11 = vmul.f32 1.442695, %v6496_v47  ;;  %v6532_v6 = vmul.f32 1.442695, %v6497_v2  ;;  %v6376_v55 = vmax.f32 %v6374_v13, %v6375_v45  ;;  %v6395_v46 = vsel %vm16062_vm10, %v14014_v34, -inf  ;;  %v6219_v54 = vpop.f32.mrb[89].mxu0  ;;  %vm16081_vm10 = vmmov %vm16034_vm0 }
 0x910   :  { %v6383_v12 = vmax.f32 %v6381_v7, %v6382_v48  ;;  %v6390_v60 = vmax.f32 %v6388_v17, %v6389_v57  ;;  %v6397_v4 = vmax.f32 %v6395_v46, %v6396_v59  ;;  %v14022_v14 = vadd.f32 %v9672_v23, %v16063_v36 }
 0x911   :  { %10184 = vpow2.f32 %v6530_v11  ;;  %v6498_v10 = vsub.f32 %v13984_v42, %v6376_v55  ;;  %v6499_v33 = vsub.f32 %v13981_v0, %v6376_v55  ;;  %v14027_v58 = vadd.f32 %v6219_v54, %v16064_v31 }
 0x912   :  { %10186 = vpow2.f32 %v6532_v6  ;;  %v6384_v5 = vrot.slane %v6383_v12, 1  ;;  %v6391_v25 = vrot.slane %v6390_v60, 2  ;;  %v6398_v49 = vrot.slane %v6397_v4, 4  ;;  %v9675_v61 = vpop.f32.mrb[90].mxu0  ;;  %v16071_v6 = vld [vmem:[#allocation131_spill] sm:$0xff] }
 0x913   :  { %v6534_v28 = vmul.f32 1.442695, %v6498_v10  ;;  %v6536_v56 = vmul.f32 1.442695, %v6499_v33  ;;  %v6405_v20 = vsel %vm16065_vm11, %v14022_v14, -inf  ;;  %v6404_v21 = vsel %vm16066_vm12, %v14027_v58, -inf  ;;  %vm16082_vm11 = vmmov %vm16034_vm0 }
 0x914   :  { %v6385_v1 = vmax.f32 %v6383_v12, %v6384_v5  ;;  %v6392_v42 = vmax.f32 %v6390_v60, %v6391_v25  ;;  %v6399_v16 = vmax.f32 %v6397_v4, %v6398_v49  ;;  %v6406_v0 = vmax.f32 %v6404_v21, %v6405_v20  ;;  %v6229_v63 = vpop.f32.mrb[91].mxu0  ;;  %v16072_v12 = vld [vmem:[#allocation132_spill] sm:$0xff]  ;;  %vm16085_vm12 = vmmov %vm16034_vm0 }
 0x915   :  { %10188 = vpow2.f32 %v6534_v28  ;;  %v14034_v37 = vadd.f32 %v9675_v61, %v16067_v39  ;;  %v14037_v32 = vadd.f32 %v6229_v63, %v16068_v22 }
 0x916   :  { %10190 = vpow2.f32 %v6536_v56  ;;  %v6500_v13 = vsub.f32 %v13994_v19, %v6385_v1  ;;  %v6501_v40 = vsub.f32 %v13991_v9, %v6385_v1  ;;  %v6393_v7 = vrot.slane %v6392_v42, 1  ;;  %v9744_v17 = vpop.f32.mrb[64].mxu1  ;;  %v14041_v47 = vpop.f32.mrb[92].mxu0 }
 0x917   :  { %v10181_v2 = vpop.eup %10180  ;;  %v6400_v45 = vrot.slane %v6399_v16, 2  ;;  %v6407_v48 = vrot.slane %v6406_v0, 4  ;;  %v6414_v57 = vsel %vm16069_vm13, %v14034_v37, -inf  ;;  %v6413_v59 = vsel %vm16070_vm1, %v14037_v32, -inf  ;;  %v14047_v23 = vpop.f32.mrb[65].mxu1  ;;  %vm16086_vm13 = vmmov %vm16034_vm0 }
 0x918   :  { %v14049_v11 = vpop.f32.mrb[93].mxu0  ;;  %v10183_v19 = vpop.eup %10182  ;;  %v14052_v9 = vmul.f32 %v10181_v2, %v16071_v6  ;;  %v6538_v55 = vmul.f32 1.442695, %v6500_v13  ;;  %v6540_v46 = vmul.f32 1.442695, %v6501_v40  ;;  %v6394_v54 = vmax.f32 %v6392_v42, %v6393_v7  ;;  %v16076_v7 = vld [vmem:[#allocation136_spill] sm:$0xff]  ;;  %vm16092_vm1 = vmmov %vm16034_vm0 }
 0x919   :  { %v14055_v60 = vmul.f32 %v10183_v19, %v16072_v12  ;;  %v6401_v4 = vmax.f32 %v6399_v16, %v6400_v45  ;;  %v6408_v10 = vmax.f32 %v6406_v0, %v6407_v48  ;;  %v6415_v33 = vmax.f32 %v6413_v59, %v6414_v57 }
 0x91a   :  { %v6622_v5 = vsel %vm16073_vm15, %v14052_v9, 0.0  ;;  %10192 = vpow2.f32 %v6538_v55  ;;  %v6502_v25 = vsub.f32 %v14004_v18, %v6394_v54  ;;  %v6503_v49 = vsub.f32 %v14001_v24, %v6394_v54  ;;  %v14061_v61 = vpop.f32.mrb[66].mxu1  ;;  %v14063_v28 = vpop.f32.mrb[94].mxu0  ;;  %v16075_v18 = vld [vmem:[#allocation135_spill] sm:$0xff]  ;;  %vm16093_vm15 = vmmov %vm16034_vm0 }
 0x91b   :  { %v10185_v56 = vpop.eup %10184  ;;  %v6623_v20 = vsel %vm16074_vm2, %v14055_v60, 0.0  ;;  %10194 = vpow2.f32 %v6540_v46  ;;  %v6402_v21 = vrot.slane %v6401_v4, 1  ;;  %v6409_v1 = vrot.slane %v6408_v10, 2  ;;  %v14067_v42 = vpop.f32.mrb[67].mxu1  ;;  %vm16099_vm2 = vmmov %vm16034_vm0 }
 0x91c   :  { %v14069_v16 = vpop.f32.mrb[95].mxu0  ;;  %v10187_v0 = vpop.eup %10186  ;;  %v6624_v63 = vadd.f32 %v6623_v20, %v6622_v5  ;;  %v14072_v13 = vmul.f32 %v10185_v56, %v16075_v18  ;;  %v6542_v24 = vmul.f32 1.442695, %v6502_v25  ;;  %v6544_v40 = vmul.f32 1.442695, %v6503_v49  ;;  %v16088_v18 = vld [vmem:[#allocation106_spill] sm:$0xff] }
 0x91d   :  { %v14075_v2 = vmul.f32 %v10187_v0, %v16076_v7  ;;  %v6403_v45 = vmax.f32 %v6401_v4, %v6402_v21  ;;  %v6410_v48 = vmax.f32 %v6408_v10, %v6409_v1  ;;  %v6416_v57 = vrot.slane %v6415_v33, 4 }
 0x91e   :  { %v6625_v59 = vrot.slane %v6624_v63, 4  ;;  %v6631_v19 = vsel %vm16034_vm0, %v14072_v13, 0.0  ;;  %10196 = vpow2.f32 %v6542_v24  ;;  %v14080_v55 = vadd.f32 %v9744_v17, %v16040_v26  ;;  %v14082_v46 = vpop.f32.mrb[68].mxu1  ;;  %v16078_v26 = vld [vmem:[#allocation139_spill] sm:$0xff]  ;;  %v16079_v24 = vld [vmem:[#allocation140_spill] sm:$0xff] }
 0x91f   :  { %v10189_v54 = vpop.eup %10188  ;;  %v6632_v5 = vsel %vm16077_vm14, %v14075_v2, 0.0  ;;  %10198 = vpow2.f32 %v6544_v40  ;;  %v6504_v25 = vsub.f32 %v14014_v34, %v6403_v45  ;;  %v6505_v4 = vsub.f32 %v14011_v43, %v6403_v45  ;;  %v14088_v10 = vpop.f32.mrb[96].mxu0  ;;  %vm16101_vm14 = vmmov %vm16034_vm0 }
 0x920   :  { %v14090_v49 = vpop.f32.mrb[69].mxu1  ;;  %v10191_v56 = vpop.eup %10190  ;;  %v6626_v20 = vadd.f32 %v6625_v59, %v6624_v63  ;;  %v6633_v21 = vadd.f32 %v6632_v5, %v6631_v19  ;;  %v14093_v17 = vmul.f32 %v10189_v54, %v16078_v26  ;;  %v6411_v1 = vrot.slane %v6410_v48, 1 }
 0x921   :  { %v14095_v0 = vpop.f32.mrb[97].mxu0  ;;  %v14098_v22 = vmul.f32 %v10191_v56, %v16079_v24  ;;  %v6546_v40 = vmul.f32 1.442695, %v6504_v25  ;;  %v6548_v34 = vmul.f32 1.442695, %v6505_v4  ;;  %v6417_v39 = vmax.f32 %v6415_v33, %v6416_v57 }
 0x922   :  { %v6627_v43 = vrot.slane %v6626_v20, 2  ;;  %v6634_v45 = vrot.slane %v6633_v21, 4  ;;  %v6640_v31 = vsel %vm16080_vm3, %v14093_v17, 0.0  ;;  %v6412_v36 = vmax.f32 %v6410_v48, %v6411_v1  ;;  %v14102_v63 = vpop.f32.mrb[70].mxu1  ;;  %v16083_v1 = vld [vmem:[#allocation143_spill] sm:$0xff]  ;;  %vm16106_vm3 = vmmov %vm16034_vm0 }
 0x923   :  { %v6641_v59 = vsel %vm16081_vm10, %v14098_v22, 0.0  ;;  %10200 = vpow2.f32 %v6546_v40  ;;  %v6418_v19 = vrot.slane %v6417_v39, 2  ;;  %v14108_v54 = vsel %vm16082_vm11, %v14080_v55, -inf  ;;  %v14110_v5 = vpop.f32.mrb[71].mxu1  ;;  %vm16109_vm10 = vmmov %vm16034_vm0 }
 0x924   :  { %v10193_v33 = vpop.eup %10192  ;;  %v6628_v57 = vadd.f32 %v6627_v43, %v6626_v20  ;;  %v6635_v25 = vadd.f32 %v6634_v45, %v6633_v21  ;;  %v6642_v4 = vadd.f32 %v6641_v59, %v6640_v31  ;;  %10202 = vpow2.f32 %v6548_v34  ;;  %v14112_v56 = vpop.f32.mrb[98].mxu0  ;;  %v16084_v20 = vld [vmem:[#allocation144_spill] sm:$0xff]  ;;  %vm16113_vm11 = vmmov %vm16034_vm0 }
 0x925   :  { %v10195_v48 = vpop.eup %10194  ;;  %v14115_v41 = vmul.f32 %v10193_v33, %v16083_v1  ;;  %v6506_v40 = vsub.f32 %v14027_v58, %v6412_v36  ;;  %v6507_v29 = vsub.f32 %v14022_v14, %v6412_v36  ;;  %v6419_v38 = vmax.f32 %v6417_v39, %v6418_v19  ;;  %v14119_v50 = vpop.f32.mrb[99].mxu0 }
 0x926   :  { %v6629_v24 = vrot.slane %v6628_v57, 1  ;;  %v6636_v26 = vrot.slane %v6635_v25, 2  ;;  %v6643_v7 = vrot.slane %v6642_v4, 4  ;;  %v14122_v21 = vmul.f32 %v10195_v48, %v16084_v20 }
 0x927   :  { %v6649_v31 = vsel %vm16085_vm12, %v14115_v41, 0.0  ;;  %v6550_v34 = vmul.f32 1.442695, %v6506_v40  ;;  %v6552_v43 = vmul.f32 1.442695, %v6507_v29  ;;  %v6420_v45 = vrot.slane %v6419_v38, 1  ;;  %vm16114_vm12 = vmmov %vm16034_vm0 }
 0x928   :  { %v10197_v59 = vpop.eup %10196  ;;  %v6630_v33 = vadd.f32 %v6629_v24, %v6628_v57  ;;  %v6637_v58 = vadd.f32 %v6636_v26, %v6635_v25  ;;  %v6644_v1 = vadd.f32 %v6643_v7, %v6642_v4  ;;  %v6650_v36 = vsel %vm16086_vm13, %v14122_v21, 0.0  ;;  %v14128_v14 = vpop.f32.mrb[72].mxu1  ;;  %v16090_v24 = vld [vmem:[#allocation107_spill] sm:$0xff]  ;;  %vm16119_vm13 = vmmov %vm16034_vm0 }
 0x929   :  { %16087 = vst [vmem:[#allocation24_spill] sm:$0xff] %v14128_v14  ;;  %v10199_v39 = vpop.eup %10198  ;;  %v6651_v19 = vadd.f32 %v6650_v36, %v6649_v31  ;;  %v14131_v48 = vmul.f32 %v10197_v59, %v16088_v18  ;;  %10204 = vpow2.f32 %v6550_v34  ;;  %v6421_v20 = vmax.f32 %v6419_v38, %v6420_v45  ;;  %v14133_v30 = vpop.f32.mrb[73].mxu1 }
 0x92a   :  { %16089 = vst [vmem:[#allocation25_spill] sm:$0xff] %v14133_v30  ;;  %v6766_v29 = vmax.f32 %v6630_v33, 1e-20  ;;  %v6638_v40 = vrot.slane %v6637_v58, 1  ;;  %v6645_v53 = vrot.slane %v6644_v1, 2  ;;  %v14136_v26 = vmul.f32 %v10199_v39, %v16090_v24  ;;  %v14138_v7 = vpop.f32.mrb[100].mxu0 }
 0x92b   :  { %16091 = vst [vmem:[#allocation26_spill] sm:$0xff] %v14138_v7  ;;  %v6652_v57 = vrot.slane %v6651_v19, 4  ;;  %v6658_v25 = vsel %vm16092_vm1, %v14131_v48, 0.0  ;;  %10206 = vpow2.f32 %v6552_v43  ;;  %v6508_v4 = vsub.f32 %v14037_v32, %v6421_v20  ;;  %v14143_v31 = vpop.f32.mrb[101].mxu0  ;;  %v16095_v32 = vld [vmem:[#allocation113_spill] sm:$0xff]  ;;  %vm16120_vm1 = vmmov %vm16034_vm0 }
 0x92c   :  { %10208 = vrcp.f32 %v6766_v29  ;;  %v6639_v38 = vadd.f32 %v6638_v40, %v6637_v58  ;;  %v6646_v34 = vadd.f32 %v6645_v53, %v6644_v1  ;;  %v6659_v45 = vsel %vm16093_vm15, %v14136_v26, 0.0  ;;  %v16096_v29 = vld [vmem:[#allocation94_spill] sm:$0xff]  ;;  %vm16123_vm15 = vmmov %vm16034_vm0 }
 0x92d   :  { %v10201_v59 = vpop.eup %10200  ;;  %v6653_v33 = vadd.f32 %v6652_v57, %v6651_v19  ;;  %v6660_v36 = vadd.f32 %v6659_v45, %v6658_v25  ;;  %v6509_v39 = vsub.f32 %v14034_v37, %v6421_v20  ;;  %v6554_v24 = vmul.f32 1.442695, %v6508_v4  ;;  %v14148_v18 = vpop.f32.mrb[74].mxu1  ;;  %v16098_v40 = vld [vmem:[#allocation114_spill] sm:$0xff] }
 0x92e   :  { %16094 = vst [vmem:[#allocation27_spill] sm:$0xff] %v14148_v18  ;;  %v10203_v30 = vpop.eup %10202  ;;  %v6767_v43 = vmax.f32 %v6639_v38, 1e-20  ;;  %v6647_v7 = vrot.slane %v6646_v34, 1  ;;  %v14151_v14 = vmul.f32 %v10201_v59, %v16095_v32  ;;  %v14155_v53 = vadd.f32 %v14041_v47, %v16096_v29  ;;  %v14157_v1 = vpop.f32.mrb[75].mxu1 }
 0x92f   :  { %16097 = vst [vmem:[#allocation28_spill] sm:$0xff] %v14157_v1  ;;  %v6654_v58 = vrot.slane %v6653_v33, 2  ;;  %v6661_v19 = vrot.slane %v6660_v36, 4  ;;  %v14160_v57 = vmul.f32 %v10203_v30, %v16098_v40  ;;  %10210 = vpow2.f32 %v6554_v24 }
 0x930   :  { %10212 = vrcp.f32 %v6767_v43  ;;  %v6648_v37 = vadd.f32 %v6647_v7, %v6646_v34  ;;  %v6667_v20 = vsel %vm16099_vm2, %v14151_v14, 0.0  ;;  %v6556_v25 = vmul.f32 1.442695, %v6509_v39  ;;  %v14164_v4 = vpop.f32.mrb[102].mxu0  ;;  %vm16125_vm2 = vmmov %vm16034_vm0 }
 0x931   :  { %16100 = vst [vmem:[#allocation29_spill] sm:$0xff] %v14164_v4  ;;  %v6655_v38 = vadd.f32 %v6654_v58, %v6653_v33  ;;  %v6662_v45 = vadd.f32 %v6661_v19, %v6660_v36  ;;  %v6668_v47 = vsel %vm16034_vm0, %v14160_v57, 0.0  ;;  %v6423_v59 = vsel %vm16101_vm14, %v14155_v53, -inf  ;;  %v14170_v32 = vpop.f32.mrb[103].mxu0  ;;  %v16103_v33 = vld [vmem:[#allocation91_spill] sm:$0xff]  ;;  %vm16127_vm14 = vmmov %vm16034_vm0 }
 0x932   :  { %16102 = vst [vmem:[#allocation30_spill] sm:$0xff] %v14170_v32  ;;  %v6768_v30 = vmax.f32 %v6648_v37, 1e-20  ;;  %v6669_v24 = vadd.f32 %v6668_v47, %v6667_v20  ;;  %10214 = vpow2.f32 %v6556_v25  ;;  %v14174_v7 = vadd.f32 %v14047_v23, %v16041_v8  ;;  %v16105_v20 = vld [vmem:[#allocation119_spill] sm:$0xff] }
 0x933   :  { %v10205_v34 = vpop.eup %10204  ;;  %v6656_v39 = vrot.slane %v6655_v38, 1  ;;  %v6663_v43 = vrot.slane %v6662_v45, 2  ;;  %v14178_v36 = vadd.f32 %v14049_v11, %v16103_v33  ;;  %v14182_v58 = vadd.f32 %v14061_v61, %v16044_v51  ;;  %v14184_v19 = vpop.f32.mrb[76].mxu1 }
 0x934   :  { %16104 = vst [vmem:[#allocation31_spill] sm:$0xff] %v14184_v19  ;;  %10216 = vrcp.f32 %v6768_v30  ;;  %v6670_v37 = vrot.slane %v6669_v24, 4  ;;  %v14187_v25 = vmul.f32 %v10205_v34, %v16105_v20  ;;  %v8036_v8 = vsel %vm16106_vm3, %v14174_v7, -inf  ;;  %v14191_v23 = vpop.f32.mrb[104].mxu0  ;;  %v14193_v47 = vpop.f32.mrb[77].mxu1  ;;  %v16111_v20 = vld [vmem:[#allocation120_spill] sm:$0xff]  ;;  %vm16128_vm3 = vmmov %vm16034_vm0 }
 0x935   :  { %16107 = vst [vmem:[#allocation32_spill] sm:$0xff] %v14191_v23  ;;  %16108 = vst [vmem:[#allocation33_spill] sm:$0xff] %v14193_v47  ;;  %v10207_v11 = vpop.eup %10206  ;;  %v6657_v40 = vadd.f32 %v6656_v39, %v6655_v38  ;;  %v6664_v33 = vadd.f32 %v6663_v43, %v6662_v45  ;;  %v8038_v51 = vmax.f32 %v8036_v8, %v14108_v54  ;;  %v6422_v61 = vsel %vm16109_vm10, %v14178_v36, -inf  ;;  %v14198_v30 = vpop.f32.mrb[105].mxu0  ;;  %v16116_v47 = vld [vmem:[#allocation123_spill] sm:$0xff] }
 0x936   :  { %16110 = vst [vmem:[#allocation34_spill] sm:$0xff] %v14198_v30  ;;  %v10209_v29 = vpop.eup %10208  ;;  %v6671_v34 = vadd.f32 %v6670_v37, %v6669_v24  ;;  %v14201_v19 = vmul.f32 %v10207_v11, %v16111_v20  ;;  %v6676_v23 = vsel %vm16113_vm11, %v14187_v25, 0.0  ;;  %v14205_v32 = vmax.f32 %v6422_v61, %v6423_v59  ;;  %vm16129_vm10 = vmmov %vm16034_vm0 }
 0x937   :  { %v6798_v38 = vmul.f32 %v10209_v29, %v14052_v9  ;;  %v6799_v45 = vmul.f32 %v10209_v29, %v14055_v60  ;;  %v6769_v54 = vmax.f32 %v6657_v40, 1e-20  ;;  %v6665_v39 = vrot.slane %v6664_v33, 1  ;;  %vm16132_vm11 = vmmov %vm16034_vm0 }
 0x938   :  { %16112 = vst [vmem:[#allocation35_spill] sm:$0xff] %v14201_v19  ;;  %v6672_v43 = vrot.slane %v6671_v34, 2  ;;  %v6677_v8 = vsel %vm16114_vm12, %v14201_v19, 0.0  ;;  %v8039_v30 = vrot.slane %v8038_v51, 4  ;;  %v6425_v24 = vrot.slane %v14205_v32, 4  ;;  %vm16133_vm12 = vmmov %vm16034_vm0 }
 0x939   :  { %v10211_v37 = vpop.eup %10210  ;;  %v6830_v11 = vmul.f32 %v6798_v38, %v13598_v3  ;;  %v6831_v20 = vmul.f32 %v6799_v45, %v13589_v44  ;;  %10218 = vrcp.f32 %v6769_v54  ;;  %v6666_v59 = vadd.f32 %v6665_v39, %v6664_v33  ;;  %v14214_v61 = vpop.f32.mrb[78].mxu1 }
 0x93a   :  { %v10213_v60 = vpop.eup %10212  ;;  %v6673_v29 = vadd.f32 %v6672_v43, %v6671_v34  ;;  %v6678_v40 = vadd.f32 %v6677_v8, %v6676_v23  ;;  %v14219_v1 = vmul.f32 %v10211_v37, %v16116_v47  ;;  %v8040_v19 = vmax.f32 %v8038_v51, %v8039_v30  ;;  %v14221_v4 = vpop.f32.mrb[79].mxu1  ;;  %v16121_v30 = vld [vmem:[#allocation124_spill] sm:$0xff] }
 0x93b   :  { %v14216_v9 = vpop.f32.mrb[106].mxu0  ;;  %16117 = vst [vmem:[#allocation37_spill] sm:$0xff] %v14221_v4  ;;  %v6862_v38 = vsel %vm16119_vm13, %v6830_v11, 0.0  ;;  %v6863_v45 = vsel %vm16120_vm1, %v6831_v20, 0.0  ;;  %v6800_v33 = vmul.f32 %v10213_v60, %v14072_v13  ;;  %v6801_v54 = vmul.f32 %v10213_v60, %v14075_v2  ;;  %vm16134_vm13 = vmmov %vm16034_vm0 }
 0x93c   :  { %16115 = vst [vmem:[#allocation36_spill] sm:$0xff] %v14216_v9  ;;  %v14223_v18 = vpop.f32.mrb[107].mxu0  ;;  %v10215_v39 = vpop.eup %10214  ;;  %v6864_v9 = vadd.f32 %v6863_v45, %v6862_v38  ;;  %v6770_v34 = vmax.f32 %v6666_v59, 1e-20  ;;  %v6674_v23 = vrot.slane %v6673_v29, 1  ;;  %v6679_v43 = vrot.slane %v6678_v40, 4  ;;  %vm16138_vm1 = vmmov %vm16034_vm0 }
 0x93d   :  { %16118 = vst [vmem:[#allocation38_spill] sm:$0xff] %v14223_v18  ;;  %v6832_v8 = vmul.f32 %v6800_v33, %v13598_v3  ;;  %v6833_v51 = vmul.f32 %v6801_v54, %v13589_v44  ;;  %v14232_v37 = vmul.f32 %v10215_v39, %v16121_v30  ;;  %v6685_v11 = vsel %vm16123_vm15, %v14219_v1, 0.0  ;;  %v14236_v20 = vpop.f32.mrb[80].mxu1  ;;  %vm16139_vm15 = vmmov %vm16034_vm0 }
 0x93e   :  { %16124 = vst [vmem:[#allocation40_spill] sm:$0xff] %v14236_v20  ;;  %v10217_v13 = vpop.eup %10216  ;;  %v6865_v47 = vrot.slane %v6864_v9, 4  ;;  %10220 = vrcp.f32 %v6770_v34  ;;  %v6675_v2 = vadd.f32 %v6674_v23, %v6673_v29  ;;  %v6680_v60 = vadd.f32 %v6679_v43, %v6678_v40  ;;  %v14238_v59 = vpop.f32.mrb[81].mxu1 }
 0x93f   :  { %16122 = vst [vmem:[#allocation39_spill] sm:$0xff] %v14232_v37  ;;  %v6871_v38 = vsel %vm16125_vm2, %v6832_v8, 0.0  ;;  %v6872_v45 = vsel %vm16034_vm0, %v6833_v51, 0.0  ;;  %v6802_v33 = vmul.f32 %v10217_v13, %v14093_v17  ;;  %v6803_v54 = vmul.f32 %v10217_v13, %v14098_v22  ;;  %vm16142_vm2 = vmmov %vm16034_vm0 }
 0x940   :  { %v14244_v39 = vadd.f32 %v6865_v47, %v6864_v9  ;;  %v6873_v30 = vadd.f32 %v6872_v45, %v6871_v38  ;;  %v6771_v18 = vmax.f32 %v6675_v2, 1e-20  ;;  %v6681_v20 = vrot.slane %v6680_v60, 2 }
 0x941   :  { %v6834_v4 = vmul.f32 %v6802_v33, %v13598_v3  ;;  %v6835_v29 = vmul.f32 %v6803_v54, %v13589_v44  ;;  %v6686_v40 = vsel %vm16127_vm14, %v14232_v37, 0.0  ;;  %v8041_v34 = vrot.slane %v8040_v19, 2  ;;  %v14250_v23 = vpop.f32.mrb[82].mxu1  ;;  %vm16146_vm14 = vmmov %vm16034_vm0 }
 0x942   :  { %16126 = vst [vmem:[#allocation41_spill] sm:$0xff] %v14244_v39  ;;  %v6874_v43 = vrot.slane %v6873_v30, 4  ;;  %10222 = vrcp.f32 %v6771_v18  ;;  %v6682_v17 = vadd.f32 %v6681_v20, %v6680_v60  ;;  %v6687_v8 = vadd.f32 %v6686_v40, %v6685_v11  ;;  %v14252_v22 = vpop.f32.mrb[83].mxu1 }
 0x943   :  { %v10219_v47 = vpop.eup %10218  ;;  %v6880_v9 = vsel %vm16128_vm3, %v6834_v4, 0.0  ;;  %v6881_v51 = vsel %vm16129_vm10, %v6835_v29, 0.0  ;;  %v8042_v13 = vmax.f32 %v8040_v19, %v8041_v34  ;;  %v6426_v2 = vmax.f32 %v14205_v32, %v6425_v24  ;;  %vm16147_vm3 = vmmov %vm16034_vm0 }
 0x944   :  { %v14257_v38 = vadd.f32 %v6874_v43, %v6873_v30  ;;  %v14259_v45 = vadd.f32 %v6881_v51, %v6880_v9  ;;  %v6804_v33 = vmul.f32 %v10219_v47, %v14115_v41  ;;  %v6805_v18 = vmul.f32 %v10219_v47, %v14122_v21  ;;  %v16135_v47 = vld [vmem:[#allocation96_spill] sm:$0xff]  ;;  %vm16148_vm10 = vmmov %vm16034_vm0 }
 0x945   :  { %v6683_v20 = vrot.slane %v6682_v17, 1  ;;  %v6688_v11 = vrot.slane %v6687_v8, 4  ;;  %v8043_v60 = vrot.slane %v8042_v13, 1  ;;  %v6427_v54 = vrot.slane %v6426_v2, 2 }
 0x946   :  { %16130 = vst [vmem:[#allocation42_spill] sm:$0xff] %v14257_v38  ;;  %16131 = vst [vmem:[#allocation43_spill] sm:$0xff] %v14259_v45  ;;  %v6836_v4 = vmul.f32 %v6804_v33, %v13598_v3  ;;  %v6837_v19 = vmul.f32 %v6805_v18, %v13589_v44  ;;  %v8046_v32 = vsel %vm16132_vm11, %v14182_v58, -inf  ;;  %v14272_v9 = vadd.f32 %v14063_v28, %v16135_v47 }
 0x947   :  { %v6684_v24 = vadd.f32 %v6683_v20, %v6682_v17  ;;  %v6689_v30 = vadd.f32 %v6688_v11, %v6687_v8  ;;  %v8044_v29 = vmax.f32 %v8042_v13, %v8043_v60  ;;  %v6428_v34 = vmax.f32 %v6426_v2, %v6427_v54  ;;  %vm16153_vm11 = vmmov %vm16034_vm0 }
 0x948   :  { %v10221_v41 = vpop.eup %10220  ;;  %v6889_v21 = vsel %vm16133_vm12, %v6836_v4, 0.0  ;;  %v6890_v43 = vsel %vm16134_vm13, %v6837_v19, 0.0  ;;  %v14276_v51 = vadd.f32 %v14067_v42, %v16045_v15  ;;  %v6432_v15 = vsel %vm16138_vm1, %v14272_v9, -inf  ;;  %vm16154_vm12 = vmmov %vm16034_vm0 }
 0x949   :  { %v14278_v33 = vadd.f32 %v6890_v43, %v6889_v21  ;;  %v6806_v17 = vmul.f32 %v10221_v41, %v14131_v48  ;;  %v6807_v8 = vmul.f32 %v10221_v41, %v14136_v26  ;;  %v6772_v13 = vmax.f32 %v6684_v24, 1e-20  ;;  %vm16155_vm13 = vmmov %vm16034_vm0 }
 0x94a   :  { %v6690_v2 = vrot.slane %v6689_v30, 2  ;;  %v8180_v18 = vsub.f32 %v14174_v7, %v8044_v29  ;;  %v8181_v20 = vsub.f32 %v14080_v55, %v8044_v29  ;;  %v6429_v11 = vrot.slane %v6428_v34, 1  ;;  %v14299_v29 = vpop.f32.mrb[84].mxu1  ;;  %vm16156_vm1 = vmmov %vm16034_vm0 }
 0x94b   :  { %16136 = vst [vmem:[#allocation44_spill] sm:$0xff] %v14278_v33  ;;  %v6838_v28 = vmul.f32 %v6806_v17, %v13598_v3  ;;  %v14286_v60 = vmul.f32 %v6807_v8, %v13589_v44  ;;  %10224 = vrcp.f32 %v6772_v13  ;;  %v8045_v24 = vsel %vm16142_vm2, %v14276_v51, -inf  ;;  %vm16159_vm2 = vmmov %vm16034_vm0 }
 0x94c   :  { %v10223_v42 = vpop.eup %10222  ;;  %v6691_v48 = vadd.f32 %v6690_v2, %v6689_v30  ;;  %v8212_v54 = vmul.f32 1.442695, %v8180_v18  ;;  %v8214_v26 = vmul.f32 1.442695, %v8181_v20  ;;  %v6430_v4 = vmax.f32 %v6428_v34, %v6429_v11  ;;  %v14303_v34 = vpop.f32.mrb[85].mxu1  ;;  %v16145_v20 = vld [vmem:[#allocation97_spill] sm:$0xff] }
 0x94d   :  { %16137 = vst [vmem:[#allocation45_spill] sm:$0xff] %v14286_v60  ;;  %v14291_v19 = vsel %vm16139_vm15, %v6838_v28, 0.0  ;;  %v6808_v55 = vmul.f32 %v10223_v42, %v14151_v14  ;;  %v14295_v7 = vmul.f32 %v10223_v42, %v14160_v57  ;;  %v8047_v14 = vmax.f32 %v8045_v24, %v8046_v32  ;;  %v16144_v57 = vld [vmem:[#allocation93_spill] sm:$0xff]  ;;  %vm16158_vm15 = vmmov %vm16034_vm0 }
 0x94e   :  { %16140 = vst [vmem:[#allocation112_spill] sm:$0xff] %v14291_v19  ;;  %v6692_v41 = vrot.slane %v6691_v48, 1  ;;  %10226 = vpow2.f32 %v8212_v54  ;;  %v6510_v30 = vsub.f32 %v14178_v36, %v6430_v4  ;;  %v6511_v21 = vsub.f32 %v14155_v53, %v6430_v4 }
 0x94f   :  { %16141 = vst [vmem:[#allocation47_spill] sm:$0xff] %v14295_v7  ;;  %v14306_v43 = vmul.f32 %v6808_v55, %v13598_v3  ;;  %10228 = vpow2.f32 %v8214_v26  ;;  %v14310_v17 = vadd.f32 %v14069_v16, %v16144_v57  ;;  %v14314_v18 = vadd.f32 %v14082_v46, %v16048_v27  ;;  %v16149_v26 = vld [vmem:[#allocation95_spill] sm:$0xff]  ;;  %v16151_v55 = vld [vmem:[#allocation101_spill] sm:$0xff] }
 0x950   :  { %v6693_v8 = vadd.f32 %v6692_v41, %v6691_v48  ;;  %v6558_v13 = vmul.f32 1.442695, %v6510_v30  ;;  %v6560_v2 = vmul.f32 1.442695, %v6511_v21  ;;  %v8048_v36 = vrot.slane %v8047_v14, 4 }
 0x951   :  { %16143 = vst [vmem:[#allocation46_spill] sm:$0xff] %v14306_v43  ;;  %v6431_v53 = vsel %vm16034_vm0, %v14310_v17, -inf  ;;  %v14320_v11 = vadd.f32 %v14088_v10, %v16145_v20  ;;  %v14324_v32 = vadd.f32 %v14090_v49, %v16049_v52  ;;  %v8055_v42 = vsel %vm16146_vm14, %v14314_v18, -inf  ;;  %vm16166_vm14 = vmmov %vm16034_vm0 }
 0x952   :  { %v6773_v16 = vmax.f32 %v6693_v8, 1e-20  ;;  %10230 = vpow2.f32 %v6558_v13  ;;  %v6433_v28 = vmax.f32 %v6431_v53, %v6432_v15  ;;  %v8049_v27 = vmax.f32 %v8047_v14, %v8048_v36  ;;  %v14356_v8 = vpop.f32.mrb[86].mxu1  ;;  %v16157_v53 = vld [vmem:[#allocation100_spill] sm:$0xff] }
 0x953   :  { %10232 = vpow2.f32 %v6560_v2  ;;  %v6441_v46 = vsel %vm16147_vm3, %v14320_v11, -inf  ;;  %v8054_v48 = vsel %vm16148_vm10, %v14324_v32, -inf  ;;  %v14334_v52 = vadd.f32 %v14095_v0, %v16149_v26  ;;  %vm16167_vm3 = vmmov %vm16034_vm0 }
 0x954   :  { %10234 = vrcp.f32 %v6773_v16  ;;  %v6434_v10 = vrot.slane %v6433_v28, 4  ;;  %v8056_v54 = vmax.f32 %v8054_v48, %v8055_v42  ;;  %v8050_v15 = vrot.slane %v8049_v27, 2  ;;  %vm16172_vm10 = vmmov %vm16034_vm0 }
 0x955   :  { %v14336_v49 = vpop.eup %10224  ;;  %v14340_v4 = vadd.f32 %v14102_v63, %v16052_v35  ;;  %v14344_v24 = vadd.f32 %v14112_v56, %v16151_v55  ;;  %v14348_v41 = vadd.f32 %v14110_v5, %v16053_v62  ;;  %v6440_v14 = vsel %vm16153_vm11, %v14334_v52, -inf  ;;  %v14362_v5 = vpop.f32.mrb[87].mxu1  ;;  %vm16178_vm11 = vmmov %vm16034_vm0 }
 0x956   :  { %16150 = vst [vmem:[#allocation51_spill] sm:$0xff] %v14336_v49  ;;  %v14352_v30 = vmul.f32 %v14336_v49, %v14187_v25  ;;  %v6435_v0 = vmax.f32 %v6433_v28, %v6434_v10  ;;  %v8057_v21 = vrot.slane %v8056_v54, 4  ;;  %v8051_v35 = vmax.f32 %v8049_v27, %v8050_v15  ;;  %v14387_v45 = vpop.f32.mrb[88].mxu1 }
 0x957   :  { %v6442_v63 = vmax.f32 %v6440_v14, %v6441_v46  ;;  %v8064_v56 = vsel %vm16154_vm12, %v14340_v4, -inf  ;;  %v6450_v62 = vsel %vm16155_vm13, %v14344_v24, -inf  ;;  %v8063_v36 = vsel %vm16156_vm1, %v14348_v41, -inf  ;;  %16161 = vst [vmem:[#allocation4_spill] sm:$0xff] %v14387_v45  ;;  %vm16182_vm12 = vmmov %vm16034_vm0 }
 0x958   :  { %16152 = vst [vmem:[#allocation48_spill] sm:$0xff] %v14352_v30  ;;  %v10227_v13 = vpop.eup %10226  ;;  %v6436_v25 = vrot.slane %v6435_v0, 2  ;;  %v8058_v2 = vmax.f32 %v8056_v54, %v8057_v21  ;;  %v14368_v16 = vadd.f32 %v14119_v50, %v16157_v53  ;;  %v8052_v27 = vrot.slane %v8051_v35, 1  ;;  %vm16183_vm13 = vmmov %vm16034_vm0 }
 0x959   :  { %v10229_v28 = vpop.eup %10228  ;;  %v14371_v42 = vmul.f32 %v10227_v13, %v16071_v6  ;;  %v6443_v46 = vrot.slane %v6442_v63, 4  ;;  %v8065_v48 = vmax.f32 %v8063_v36, %v8064_v56  ;;  %vm16186_vm1 = vmmov %vm16034_vm0 }
 0x95a   :  { %v14374_v10 = vmul.f32 %v10229_v28, %v16072_v12  ;;  %v6437_v15 = vmax.f32 %v6435_v0, %v6436_v25  ;;  %v8059_v14 = vrot.slane %v8058_v2, 2  ;;  %v6449_v54 = vsel %vm16158_vm15, %v14368_v16, -inf  ;;  %v16160_v0 = vld [vmem:[#allocation125_spill] sm:$0xff]  ;;  %vm16188_vm15 = vmmov %vm16034_vm0 }
 0x95b   :  { %v8308_v21 = vsel %vm16159_vm2, %v14371_v42, 0.0  ;;  %v8053_v50 = vmax.f32 %v8051_v35, %v8052_v27  ;;  %v6444_v40 = vmax.f32 %v6442_v63, %v6443_v46  ;;  %v8066_v43 = vrot.slane %v8065_v48, 4  ;;  %v16163_v63 = vld [vmem:[#allocation126_spill] sm:$0xff]  ;;  %vm16192_vm2 = vmmov %vm16034_vm0 }
 0x95c   :  { %v10231_v19 = vpop.eup %10230  ;;  %v8309_v6 = vsel %vm16034_vm0, %v14374_v10, 0.0  ;;  %v6438_v13 = vrot.slane %v6437_v15, 1  ;;  %v8060_v56 = vmax.f32 %v8058_v2, %v8059_v14  ;;  %v6451_v36 = vmax.f32 %v6449_v54, %v6450_v62  ;;  %v14394_v62 = vpop.f32.mrb[89].mxu1 }
 0x95d   :  { %v10233_v12 = vpop.eup %10232  ;;  %v8310_v28 = vadd.f32 %v8309_v6, %v8308_v21  ;;  %v14383_v25 = vmul.f32 %v10231_v19, %v16160_v0  ;;  %v8182_v60 = vsub.f32 %v14276_v51, %v8053_v50  ;;  %v8183_v33 = vsub.f32 %v14182_v58, %v8053_v50  ;;  %16164 = vst [vmem:[#allocation54_spill] sm:$0xff] %v14394_v62  ;;  %v14408_v49 = vpop.f32.mrb[90].mxu1  ;;  %v16206_v0 = vld [vmem:[#allocation143_spill] sm:$0xff] }
 0x95e   :  { %v14389_v35 = vpop.eup %10234  ;;  %v14392_v27 = vmul.f32 %v10233_v12, %v16163_v63  ;;  %v6439_v46 = vmax.f32 %v6437_v15, %v6438_v13  ;;  %v8061_v38 = vrot.slane %v8060_v56, 1  ;;  %v6445_v2 = vrot.slane %v6444_v40, 2  ;;  %16168 = vst [vmem:[#allocation60_spill] sm:$0xff] %v14408_v49 }
 0x95f   :  { %16162 = vst [vmem:[#allocation57_spill] sm:$0xff] %v14389_v35  ;;  %v14398_v19 = vmul.f32 %v14389_v35, %v14219_v1  ;;  %v8311_v14 = vrot.slane %v8310_v28, 4  ;;  %v6694_v58 = vsel %vm16166_vm14, %v14383_v25, 0.0  ;;  %v8216_v51 = vmul.f32 1.442695, %v8182_v60  ;;  %vm16193_vm14 = vmmov %vm16034_vm0 }
 0x960   :  { %v6695_v54 = vsel %vm16167_vm3, %v14392_v27, 0.0  ;;  %v8218_v21 = vmul.f32 1.442695, %v8183_v33  ;;  %v6512_v50 = vsub.f32 %v14310_v17, %v6439_v46  ;;  %v6513_v15 = vsub.f32 %v14272_v9, %v6439_v46  ;;  %vm16199_vm3 = vmmov %vm16034_vm0 }
 0x961   :  { %16165 = vst [vmem:[#allocation63_spill] sm:$0xff] %v14398_v19  ;;  %v8312_v6 = vadd.f32 %v8311_v14, %v8310_v28  ;;  %v6696_v13 = vadd.f32 %v6695_v54, %v6694_v58  ;;  %10236 = vpow2.f32 %v8216_v51  ;;  %v8062_v12 = vmax.f32 %v8060_v56, %v8061_v38  ;;  %v14410_v56 = vpop.f32.mrb[91].mxu1  ;;  %v16171_v51 = vld [vmem:[#allocation24_spill] sm:$0xff] }
 0x962   :  { %10238 = vpow2.f32 %v8218_v21  ;;  %v6562_v1 = vmul.f32 1.442695, %v6512_v50  ;;  %v6564_v39 = vmul.f32 1.442695, %v6513_v15  ;;  %v6446_v19 = vmax.f32 %v6444_v40, %v6445_v2  ;;  %16169 = vst [vmem:[#allocation69_spill] sm:$0xff] %v14410_v56  ;;  %v16173_v15 = vld [vmem:[#allocation105_spill] sm:$0xff] }
 0x963   :  { %v8313_v30 = vrot.slane %v8312_v6, 2  ;;  %v6697_v7 = vrot.slane %v6696_v13, 4  ;;  %v8184_v60 = vsub.f32 %v14324_v32, %v8062_v12  ;;  %v8185_v35 = vsub.f32 %v14314_v18, %v8062_v12  ;;  %v16170_v18 = vld [vmem:[#allocation82_spill] sm:$0xff] }
 0x964   :  { %10240 = vpow2.f32 %v6562_v1  ;;  %v6447_v33 = vrot.slane %v6446_v19, 1  ;;  %v8067_v37 = vmax.f32 %v8065_v48, %v8066_v43  ;;  %v6452_v17 = vrot.slane %v6451_v36, 4 }
 0x965   :  { %v8314_v9 = vadd.f32 %v8313_v30, %v8312_v6  ;;  %v6698_v28 = vadd.f32 %v6697_v7, %v6696_v13  ;;  %10242 = vpow2.f32 %v6564_v39  ;;  %v8220_v38 = vmul.f32 1.442695, %v8184_v60  ;;  %v16174_v6 = vld [vmem:[#allocation26_spill] sm:$0xff] }
 0x966   :  { %v8222_v46 = vmul.f32 1.442695, %v8185_v35  ;;  %v6448_v40 = vmax.f32 %v6446_v19, %v6447_v33  ;;  %v8068_v2 = vrot.slane %v8067_v37, 2  ;;  %v6453_v14 = vmax.f32 %v6451_v36, %v6452_v17  ;;  %v16175_v33 = vld [vmem:[#allocation81_spill] sm:$0xff] }
 0x967   :  { %v8315_v58 = vrot.slane %v8314_v9, 1  ;;  %v6699_v32 = vrot.slane %v6698_v28, 2  ;;  %10244 = vpow2.f32 %v8220_v38  ;;  %v14414_v54 = vadd.f32 %v16171_v51, %v16170_v18 }
 0x968   :  { %10246 = vpow2.f32 %v8222_v46  ;;  %v6514_v43 = vsub.f32 %v14334_v52, %v6448_v40  ;;  %v6515_v7 = vsub.f32 %v14320_v11, %v6448_v40  ;;  %v8069_v39 = vmax.f32 %v8067_v37, %v8068_v2  ;;  %v16176_v11 = vld [vmem:[#allocation25_spill] sm:$0xff]  ;;  %v14435_v40 = vpop.f32.mrb[92].mxu1 }
 0x969   :  { %v8316_v30 = vadd.f32 %v8315_v58, %v8314_v9  ;;  %v6700_v48 = vadd.f32 %v6699_v32, %v6698_v28  ;;  %v6454_v21 = vrot.slane %v6453_v14, 2  ;;  %v8073_v35 = vsel %vm16172_vm10, %v14414_v54, -inf  ;;  %v16177_v9 = vld [vmem:[#allocation135_spill] sm:$0xff]  ;;  %16179 = vst [vmem:[#allocation66_spill] sm:$0xff] %v14435_v40  ;;  %v16180_v58 = vld [vmem:[#allocation136_spill] sm:$0xff]  ;;  %v14440_v18 = vpop.f32.mrb[93].mxu1  ;;  %vm16202_vm10 = vmmov %vm16034_vm0 }
 0x96a   :  { %v6566_v36 = vmul.f32 1.442695, %v6514_v43  ;;  %v6568_v19 = vmul.f32 1.442695, %v6515_v7  ;;  %v8070_v50 = vrot.slane %v8069_v39, 1  ;;  %v14422_v13 = vadd.f32 %v16174_v6, %v16173_v15  ;;  %16181 = vst [vmem:[#allocation75_spill] sm:$0xff] %v14440_v18 }
 0x96b   :  { %v10237_v12 = vpop.eup %10236  ;;  %v8452_v1 = vmax.f32 %v8316_v30, 1e-20  ;;  %v6701_v60 = vrot.slane %v6700_v48, 1  ;;  %v6455_v52 = vmax.f32 %v6453_v14, %v6454_v21  ;;  %v14426_v37 = vadd.f32 %v16176_v11, %v16175_v33  ;;  %v16201_v18 = vld [vmem:[#allocation22_spill] sm:$0xff] }
 0x96c   :  { %v10239_v17 = vpop.eup %10238  ;;  %v14429_v28 = vmul.f32 %v10237_v12, %v16177_v9  ;;  %10248 = vpow2.f32 %v6566_v36  ;;  %v8071_v38 = vmax.f32 %v8069_v39, %v8070_v50  ;;  %v14433_v46 = vsel %vm16178_vm11, %v14422_v13, -inf  ;;  %v16184_v36 = vld [vmem:[#allocation127_spill] sm:$0xff]  ;;  %v14458_v9 = vpop.f32.mrb[94].mxu1  ;;  %vm16203_vm11 = vmmov %vm16034_vm0 }
 0x96d   :  { %10250 = vrcp.f32 %v8452_v1  ;;  %v6702_v2 = vadd.f32 %v6701_v60, %v6700_v48  ;;  %v14438_v14 = vmul.f32 %v10239_v17, %v16180_v58  ;;  %v6456_v32 = vrot.slane %v6455_v52, 1  ;;  %v16185_v1 = vld [vmem:[#allocation128_spill] sm:$0xff]  ;;  %16187 = vst [vmem:[#allocation72_spill] sm:$0xff] %v14458_v9  ;;  %v16189_v58 = vld [vmem:[#allocation139_spill] sm:$0xff] }
 0x96e   :  { %v10241_v51 = vpop.eup %10240  ;;  %v8317_v43 = vsel %vm16182_vm12, %v14429_v28, 0.0  ;;  %10252 = vpow2.f32 %v6568_v19  ;;  %v8186_v7 = vsub.f32 %v14348_v41, %v8071_v38  ;;  %v8187_v39 = vsub.f32 %v14340_v4, %v8071_v38  ;;  %v16197_v9 = vld [vmem:[#allocation27_spill] sm:$0xff]  ;;  %vm16204_vm12 = vmmov %vm16034_vm0 }
 0x96f   :  { %v10243_v30 = vpop.eup %10242  ;;  %v6774_v21 = vmax.f32 %v6702_v2, 1e-20  ;;  %v8318_v48 = vsel %vm16183_vm13, %v14438_v14, 0.0  ;;  %v14449_v50 = vmul.f32 %v10241_v51, %v16184_v36  ;;  %v6457_v6 = vmax.f32 %v6455_v52, %v6456_v32  ;;  %v14465_v51 = vpop.f32.mrb[95].mxu1  ;;  %vm16205_vm13 = vmmov %vm16034_vm0 }
 0x970   :  { %v8319_v12 = vadd.f32 %v8318_v48, %v8317_v43  ;;  %v14452_v60 = vmul.f32 %v10243_v30, %v16185_v1  ;;  %v8224_v33 = vmul.f32 1.442695, %v8186_v7  ;;  %v8226_v11 = vmul.f32 1.442695, %v8187_v39  ;;  %16190 = vst [vmem:[#allocation83_spill] sm:$0xff] %v14465_v51  ;;  %v16191_v7 = vld [vmem:[#allocation140_spill] sm:$0xff] }
 0x971   :  { %v10245_v19 = vpop.eup %10244  ;;  %10254 = vrcp.f32 %v6774_v21  ;;  %v6703_v4 = vsel %vm16186_vm1, %v14449_v50, 0.0  ;;  %v6516_v41 = vsub.f32 %v14368_v16, %v6457_v6  ;;  %v6517_v17 = vsub.f32 %v14344_v24, %v6457_v6  ;;  %v16196_v51 = vld [vmem:[#allocation88_spill] sm:$0xff]  ;;  %vm16207_vm1 = vmmov %vm16034_vm0 }
 0x972   :  { %v10247_v38 = vpop.eup %10246  ;;  %v8320_v2 = vrot.slane %v8319_v12, 4  ;;  %v6704_v52 = vsel %vm16188_vm15, %v14452_v60, 0.0  ;;  %v14463_v32 = vmul.f32 %v10245_v19, %v16189_v58  ;;  %10256 = vpow2.f32 %v8224_v33  ;;  %vm16208_vm15 = vmmov %vm16034_vm0 }
 0x973   :  { %v6705_v43 = vadd.f32 %v6704_v52, %v6703_v4  ;;  %v14468_v39 = vmul.f32 %v10247_v38, %v16191_v7  ;;  %10258 = vpow2.f32 %v8226_v11  ;;  %v6570_v16 = vmul.f32 1.442695, %v6516_v41  ;;  %v16194_v11 = vld [vmem:[#allocation104_spill] sm:$0xff] }
 0x974   :  { %v8321_v24 = vadd.f32 %v8320_v2, %v8319_v12  ;;  %v8326_v30 = vsel %vm16192_vm2, %v14463_v32, 0.0  ;;  %v6572_v21 = vmul.f32 1.442695, %v6517_v17  ;;  %v8072_v48 = vsel %vm16034_vm0, %v14426_v37, -inf  ;;  %v16195_v17 = vld [vmem:[#allocation129_spill] sm:$0xff]  ;;  %vm16211_vm2 = vmmov %vm16034_vm0 }
 0x975   :  { %v6706_v6 = vrot.slane %v6705_v43, 4  ;;  %v8327_v33 = vsel %vm16193_vm14, %v14468_v39, 0.0  ;;  %10260 = vpow2.f32 %v6570_v16  ;;  %v8074_v19 = vmax.f32 %v8072_v48, %v8073_v35  ;;  %vm16215_vm14 = vmmov %vm16034_vm0 }
 0x976   :  { %v10249_v4 = vpop.eup %10248  ;;  %v8322_v52 = vrot.slane %v8321_v24, 2  ;;  %v8328_v38 = vadd.f32 %v8327_v33, %v8326_v30  ;;  %10262 = vpow2.f32 %v6572_v21  ;;  %v14478_v12 = vadd.f32 %v14143_v31, %v16194_v11  ;;  %v16198_v31 = vld [vmem:[#allocation130_spill] sm:$0xff] }
 0x977   :  { %v10251_v41 = vpop.eup %10250  ;;  %v6707_v2 = vadd.f32 %v6706_v6, %v6705_v43  ;;  %v14481_v58 = vmul.f32 %v10249_v4, %v16195_v17  ;;  %v8075_v7 = vrot.slane %v8074_v19, 4  ;;  %v14485_v1 = vadd.f32 %v16197_v9, %v16196_v51  ;;  %v16200_v4 = vld [vmem:[#allocation23_spill] sm:$0xff] }
 0x978   :  { %v10253_v16 = vpop.eup %10252  ;;  %v8484_v35 = vmul.f32 %v10251_v41, %v14371_v42  ;;  %v8485_v30 = vmul.f32 %v10251_v41, %v14374_v10  ;;  %v8323_v21 = vadd.f32 %v8322_v52, %v8321_v24  ;;  %v8329_v48 = vrot.slane %v8328_v38, 4 }
 0x979   :  { %v6708_v33 = vrot.slane %v6707_v2, 2  ;;  %v14490_v36 = vmul.f32 %v10253_v16, %v16198_v31  ;;  %v6712_v43 = vsel %vm16199_vm3, %v14481_v58, 0.0  ;;  %v8076_v6 = vmax.f32 %v8074_v19, %v8075_v7  ;;  %vm16216_vm3 = vmmov %vm16034_vm0 }
 0x97a   :  { %v8516_v17 = vmul.f32 %v8484_v35, %v16200_v4  ;;  %v8517_v9 = vmul.f32 %v8485_v30, %v16201_v18  ;;  %v8324_v51 = vrot.slane %v8323_v21, 1  ;;  %v8330_v40 = vadd.f32 %v8329_v48, %v8328_v38 }
 0x97b   :  { %v10255_v56 = vpop.eup %10254  ;;  %v6709_v42 = vadd.f32 %v6708_v33, %v6707_v2  ;;  %v6713_v10 = vsel %vm16202_vm10, %v14490_v36, 0.0  ;;  %v8077_v24 = vrot.slane %v8076_v6, 2  ;;  %v6458_v52 = vsel %vm16203_vm11, %v14478_v12, -inf  ;;  %vm16217_vm10 = vmmov %vm16034_vm0 }
 0x97c   :  { %v10257_v41 = vpop.eup %10256  ;;  %v8548_v16 = vsel %vm16204_vm12, %v8516_v17, 0.0  ;;  %v8549_v19 = vsel %vm16205_vm13, %v8517_v9, 0.0  ;;  %v6814_v7 = vmul.f32 %v10255_v56, %v14383_v25  ;;  %v6815_v35 = vmul.f32 %v10255_v56, %v14392_v27  ;;  %vm16222_vm11 = vmmov %vm16034_vm0 }
 0x97d   :  { %v10259_v30 = vpop.eup %10258  ;;  %v8550_v38 = vadd.f32 %v8549_v19, %v8548_v16  ;;  %v8325_v48 = vadd.f32 %v8324_v51, %v8323_v21  ;;  %v6710_v2 = vrot.slane %v6709_v42, 1  ;;  %v8331_v33 = vrot.slane %v8330_v40, 2  ;;  %v16209_v51 = vld [vmem:[#allocation144_spill] sm:$0xff]  ;;  %vm16223_vm12 = vmmov %vm16034_vm0 }
 0x97e   :  { %v6846_v31 = vmul.f32 %v6814_v7, %v13598_v3  ;;  %v6847_v49 = vmul.f32 %v6815_v35, %v13589_v44  ;;  %v6714_v63 = vadd.f32 %v6713_v10, %v6712_v43  ;;  %v14507_v62 = vmul.f32 %v10257_v41, %v16206_v0  ;;  %v16212_v7 = vld [vmem:[#allocation133_spill] sm:$0xff]  ;;  %vm16224_vm13 = vmmov %vm16034_vm0 }
 0x97f   :  { %v10261_v17 = vpop.eup %10260  ;;  %v8551_v11 = vrot.slane %v8550_v38, 4  ;;  %v8453_v9 = vmax.f32 %v8325_v48, 1e-20  ;;  %v6711_v45 = vadd.f32 %v6710_v2, %v6709_v42  ;;  %v8332_v25 = vadd.f32 %v8331_v33, %v8330_v40 }
 0x980   :  { %v10263_v15 = vpop.eup %10262  ;;  %v6934_v27 = vsel %vm16207_vm1, %v6846_v31, 0.0  ;;  %v6935_v56 = vsel %vm16208_vm15, %v6847_v49, 0.0  ;;  %v6715_v21 = vrot.slane %v6714_v63, 4  ;;  %v14512_v16 = vmul.f32 %v10259_v30, %v16209_v51  ;;  %vm16225_vm1 = vmmov %vm16034_vm0 }
 0x981   :  { %v14514_v19 = vadd.f32 %v8551_v11, %v8550_v38  ;;  %v6936_v43 = vadd.f32 %v6935_v56, %v6934_v27  ;;  %10264 = vrcp.f32 %v8453_v9  ;;  %v6775_v0 = vmax.f32 %v6711_v45, 1e-20  ;;  %v16213_v38 = vld [vmem:[#allocation134_spill] sm:$0xff]  ;;  %vm16226_vm15 = vmmov %vm16034_vm0 }
 0x982   :  { %v8333_v10 = vrot.slane %v8332_v25, 1  ;;  %v6716_v41 = vadd.f32 %v6715_v21, %v6714_v63  ;;  %v8335_v42 = vsel %vm16211_vm2, %v14507_v62, 0.0  ;;  %v8336_v40 = vsel %vm16034_vm0, %v14512_v16, 0.0  ;;  %vm16227_vm2 = vmmov %vm16034_vm0 }
 0x983   :  { %16210 = vst [vmem:[#allocation78_spill] sm:$0xff] %v14514_v19  ;;  %v6937_v31 = vrot.slane %v6936_v43, 4  ;;  %10266 = vrcp.f32 %v6775_v0  ;;  %v8337_v49 = vadd.f32 %v8336_v40, %v8335_v42  ;;  %v14521_v35 = vmul.f32 %v10261_v17, %v16212_v7  ;;  %v16220_v40 = vld [vmem:[#allocation86_spill] sm:$0xff] }
 0x984   :  { %v8334_v30 = vadd.f32 %v8333_v10, %v8332_v25  ;;  %v6717_v11 = vrot.slane %v6716_v41, 2  ;;  %v14524_v48 = vmul.f32 %v10263_v15, %v16213_v38  ;;  %v8078_v45 = vmax.f32 %v8076_v6, %v8077_v24  ;;  %v16219_v10 = vld [vmem:[#allocation29_spill] sm:$0xff] }
 0x985   :  { %v14526_v2 = vadd.f32 %v6937_v31, %v6936_v43  ;;  %v8338_v63 = vrot.slane %v8337_v49, 4  ;;  %v6721_v33 = vsel %vm16215_vm14, %v14521_v35, 0.0  ;;  %v6460_v9 = vmax.f32 %v6458_v52, %v14433_v46  ;;  %v16218_v43 = vld [vmem:[#allocation111_spill] sm:$0xff]  ;;  %v16221_v31 = vld [vmem:[#allocation28_spill] sm:$0xff]  ;;  %vm16229_vm14 = vmmov %vm16034_vm0 }
 0x986   :  { %v8454_v27 = vmax.f32 %v8334_v30, 1e-20  ;;  %v6718_v56 = vadd.f32 %v6717_v11, %v6716_v41  ;;  %v6722_v17 = vsel %vm16216_vm3, %v14524_v48, 0.0  ;;  %v8079_v21 = vrot.slane %v8078_v45, 1  ;;  %vm16235_vm3 = vmmov %vm16034_vm0 }
 0x987   :  { %16214 = vst [vmem:[#allocation8_spill] sm:$0xff] %v14526_v2  ;;  %v8339_v25 = vadd.f32 %v8338_v63, %v8337_v49  ;;  %v6723_v51 = vadd.f32 %v6722_v17, %v6721_v33  ;;  %v6461_v0 = vrot.slane %v6460_v9, 4  ;;  %v14535_v15 = vsel %vm16217_vm10, %v14485_v1, -inf  ;;  %vm16240_vm10 = vmmov %vm16034_vm0 }
 0x988   :  { %10268 = vrcp.f32 %v8454_v27  ;;  %v6719_v6 = vrot.slane %v6718_v56, 1  ;;  %v8080_v24 = vmax.f32 %v8078_v45, %v8079_v21  ;;  %v14539_v42 = vadd.f32 %v16219_v10, %v16218_v43 }
 0x989   :  { %v8340_v46 = vrot.slane %v8339_v25, 2  ;;  %v6724_v52 = vrot.slane %v6723_v51, 4  ;;  %v6462_v41 = vmax.f32 %v6460_v9, %v6461_v0  ;;  %v14543_v30 = vadd.f32 %v16221_v31, %v16220_v40 }
 0x98a   :  { %v6720_v49 = vadd.f32 %v6719_v6, %v6718_v56  ;;  %v8188_v11 = vsub.f32 %v14426_v37, %v8080_v24  ;;  %v8189_v63 = vsub.f32 %v14414_v54, %v8080_v24  ;;  %v14549_v33 = vsel %vm16222_vm11, %v14539_v42, -inf  ;;  %vm16241_vm11 = vmmov %vm16034_vm0 }
 0x98b   :  { %v10265_v45 = vpop.eup %10264  ;;  %v8341_v27 = vadd.f32 %v8340_v46, %v8339_v25  ;;  %v6725_v17 = vadd.f32 %v6724_v52, %v6723_v51  ;;  %v6463_v21 = vrot.slane %v6462_v41, 2  ;;  %v8081_v9 = vsel %vm16223_vm12, %v14543_v30, -inf  ;;  %vm16243_vm12 = vmmov %vm16034_vm0 }
 0x98c   :  { %v8486_v0 = vmul.f32 %v10265_v45, %v14429_v28  ;;  %v8487_v10 = vmul.f32 %v10265_v45, %v14438_v14  ;;  %v6776_v56 = vmax.f32 %v6720_v49, 1e-20  ;;  %v8228_v6 = vmul.f32 1.442695, %v8188_v11 }
 0x98d   :  { %v10267_v37 = vpop.eup %10266  ;;  %v8342_v40 = vrot.slane %v8341_v27, 1  ;;  %v6726_v54 = vrot.slane %v6725_v17, 2  ;;  %v8230_v24 = vmul.f32 1.442695, %v8189_v63  ;;  %v6464_v31 = vmax.f32 %v6462_v41, %v6463_v21 }
 0x98e   :  { %v8518_v2 = vmul.f32 %v8486_v0, %v16200_v4  ;;  %v8519_v25 = vmul.f32 %v8487_v10, %v16201_v18  ;;  %v6816_v51 = vmul.f32 %v10267_v37, %v14449_v50  ;;  %v6817_v46 = vmul.f32 %v10267_v37, %v14452_v60 }
 0x98f   :  { %10270 = vrcp.f32 %v6776_v56  ;;  %v8343_v52 = vadd.f32 %v8342_v40, %v8341_v27  ;;  %v6727_v28 = vadd.f32 %v6726_v54, %v6725_v17  ;;  %v6465_v19 = vrot.slane %v6464_v31, 1 }
 0x990   :  { %v8557_v14 = vsel %vm16224_vm13, %v8518_v2, 0.0  ;;  %v8558_v49 = vsel %vm16225_vm1, %v8519_v25, 0.0  ;;  %v6848_v11 = vmul.f32 %v6816_v51, %v13598_v3  ;;  %v6849_v41 = vmul.f32 %v6817_v46, %v13589_v44  ;;  %vm16245_vm13 = vmmov %vm16034_vm0 }
 0x991   :  { %v8559_v63 = vadd.f32 %v8558_v49, %v8557_v14  ;;  %v8455_v45 = vmax.f32 %v8343_v52, 1e-20  ;;  %v6728_v21 = vrot.slane %v6727_v28, 1  ;;  %10272 = vpow2.f32 %v8228_v6  ;;  %vm16246_vm1 = vmmov %vm16034_vm0 }
 0x992   :  { %v10269_v0 = vpop.eup %10268  ;;  %v6943_v50 = vsel %vm16226_vm15, %v6848_v11, 0.0  ;;  %v6944_v60 = vsel %vm16227_vm2, %v6849_v41, 0.0  ;;  %10274 = vpow2.f32 %v8230_v24  ;;  %v6466_v27 = vmax.f32 %v6464_v31, %v6465_v19  ;;  %v16233_v41 = vld [vmem:[#allocation90_spill] sm:$0xff]  ;;  %vm16247_vm15 = vmmov %vm16034_vm0 }
 0x993   :  { %v8560_v17 = vrot.slane %v8559_v63, 4  ;;  %v6945_v10 = vadd.f32 %v6944_v60, %v6943_v50  ;;  %v8488_v2 = vmul.f32 %v10269_v0, %v14463_v32  ;;  %v8489_v56 = vmul.f32 %v10269_v0, %v14468_v39  ;;  %v16237_v0 = vld [vmem:[#allocation32_spill] sm:$0xff]  ;;  %v16238_v60 = vld [vmem:[#allocation87_spill] sm:$0xff]  ;;  %vm16251_vm2 = vmmov %vm16034_vm0 }
 0x994   :  { %10276 = vrcp.f32 %v8455_v45  ;;  %v6729_v37 = vadd.f32 %v6728_v21, %v6727_v28  ;;  %v6518_v40 = vsub.f32 %v14478_v12, %v6466_v27  ;;  %v6519_v54 = vsub.f32 %v14422_v13, %v6466_v27  ;;  %v16230_v28 = vld [vmem:[#allocation110_spill] sm:$0xff]  ;;  %v16239_v27 = vld [vmem:[#allocation33_spill] sm:$0xff] }
 0x995   :  { %v14569_v6 = vadd.f32 %v8560_v17, %v8559_v63  ;;  %v6946_v25 = vrot.slane %v6945_v10, 4  ;;  %v8520_v51 = vmul.f32 %v8488_v2, %v16200_v4  ;;  %v8521_v24 = vmul.f32 %v8489_v56, %v16201_v18  ;;  %v16231_v13 = vld [vmem:[#allocation30_spill] sm:$0xff]  ;;  %v16234_v63 = vld [vmem:[#allocation31_spill] sm:$0xff] }
 0x996   :  { %v6777_v19 = vmax.f32 %v6729_v37, 1e-20  ;;  %v6574_v31 = vmul.f32 1.442695, %v6518_v40  ;;  %v6576_v46 = vmul.f32 1.442695, %v6519_v54  ;;  %v8083_v32 = vmax.f32 %v8081_v9, %v14535_v15 }
 0x997   :  { %v14574_v52 = vadd.f32 %v6946_v25, %v6945_v10  ;;  %v8566_v39 = vsel %vm16034_vm0, %v8520_v51, 0.0  ;;  %v8567_v12 = vsel %vm16229_vm14, %v8521_v24, 0.0  ;;  %v14580_v14 = vadd.f32 %v16231_v13, %v16230_v28  ;;  %v16236_v9 = vld [vmem:[#allocation118_spill] sm:$0xff]  ;;  %vm16252_vm14 = vmmov %vm16034_vm0 }
 0x998   :  { %v14582_v49 = vadd.f32 %v8567_v12, %v8566_v39  ;;  %10278 = vrcp.f32 %v6777_v19  ;;  %v8084_v11 = vrot.slane %v8083_v32, 4  ;;  %v14586_v45 = vadd.f32 %v16234_v63, %v16233_v41  ;;  %v16242_v39 = vld [vmem:[#allocation106_spill] sm:$0xff] }
 0x999   :  { %16228 = vst [vmem:[#allocation7_spill] sm:$0xff] %v14574_v52  ;;  %v10271_v21 = vpop.eup %10270  ;;  %10280 = vpow2.f32 %v6574_v31  ;;  %v6467_v15 = vsel %vm16235_vm3, %v14580_v14, -inf  ;;  %v14592_v50 = vadd.f32 %v16237_v0, %v16236_v9  ;;  %v14596_v17 = vadd.f32 %v16239_v27, %v16238_v60  ;;  %v16249_v0 = vld [vmem:[#allocation34_spill] sm:$0xff]  ;;  %vm16253_vm3 = vmmov %vm16034_vm0 }
 0x99a   :  { %16232 = vst [vmem:[#allocation6_spill] sm:$0xff] %v14582_v49  ;;  %v6818_v2 = vmul.f32 %v10271_v21, %v14481_v58  ;;  %v6819_v56 = vmul.f32 %v10271_v21, %v14490_v36  ;;  %10282 = vpow2.f32 %v6576_v46  ;;  %v8085_v40 = vmax.f32 %v8083_v32, %v8084_v11  ;;  %v16244_v46 = vld [vmem:[#allocation107_spill] sm:$0xff] }
 0x99b   :  { %v10273_v37 = vpop.eup %10272  ;;  %v6469_v54 = vmax.f32 %v6467_v15, %v14549_v33  ;;  %v8091_v25 = vsel %vm16240_vm10, %v14586_v45, -inf  ;;  %v6477_v51 = vsel %vm16241_vm11, %v14592_v50, -inf  ;;  %v8090_v36 = vsel %vm16243_vm12, %v14596_v17, -inf  ;;  %v16248_v15 = vld [vmem:[#allocation117_spill] sm:$0xff]  ;;  %vm16257_vm10 = vmmov %vm16034_vm0 }
 0x99c   :  { %v10275_v24 = vpop.eup %10274  ;;  %v6850_v19 = vmul.f32 %v6818_v2, %v13598_v3  ;;  %v6851_v31 = vmul.f32 %v6819_v56, %v13589_v44  ;;  %v14609_v58 = vmul.f32 %v10273_v37, %v16242_v39  ;;  %v8086_v33 = vrot.slane %v8085_v40, 2  ;;  %vm16258_vm11 = vmmov %vm16034_vm0 }
 0x99d   :  { %v14614_v32 = vmul.f32 %v10275_v24, %v16244_v46  ;;  %v6470_v12 = vrot.slane %v6469_v54, 4  ;;  %v8092_v13 = vmax.f32 %v8090_v36, %v8091_v25  ;;  %v14622_v60 = vadd.f32 %v16249_v0, %v16248_v15  ;;  %vm16259_vm12 = vmmov %vm16034_vm0 }
 0x99e   :  { %v10277_v11 = vpop.eup %10276  ;;  %v6952_v41 = vsel %vm16245_vm13, %v6850_v19, 0.0  ;;  %v6953_v63 = vsel %vm16246_vm1, %v6851_v31, 0.0  ;;  %v8344_v21 = vsel %vm16247_vm15, %v14609_v58, 0.0  ;;  %v8087_v24 = vmax.f32 %v8085_v40, %v8086_v33  ;;  %vm16260_vm13 = vmmov %vm16034_vm0 }
 0x99f   :  { %v14624_v27 = vadd.f32 %v6953_v63, %v6952_v41  ;;  %v8490_v2 = vmul.f32 %v10277_v11, %v14507_v62  ;;  %v8491_v56 = vmul.f32 %v10277_v11, %v14512_v16  ;;  %v8345_v37 = vsel %vm16251_vm2, %v14614_v32, 0.0  ;;  %vm16263_vm1 = vmmov %vm16034_vm0 }
 0x9a0   :  { %v8346_v25 = vadd.f32 %v8345_v37, %v8344_v21  ;;  %v6471_v19 = vmax.f32 %v6469_v54, %v6470_v12  ;;  %v8093_v31 = vrot.slane %v8092_v13, 4  ;;  %v6476_v41 = vsel %vm16034_vm0, %v14622_v60, -inf  ;;  %v16255_v37 = vld [vmem:[#allocation137_spill] sm:$0xff]  ;;  %vm16268_vm15 = vmmov %vm16034_vm0 }
 0x9a1   :  { %16250 = vst [vmem:[#allocation5_spill] sm:$0xff] %v14624_v27  ;;  %v8522_v36 = vmul.f32 %v8490_v2, %v16200_v4  ;;  %v8523_v46 = vmul.f32 %v8491_v56, %v16201_v18  ;;  %v8088_v0 = vrot.slane %v8087_v24, 1  ;;  %vm16271_vm2 = vmmov %vm16034_vm0 }
 0x9a2   :  { %v10279_v63 = vpop.eup %10278  ;;  %v8347_v62 = vrot.slane %v8346_v25, 4  ;;  %v6472_v16 = vrot.slane %v6471_v19, 2  ;;  %v8094_v11 = vmax.f32 %v8092_v13, %v8093_v31  ;;  %v16256_v31 = vld [vmem:[#allocation138_spill] sm:$0xff] }
 0x9a3   :  { %v10281_v10 = vpop.eup %10280  ;;  %v8575_v21 = vsel %vm16252_vm14, %v8522_v36, 0.0  ;;  %v8576_v40 = vsel %vm16253_vm3, %v8523_v46, 0.0  ;;  %v6820_v54 = vmul.f32 %v10279_v63, %v14521_v35  ;;  %v6821_v33 = vmul.f32 %v10279_v63, %v14524_v48  ;;  %vm16274_vm14 = vmmov %vm16034_vm0 }
 0x9a4   :  { %v10283_v12 = vpop.eup %10282  ;;  %v14639_v2 = vadd.f32 %v8576_v40, %v8575_v21  ;;  %v8348_v56 = vadd.f32 %v8347_v62, %v8346_v25  ;;  %v14642_v39 = vmul.f32 %v10281_v10, %v16255_v37  ;;  %v8089_v27 = vmax.f32 %v8087_v24, %v8088_v0  ;;  %vm16278_vm3 = vmmov %vm16034_vm0 }
 0x9a5   :  { %v6852_v52 = vmul.f32 %v6820_v54, %v13598_v3  ;;  %v6853_v13 = vmul.f32 %v6821_v33, %v13589_v44  ;;  %v14647_v36 = vmul.f32 %v10283_v12, %v16256_v31  ;;  %v6473_v46 = vmax.f32 %v6471_v19, %v6472_v16 }
 0x9a6   :  { %16254 = vst [vmem:[#allocation13_spill] sm:$0xff] %v14639_v2  ;;  %v8349_v49 = vrot.slane %v8348_v56, 2  ;;  %v6730_v35 = vsel %vm16257_vm10, %v14642_v39, 0.0  ;;  %v8190_v48 = vsub.f32 %v14543_v30, %v8089_v27  ;;  %v8191_v25 = vsub.f32 %v14485_v1, %v8089_v27  ;;  %v16262_v1 = vld [vmem:[#allocation92_spill] sm:$0xff]  ;;  %vm16279_vm10 = vmmov %vm16034_vm0 }
 0x9a7   :  { %v6961_v10 = vsel %vm16258_vm11, %v6852_v52, 0.0  ;;  %v6962_v24 = vsel %vm16259_vm12, %v6853_v13, 0.0  ;;  %v6731_v63 = vsel %vm16260_vm13, %v14647_v36, 0.0  ;;  %v6474_v62 = vrot.slane %v6473_v46, 1  ;;  %vm16280_vm11 = vmmov %vm16034_vm0 }
 0x9a8   :  { %v14657_v0 = vadd.f32 %v6962_v24, %v6961_v10  ;;  %v8350_v21 = vadd.f32 %v8349_v49, %v8348_v56  ;;  %v6732_v19 = vadd.f32 %v6731_v63, %v6730_v35  ;;  %v8232_v16 = vmul.f32 1.442695, %v8190_v48  ;;  %v16265_v24 = vld [vmem:[#allocation36_spill] sm:$0xff]  ;;  %vm16283_vm12 = vmmov %vm16034_vm0 }
 0x9a9   :  { %v8234_v40 = vmul.f32 1.442695, %v8191_v25  ;;  %v6475_v54 = vmax.f32 %v6473_v46, %v6474_v62  ;;  %v8095_v33 = vrot.slane %v8094_v11, 2  ;;  %v6478_v12 = vmax.f32 %v6476_v41, %v6477_v51  ;;  %v16264_v25 = vld [vmem:[#allocation122_spill] sm:$0xff]  ;;  %vm16285_vm13 = vmmov %vm16034_vm0 }
 0x9aa   :  { %16261 = vst [vmem:[#allocation9_spill] sm:$0xff] %v14657_v0  ;;  %v8351_v30 = vrot.slane %v8350_v21, 1  ;;  %v6733_v2 = vrot.slane %v6732_v19, 4  ;;  %10284 = vpow2.f32 %v8232_v16  ;;  %v14661_v52 = vadd.f32 %v14214_v61, %v16262_v1  ;;  %v16290_v0 = vld [vmem:[#allocation120_spill] sm:$0xff] }
 0x9ab   :  { %10286 = vpow2.f32 %v8234_v40  ;;  %v6520_v27 = vsub.f32 %v14580_v14, %v6475_v54  ;;  %v6521_v13 = vsub.f32 %v14539_v42, %v6475_v54  ;;  %v8096_v10 = vmax.f32 %v8094_v11, %v8095_v33  ;;  %v16266_v14 = vld [vmem:[#allocation89_spill] sm:$0xff] }
 0x9ac   :  { %v8352_v49 = vadd.f32 %v8351_v30, %v8350_v21  ;;  %v6734_v56 = vadd.f32 %v6733_v2, %v6732_v19  ;;  %v6479_v35 = vrot.slane %v6478_v12, 4  ;;  %v8100_v46 = vsel %vm16263_vm1, %v14661_v52, -inf  ;;  %v16267_v40 = vld [vmem:[#allocation37_spill] sm:$0xff]  ;;  %v16270_v19 = vld [vmem:[#allocation38_spill] sm:$0xff]  ;;  %vm16286_vm1 = vmmov %vm16034_vm0 }
 0x9ad   :  { %v6578_v51 = vmul.f32 1.442695, %v6520_v27  ;;  %v6580_v41 = vmul.f32 1.442695, %v6521_v13  ;;  %v8097_v48 = vrot.slane %v8096_v10, 1  ;;  %v14669_v63 = vadd.f32 %v16265_v24, %v16264_v25  ;;  %v16269_v21 = vld [vmem:[#allocation121_spill] sm:$0xff] }
 0x9ae   :  { %v8456_v61 = vmax.f32 %v8352_v49, 1e-20  ;;  %v6735_v62 = vrot.slane %v6734_v56, 2  ;;  %v6480_v16 = vmax.f32 %v6478_v12, %v6479_v35  ;;  %v14673_v42 = vadd.f32 %v16267_v40, %v16266_v14 }
 0x9af   :  { %10288 = vpow2.f32 %v6578_v51  ;;  %v8098_v11 = vmax.f32 %v8096_v10, %v8097_v48  ;;  %v6486_v2 = vsel %vm16268_vm15, %v14669_v63, -inf  ;;  %v14679_v54 = vadd.f32 %v16270_v19, %v16269_v21  ;;  %v16272_v51 = vld [vmem:[#allocation94_spill] sm:$0xff]  ;;  %v16273_v48 = vld [vmem:[#allocation40_spill] sm:$0xff]  ;;  %vm16288_vm15 = vmmov %vm16034_vm0 }
 0x9b0   :  { %10290 = vrcp.f32 %v8456_v61  ;;  %v6736_v33 = vadd.f32 %v6735_v62, %v6734_v56  ;;  %v6481_v30 = vrot.slane %v6480_v16, 2  ;;  %v8099_v1 = vsel %vm16271_vm2, %v14673_v42, -inf  ;;  %vm16291_vm2 = vmmov %vm16034_vm0 }
 0x9b1   :  { %10292 = vpow2.f32 %v6580_v41  ;;  %v8192_v12 = vsub.f32 %v14596_v17, %v8098_v11  ;;  %v8193_v27 = vsub.f32 %v14586_v45, %v8098_v11  ;;  %v8101_v13 = vmax.f32 %v8099_v1, %v8100_v46  ;;  %v16275_v17 = vld [vmem:[#allocation91_spill] sm:$0xff]  ;;  %v16276_v11 = vld [vmem:[#allocation113_spill] sm:$0xff] }
 0x9b2   :  { %v6737_v10 = vrot.slane %v6736_v33, 1  ;;  %v6482_v49 = vmax.f32 %v6480_v16, %v6481_v30  ;;  %v6485_v35 = vsel %vm16034_vm0, %v14679_v54, -inf  ;;  %v14689_v24 = vadd.f32 %v16273_v48, %v16272_v51  ;;  %v16277_v51 = vld [vmem:[#allocation114_spill] sm:$0xff] }
 0x9b3   :  { %v8236_v56 = vmul.f32 1.442695, %v8192_v12  ;;  %v8238_v61 = vmul.f32 1.442695, %v8193_v27  ;;  %v8102_v62 = vrot.slane %v8101_v13, 4  ;;  %v6487_v14 = vmax.f32 %v6485_v35, %v6486_v2 }
 0x9b4   :  { %v10285_v40 = vpop.eup %10284  ;;  %v6738_v41 = vadd.f32 %v6737_v10, %v6736_v33  ;;  %v6483_v19 = vrot.slane %v6482_v49, 1  ;;  %v8109_v45 = vsel %vm16274_vm14, %v14689_v24, -inf  ;;  %v14695_v46 = vadd.f32 %v14238_v59, %v16275_v17  ;;  %vm16293_vm14 = vmmov %vm16034_vm0 }
 0x9b5   :  { %v10287_v16 = vpop.eup %10286  ;;  %v14698_v30 = vmul.f32 %v10285_v40, %v16276_v11  ;;  %10294 = vpow2.f32 %v8236_v56  ;;  %v8103_v1 = vmax.f32 %v8101_v13, %v8102_v62  ;;  %v6488_v12 = vrot.slane %v6487_v14, 4 }
 0x9b6   :  { %v6778_v27 = vmax.f32 %v6738_v41, 1e-20  ;;  %v14701_v2 = vmul.f32 %v10287_v16, %v16277_v51  ;;  %10296 = vpow2.f32 %v8238_v61  ;;  %v6484_v33 = vmax.f32 %v6482_v49, %v6483_v19  ;;  %v16281_v16 = vld [vmem:[#allocation141_spill] sm:$0xff] }
 0x9b7   :  { %v8353_v10 = vsel %vm16278_vm3, %v14698_v30, 0.0  ;;  %v8104_v35 = vrot.slane %v8103_v1, 2  ;;  %v6489_v48 = vmax.f32 %v6487_v14, %v6488_v12  ;;  %v8108_v59 = vsel %vm16279_vm10, %v14695_v46, -inf  ;;  %vm16297_vm3 = vmmov %vm16034_vm0 }
 0x9b8   :  { %10298 = vrcp.f32 %v6778_v27  ;;  %v8354_v56 = vsel %vm16280_vm11, %v14701_v2, 0.0  ;;  %v6522_v13 = vsub.f32 %v14622_v60, %v6484_v33  ;;  %v6523_v62 = vsub.f32 %v14592_v50, %v6484_v33  ;;  %vm16298_vm10 = vmmov %vm16034_vm0 }
 0x9b9   :  { %v10289_v40 = vpop.eup %10288  ;;  %v8355_v41 = vadd.f32 %v8354_v56, %v8353_v10  ;;  %v8105_v61 = vmax.f32 %v8103_v1, %v8104_v35  ;;  %v6490_v49 = vrot.slane %v6489_v48, 2  ;;  %v8110_v19 = vmax.f32 %v8108_v59, %v8109_v45  ;;  %v16282_v1 = vld [vmem:[#allocation142_spill] sm:$0xff]  ;;  %vm16299_vm11 = vmmov %vm16034_vm0 }
 0x9ba   :  { %v10291_v17 = vpop.eup %10290  ;;  %v14712_v11 = vmul.f32 %v10289_v40, %v16281_v16  ;;  %v6582_v14 = vmul.f32 1.442695, %v6522_v13  ;;  %v6584_v12 = vmul.f32 1.442695, %v6523_v62  ;;  %v14716_v27 = vadd.f32 %v14250_v23, %v16135_v47 }
 0x9bb   :  { %v10293_v51 = vpop.eup %10292  ;;  %v8492_v60 = vmul.f32 %v10291_v17, %v14609_v58  ;;  %v8493_v50 = vmul.f32 %v10291_v17, %v14614_v32  ;;  %v8356_v33 = vrot.slane %v8355_v41, 4  ;;  %v8106_v10 = vrot.slane %v8105_v61, 1 }
 0x9bc   :  { %v14721_v35 = vmul.f32 %v10293_v51, %v16282_v1  ;;  %v6739_v45 = vsel %vm16283_vm12, %v14712_v11, 0.0  ;;  %10300 = vpow2.f32 %v6582_v14  ;;  %v6491_v59 = vmax.f32 %v6489_v48, %v6490_v49  ;;  %vm16300_vm12 = vmmov %vm16034_vm0 }
 0x9bd   :  { %v8524_v56 = vmul.f32 %v8492_v60, %v16200_v4  ;;  %v14727_v23 = vmul.f32 %v8493_v50, %v16201_v18  ;;  %v8357_v47 = vadd.f32 %v8356_v33, %v8355_v41  ;;  %10302 = vpow2.f32 %v6584_v12  ;;  %v16289_v60 = vld [vmem:[#allocation119_spill] sm:$0xff] }
 0x9be   :  { %v6740_v58 = vsel %vm16285_vm13, %v14721_v35, 0.0  ;;  %v8107_v32 = vmax.f32 %v8105_v61, %v8106_v10  ;;  %v6492_v13 = vrot.slane %v6491_v59, 1  ;;  %v8111_v62 = vrot.slane %v8110_v19, 4  ;;  %vm16302_vm13 = vmmov %vm16034_vm0 }
 0x9bf   :  { %16284 = vst [vmem:[#allocation14_spill] sm:$0xff] %v14727_v23  ;;  %v10295_v40 = vpop.eup %10294  ;;  %v14732_v17 = vsel %vm16286_vm1, %v8524_v56, 0.0  ;;  %v8358_v51 = vrot.slane %v8357_v47, 2  ;;  %v6741_v14 = vadd.f32 %v6740_v58, %v6739_v45  ;;  %v8118_v48 = vsel %vm16288_vm15, %v14716_v27, -inf  ;;  %vm16304_vm1 = vmmov %vm16034_vm0 }
 0x9c0   :  { %16287 = vst [vmem:[#allocation15_spill] sm:$0xff] %v14732_v17  ;;  %v10297_v49 = vpop.eup %10296  ;;  %v14737_v50 = vmul.f32 %v10295_v40, %v16289_v60  ;;  %v8194_v41 = vsub.f32 %v14673_v42, %v8107_v32  ;;  %v8195_v12 = vsub.f32 %v14661_v52, %v8107_v32  ;;  %v6493_v61 = vmax.f32 %v6491_v59, %v6492_v13  ;;  %vm16305_vm15 = vmmov %vm16034_vm0 }
 0x9c1   :  { %v8359_v33 = vadd.f32 %v8358_v51, %v8357_v47  ;;  %v6742_v10 = vrot.slane %v6741_v14, 4  ;;  %v14742_v23 = vmul.f32 %v10297_v49, %v16290_v0  ;;  %v8112_v56 = vmax.f32 %v8110_v19, %v8111_v62 }
 0x9c2   :  { %v10299_v17 = vpop.eup %10298  ;;  %v8362_v45 = vsel %vm16291_vm2, %v14737_v50, 0.0  ;;  %v8240_v58 = vmul.f32 1.442695, %v8194_v41  ;;  %v8242_v1 = vmul.f32 1.442695, %v8195_v12  ;;  %v6524_v40 = vsub.f32 %v14679_v54, %v6493_v61  ;;  %vm16306_vm2 = vmmov %vm16034_vm0 }
 0x9c3   :  { %v6822_v60 = vmul.f32 %v10299_v17, %v14642_v39  ;;  %v6823_v42 = vmul.f32 %v10299_v17, %v14647_v36  ;;  %v8360_v52 = vrot.slane %v8359_v33, 1  ;;  %v6743_v59 = vadd.f32 %v6742_v10, %v6741_v14 }
 0x9c4   :  { %v8363_v47 = vsel %vm16034_vm0, %v14742_v23, 0.0  ;;  %10304 = vpow2.f32 %v8240_v58  ;;  %v6525_v0 = vsub.f32 %v14669_v63, %v6493_v61  ;;  %v6586_v19 = vmul.f32 1.442695, %v6524_v40  ;;  %v16295_v63 = vld [vmem:[#allocation145_spill] sm:$0xff]  ;;  %v16296_v58 = vld [vmem:[#allocation146_spill] sm:$0xff] }
 0x9c5   :  { %v6854_v32 = vmul.f32 %v6822_v60, %v13598_v3  ;;  %v14754_v13 = vmul.f32 %v6823_v42, %v13589_v44  ;;  %v8361_v62 = vadd.f32 %v8360_v52, %v8359_v33  ;;  %v6744_v54 = vrot.slane %v6743_v59, 2 }
 0x9c6   :  { %v10301_v51 = vpop.eup %10300  ;;  %v8364_v39 = vadd.f32 %v8363_v47, %v8362_v45  ;;  %10306 = vpow2.f32 %v8242_v1  ;;  %v6588_v36 = vmul.f32 1.442695, %v6525_v0  ;;  %v8113_v17 = vrot.slane %v8112_v56, 2 }
 0x9c7   :  { %16292 = vst [vmem:[#allocation49_spill] sm:$0xff] %v14754_v13  ;;  %v10303_v14 = vpop.eup %10302  ;;  %v14757_v49 = vsel %vm16293_vm14, %v6854_v32, 0.0  ;;  %v8457_v41 = vmax.f32 %v8361_v62, 1e-20  ;;  %v6745_v12 = vadd.f32 %v6744_v54, %v6743_v59  ;;  %v14760_v61 = vmul.f32 %v10301_v51, %v16295_v63  ;;  %vm16309_vm14 = vmmov %vm16034_vm0 }
 0x9c8   :  { %16294 = vst [vmem:[#allocation52_spill] sm:$0xff] %v14757_v49  ;;  %v8365_v10 = vrot.slane %v8364_v39, 4  ;;  %v14763_v40 = vmul.f32 %v10303_v14, %v16296_v58  ;;  %10308 = vpow2.f32 %v6586_v19  ;;  %v8114_v33 = vmax.f32 %v8112_v56, %v8113_v17 }
 0x9c9   :  { %10310 = vrcp.f32 %v8457_v41  ;;  %v6746_v45 = vrot.slane %v6745_v12, 1  ;;  %v6748_v1 = vsel %vm16297_vm3, %v14760_v61, 0.0  ;;  %v14769_v60 = vadd.f32 %v14252_v22, %v16144_v57  ;;  %vm16312_vm3 = vmmov %vm16034_vm0 }
 0x9ca   :  { %v8366_v42 = vadd.f32 %v8365_v10, %v8364_v39  ;;  %v6749_v52 = vsel %vm16298_vm10, %v14763_v40, 0.0  ;;  %10312 = vpow2.f32 %v6588_v36  ;;  %v8115_v59 = vrot.slane %v8114_v33, 1  ;;  %vm16318_vm10 = vmmov %vm16034_vm0 }
 0x9cb   :  { %v6747_v47 = vadd.f32 %v6746_v45, %v6745_v12  ;;  %v6750_v0 = vadd.f32 %v6749_v52, %v6748_v1  ;;  %v8117_v56 = vsel %vm16299_vm11, %v14769_v60, -inf  ;;  %v14777_v19 = vadd.f32 %v14299_v29, %v16145_v20  ;;  %vm16319_vm11 = vmmov %vm16034_vm0 }
 0x9cc   :  { %v8367_v32 = vrot.slane %v8366_v42, 2  ;;  %v8116_v62 = vmax.f32 %v8114_v33, %v8115_v59  ;;  %v8119_v54 = vmax.f32 %v8117_v56, %v8118_v48  ;;  %v14781_v22 = vadd.f32 %v14303_v34, %v16149_v26  ;;  %v16301_v34 = vld [vmem:[#allocation123_spill] sm:$0xff] }
 0x9cd   :  { %v6779_v57 = vmax.f32 %v6747_v47, 1e-20  ;;  %v6751_v51 = vrot.slane %v6750_v0, 4  ;;  %v8127_v39 = vsel %vm16300_vm12, %v14777_v19, -inf  ;;  %v14787_v36 = vadd.f32 %v14356_v8, %v16151_v55  ;;  %vm16320_vm12 = vmmov %vm16034_vm0 }
 0x9ce   :  { %v10305_v17 = vpop.eup %10304  ;;  %v8368_v14 = vadd.f32 %v8367_v32, %v8366_v42  ;;  %v8196_v29 = vsub.f32 %v14695_v46, %v8116_v62  ;;  %v8197_v20 = vsub.f32 %v14689_v24, %v8116_v62  ;;  %v8120_v48 = vrot.slane %v8119_v54, 4  ;;  %v16303_v42 = vld [vmem:[#allocation124_spill] sm:$0xff] }
 0x9cf   :  { %10314 = vrcp.f32 %v6779_v57  ;;  %v6752_v41 = vadd.f32 %v6751_v51, %v6750_v0  ;;  %v14792_v26 = vmul.f32 %v10305_v17, %v16301_v34  ;;  %v8126_v12 = vsel %vm16302_vm13, %v14781_v22, -inf  ;;  %v16307_v57 = vld [vmem:[#allocation147_spill] sm:$0xff]  ;;  %v16308_v34 = vld [vmem:[#allocation148_spill] sm:$0xff]  ;;  %vm16321_vm13 = vmmov %vm16034_vm0 }
 0x9d0   :  { %v10307_v10 = vpop.eup %10306  ;;  %v8369_v33 = vrot.slane %v8368_v14, 1  ;;  %v8244_v45 = vmul.f32 1.442695, %v8196_v29  ;;  %v8246_v55 = vmul.f32 1.442695, %v8197_v20  ;;  %v8121_v8 = vmax.f32 %v8119_v54, %v8120_v48 }
 0x9d1   :  { %v6753_v1 = vrot.slane %v6752_v41, 2  ;;  %v14797_v52 = vmul.f32 %v10307_v10, %v16303_v42  ;;  %v8371_v24 = vsel %vm16304_vm1, %v14792_v26, 0.0  ;;  %v8128_v46 = vmax.f32 %v8126_v12, %v8127_v39  ;;  %vm16323_vm1 = vmmov %vm16034_vm0 }
 0x9d2   :  { %v10309_v59 = vpop.eup %10308  ;;  %v8370_v47 = vadd.f32 %v8369_v33, %v8368_v14  ;;  %10316 = vpow2.f32 %v8244_v45  ;;  %v8122_v0 = vrot.slane %v8121_v8, 2  ;;  %v8136_v56 = vsel %vm16305_vm15, %v14787_v36, -inf  ;;  %vm16326_vm15 = vmmov %vm16034_vm0 }
 0x9d3   :  { %v10311_v32 = vpop.eup %10310  ;;  %v6754_v62 = vadd.f32 %v6753_v1, %v6752_v41  ;;  %v8372_v54 = vsel %vm16306_vm2, %v14797_v52, 0.0  ;;  %v14806_v51 = vmul.f32 %v10309_v59, %v16307_v57  ;;  %10318 = vpow2.f32 %v8246_v55  ;;  %vm16329_vm2 = vmmov %vm16034_vm0 }
 0x9d4   :  { %v10313_v17 = vpop.eup %10312  ;;  %v8494_v29 = vmul.f32 %v10311_v32, %v14698_v30  ;;  %v14810_v39 = vmul.f32 %v10311_v32, %v14701_v2  ;;  %v8458_v14 = vmax.f32 %v8370_v47, 1e-20  ;;  %v8373_v20 = vadd.f32 %v8372_v54, %v8371_v24  ;;  %v16310_v32 = vld [vmem:[#allocation105_spill] sm:$0xff] }
 0x9d5   :  { %v6755_v48 = vrot.slane %v6754_v62, 1  ;;  %v14813_v12 = vmul.f32 %v10313_v17, %v16308_v34  ;;  %v6757_v41 = vsel %vm16034_vm0, %v14806_v51, 0.0  ;;  %v8123_v10 = vmax.f32 %v8121_v8, %v8122_v0  ;;  %v16311_v8 = vld [vmem:[#allocation4_spill] sm:$0xff] }
 0x9d6   :  { %v14818_v33 = vmul.f32 %v8494_v29, %v16200_v4  ;;  %10320 = vrcp.f32 %v8458_v14  ;;  %v8374_v45 = vrot.slane %v8373_v20, 4  ;;  %v8129_v55 = vrot.slane %v8128_v46, 4  ;;  %v16313_v14 = vld [vmem:[#allocation104_spill] sm:$0xff] }
 0x9d7   :  { %v6756_v30 = vadd.f32 %v6755_v48, %v6754_v62  ;;  %v6758_v2 = vsel %vm16309_vm14, %v14813_v12, 0.0  ;;  %v8124_v1 = vrot.slane %v8123_v10, 1  ;;  %v14824_v42 = vadd.f32 %v14362_v5, %v16157_v53  ;;  %v16314_v48 = vld [vmem:[#allocation54_spill] sm:$0xff]  ;;  %vm16331_vm14 = vmmov %vm16034_vm0 }
 0x9d8   :  { %v8375_v24 = vadd.f32 %v8374_v45, %v8373_v20  ;;  %v6759_v59 = vadd.f32 %v6758_v2, %v6757_v41  ;;  %v8130_v47 = vmax.f32 %v8128_v46, %v8129_v55  ;;  %v14828_v0 = vadd.f32 %v16311_v8, %v16310_v32 }
 0x9d9   :  { %v10315_v54 = vpop.eup %10314  ;;  %v6780_v17 = vmax.f32 %v6756_v30, 1e-20  ;;  %v8125_v29 = vmax.f32 %v8123_v10, %v8124_v1  ;;  %v8135_v62 = vsel %vm16312_vm3, %v14824_v42, -inf  ;;  %v14834_v49 = vadd.f32 %v16314_v48, %v16313_v14  ;;  %vm16332_vm3 = vmmov %vm16034_vm0 }
 0x9da   :  { %v6824_v5 = vmul.f32 %v10315_v54, %v14712_v11  ;;  %v14838_v53 = vmul.f32 %v10315_v54, %v14721_v35  ;;  %v8376_v46 = vrot.slane %v8375_v24, 2  ;;  %v6760_v20 = vrot.slane %v6759_v59, 4  ;;  %v16316_v11 = vld [vmem:[#allocation125_spill] sm:$0xff] }
 0x9db   :  { %10322 = vrcp.f32 %v6780_v17  ;;  %v8198_v41 = vsub.f32 %v14769_v60, %v8125_v29  ;;  %v8199_v45 = vsub.f32 %v14716_v27, %v8125_v29  ;;  %v8131_v10 = vrot.slane %v8130_v47, 2  ;;  %v16317_v60 = vld [vmem:[#allocation126_spill] sm:$0xff] }
 0x9dc   :  { %16315 = vst [vmem:[#allocation55_spill] sm:$0xff] %v14838_v53  ;;  %v10317_v55 = vpop.eup %10316  ;;  %v14843_v30 = vmul.f32 %v6824_v5, %v13598_v3  ;;  %v8377_v2 = vadd.f32 %v8376_v46, %v8375_v24  ;;  %v6761_v1 = vadd.f32 %v6760_v20, %v6759_v59  ;;  %v8137_v32 = vmax.f32 %v8135_v62, %v8136_v56 }
 0x9dd   :  { %v10319_v8 = vpop.eup %10318  ;;  %v14846_v14 = vmul.f32 %v10317_v55, %v16316_v11  ;;  %v8248_v35 = vmul.f32 1.442695, %v8198_v41  ;;  %v8250_v54 = vmul.f32 1.442695, %v8199_v45  ;;  %v8132_v48 = vmax.f32 %v8130_v47, %v8131_v10  ;;  %v16322_v11 = vld [vmem:[#allocation60_spill] sm:$0xff] }
 0x9de   :  { %v8378_v17 = vrot.slane %v8377_v2, 1  ;;  %v6762_v13 = vrot.slane %v6761_v1, 2  ;;  %v14849_v53 = vmul.f32 %v10319_v8, %v16317_v60  ;;  %v8138_v27 = vrot.slane %v8137_v32, 4 }
 0x9df   :  { %v8380_v29 = vsel %vm16318_vm10, %v14846_v14, 0.0  ;;  %10324 = vpow2.f32 %v8248_v35  ;;  %v8133_v24 = vrot.slane %v8132_v48, 1  ;;  %v8145_v56 = vsel %vm16319_vm11, %v14828_v0, -inf  ;;  %vm16334_vm10 = vmmov %vm16034_vm0 }
 0x9e0   :  { %v14855_v59 = vpop.eup %10320  ;;  %v8379_v62 = vadd.f32 %v8378_v17, %v8377_v2  ;;  %v6763_v5 = vadd.f32 %v6762_v13, %v6761_v1  ;;  %v8381_v47 = vsel %vm16320_vm12, %v14849_v53, 0.0  ;;  %10326 = vpow2.f32 %v8250_v54  ;;  %vm16337_vm11 = vmmov %vm16034_vm0 }
 0x9e1   :  { %v14861_v46 = vmul.f32 %v14855_v59, %v14737_v50  ;;  %v8382_v20 = vadd.f32 %v8381_v47, %v8380_v29  ;;  %v8134_v41 = vmax.f32 %v8132_v48, %v8133_v24  ;;  %v8139_v45 = vmax.f32 %v8137_v32, %v8138_v27  ;;  %vm16339_vm12 = vmmov %vm16034_vm0 }
 0x9e2   :  { %v8459_v10 = vmax.f32 %v8379_v62, 1e-20  ;;  %v6764_v55 = vrot.slane %v6763_v5, 1  ;;  %v8144_v8 = vsel %vm16321_vm13, %v14834_v49, -inf  ;;  %v14867_v2 = vadd.f32 %v16322_v11, %v16218_v43  ;;  %vm16340_vm13 = vmmov %vm16034_vm0 }
 0x9e3   :  { %v8383_v13 = vrot.slane %v8382_v20, 4  ;;  %v8200_v1 = vsub.f32 %v14781_v22, %v8134_v41  ;;  %v8201_v35 = vsub.f32 %v14777_v19, %v8134_v41  ;;  %v8140_v54 = vrot.slane %v8139_v45, 2  ;;  %v16324_v19 = vld [vmem:[#allocation69_spill] sm:$0xff]  ;;  %v16325_v41 = vld [vmem:[#allocation66_spill] sm:$0xff] }
 0x9e4   :  { %10328 = vrcp.f32 %v8459_v10  ;;  %v6765_v50 = vadd.f32 %v6764_v55, %v6763_v5  ;;  %v8146_v17 = vmax.f32 %v8144_v8, %v8145_v56  ;;  %v8154_v32 = vsel %vm16323_vm1, %v14867_v2, -inf  ;;  %vm16341_vm1 = vmmov %vm16034_vm0 }
 0x9e5   :  { %v14873_v48 = vpop.eup %10322  ;;  %v8384_v60 = vadd.f32 %v8383_v13, %v8382_v20  ;;  %v8252_v27 = vmul.f32 1.442695, %v8200_v1  ;;  %v8254_v29 = vmul.f32 1.442695, %v8201_v35  ;;  %v8141_v24 = vmax.f32 %v8139_v45, %v8140_v54  ;;  %v16328_v35 = vld [vmem:[#allocation127_spill] sm:$0xff] }
 0x9e6   :  { %v14877_v43 = vmul.f32 %v14873_v48, %v14760_v61  ;;  %v6781_v22 = vmax.f32 %v6765_v50, 1e-20  ;;  %v8147_v62 = vrot.slane %v8146_v17, 4  ;;  %v14881_v47 = vadd.f32 %v16324_v19, %v16230_v28  ;;  %v16327_v61 = vld [vmem:[#allocation75_spill] sm:$0xff] }
 0x9e7   :  { %v8385_v56 = vrot.slane %v8384_v60, 2  ;;  %10330 = vpow2.f32 %v8252_v27  ;;  %v8142_v5 = vrot.slane %v8141_v24, 1  ;;  %v14885_v10 = vadd.f32 %v16325_v41, %v16236_v9 }
 0x9e8   :  { %10332 = vrcp.f32 %v6781_v22  ;;  %v8148_v20 = vmax.f32 %v8146_v17, %v8147_v62  ;;  %v8153_v45 = vsel %vm16326_vm15, %v14881_v47, -inf  ;;  %v14891_v55 = vadd.f32 %v16327_v61, %v16248_v15  ;;  %v16330_v22 = vld [vmem:[#allocation128_spill] sm:$0xff]  ;;  %vm16342_vm15 = vmmov %vm16034_vm0 }
 0x9e9   :  { %v10325_v8 = vpop.eup %10324  ;;  %v8386_v11 = vadd.f32 %v8385_v56, %v8384_v60  ;;  %10334 = vpow2.f32 %v8254_v29  ;;  %v8143_v28 = vmax.f32 %v8141_v24, %v8142_v5  ;;  %v8155_v13 = vmax.f32 %v8153_v45, %v8154_v32 }
 0x9ea   :  { %v10327_v1 = vpop.eup %10326  ;;  %v14894_v54 = vmul.f32 %v10325_v8, %v16328_v35  ;;  %v8149_v9 = vrot.slane %v8148_v20, 2  ;;  %v8163_v50 = vsel %vm16329_vm2, %v14885_v10, -inf  ;;  %v8162_v17 = vsel %vm16034_vm0, %v14891_v55, -inf  ;;  %vm16343_vm2 = vmmov %vm16034_vm0 }
 0x9eb   :  { %v8387_v27 = vrot.slane %v8386_v11, 1  ;;  %v14901_v15 = vmul.f32 %v10327_v1, %v16330_v22  ;;  %v8202_v60 = vsub.f32 %v14824_v42, %v8143_v28  ;;  %v8203_v29 = vsub.f32 %v14787_v36, %v8143_v28 }
 0x9ec   :  { %v8389_v32 = vsel %vm16331_vm14, %v14894_v54, 0.0  ;;  %v8150_v24 = vmax.f32 %v8148_v20, %v8149_v9  ;;  %v8156_v62 = vrot.slane %v8155_v13, 4  ;;  %v8164_v19 = vmax.f32 %v8162_v17, %v8163_v50  ;;  %v16333_v20 = vld [vmem:[#allocation72_spill] sm:$0xff]  ;;  %vm16344_vm14 = vmmov %vm16034_vm0 }
 0x9ed   :  { %v8388_v56 = vadd.f32 %v8387_v27, %v8386_v11  ;;  %v8390_v5 = vsel %vm16332_vm3, %v14901_v15, 0.0  ;;  %v8256_v41 = vmul.f32 1.442695, %v8202_v60  ;;  %v8258_v45 = vmul.f32 1.442695, %v8203_v29  ;;  %v16335_v60 = vld [vmem:[#allocation83_spill] sm:$0xff]  ;;  %vm16345_vm3 = vmmov %vm16034_vm0 }
 0x9ee   :  { %v10329_v61 = vpop.eup %10328  ;;  %v8391_v8 = vadd.f32 %v8390_v5, %v8389_v32  ;;  %v8151_v1 = vrot.slane %v8150_v24, 1  ;;  %v8157_v35 = vmax.f32 %v8155_v13, %v8156_v62  ;;  %v8165_v22 = vrot.slane %v8164_v19, 4  ;;  %v16336_v62 = vld [vmem:[#allocation129_spill] sm:$0xff] }
 0x9ef   :  { %v14910_v42 = vmul.f32 %v10329_v61, %v14792_v26  ;;  %v8460_v36 = vmax.f32 %v8388_v56, 1e-20  ;;  %10336 = vpow2.f32 %v8256_v41  ;;  %v14914_v28 = vadd.f32 %v16333_v20, %v16264_v25 }
 0x9f0   :  { %v8392_v11 = vrot.slane %v8391_v8, 4  ;;  %10338 = vpow2.f32 %v8258_v45  ;;  %v8152_v9 = vmax.f32 %v8150_v24, %v8151_v1  ;;  %v8158_v50 = vrot.slane %v8157_v35, 2 }
 0x9f1   :  { %v10331_v17 = vpop.eup %10330  ;;  %10340 = vrcp.f32 %v8460_v36  ;;  %v8166_v27 = vmax.f32 %v8164_v19, %v8165_v22  ;;  %v8172_v13 = vsel %vm16334_vm10, %v14914_v28, -inf  ;;  %v14920_v26 = vadd.f32 %v16335_v60, %v16269_v21  ;;  %v16338_v22 = vld [vmem:[#allocation130_spill] sm:$0xff]  ;;  %vm16350_vm10 = vmmov %vm16034_vm0 }
 0x9f2   :  { %v14922_v29 = vpop.eup %10332  ;;  %v8393_v32 = vadd.f32 %v8392_v11, %v8391_v8  ;;  %v14925_v25 = vmul.f32 %v10331_v17, %v16336_v62  ;;  %v8204_v56 = vsub.f32 %v14834_v49, %v8152_v9  ;;  %v8205_v24 = vsub.f32 %v14828_v0, %v8152_v9 }
 0x9f3   :  { %v10335_v5 = vpop.eup %10334  ;;  %v14931_v19 = vmul.f32 %v14922_v29, %v14806_v51  ;;  %v8159_v41 = vmax.f32 %v8157_v35, %v8158_v50  ;;  %v8167_v45 = vrot.slane %v8166_v27, 2  ;;  %v8171_v21 = vsel %vm16337_vm11, %v14920_v26, -inf  ;;  %vm16351_vm11 = vmmov %vm16034_vm0 }
 0x9f4   :  { %v8394_v1 = vrot.slane %v8393_v32, 2  ;;  %v14936_v8 = vmul.f32 %v10335_v5, %v16338_v22  ;;  %v8398_v36 = vsel %vm16339_vm12, %v14925_v25, 0.0  ;;  %v8260_v49 = vmul.f32 1.442695, %v8204_v56  ;;  %vm16352_vm12 = vmmov %vm16034_vm0 }
 0x9f5   :  { %v8262_v20 = vmul.f32 1.442695, %v8205_v24  ;;  %v8160_v0 = vrot.slane %v8159_v41, 1  ;;  %v8168_v11 = vmax.f32 %v8166_v27, %v8167_v45  ;;  %v8173_v9 = vmax.f32 %v8171_v21, %v8172_v13 }
 0x9f6   :  { %v8395_v17 = vadd.f32 %v8394_v1, %v8393_v32  ;;  %v8399_v51 = vsel %vm16340_vm13, %v14936_v8, 0.0  ;;  %10342 = vpow2.f32 %v8260_v49  ;;  %v8497_v35 = vmul.f32 %v14855_v59, %v14742_v23  ;;  %vm16353_vm13 = vmmov %vm16034_vm0 }
 0x9f7   :  { %v8400_v50 = vadd.f32 %v8399_v51, %v8398_v36  ;;  %10344 = vpow2.f32 %v8262_v20  ;;  %v8161_v60 = vmax.f32 %v8159_v41, %v8160_v0  ;;  %v8169_v62 = vrot.slane %v8168_v11, 1 }
 0x9f8   :  { %v8396_v5 = vrot.slane %v8395_v17, 1  ;;  %v8174_v22 = vrot.slane %v8173_v9, 4  ;;  %v8499_v56 = vmul.f32 %v10329_v61, %v14797_v52  ;;  %v14947_v27 = vmul.f32 %v14810_v39, %v16201_v18 }
 0x9f9   :  { %v10337_v13 = vpop.eup %10336  ;;  %v8401_v32 = vrot.slane %v8400_v50, 4  ;;  %v8206_v24 = vsub.f32 %v14881_v47, %v8161_v60  ;;  %v8207_v45 = vsub.f32 %v14867_v2, %v8161_v60  ;;  %v8170_v21 = vmax.f32 %v8168_v11, %v8169_v62 }
 0x9fa   :  { %v10339_v23 = vpop.eup %10338  ;;  %v8397_v59 = vadd.f32 %v8396_v5, %v8395_v17  ;;  %v14952_v41 = vmul.f32 %v10337_v13, %v16212_v7  ;;  %v8175_v1 = vmax.f32 %v8173_v9, %v8174_v22  ;;  %v14956_v52 = vmul.f32 %v14861_v46, %v16200_v4 }
 0x9fb   :  { %v10341_v61 = vpop.eup %10340  ;;  %v8402_v39 = vadd.f32 %v8401_v32, %v8400_v50  ;;  %v14959_v36 = vmul.f32 %v10339_v23, %v16213_v38  ;;  %v8264_v49 = vmul.f32 1.442695, %v8206_v24  ;;  %v8266_v47 = vmul.f32 1.442695, %v8207_v45 }
 0x9fc   :  { %v8500_v2 = vmul.f32 %v10341_v61, %v14846_v14  ;;  %v8501_v20 = vmul.f32 %v10341_v61, %v14849_v53  ;;  %v8461_v0 = vmax.f32 %v8397_v59, 1e-20  ;;  %v8407_v7 = vsel %vm16341_vm1, %v14952_v41, 0.0  ;;  %vm16354_vm1 = vmmov %vm16034_vm0 }
 0x9fd   :  { %v8403_v11 = vrot.slane %v8402_v39, 2  ;;  %v8408_v46 = vsel %vm16342_vm15, %v14959_v36, 0.0  ;;  %10346 = vpow2.f32 %v8264_v49  ;;  %v8208_v9 = vsub.f32 %v14891_v55, %v8170_v21  ;;  %vm16355_vm15 = vmmov %vm16034_vm0 }
 0x9fe   :  { %v8532_v38 = vmul.f32 %v8500_v2, %v16200_v4  ;;  %v8533_v17 = vmul.f32 %v8501_v20, %v16201_v18  ;;  %10348 = vrcp.f32 %v8461_v0  ;;  %v8409_v51 = vadd.f32 %v8408_v46, %v8407_v7 }
 0x9ff   :  { %v8404_v14 = vadd.f32 %v8403_v11, %v8402_v39  ;;  %10350 = vpow2.f32 %v8266_v47  ;;  %v8209_v53 = vsub.f32 %v14885_v10, %v8170_v21  ;;  %v8268_v50 = vmul.f32 1.442695, %v8208_v9 }
 0xa00   :  { %v10343_v60 = vpop.eup %10342  ;;  %v8620_v62 = vsel %vm16343_vm2, %v8532_v38, 0.0  ;;  %v8621_v5 = vsel %vm16034_vm0, %v8533_v17, 0.0  ;;  %v8410_v22 = vrot.slane %v8409_v51, 4  ;;  %v8176_v13 = vrot.slane %v8175_v1, 2  ;;  %vm16357_vm2 = vmmov %vm16034_vm0 }
 0xa01   :  { %v10345_v32 = vpop.eup %10344  ;;  %v8622_v55 = vadd.f32 %v8621_v5, %v8620_v62  ;;  %v8405_v24 = vrot.slane %v8404_v14, 1  ;;  %v14974_v45 = vmul.f32 %v10343_v60, %v16255_v37  ;;  %10352 = vpow2.f32 %v8268_v50 }
 0xa02   :  { %v8411_v23 = vadd.f32 %v8410_v22, %v8409_v51  ;;  %v14977_v59 = vmul.f32 %v10345_v32, %v16256_v31  ;;  %v8270_v10 = vmul.f32 1.442695, %v8209_v53  ;;  %v8177_v21 = vmax.f32 %v8175_v1, %v8176_v13  ;;  %v16347_v53 = vld [vmem:[#allocation6_spill] sm:$0xff] }
 0xa03   :  { %v8623_v61 = vrot.slane %v8622_v55, 4  ;;  %v8406_v39 = vadd.f32 %v8405_v24, %v8404_v14  ;;  %v8416_v49 = vsel %vm16344_vm14, %v14974_v45, 0.0  ;;  %v14982_v47 = vmul.f32 %v8497_v35, %v16201_v18  ;;  %v16346_v35 = vld [vmem:[#allocation78_spill] sm:$0xff]  ;;  %vm16359_vm14 = vmmov %vm16034_vm0 }
 0xa04   :  { %v8412_v2 = vrot.slane %v8411_v23, 2  ;;  %v8417_v37 = vsel %vm16345_vm3, %v14977_v59, 0.0  ;;  %10354 = vpow2.f32 %v8270_v10  ;;  %v8178_v20 = vrot.slane %v8177_v21, 1  ;;  %vm16360_vm3 = vmmov %vm16034_vm0 }
 0xa05   :  { %v14986_v0 = vadd.f32 %v8623_v61, %v8622_v55  ;;  %v8462_v31 = vmax.f32 %v8406_v39, 1e-20  ;;  %v8418_v7 = vadd.f32 %v8417_v37, %v8416_v49  ;;  %v14990_v1 = vmul.f32 %v14910_v42, %v16200_v4 }
 0xa06   :  { %v8413_v11 = vadd.f32 %v8412_v2, %v8411_v23  ;;  %v8179_v46 = vmax.f32 %v8177_v21, %v8178_v20  ;;  %v14993_v9 = vmul.f32 %v8499_v56, %v16201_v18  ;;  %v8553_v38 = vrot.slane %v16346_v35, 2  ;;  %v16349_v21 = vld [vmem:[#allocation142_spill] sm:$0xff] }
 0xa07   :  { %v10347_v17 = vpop.eup %10346  ;;  %10356 = vrcp.f32 %v8462_v31  ;;  %v8419_v51 = vrot.slane %v8418_v7, 4  ;;  %v8562_v14 = vrot.slane %v14569_v6, 2  ;;  %v16348_v50 = vrot.slane %v16347_v53, 4 }
 0xa08   :  { %v10349_v62 = vpop.eup %10348  ;;  %v8414_v5 = vrot.slane %v8413_v11, 1  ;;  %v15001_v42 = vmul.f32 %v10347_v17, %v16281_v16  ;;  %v8210_v22 = vsub.f32 %v14920_v26, %v8179_v46  ;;  %v8211_v56 = vsub.f32 %v14914_v28, %v8179_v46 }
 0xa09   :  { %v8570_v60 = vadd.f32 %v16348_v50, %v16347_v53  ;;  %v10351_v13 = vpop.eup %10350  ;;  %v8502_v32 = vmul.f32 %v10349_v62, %v14894_v54  ;;  %v8503_v55 = vmul.f32 %v10349_v62, %v14901_v15  ;;  %v8420_v24 = vadd.f32 %v8419_v51, %v8418_v7 }
 0xa0a   :  { %v8554_v23 = vadd.f32 %v8553_v38, %v16346_v35  ;;  %v8415_v10 = vadd.f32 %v8414_v5, %v8413_v11  ;;  %v15009_v61 = vmul.f32 %v10351_v13, %v16349_v21  ;;  %v8425_v16 = vsel %vm16350_vm10, %v15001_v42, 0.0  ;;  %vm16361_vm10 = vmmov %vm16034_vm0 }
 0xa0b   :  { %v8272_v39 = vmul.f32 1.442695, %v8210_v22  ;;  %v10353_v49 = vpop.eup %10352  ;;  %v8534_v26 = vmul.f32 %v8502_v32, %v16200_v4  ;;  %v8535_v28 = vmul.f32 %v8503_v55, %v16201_v18  ;;  %v8421_v2 = vrot.slane %v8420_v24, 2 }
 0xa0c   :  { %v8274_v54 = vmul.f32 1.442695, %v8211_v56  ;;  %v8463_v37 = vmax.f32 %v8415_v10, 1e-20  ;;  %v8426_v15 = vsel %vm16351_vm11, %v15009_v61, 0.0  ;;  %v15018_v20 = vmul.f32 %v10353_v49, %v16295_v63  ;;  %v16356_v10 = vld [vmem:[#allocation13_spill] sm:$0xff]  ;;  %vm16363_vm11 = vmmov %vm16034_vm0 }
 0xa0d   :  { %10358 = vpow2.f32 %v8272_v39  ;;  %v8629_v31 = vsel %vm16352_vm12, %v8534_v26, 0.0  ;;  %v8630_v7 = vsel %vm16353_vm13, %v8535_v28, 0.0  ;;  %v8422_v11 = vadd.f32 %v8421_v2, %v8420_v24  ;;  %vm16364_vm12 = vmmov %vm16034_vm0 }
 0xa0e   :  { %v8427_v46 = vadd.f32 %v8426_v15, %v8425_v16  ;;  %v10355_v35 = vpop.eup %10354  ;;  %v8631_v38 = vadd.f32 %v8630_v7, %v8629_v31  ;;  %10360 = vrcp.f32 %v8463_v37  ;;  %v8434_v17 = vsel %vm16354_vm1, %v15018_v20, 0.0  ;;  %vm16365_vm13 = vmmov %vm16034_vm0 }
 0xa0f   :  { %v8555_v51 = vrot.slane %v8554_v23, 1  ;;  %v8423_v53 = vrot.slane %v8422_v11, 1  ;;  %v15025_v62 = vmul.f32 %v10355_v35, %v16296_v58  ;;  %10362 = vpow2.f32 %v8274_v54  ;;  %vm16366_vm1 = vmmov %vm16034_vm0 }
 0xa10   :  { %v8428_v50 = vrot.slane %v8427_v46, 4  ;;  %v8632_v63 = vrot.slane %v8631_v38, 4  ;;  %v8563_v22 = vadd.f32 %v8562_v14, %v14569_v6  ;;  %v8571_v56 = vrot.slane %v8570_v60, 2 }
 0xa11   :  { %v15027_v5 = vadd.f32 %v8555_v51, %v8554_v23  ;;  %v10357_v13 = vpop.eup %10356  ;;  %v8424_v32 = vadd.f32 %v8423_v53, %v8422_v11  ;;  %v8435_v24 = vsel %vm16355_vm15, %v15025_v62, 0.0  ;;  %v8578_v21 = vrot.slane %v16356_v10, 4  ;;  %vm16367_vm15 = vmmov %vm16034_vm0 }
 0xa12   :  { %v8429_v55 = vadd.f32 %v8428_v50, %v8427_v46  ;;  %v15033_v16 = vadd.f32 %v8632_v63, %v8631_v38  ;;  %v8504_v58 = vmul.f32 %v10357_v13, %v14925_v25  ;;  %v8505_v39 = vmul.f32 %v10357_v13, %v14936_v8 }
 0xa13   :  { %v8436_v49 = vadd.f32 %v8435_v24, %v8434_v17  ;;  %v8464_v23 = vmax.f32 %v8424_v32, 1e-20  ;;  %v8564_v28 = vrot.slane %v8563_v22, 1  ;;  %v8572_v6 = vadd.f32 %v8571_v56, %v8570_v60 }
 0xa14   :  { %v8430_v26 = vrot.slane %v8429_v55, 2  ;;  %v8536_v14 = vmul.f32 %v8504_v58, %v16200_v4  ;;  %v8537_v2 = vmul.f32 %v8505_v39, %v16201_v18  ;;  %v8579_v37 = vadd.f32 %v8578_v21, %v16356_v10 }
 0xa15   :  { %v8437_v54 = vrot.slane %v8436_v49, 4  ;;  %10364 = vrcp.f32 %v8464_v23  ;;  %v15040_v31 = vadd.f32 %v8564_v28, %v8563_v22  ;;  %v8573_v7 = vrot.slane %v8572_v6, 1  ;;  %v16358_v22 = vld [vmem:[#allocation14_spill] sm:$0xff]  ;;  %v16362_v28 = vld [vmem:[#allocation15_spill] sm:$0xff] }
 0xa16   :  { %v8431_v15 = vadd.f32 %v8430_v26, %v8429_v55  ;;  %v8638_v8 = vsel %vm16357_vm2, %v8536_v14, 0.0  ;;  %v8639_v11 = vsel %vm16034_vm0, %v8537_v2, 0.0  ;;  %v8580_v35 = vrot.slane %v8579_v37, 2  ;;  %vm16368_vm2 = vmmov %vm16034_vm0 }
 0xa17   :  { %v10359_v25 = vpop.eup %10358  ;;  %v8438_v46 = vadd.f32 %v8437_v54, %v8436_v49  ;;  %v15044_v60 = vadd.f32 %v8639_v11, %v8638_v8  ;;  %v8574_v51 = vadd.f32 %v8573_v7, %v8572_v6  ;;  %v8585_v56 = vsel %vm16359_vm14, %v16358_v22, 0.0  ;;  %vm16369_vm14 = vmmov %vm16034_vm0 }
 0xa18   :  { %v8432_v38 = vrot.slane %v8431_v15, 1  ;;  %v15047_v17 = vmul.f32 %v10359_v25, %v16307_v57  ;;  %v10361_v53 = vpop.eup %10360  ;;  %v8581_v63 = vadd.f32 %v8580_v35, %v8579_v37  ;;  %v8593_v13 = vsel %vm16360_vm3, %v14818_v33, 0.0  ;;  %vm16370_vm3 = vmmov %vm16034_vm0 }
 0xa19   :  { %v8439_v50 = vrot.slane %v8438_v46, 2  ;;  %v10363_v32 = vpop.eup %10362  ;;  %v8641_v55 = vrot.slane %v15044_v60, 4  ;;  %v8506_v24 = vmul.f32 %v10361_v53, %v14952_v41  ;;  %v8507_v10 = vmul.f32 %v10361_v53, %v14959_v36 }
 0xa1a   :  { %v8433_v21 = vadd.f32 %v8432_v38, %v8431_v15  ;;  %v15057_v58 = vmul.f32 %v10363_v32, %v16308_v34  ;;  %v8443_v39 = vsel %vm16361_vm10, %v15047_v17, 0.0  ;;  %v8582_v49 = vrot.slane %v8581_v63, 1  ;;  %vm16384_vm10 = vmmov %vm16034_vm0 }
 0xa1b   :  { %v8440_v57 = vadd.f32 %v8439_v50, %v8438_v46  ;;  %v8538_v23 = vmul.f32 %v8506_v24, %v16200_v4  ;;  %v8539_v33 = vmul.f32 %v8507_v10, %v16201_v18  ;;  %v8586_v6 = vadd.f32 %v8585_v56, %v16362_v28 }
 0xa1c   :  { %v8465_v26 = vmax.f32 %v8433_v21, 1e-20  ;;  %v8444_v41 = vsel %vm16363_vm11, %v15057_v58, 0.0  ;;  %v8583_v36 = vadd.f32 %v8582_v49, %v8581_v63  ;;  %v8594_v34 = vsel %vm16364_vm12, %v14947_v27, 0.0  ;;  %vm16388_vm12 = vmmov %vm16034_vm0 }
 0xa1d   :  { %v8441_v14 = vrot.slane %v8440_v57, 1  ;;  %v8647_v2 = vsel %vm16365_vm13, %v8538_v23, 0.0  ;;  %v8648_v54 = vsel %vm16366_vm1, %v8539_v33, 0.0  ;;  %v8445_v37 = vadd.f32 %v8444_v41, %v8443_v39  ;;  %v16372_v23 = vld [vmem:[#allocation51_spill] sm:$0xff]  ;;  %vm16389_vm13 = vmmov %vm16034_vm0 }
 0xa1e   :  { %10366 = vrcp.f32 %v8465_v26  ;;  %v15070_v15 = vadd.f32 %v8648_v54, %v8647_v2  ;;  %v8587_v25 = vrot.slane %v8586_v6, 4  ;;  %v8595_v8 = vadd.f32 %v8594_v34, %v8593_v13  ;;  %v16373_v2 = vld [vmem:[#allocation39_spill] sm:$0xff]  ;;  %v16374_v54 = vld [vmem:[#allocation57_spill] sm:$0xff]  ;;  %vm16390_vm1 = vmmov %vm16034_vm0 }
 0xa1f   :  { %v8442_v7 = vadd.f32 %v8441_v14, %v8440_v57  ;;  %v10365_v11 = vpop.eup %10364  ;;  %v8446_v46 = vrot.slane %v8445_v37, 4  ;;  %v8602_v35 = vsel %vm16367_vm15, %v14956_v52, 0.0  ;;  %v8603_v38 = vsel %vm16368_vm2, %v14982_v47, 0.0  ;;  %vm16391_vm15 = vmmov %vm16034_vm0 }
 0xa20   :  { %v8611_v27 = vsel %vm16034_vm0, %v14990_v1, 0.0  ;;  %v8508_v53 = vmul.f32 %v10365_v11, %v14974_v45  ;;  %v8509_v50 = vmul.f32 %v10365_v11, %v14977_v59  ;;  %v8588_v22 = vadd.f32 %v8587_v25, %v8586_v6  ;;  %vm16392_vm2 = vmmov %vm16034_vm0 }
 0xa21   :  { %v8466_v63 = vmax.f32 %v8442_v7, 1e-20  ;;  %v8447_v56 = vadd.f32 %v8446_v46, %v8445_v37  ;;  %v8596_v32 = vrot.slane %v8595_v8, 4  ;;  %v8604_v13 = vadd.f32 %v8603_v38, %v8602_v35  ;;  %v16375_v7 = vld [vmem:[#allocation47_spill] sm:$0xff] }
 0xa22   :  { %v8612_v24 = vsel %vm16369_vm14, %v14993_v9, 0.0  ;;  %v8540_v52 = vmul.f32 %v8508_v53, %v16200_v4  ;;  %v15084_v10 = vmul.f32 %v8509_v50, %v16201_v18  ;;  %v8589_v47 = vrot.slane %v8588_v22, 2  ;;  %v16371_v9 = vld [vmem:[#allocation35_spill] sm:$0xff]  ;;  %vm16393_vm14 = vmmov %vm16034_vm0 }
 0xa23   :  { %10368 = vrcp.f32 %v8466_v63  ;;  %v8448_v1 = vrot.slane %v8447_v56, 2  ;;  %v8597_v21 = vadd.f32 %v8596_v32, %v8595_v8  ;;  %v8605_v45 = vrot.slane %v8604_v13, 4 }
 0xa24   :  { %v8613_v57 = vadd.f32 %v8612_v24, %v8611_v27  ;;  %v15087_v59 = vsel %vm16370_vm3, %v8540_v52, 0.0  ;;  %v8590_v39 = vadd.f32 %v8589_v47, %v8588_v22  ;;  %v8708_v49 = vsel %vm2767_vm4, %v15040_v31, %v15027_v5  ;;  %vm16401_vm3 = vmmov %vm16034_vm0 }
 0xa25   :  { %v6811_v33 = vmul.f32 %v16372_v23, %v16371_v9  ;;  %v8449_v26 = vadd.f32 %v8448_v1, %v8447_v56  ;;  %v8598_v28 = vrot.slane %v8597_v21, 2  ;;  %v8606_v6 = vadd.f32 %v8605_v45, %v8604_v13  ;;  %v16376_v13 = vld [vmem:[#allocation48_spill] sm:$0xff]  ;;  %v16379_v9 = vld [vmem:[#allocation42_spill] sm:$0xff] }
 0xa26   :  { %v8614_v14 = vrot.slane %v8613_v57, 4  ;;  %v8591_v41 = vrot.slane %v8590_v39, 1  ;;  %v8709_v34 = vsel %vm2770_vm5, %v8574_v51, %v8708_v49  ;;  %v6813_v37 = vmul.f32 %v16374_v54, %v16373_v2 }
 0xa27   :  { %v6841_v25 = vmul.f32 %v16375_v7, %v13589_v44  ;;  %v8450_v11 = vrot.slane %v8449_v26, 1  ;;  %v8599_v46 = vadd.f32 %v8598_v28, %v8597_v21  ;;  %v8607_v5 = vrot.slane %v8606_v6, 2 }
 0xa28   :  { %v10367_v8 = vpop.eup %10366  ;;  %v8615_v31 = vadd.f32 %v8614_v14, %v8613_v57  ;;  %v8592_v27 = vadd.f32 %v8591_v41, %v8590_v39  ;;  %v8710_v53 = vsel %vm2773_vm6, %v8583_v36, %v8709_v34  ;;  %v6842_v24 = vmul.f32 %v16376_v13, %v13598_v3  ;;  %v16377_v36 = vld [vmem:[#allocation63_spill] sm:$0xff]  ;;  %v16378_v39 = vld [vmem:[#allocation41_spill] sm:$0xff] }
 0xa29   :  { %v8510_v35 = vmul.f32 %v10367_v8, %v15001_v42  ;;  %v15101_v38 = vmul.f32 %v10367_v8, %v15009_v61  ;;  %v8451_v51 = vadd.f32 %v8450_v11, %v8449_v26  ;;  %v8600_v50 = vrot.slane %v8599_v46, 1  ;;  %v16380_v34 = vld [vmem:[#allocation43_spill] sm:$0xff]  ;;  %v16382_v8 = vld [vmem:[#allocation44_spill] sm:$0xff] }
 0xa2a   :  { %v8608_v63 = vadd.f32 %v8607_v5, %v8606_v6  ;;  %v8616_v22 = vrot.slane %v8615_v31, 2  ;;  %v8711_v32 = vsel %vm2776_vm7, %v8592_v27, %v8710_v53  ;;  %v6843_v42 = vmul.f32 %v6811_v33, %v13589_v44  ;;  %v16385_v27 = vld [vmem:[#allocation112_spill] sm:$0xff] }
 0xa2b   :  { %v15105_v56 = vmul.f32 %v8510_v35, %v16200_v4  ;;  %v8467_v52 = vmax.f32 %v8451_v51, 1e-20  ;;  %v8601_v61 = vadd.f32 %v8600_v50, %v8599_v46  ;;  %v6844_v45 = vmul.f32 %v16377_v36, %v13598_v3 }
 0xa2c   :  { %v8609_v47 = vrot.slane %v8608_v63, 1  ;;  %v8617_v1 = vadd.f32 %v8616_v22, %v8615_v31  ;;  %v6845_v57 = vmul.f32 %v6813_v37, %v13589_v44  ;;  %v6867_v49 = vrot.slane %v16378_v39, 2 }
 0xa2d   :  { %v15111_v21 = vpop.eup %10368  ;;  %v6876_v23 = vrot.slane %v16379_v9, 2  ;;  %10370 = vrcp.f32 %v8467_v52  ;;  %v8712_v6 = vsel %vm2779_vm8, %v8601_v61, %v8711_v32  ;;  %v16381_v2 = vrot.slane %v16380_v34, 4 }
 0xa2e   :  { %v15120_v26 = vmul.f32 %v15111_v21, %v15018_v20  ;;  %v8610_v33 = vadd.f32 %v8609_v47, %v8608_v63  ;;  %v8618_v28 = vrot.slane %v8617_v1, 1  ;;  %v6868_v14 = vadd.f32 %v6867_v49, %v16378_v39  ;;  %v16383_v20 = vld [vmem:[#allocation45_spill] sm:$0xff]  ;;  %v16387_v63 = vld [vmem:[#allocation46_spill] sm:$0xff] }
 0xa2f   :  { %v6877_v41 = vadd.f32 %v6876_v23, %v16379_v9  ;;  %v6884_v54 = vadd.f32 %v16381_v2, %v16380_v34  ;;  %v6892_v11 = vrot.slane %v16382_v8, 4  ;;  %v6899_v46 = vsel %vm16384_vm10, %v16383_v20, 0.0  ;;  %vm16403_vm10 = vmmov %vm16034_vm0 }
 0xa30   :  { %v8619_v37 = vadd.f32 %v8618_v28, %v8617_v1  ;;  %v8713_v7 = vsel %vm2782_vm9, %v8610_v33, %v8712_v6  ;;  %v6869_v5 = vrot.slane %v6868_v14, 1  ;;  %v6900_v53 = vadd.f32 %v6899_v46, %v16385_v27  ;;  %v16394_v27 = vld [vmem:[#allocation55_spill] sm:$0xff] }
 0xa31   :  { %v6878_v31 = vrot.slane %v6877_v41, 1  ;;  %v6885_v35 = vrot.slane %v6884_v54, 2  ;;  %vm16386_vm11 = vcmask 1047559   ;;  %v6893_v50 = vadd.f32 %v6892_v11, %v16382_v8 }
 0xa32   :  { %v8714_v51 = vsel %vm16386_vm11, %v8619_v37, %v8713_v7  ;;  %v6907_v22 = vsel %vm16388_vm12, %v16387_v63, 0.0  ;;  %v6908_v32 = vsel %vm16389_vm13, %v6841_v25, 0.0  ;;  %v6870_v52 = vadd.f32 %v6869_v5, %v6868_v14  ;;  %vm16404_vm12 = vmmov %vm16034_vm0 }
 0xa33   :  { %v8724_v13 = vsel %vm16390_vm1, %v8714_v51, 0.0  ;;  %v6879_v61 = vadd.f32 %v6878_v31, %v6877_v41  ;;  %v6886_v47 = vadd.f32 %v6885_v35, %v6884_v54  ;;  %v6894_v1 = vrot.slane %v6893_v50, 2  ;;  %vm16405_vm13 = vmmov %vm16034_vm0 }
 0xa34   :  { %8725 = vadd.xlane.f32.xlu0 %v8724_v13  ;;  %v6901_v36 = vrot.slane %v6900_v53, 4  ;;  %v6909_v39 = vadd.f32 %v6908_v32, %v6907_v22  ;;  %v6916_v49 = vsel %vm16391_vm15, %v6842_v24, 0.0  ;;  %v6917_v23 = vsel %vm16392_vm2, %v6843_v42, 0.0  ;;  %vm16406_vm1 = vmmov %vm16034_vm0 }
 0xa35   :  { %v6887_v9 = vrot.slane %v6886_v47, 1  ;;  %v6925_v33 = vsel %vm16034_vm0, %v6844_v45, 0.0  ;;  %v6926_v28 = vsel %vm16393_vm14, %v6845_v57, 0.0  ;;  %v6895_v6 = vadd.f32 %v6894_v1, %v6893_v50  ;;  %vm16407_vm15 = vmmov %vm16034_vm0 }
 0xa36   :  { %v6902_v25 = vadd.f32 %v6901_v36, %v6900_v53  ;;  %v6910_v34 = vrot.slane %v6909_v39, 4  ;;  %v6918_v2 = vadd.f32 %v6917_v23, %v6916_v49  ;;  %v6927_v41 = vadd.f32 %v6926_v28, %v6925_v33  ;;  %v16397_v23 = vld [vmem:[#allocation5_spill] sm:$0xff]  ;;  %vm16408_vm2 = vmmov %vm16034_vm0 }
 0xa37   :  { %v6888_v14 = vadd.f32 %v6887_v9, %v6886_v47  ;;  %v7022_v54 = vsel %vm2767_vm4, %v6879_v61, %v6870_v52  ;;  %v6827_v37 = vmul.f32 %v14873_v48, %v14763_v40  ;;  %v15146_v7 = vpop.eup %10370  ;;  %v6896_v24 = vrot.slane %v6895_v6, 1  ;;  %v16395_v52 = vld [vmem:[#allocation8_spill] sm:$0xff]  ;;  %vm16409_vm14 = vmmov %vm16034_vm0 }
 0xa38   :  { %v6903_v8 = vrot.slane %v6902_v25, 2  ;;  %v6911_v42 = vadd.f32 %v6910_v34, %v6909_v39  ;;  %v6919_v11 = vrot.slane %v6918_v2, 4  ;;  %v15150_v45 = vmul.f32 %v15146_v7, %v15047_v17  ;;  %v16396_v39 = vld [vmem:[#allocation7_spill] sm:$0xff] }
 0xa39   :  { %v6928_v57 = vrot.slane %v6927_v41, 4  ;;  %v7023_v20 = vsel %vm2770_vm5, %v6888_v14, %v7022_v54  ;;  %v6829_v46 = vmul.f32 %v14922_v29, %v14813_v12  ;;  %v6897_v5 = vadd.f32 %v6896_v24, %v6895_v6  ;;  %v16399_v6 = vld [vmem:[#allocation9_spill] sm:$0xff] }
 0xa3a   :  { %v6904_v31 = vadd.f32 %v6903_v8, %v6902_v25  ;;  %v6912_v35 = vrot.slane %v6911_v42, 2  ;;  %v6920_v40 = vadd.f32 %v6919_v11, %v6918_v2  ;;  %v6857_v53 = vmul.f32 %v16394_v27, %v13589_v44 }
 0xa3b   :  { %v6929_v48 = vadd.f32 %v6928_v57, %v6927_v41  ;;  %v6858_v51 = vmul.f32 %v14877_v43, %v13598_v3  ;;  %v6859_v17 = vmul.f32 %v6827_v37, %v13589_v44  ;;  %v7024_v32 = vsel %vm2773_vm6, %v6897_v5, %v7023_v20 }
 0xa3c   :  { %v6905_v50 = vrot.slane %v6904_v31, 1  ;;  %v6913_v63 = vadd.f32 %v6912_v35, %v6911_v42  ;;  %v6921_v22 = vrot.slane %v6920_v40, 2  ;;  %v6860_v12 = vmul.f32 %v14931_v19, %v13598_v3  ;;  %v16400_v42 = vld [vmem:[#allocation49_spill] sm:$0xff] }
 0xa3d   :  { %v6930_v13 = vrot.slane %v6929_v48, 2  ;;  %v6861_v29 = vmul.f32 %v6829_v46, %v13589_v44  ;;  %v6939_v61 = vrot.slane %v16395_v52, 2  ;;  %v6948_v43 = vrot.slane %v16396_v39, 2 }
 0xa3e   :  { %v6906_v47 = vadd.f32 %v6905_v50, %v6904_v31  ;;  %v6914_v1 = vrot.slane %v6913_v63, 1  ;;  %v6922_v36 = vadd.f32 %v6921_v22, %v6920_v40  ;;  %v16398_v33 = vrot.slane %v16397_v23, 4  ;;  %v16402_v40 = vld [vmem:[#allocation52_spill] sm:$0xff] }
 0xa3f   :  { %v6931_v49 = vadd.f32 %v6930_v13, %v6929_v48  ;;  %v6940_v9 = vadd.f32 %v6939_v61, %v16395_v52  ;;  %v6964_v25 = vrot.slane %v16399_v6, 4  ;;  %v6949_v19 = vadd.f32 %v6948_v43, %v16396_v39 }
 0xa40   :  { %v6956_v28 = vadd.f32 %v16398_v33, %v16397_v23  ;;  %v6915_v34 = vadd.f32 %v6914_v1, %v6913_v63  ;;  %v6923_v3 = vrot.slane %v6922_v36, 1  ;;  %v7025_v44 = vsel %vm2776_vm7, %v6906_v47, %v7024_v32 }
 0xa41   :  { %v6932_v2 = vrot.slane %v6931_v49, 1  ;;  %v6941_v14 = vrot.slane %v6940_v9, 1  ;;  %v6965_v54 = vadd.f32 %v6964_v25, %v16399_v6  ;;  %v6950_v8 = vrot.slane %v6949_v19, 1 }
 0xa42   :  { %v6957_v41 = vrot.slane %v6956_v28, 2  ;;  %v6924_v37 = vadd.f32 %v6923_v3, %v6922_v36  ;;  %v7026_v24 = vsel %vm2779_vm8, %v6915_v34, %v7025_v44  ;;  %v6971_v11 = vsel %vm16401_vm3, %v16400_v42, 0.0  ;;  %vm16410_vm3 = vmmov %vm16034_vm0 }
 0xa43   :  { %v6933_v57 = vadd.f32 %v6932_v2, %v6931_v49  ;;  %v6942_v20 = vadd.f32 %v6941_v14, %v6940_v9  ;;  %v6966_v5 = vrot.slane %v6965_v54, 2  ;;  %v6951_v35 = vadd.f32 %v6950_v8, %v6949_v19 }
 0xa44   :  { %v6958_v46 = vadd.f32 %v6957_v41, %v6956_v28  ;;  %v7027_v31 = vsel %vm2782_vm9, %v6924_v37, %v7026_v24  ;;  %v6972_v48 = vadd.f32 %v6971_v11, %v16402_v40  ;;  %v6979_v27 = vsel %vm16403_vm10, %v14843_v30, 0.0  ;;  %vm16411_vm10 = vmmov %vm16034_vm0 }
 0xa45   :  { %v7028_v50 = vsel %vm16386_vm11, %v6933_v57, %v7027_v31  ;;  %v6967_v22 = vadd.f32 %v6966_v5, %v6965_v54  ;;  %v6980_v32 = vsel %vm16404_vm12, %v6857_v53, 0.0  ;;  %v6988_v47 = vsel %vm16406_vm1, %v6858_v51, 0.0  ;;  %vm16412_vm12 = vmmov %vm16034_vm0 }
 0xa46   :  { %v6959_v63 = vrot.slane %v6958_v46, 1  ;;  %v7038_v13 = vsel %vm16405_vm13, %v7028_v50, 0.0  ;;  %v6973_v52 = vrot.slane %v6972_v48, 4  ;;  %v6981_v61 = vadd.f32 %v6980_v32, %v6979_v27  ;;  %vm16413_vm13 = vmmov %vm16034_vm0 }
 0xa47   :  { %7039 = vadd.xlane.f32.xlu0 %v7038_v13  ;;  %v6968_v36 = vrot.slane %v6967_v22, 1  ;;  %v6989_v39 = vsel %vm16407_vm15, %v6859_v17, 0.0  ;;  %v6997_v43 = vsel %vm16408_vm2, %v6860_v12, 0.0  ;;  %v6998_v23 = vsel %vm16034_vm0, %v6861_v29, 0.0  ;;  %vm16414_vm1 = vmmov %vm16034_vm0 }
 0xa48   :  { %v6960_v1 = vadd.f32 %v6959_v63, %v6958_v46  ;;  %v6974_v30 = vadd.f32 %v6973_v52, %v6972_v48  ;;  %v6982_v49 = vrot.slane %v6981_v61, 4  ;;  %v6990_v9 = vadd.f32 %v6989_v39, %v6988_v47  ;;  %vm16415_vm15 = vmmov %vm16034_vm0 }
 0xa49   :  { %v6969_v33 = vadd.f32 %v6968_v36, %v6967_v22  ;;  %v6999_v53 = vadd.f32 %v6998_v23, %v6997_v43  ;;  %v7029_v28 = vsel %vm2767_vm4, %v6951_v35, %v6942_v20  ;;  %v8513_v6 = vmul.f32 %v15111_v21, %v15025_v62  ;;  %vm16416_vm2 = vmmov %vm16034_vm0 }
 0xa4a   :  { %v6975_v51 = vrot.slane %v6974_v30, 2  ;;  %v6983_v25 = vadd.f32 %v6982_v49, %v6981_v61  ;;  %v6991_v34 = vrot.slane %v6990_v9, 4  ;;  %v7030_v3 = vsel %vm2770_vm5, %v6960_v1, %v7029_v28 }
 0xa4b   :  { %v7000_v17 = vrot.slane %v6999_v53, 4  ;;  %v7031_v12 = vsel %vm2773_vm6, %v6969_v33, %v7030_v3  ;;  %v8515_v44 = vmul.f32 %v15146_v7, %v15057_v58  ;;  %v8543_v29 = vmul.f32 %v15101_v38, %v16201_v18 }
 0xa4c   :  { %v6976_v19 = vadd.f32 %v6975_v51, %v6974_v30  ;;  %v6984_v2 = vrot.slane %v6983_v25, 2  ;;  %v6992_v14 = vadd.f32 %v6991_v34, %v6990_v9  ;;  %v8544_v62 = vmul.f32 %v15120_v26, %v16200_v4 }
 0xa4d   :  { %v7001_v21 = vadd.f32 %v7000_v17, %v6999_v53  ;;  %v8545_v41 = vmul.f32 %v8513_v6, %v16201_v18  ;;  %v8546_v54 = vmul.f32 %v15150_v45, %v16200_v4  ;;  %v8547_v37 = vmul.f32 %v8515_v44, %v16201_v18 }
 0xa4e   :  { %v6977_v24 = vrot.slane %v6976_v19, 1  ;;  %v6985_v8 = vadd.f32 %v6984_v2, %v6983_v25  ;;  %v6993_v58 = vrot.slane %v6992_v14, 2  ;;  %v8625_v7 = vrot.slane %v14986_v0, 2 }
 0xa4f   :  { %v7002_v38 = vrot.slane %v7001_v21, 2  ;;  %v8634_v42 = vrot.slane %v15033_v16, 2  ;;  %v8642_v26 = vadd.f32 %v8641_v55, %v15044_v60  ;;  %v8650_v11 = vrot.slane %v15070_v15, 4 }
 0xa50   :  { %v6978_v57 = vadd.f32 %v6977_v24, %v6976_v19  ;;  %v6986_v20 = vrot.slane %v6985_v8, 1  ;;  %v6994_v46 = vadd.f32 %v6993_v58, %v6992_v14  ;;  %v8626_v4 = vadd.f32 %v8625_v7, %v14986_v0 }
 0xa51   :  { %v7003_v18 = vadd.f32 %v7002_v38, %v7001_v21  ;;  %v8635_v45 = vadd.f32 %v8634_v42, %v15033_v16  ;;  %v8643_v5 = vrot.slane %v8642_v26, 2  ;;  %v8651_v31 = vadd.f32 %v8650_v11, %v15070_v15 }
 0xa52   :  { %v6987_v35 = vadd.f32 %v6986_v20, %v6985_v8  ;;  %v6995_v40 = vrot.slane %v6994_v46, 1  ;;  %v7032_v48 = vsel %vm2776_vm7, %v6978_v57, %v7031_v12  ;;  %v8627_v27 = vrot.slane %v8626_v4, 1 }
 0xa53   :  { %v7004_v60 = vrot.slane %v7003_v18, 1  ;;  %v8636_v55 = vrot.slane %v8635_v45, 1  ;;  %v8644_v0 = vadd.f32 %v8643_v5, %v8642_v26  ;;  %v8652_v50 = vrot.slane %v8651_v31, 2 }
 0xa54   :  { %v6996_v63 = vadd.f32 %v6995_v40, %v6994_v46  ;;  %v7033_v16 = vsel %vm2779_vm8, %v6987_v35, %v7032_v48  ;;  %v8628_v22 = vadd.f32 %v8627_v27, %v8626_v4  ;;  %v8657_v15 = vsel %vm16409_vm14, %v15084_v10, 0.0 }
 0xa55   :  { %v7005_v32 = vadd.f32 %v7004_v60, %v7003_v18  ;;  %v8637_v13 = vadd.f32 %v8636_v55, %v8635_v45  ;;  %v8645_v52 = vrot.slane %v8644_v0, 1  ;;  %v8653_v61 = vadd.f32 %v8652_v50, %v8651_v31 }
 0xa56   :  { %v7034_v47 = vsel %vm2782_vm9, %v6996_v63, %v7033_v16  ;;  %v8658_v1 = vadd.f32 %v8657_v15, %v15087_v59  ;;  %v8665_v36 = vsel %vm16410_vm3, %v15105_v56, 0.0  ;;  %v8666_v39 = vsel %vm16411_vm10, %v8543_v29, 0.0 }
 0xa57   :  { %v7035_v10 = vsel %vm16386_vm11, %v7005_v32, %v7034_v47  ;;  %v8646_v43 = vadd.f32 %v8645_v52, %v8644_v0  ;;  %v8654_v30 = vrot.slane %v8653_v61, 1  ;;  %v8667_v49 = vadd.f32 %v8666_v39, %v8665_v36  ;;  %v8754_v36 = vld [vmem:[%s8796_s23 + $0x8] sm:$0xff]  ;;  %v8753_v39 = vld [vmem:[%s8796_s23] sm:$0xff] }
 0xa58   :  { %v7041_v9 = vsel %vm16412_vm12, %v7035_v10, 0.0  ;;  %v8659_v23 = vrot.slane %v8658_v1, 4  ;;  %v8674_v33 = vsel %vm16413_vm13, %v8544_v62, 0.0  ;;  %v8675_v53 = vsel %vm16414_vm1, %v8545_v41, 0.0 }
 0xa59   :  { %7042 = vadd.xlane.f32.xlu0 %v7041_v9  ;;  %v8655_v59 = vadd.f32 %v8654_v30, %v8653_v61  ;;  %v8668_v28 = vrot.slane %v8667_v49, 4  ;;  %v8676_v56 = vadd.f32 %v8675_v53, %v8674_v33  ;;  %v8683_v6 = vsel %vm16415_vm15, %v8546_v54, 0.0 }
 0xa5a   :  { %v8660_v51 = vadd.f32 %v8659_v23, %v8658_v1  ;;  %v8684_v25 = vsel %vm16416_vm2, %v8547_v37, 0.0  ;;  %v8715_v34 = vsel %vm2767_vm4, %v8637_v13, %v8628_v22  ;;  %v87_v3 = vstv %s15216_s29  ;;  %vm16417_vm4 = vmmov %vm16386_vm11 }
 0xa5b   :  { %v8669_v17 = vadd.f32 %v8668_v28, %v8667_v49  ;;  %v8677_v12 = vrot.slane %v8676_v56, 4  ;;  %v8685_v44 = vadd.f32 %v8684_v25, %v8683_v6  ;;  %v8716_v29 = vsel %vm2770_vm5, %v8646_v43, %v8715_v34  ;;  %88 = vst [vmem:[#allocation3] sm:$0x1] %v87_v3  ;;  %vm16418_vm5 = vmmov %vm16034_vm0 }
 0xa5c   :  { %v8661_v19 = vrot.slane %v8660_v51, 2  ;;  %v8717_v2 = vsel %vm2773_vm6, %v8655_v59, %v8716_v29  ;;  %v85_v14 = vstv %s15224_s3  ;;  %v8774_v10 = vadd.f32 %v8754_v36, %v8753_v39 }
 0xa5d   :  { %v8670_v62 = vrot.slane %v8669_v17, 2  ;;  %v8678_v21 = vadd.f32 %v8677_v12, %v8676_v56  ;;  %v8686_v41 = vrot.slane %v8685_v44, 4  ;;  %86 = vst [vmem:[#allocation2] sm:$0x1] %v85_v14 }
 0xa5e   :  { %v8662_v54 = vadd.f32 %v8661_v19, %v8660_v51  ;;  %v8775_v43 = vrot.slane %v8774_v10, 4 }
 0xa5f   :  { %v8671_v24 = vadd.f32 %v8670_v62, %v8669_v17  ;;  %v8679_v37 = vrot.slane %v8678_v21, 2  ;;  %v8687_v8 = vadd.f32 %v8686_v41, %v8685_v44 }
 0xa60   :  { %v8663_v58 = vrot.slane %v8662_v54, 1  ;;  %v8776_v30 = vadd.f32 %v8775_v43, %v8774_v10 }
 0xa61   :  { %v8672_v7 = vrot.slane %v8671_v24, 1  ;;  %v8680_v38 = vadd.f32 %v8679_v37, %v8678_v21  ;;  %v8688_v42 = vrot.slane %v8687_v8, 2 }
 0xa62   :  { %v8664_v26 = vadd.f32 %v8663_v58, %v8662_v54  ;;  %v9063_v48 = vld [vmem:[#allocation3] ss:$0 sm:$0xff]  ;;  %v8777_v9 = vrot.slane %v8776_v30, 2 }
 0xa63   :  { %v8673_v11 = vadd.f32 %v8672_v7, %v8671_v24  ;;  %v8681_v57 = vrot.slane %v8680_v38, 1  ;;  %v8689_v20 = vadd.f32 %v8688_v42, %v8687_v8 }
 0xa64   :  { %v8718_v46 = vsel %vm2776_vm7, %v8664_v26, %v8717_v2  ;;  %v9022_v0 = vld [vmem:[#allocation2] ss:$0 sm:$0xff]  ;;  %v8778_v23 = vadd.f32 %v8777_v9, %v8776_v30 }
 0xa65   :  { %v8682_v4 = vadd.f32 %v8681_v57, %v8680_v38  ;;  %v8690_v18 = vrot.slane %v8689_v20, 1  ;;  %v8719_v45 = vsel %vm2779_vm8, %v8673_v11, %v8718_v46 }
 0xa66   :  { %v8779_v33 = vrot.slane %v8778_v23, 1 }
 0xa67   :  { %v8691_v5 = vadd.f32 %v8690_v18, %v8689_v20  ;;  %v8720_v31 = vsel %vm2782_vm9, %v8682_v4, %v8719_v45 }
 0xa68   :  { %v8780_v53 = vadd.f32 %v8779_v33, %v8778_v23 }
 0xa69   :  { %v8721_v35 = vsel %vm16417_vm4, %v8691_v5, %v8720_v31 }
 0xa6a   :  { %v8727_v40 = vsel %vm16418_vm5, %v8721_v35, 0.0  ;;  %v8781_v59 = vmax.f32 %v8780_v53, 1.0 }
 0xa6b   :  { %8728 = vadd.xlane.f32.xlu1 %v8727_v40 }
 0xa6c   :  { %10372 = vrcp.f32 %v8781_v59 }
 0xa76   :  { %v10373_v44 = vpop.eup %10372 }
 0xac1   :  { %v8726_v27 = vpop.xlane.xlu0 %8725 }
 0xac2   :  { %v8730_v60 = vmul.f32 0.0625, %v8726_v27 }
 0xac4   :  { %v8739_v55 = vadd.f32 %v9063_v48, %v8730_v60 }
 0xac6   :  { %8757 = vperm.xlu1 %9982, %v8739_v55  }
 0xad4   :  { %v7040_v50 = vpop.xlane.xlu0 %7039 }
 0xad5   :  { %v7044_v63 = vmul.f32 0.0625, %v7040_v50 }
 0xad7   :  { %v7053_v16 = vadd.f32 %v9022_v0, %v7044_v63 }
 0xad9   :  { %8743 = vperm.xlu1 %9982, %v7053_v16  }
 0xae6   :  { %v7043_v22 = vpop.xlane.xlu0 %7042 }
 0xae7   :  { %v7045_v15 = vmul.f32 0.0625, %v7043_v22 }
 0xae9   :  { %v7054_v32 = vadd.f32 %v9022_v0, %v7045_v15 }
 0xaeb   :  { %8748 = vperm.xlu1 %9982, %v7054_v32  }
 0xaf8   :  { %v8729_v13 = vpop.xlane.xlu1 %8728 }
 0xaf9   :  { %v8731_v52 = vmul.f32 0.0625, %v8729_v13 }
 0xafb   :  { %v8740_v61 = vadd.f32 %v9063_v48, %v8731_v52 }
 0xafd   :  { %8762 = vperm.xlu0 %9983, %v8740_v61  }
 0xb45   :  { %v8758_v47 = vpop.permute.xlu1 %8757 }
 0xb46   :  { %v8765_v56 = vmul.f32 %v8758_v47, %v8753_v39 }
 0xb58   :  { %v8744_v1 = vpop.permute.xlu1 %8743 }
 0xb59   :  { %8751 = vst [vmem:[%s8830_s7] sm:$0xff] %v8744_v1 }
 0xb6a   :  { %v8749_v49 = vpop.permute.xlu1 %8748 }
 0xb6b   :  { %8752 = vst [vmem:[%s8830_s7 + $0x8] sm:$0xff] %v8749_v49 }
 0xb7c   :  { %v8763_v28 = vpop.permute.xlu0 %8762 }
 0xb7d   :  { %v8766_v6 = vmul.f32 %v8763_v28, %v8754_v36 }
 0xb7f   :  { %v8767_v51 = vadd.f32 %v8766_v6, %v8765_v56 }
 0xb81   :  { %v8768_v25 = vrot.slane %v8767_v51, 4 }
 0xb83   :  { %v8769_v34 = vadd.f32 %v8768_v25, %v8767_v51 }
 0xb85   :  { %v8770_v3 = vrot.slane %v8769_v34, 2 }
 0xb87   :  { %v8771_v17 = vadd.f32 %v8770_v3, %v8769_v34 }
 0xb89   :  { %v8772_v12 = vrot.slane %v8771_v17, 1 }
 0xb8b   :  { %v8773_v29 = vadd.f32 %v8772_v12, %v8771_v17 }
 0xb8d   :  { %v8783_v19 = vmul.f32 %v10373_v44, %v8773_v29 }
 0xb8f   :  { %8784 = vst [vmem:[%s8831_s13] sm:$0xff] %v8783_v19 }

</bundles_post_ra>
